<compile_context>
chip_gen: v6e
topology: v6e:2x2x1
jax: 0.10.0
libtpu: 0.0.40
codegen_flags: <defaults>
</compile_context>

<pallas_src>
import functools

import jax
import jax.numpy as jnp
from jax.experimental import pallas as pl
from jax.experimental.pallas import tpu as pltpu


def _leaky_relu(x, alpha):
    return jnp.where(x > 0, x, alpha * x)


def make_disc_kernel(n_conv, n_fc, alpha, tb, num_hits):
    """Per-hit MLP (lane-dense (features, rows) layout) -> max over hits ->
    fc head in (features, TB) layout -> stable sigmoid -> (1, TB) store."""

    def kernel(x_ref, *refs):
        out_ref = refs[-1]
        params = refs[:-1]
        idx = 0

        # --- sfc: Conv1d(k=1)+LeakyReLU stack, (features, rows) lane-dense ---
        h = x_ref[...]                                    # (node_feat, TB*H) bf16
        for _ in range(n_conv):
            w = params[idx][...]                          # (f_out, f_in) bf16
            b = params[idx + 1][...]                      # (f_out, 1) f32
            idx += 2
            h = jnp.dot(w, h.astype(jnp.bfloat16),
                        preferred_element_type=jnp.float32) + b
            h = _leaky_relu(h, alpha)                     # f32

        # --- torch.max over hits ---
        # One XLU relayout (f_last, R) -> (R, f_last); the reshape splitting the
        # row axis is free when num_hits % 8 == 0, then a sublane-group reduce.
        f_last = h.shape[0]
        ht = h.T                                          # (TB*H, f_last) f32
        p = ht.reshape(tb, num_hits, f_last)
        p = jnp.max(p, axis=1)                            # (TB, f_last) f32
        h = p.T                                           # (f_last, TB) f32  (lane-dense over TB)

        # --- fc head: Linear + LeakyReLU stack, (features, TB) layout ---
        for _ in range(n_fc):
            w = params[idx][...]                          # (f_out, f_in) bf16
            b = params[idx + 1][...]                      # (f_out, 1) f32
            idx += 2
            h = jnp.dot(w, h.astype(jnp.bfloat16),
                        preferred_element_type=jnp.float32) + b
            h = _leaky_relu(h, alpha)

        # --- final Linear(f, 1): VPU multiply + sublane reduce -> (1, TB) ---
        wf = params[idx][...]                             # (f_last_fc, 1) f32
        bf = params[idx + 1][...]                         # (1, 1) f32
        y = jnp.sum(h * wf, axis=0, keepdims=True) + bf   # (1, TB) f32

        # Numerically stable sigmoid; exp and approx-reciprocal hit the EUP.
        z = jnp.exp(-jnp.abs(y))
        r = pl.reciprocal(1.0 + z, approx=True)
        sig = jnp.where(y >= 0, r, z * r)
        out_ref[...] = sig.astype(out_ref.dtype)          # lane-dense (1, TB) store

    return kernel


def _pick_batch_tile(batch, num_hits, row_budget=16384):
    """Pick the batch tile TB:
      * TB divides batch and TB % 128 == 0, so both the x block
        (node_feat, TB*num_hits) and the out block (1, TB) are lane-dense and
        satisfy the (8,128) tiling rules.
      * TB*num_hits <= row_budget (a few MiB of f32 activations per step —
        safe within the 48 MiB VMEM limit on all of v5e/v6e/v7x).
      * Prefer an even grid length (>= 2 steps) so the "parallel" axis feeds
        both v7x TensorCores; otherwise take the largest tile (fewest steps,
        best for single-TC v5e/v6e).
    Fallback: TB = batch (a single full-extent step is always legal)."""
    cands = [tb for tb in range(128, batch + 1, 128)
             if batch % tb == 0 and tb * num_hits <= row_budget]
    if not cands:
        return batch
    even = [tb for tb in cands if (batch // tb) % 2 == 0]
    return max(even) if even else max(cands)


def disc_forward(x, conv_ws, conv_bs, fc_ws, fc_bs, final_w, final_b,
                 *, alpha, num_hits, row_budget=16384):
    batch, n_hits, node_feat = x.shape
    assert n_hits == num_hits

    # Single fused pass: reshape (free) + transpose + f32->bf16 downcast.
    # Kernel then reads lane-dense bf16 (node_feat, batch*num_hits) blocks.
    x_t = x.reshape(batch * num_hits, node_feat).T.astype(jnp.bfloat16)

    tb = _pick_batch_tile(batch, num_hits, row_budget)
    grid_n = batch // tb

    flat_params = []
    for w, b in zip(conv_ws, conv_bs):
        flat_params += [w.astype(jnp.bfloat16), b.astype(jnp.float32)]
    for w, b in zip(fc_ws, fc_bs):
        flat_params += [w.astype(jnp.bfloat16), b.astype(jnp.float32)]
    flat_params += [final_w.astype(jnp.float32), final_b.astype(jnp.float32)]

    kernel = make_disc_kernel(len(conv_ws), len(fc_ws), alpha, tb, num_hits)

    in_specs = [pl.BlockSpec((node_feat, tb * num_hits), lambda i: (0, i))]
    for p in flat_params:
        # Full-array blocks with a constant block index -> VMEM-resident weights.
        in_specs.append(pl.BlockSpec(p.shape, lambda i: (0, 0)))
    # Lane-dense output: (1, batch) array, (1, TB) blocks.
    out_specs = pl.BlockSpec((1, tb), lambda i: (0, i))

    # Advisory cost estimate for XLA scheduling around the custom call.
    rows = batch * num_hits
    flops = 0
    for w in conv_ws:
        flops += 2 * rows * w.shape[0] * w.shape[1]
    for w in fc_ws:
        flops += 2 * batch * w.shape[0] * w.shape[1]
    flops += 2 * batch * final_w.shape[0]
    bytes_accessed = (x_t.size * x_t.dtype.itemsize
                      + sum(p.size * p.dtype.itemsize for p in flat_params)
                      + batch * 4)
    cost = pl.CostEstimate(flops=int(flops), transcendentals=int(batch),
                           bytes_accessed=int(bytes_accessed))

    out = pl.pallas_call(
        kernel,
        out_shape=jax.ShapeDtypeStruct((1, batch), jnp.float32),
        grid=(grid_n,),
        in_specs=in_specs,
        out_specs=out_specs,
        compiler_params=pltpu.CompilerParams(
            dimension_semantics=("parallel",),       # megacore sharding on v7x
            vmem_limit_bytes=48 * 1024 * 1024,       # > v5e 16 MiB default, < v7x 64 MiB
        ),
        cost_estimate=cost,
    )(x_t, *flat_params)
    return out.reshape(batch, 1)


def reference_forward(x, conv_ws, conv_bs, fc_ws, fc_bs, final_w, final_b,
                      *, alpha, num_hits):
    """Plain-JAX f32 reference mirroring the PyTorch forward."""
    batch = x.shape[0]
    h = x.reshape(batch * num_hits, -1).astype(jnp.float32)
    for w, b in zip(conv_ws, conv_bs):           # w: (out,in), b: (out,1)
        h = _leaky_relu(h @ w.T + b.T, alpha)
    h = h.reshape(batch, num_hits, -1).max(axis=1)
    for w, b in zip(fc_ws, fc_bs):               # w: (out,in), b: (out,1)
        h = _leaky_relu(h @ w.T + b.T, alpha)
    y = h @ final_w + final_b                    # final_w: (f,1), final_b: (1,1)
    return jax.nn.sigmoid(y)


def init_params(key, rgand_sfc, rgand_fc):
    """Deterministic init ~ PyTorch default uniform(-1/sqrt(fan_in), +).
    rgand_sfc already has node_feat_size at index 0; rgand_fc has rgand_sfc[-1]."""
    n_layers = (len(rgand_sfc) - 1) + (len(rgand_fc) - 1) + 1
    keys = jax.random.split(key, 2 * n_layers)
    k = 0

    def uni(shape, fan_in):
        nonlocal k
        bound = 1.0 / float(fan_in) ** 0.5
        arr = jax.random.uniform(keys[k], shape, jnp.float32, -bound, bound)
        k += 1
        return arr

    conv_ws, conv_bs = [], []
    for i in range(len(rgand_sfc) - 1):
        f_in, f_out = rgand_sfc[i], rgand_sfc[i + 1]
        conv_ws.append(uni((f_out, f_in), f_in))   # Conv1d weight (out,in,1) squeezed
        conv_bs.append(uni((f_out, 1), f_in))      # column bias
    fc_ws, fc_bs = [], []
    for i in range(len(rgand_fc) - 1):
        f_in, f_out = rgand_fc[i], rgand_fc[i + 1]
        fc_ws.append(uni((f_out, f_in), f_in))     # Linear weight (out,in)
        fc_bs.append(uni((f_out, 1), f_in))        # column bias
    final_w = uni((rgand_fc[-1], 1), rgand_fc[-1]) # Linear(f,1) weight, transposed to column
    final_b = uni((1, 1), rgand_fc[-1])
    return conv_ws, conv_bs, fc_ws, fc_bs, final_w, final_b


if __name__ == "__main__":
    # Small, forward-consistent hyperparameters (batch sized to exercise a
    # multi-step "parallel" grid with lane-dense 128-multiple tiles).
    node_feat_size = 3
    num_hits = 16
    batch = 512
    leaky_relu_alpha = 0.2
    # After the module's insert(0, ...) calls:
    rgand_sfc = [node_feat_size, 16, 32]   # Conv1d(k=1) widths
    rgand_fc = [rgand_sfc[-1], 32, 16]     # fc widths (final Linear(16, 1) appended)

    key = jax.random.PRNGKey(0)
    kx, kp = jax.random.split(key)
    x = jax.random.normal(kx, (batch, num_hits, node_feat_size), jnp.float32)
    params = init_params(kp, rgand_sfc, rgand_fc)

    fwd = jax.jit(functools.partial(disc_forward,
                                    alpha=leaky_relu_alpha, num_hits=num_hits))
    out = jax.block_until_ready(fwd(x, *params))

    ref = reference_forward(x, *params, alpha=leaky_relu_alpha, num_hits=num_hits)
    assert out.shape == (batch, 1)
    # bf16 weights/activations in the matmuls vs. f32 reference -> loose tol.
    assert jnp.allclose(out, ref, atol=2e-2, rtol=2e-2), (
        float(jnp.max(jnp.abs(out - ref))))

    print("KERNEL_OK")
</pallas_src>

<mosaic_0001>
module attributes {stable_mosaic.version = 11 : i64} {
  func.func @kernel(%arg0: i32, %arg1: memref<3x4096xbf16, #tpu.memory_space<vmem>>, %arg2: memref<16x3xbf16, #tpu.memory_space<vmem>>, %arg3: memref<16x1xf32, #tpu.memory_space<vmem>>, %arg4: memref<32x16xbf16, #tpu.memory_space<vmem>>, %arg5: memref<32x1xf32, #tpu.memory_space<vmem>>, %arg6: memref<32x32xbf16, #tpu.memory_space<vmem>>, %arg7: memref<32x1xf32, #tpu.memory_space<vmem>>, %arg8: memref<16x32xbf16, #tpu.memory_space<vmem>>, %arg9: memref<16x1xf32, #tpu.memory_space<vmem>>, %arg10: memref<16x1xf32, #tpu.memory_space<vmem>>, %arg11: memref<1x1xf32, #tpu.memory_space<vmem>>, %arg12: memref<1x256xf32, #tpu.memory_space<vmem>>) attributes {dimension_semantics = [#tpu.dimension_semantics<parallel>], iteration_bounds = array<i64: 2>, scalar_prefetch = 0 : i64, scratch_operands = 0 : i64, tpu.core_type = #tpu.core_type<tc>, window_params = [{transform_indices = @transform_0, window_bounds = array<i64: 3, 4096>}, {pipeline_mode = #tpu.pipeline_mode<synchronous>, transform_indices = @transform_1, window_bounds = array<i64: 16, 3>}, {pipeline_mode = #tpu.pipeline_mode<synchronous>, transform_indices = @transform_2, window_bounds = array<i64: 16, 1>}, {pipeline_mode = #tpu.pipeline_mode<synchronous>, transform_indices = @transform_3, window_bounds = array<i64: 32, 16>}, {pipeline_mode = #tpu.pipeline_mode<synchronous>, transform_indices = @transform_4, window_bounds = array<i64: 32, 1>}, {pipeline_mode = #tpu.pipeline_mode<synchronous>, transform_indices = @transform_5, window_bounds = array<i64: 32, 32>}, {pipeline_mode = #tpu.pipeline_mode<synchronous>, transform_indices = @transform_6, window_bounds = array<i64: 32, 1>}, {pipeline_mode = #tpu.pipeline_mode<synchronous>, transform_indices = @transform_7, window_bounds = array<i64: 16, 32>}, {pipeline_mode = #tpu.pipeline_mode<synchronous>, transform_indices = @transform_8, window_bounds = array<i64: 16, 1>}, {pipeline_mode = #tpu.pipeline_mode<synchronous>, transform_indices = @transform_9, window_bounds = array<i64: 16, 1>}, {pipeline_mode = #tpu.pipeline_mode<synchronous>, transform_indices = @transform_10, window_bounds = array<i64: 1, 1>}, {transform_indices = @transform_11, window_bounds = array<i64: 1, 256>}]} {
    %c0 = arith.constant 0 : index
    %c0_0 = arith.constant 0 : index
    %0 = vector.load %arg1[%c0, %c0_0] : memref<3x4096xbf16, #tpu.memory_space<vmem>>, vector<3x4096xbf16>
    %c0_1 = arith.constant 0 : index
    %c0_2 = arith.constant 0 : index
    %1 = vector.load %arg2[%c0_1, %c0_2] : memref<16x3xbf16, #tpu.memory_space<vmem>>, vector<16x3xbf16>
    %c0_3 = arith.constant 0 : index
    %c0_4 = arith.constant 0 : index
    %2 = vector.load %arg3[%c0_3, %c0_4] : memref<16x1xf32, #tpu.memory_space<vmem>>, vector<16x1xf32>
    %cst = arith.constant dense<0.000000e+00> : vector<16x4096xf32>
    %3 = tpu.matmul %1, %0, %cst {dimension_numbers = #tpu.dot_dimension_numbers<[1], [0], [0], [1], [0, 0, 1, 1], [], []>} : vector<16x3xbf16>, vector<3x4096xbf16>, vector<16x4096xf32> -> vector<16x4096xf32>
    %4 = vector.broadcast %2 : vector<16x1xf32> to vector<16x4096xf32>
    %5 = arith.addf %3, %4 : vector<16x4096xf32>
    %cst_5 = arith.constant 0.000000e+00 : f32
    %6 = vector.broadcast %cst_5 : f32 to vector<16x4096xf32>
    %7 = arith.cmpf ogt, %5, %6 : vector<16x4096xf32>
    %cst_6 = arith.constant 2.000000e-01 : f32
    %8 = vector.broadcast %cst_6 : f32 to vector<16x4096xf32>
    %9 = arith.mulf %8, %5 : vector<16x4096xf32>
    %10 = arith.select %7, %5, %9 : vector<16x4096xi1>, vector<16x4096xf32>
    %c0_7 = arith.constant 0 : index
    %c0_8 = arith.constant 0 : index
    %11 = vector.load %arg4[%c0_7, %c0_8] : memref<32x16xbf16, #tpu.memory_space<vmem>>, vector<32x16xbf16>
    %c0_9 = arith.constant 0 : index
    %c0_10 = arith.constant 0 : index
    %12 = vector.load %arg5[%c0_9, %c0_10] : memref<32x1xf32, #tpu.memory_space<vmem>>, vector<32x1xf32>
    %13 = arith.truncf %10 : vector<16x4096xf32> to vector<16x4096xbf16>
    %cst_11 = arith.constant dense<0.000000e+00> : vector<32x4096xf32>
    %14 = tpu.matmul %11, %13, %cst_11 {dimension_numbers = #tpu.dot_dimension_numbers<[1], [0], [0], [1], [0, 0, 1, 1], [], []>} : vector<32x16xbf16>, vector<16x4096xbf16>, vector<32x4096xf32> -> vector<32x4096xf32>
    %15 = vector.broadcast %12 : vector<32x1xf32> to vector<32x4096xf32>
    %16 = arith.addf %14, %15 : vector<32x4096xf32>
    %cst_12 = arith.constant 0.000000e+00 : f32
    %17 = vector.broadcast %cst_12 : f32 to vector<32x4096xf32>
    %18 = arith.cmpf ogt, %16, %17 : vector<32x4096xf32>
    %cst_13 = arith.constant 2.000000e-01 : f32
    %19 = vector.broadcast %cst_13 : f32 to vector<32x4096xf32>
    %20 = arith.mulf %19, %16 : vector<32x4096xf32>
    %21 = arith.select %18, %16, %20 : vector<32x4096xi1>, vector<32x4096xf32>
    %22 = tpu.transpose %21, [1, 0] : vector<32x4096xf32> -> vector<4096x32xf32>
    %23 = vector.shape_cast %22 : vector<4096x32xf32> to vector<256x16x32xf32>
    %cst_14 = arith.constant dense<0xFF800000> : vector<256x32xf32>
    %24 = vector.multi_reduction <maximumf>, %23, %cst_14 [1] : vector<256x16x32xf32> to vector<256x32xf32>
    %25 = tpu.transpose %24, [1, 0] : vector<256x32xf32> -> vector<32x256xf32>
    %c0_15 = arith.constant 0 : index
    %c0_16 = arith.constant 0 : index
    %26 = vector.load %arg6[%c0_15, %c0_16] : memref<32x32xbf16, #tpu.memory_space<vmem>>, vector<32x32xbf16>
    %c0_17 = arith.constant 0 : index
    %c0_18 = arith.constant 0 : index
    %27 = vector.load %arg7[%c0_17, %c0_18] : memref<32x1xf32, #tpu.memory_space<vmem>>, vector<32x1xf32>
    %28 = arith.truncf %25 : vector<32x256xf32> to vector<32x256xbf16>
    %cst_19 = arith.constant dense<0.000000e+00> : vector<32x256xf32>
    %29 = tpu.matmul %26, %28, %cst_19 {dimension_numbers = #tpu.dot_dimension_numbers<[1], [0], [0], [1], [0, 0, 1, 1], [], []>} : vector<32x32xbf16>, vector<32x256xbf16>, vector<32x256xf32> -> vector<32x256xf32>
    %30 = vector.broadcast %27 : vector<32x1xf32> to vector<32x256xf32>
    %31 = arith.addf %29, %30 : vector<32x256xf32>
    %cst_20 = arith.constant 0.000000e+00 : f32
    %32 = vector.broadcast %cst_20 : f32 to vector<32x256xf32>
    %33 = arith.cmpf ogt, %31, %32 : vector<32x256xf32>
    %cst_21 = arith.constant 2.000000e-01 : f32
    %34 = vector.broadcast %cst_21 : f32 to vector<32x256xf32>
    %35 = arith.mulf %34, %31 : vector<32x256xf32>
    %36 = arith.select %33, %31, %35 : vector<32x256xi1>, vector<32x256xf32>
    %c0_22 = arith.constant 0 : index
    %c0_23 = arith.constant 0 : index
    %37 = vector.load %arg8[%c0_22, %c0_23] : memref<16x32xbf16, #tpu.memory_space<vmem>>, vector<16x32xbf16>
    %c0_24 = arith.constant 0 : index
    %c0_25 = arith.constant 0 : index
    %38 = vector.load %arg9[%c0_24, %c0_25] : memref<16x1xf32, #tpu.memory_space<vmem>>, vector<16x1xf32>
    %39 = arith.truncf %36 : vector<32x256xf32> to vector<32x256xbf16>
    %cst_26 = arith.constant dense<0.000000e+00> : vector<16x256xf32>
    %40 = tpu.matmul %37, %39, %cst_26 {dimension_numbers = #tpu.dot_dimension_numbers<[1], [0], [0], [1], [0, 0, 1, 1], [], []>} : vector<16x32xbf16>, vector<32x256xbf16>, vector<16x256xf32> -> vector<16x256xf32>
    %41 = vector.broadcast %38 : vector<16x1xf32> to vector<16x256xf32>
    %42 = arith.addf %40, %41 : vector<16x256xf32>
    %cst_27 = arith.constant 0.000000e+00 : f32
    %43 = vector.broadcast %cst_27 : f32 to vector<16x256xf32>
    %44 = arith.cmpf ogt, %42, %43 : vector<16x256xf32>
    %cst_28 = arith.constant 2.000000e-01 : f32
    %45 = vector.broadcast %cst_28 : f32 to vector<16x256xf32>
    %46 = arith.mulf %45, %42 : vector<16x256xf32>
    %47 = arith.select %44, %42, %46 : vector<16x256xi1>, vector<16x256xf32>
    %c0_29 = arith.constant 0 : index
    %c0_30 = arith.constant 0 : index
    %48 = vector.load %arg10[%c0_29, %c0_30] : memref<16x1xf32, #tpu.memory_space<vmem>>, vector<16x1xf32>
    %c0_31 = arith.constant 0 : index
    %c0_32 = arith.constant 0 : index
    %49 = vector.load %arg11[%c0_31, %c0_32] : memref<1x1xf32, #tpu.memory_space<vmem>>, vector<1x1xf32>
    %50 = vector.broadcast %48 : vector<16x1xf32> to vector<16x256xf32>
    %51 = arith.mulf %47, %50 : vector<16x256xf32>
    %cst_33 = arith.constant dense<0.000000e+00> : vector<256xf32>
    %52 = vector.multi_reduction <add>, %51, %cst_33 [0] : vector<16x256xf32> to vector<256xf32>
    %53 = vector.shape_cast %52 : vector<256xf32> to vector<1x256xf32>
    %54 = vector.broadcast %49 : vector<1x1xf32> to vector<1x256xf32>
    %55 = arith.addf %53, %54 : vector<1x256xf32>
    %56 = math.absf %55 : vector<1x256xf32>
    %cst_34 = arith.constant 0.000000e+00 : f32
    %57 = vector.broadcast %cst_34 : f32 to vector<1x256xf32>
    %58 = arith.subf %57, %56 : vector<1x256xf32>
    %59 = math.exp %58 : vector<1x256xf32>
    %cst_35 = arith.constant 1.000000e+00 : f32
    %60 = vector.broadcast %cst_35 : f32 to vector<1x256xf32>
    %61 = arith.addf %60, %59 : vector<1x256xf32>
    %62 = tpu.reciprocal %61 {approx = true} : vector<1x256xf32> -> vector<1x256xf32>
    %cst_36 = arith.constant 0.000000e+00 : f32
    %63 = vector.broadcast %cst_36 : f32 to vector<1x256xf32>
    %64 = arith.cmpf oge, %55, %63 : vector<1x256xf32>
    %65 = arith.mulf %59, %62 : vector<1x256xf32>
    %66 = arith.select %64, %62, %65 : vector<1x256xi1>, vector<1x256xf32>
    %c0_37 = arith.constant 0 : index
    %c0_38 = arith.constant 0 : index
    %67 = vector.load %arg12[%c0_37, %c0_38] : memref<1x256xf32, #tpu.memory_space<vmem>>, vector<1x256xf32>
    tpu.vector_store %arg12[%c0_37, %c0_38], %66 {strides = array<i32>} : memref<1x256xf32, #tpu.memory_space<vmem>>, vector<1x256xf32>,
    return
  }
  func.func @transform_0(%arg0: i32) -> (i32, i32) {
    %c0_i32 = arith.constant 0 : i32
    %c0_i32_0 = arith.constant 0 : i32
    return %c0_i32, %arg0 : i32, i32
  }
  func.func @transform_1(%arg0: i32) -> (i32, i32) {
    %c0_i32 = arith.constant 0 : i32
    %c0_i32_0 = arith.constant 0 : i32
    %c0_i32_1 = arith.constant 0 : i32
    return %c0_i32, %c0_i32_0 : i32, i32
  }
  func.func @transform_2(%arg0: i32) -> (i32, i32) {
    %c0_i32 = arith.constant 0 : i32
    %c0_i32_0 = arith.constant 0 : i32
    %c0_i32_1 = arith.constant 0 : i32
    return %c0_i32, %c0_i32_0 : i32, i32
  }
  func.func @transform_3(%arg0: i32) -> (i32, i32) {
    %c0_i32 = arith.constant 0 : i32
    %c0_i32_0 = arith.constant 0 : i32
    %c0_i32_1 = arith.constant 0 : i32
    return %c0_i32, %c0_i32_0 : i32, i32
  }
  func.func @transform_4(%arg0: i32) -> (i32, i32) {
    %c0_i32 = arith.constant 0 : i32
    %c0_i32_0 = arith.constant 0 : i32
    %c0_i32_1 = arith.constant 0 : i32
    return %c0_i32, %c0_i32_0 : i32, i32
  }
  func.func @transform_5(%arg0: i32) -> (i32, i32) {
    %c0_i32 = arith.constant 0 : i32
    %c0_i32_0 = arith.constant 0 : i32
    %c0_i32_1 = arith.constant 0 : i32
    return %c0_i32, %c0_i32_0 : i32, i32
  }
  func.func @transform_6(%arg0: i32) -> (i32, i32) {
    %c0_i32 = arith.constant 0 : i32
    %c0_i32_0 = arith.constant 0 : i32
    %c0_i32_1 = arith.constant 0 : i32
    return %c0_i32, %c0_i32_0 : i32, i32
  }
  func.func @transform_7(%arg0: i32) -> (i32, i32) {
    %c0_i32 = arith.constant 0 : i32
    %c0_i32_0 = arith.constant 0 : i32
    %c0_i32_1 = arith.constant 0 : i32
    return %c0_i32, %c0_i32_0 : i32, i32
  }
  func.func @transform_8(%arg0: i32) -> (i32, i32) {
    %c0_i32 = arith.constant 0 : i32
    %c0_i32_0 = arith.constant 0 : i32
    %c0_i32_1 = arith.constant 0 : i32
    return %c0_i32, %c0_i32_0 : i32, i32
  }
  func.func @transform_9(%arg0: i32) -> (i32, i32) {
    %c0_i32 = arith.constant 0 : i32
    %c0_i32_0 = arith.constant 0 : i32
    %c0_i32_1 = arith.constant 0 : i32
    return %c0_i32, %c0_i32_0 : i32, i32
  }
  func.func @transform_10(%arg0: i32) -> (i32, i32) {
    %c0_i32 = arith.constant 0 : i32
    %c0_i32_0 = arith.constant 0 : i32
    %c0_i32_1 = arith.constant 0 : i32
    return %c0_i32, %c0_i32_0 : i32, i32
  }
  func.func @transform_11(%arg0: i32) -> (i32, i32) {
    %c0_i32 = arith.constant 0 : i32
    %c0_i32_0 = arith.constant 0 : i32
    return %c0_i32, %arg0 : i32, i32
  }
}

</mosaic_0001>

<bundles_post_ra>
// kernel: disc_forward.1
= control target key start
LH: loop header
LB: loop body
LE: loop exit
PB: predicated region body
PF: predicated region fallthrough
CT: control target
= control target key end

     0   :  { %s12499_s0 = inlined_call_operand.vmem [shape: bf16[3,8192], index: 0, kind: input, shape index: {}]   ;;  %s12500_s1 = inlined_call_operand.vmem [shape: bf16[16,3], index: 1, kind: input, shape index: {}]   ;;  %s12501_s2 = inlined_call_operand.vmem [shape: f32[16,1], index: 2, kind: input, shape index: {}]   ;;  %s12502_s3 = inlined_call_operand.vmem [shape: bf16[32,16], index: 3, kind: input, shape index: {}]   ;;  %s12503_s4 = inlined_call_operand.vmem [shape: f32[32,1], index: 4, kind: input, shape index: {}]   ;;  %s12504_s5 = inlined_call_operand.vmem [shape: bf16[32,32], index: 5, kind: input, shape index: {}]   ;;  %s12505_s6 = inlined_call_operand.vmem [shape: f32[32,1], index: 6, kind: input, shape index: {}]   ;;  %s12506_s7 = inlined_call_operand.vmem [shape: bf16[16,32], index: 7, kind: input, shape index: {}]   ;;  %s12507_s8 = inlined_call_operand.vmem [shape: f32[16,1], index: 8, kind: input, shape index: {}]   ;;  %s12508_s9 = inlined_call_operand.vmem [shape: f32[16,1], index: 9, kind: input, shape index: {}]   ;;  %s12509_s10 = inlined_call_operand.<no memory space> [shape: f32[1,1], index: 10, kind: input, shape index: {}]   ;;  %s12510_s11 = inlined_call_operand.hbm [shape: f32[1,512], index: 11, kind: output, shape index: {}]  }
   0x1   :  { %12657 = sst [smem:[#allocation115_spill]] %s12499_s0  ;;  %v16_v0 = vstv %s12509_s10 }
   0x2   :  { %17 = vst [vmem:[#allocation2] sm:$0x1] %v16_v0 }
   0x3   :  { %18 = vsyncpa [#allocation4], 0 }
   0x4   :  { %20 = vsyncpa [#allocation4 + $0x1], 0  ;;  %s8858_s19 = smov 0   ;;  %s8860_s20 = smov 0  }
   0x5   :  { %s8862_s21 = smov 0   ;;  %s8864_s22 = smov 0  }
   0x6 LB: > { %s7129_s10 = sadd.s32 4294967295, %s8788_s22   ;;  %s7130_s23 = sadd.s32 4294967294, %s8788_s22   ;;  %s8788_s22 = sphi %s8864_s22, %s13170_s22   ;;  %s8784_s21 = sphi %s8862_s21, %s13169_s21   ;;  %s8780_s20 = sphi %s8860_s20, %s13168_s20   ;;  %s8776_s19 = sphi %s8858_s19, %s13167_s19  }
   0x7   : > { %s8881_s24 = sadd.s32 1, %s8788_s22   ;;  %s269_s25 = sadd.s32 1, %s8784_s21 }
   0x8   : > { %s266_s26 = ssub.s32 %s8788_s22, %s8881_s24  ;;  %p279_p0 = scmp.ne.s32.totalorder %s8784_s21, %s8780_s20 }
   0x9   : > { %p267_p1 = scmp.eq.s32.totalorder %s266_s26, 0  ;;  %p280_p2 = scmp.eq.s32.totalorder %s7129_s10, 1 }
   0xa   : > { %p285_p3 = scmp.ne.s32.totalorder %s8780_s20, %s8776_s19  ;;  %p286_p4 = scmp.eq.s32.totalorder %s7130_s23, 1 }
   0xb   : > { %s8891_s27 = scalar_select %p267_p1, %s8784_s21, %s269_s25  }
   0xc   : > { %p8893_p5 = por %p280_p2, %p279_p0  ;;  %p8897_p6 = por %p286_p4, %p285_p3 }
   0xd   : > { %p7133_p7 = scmp.ge.s32.totalorder %s8788_s22, 1  ;;  %p343_p8 = scmp.lt.s32.totalorder %s8788_s22, 3 }
   0xf   : > { %p344_p9 = pnand %p7133_p7, %p343_p8 }
  0x11   : > { %347 = sbr.rel (%p344_p9) target bundleno = 1978 (0x7ba), region = 64 }
  0x16   : > { %s8903_s30 = sshll.u32 %s7129_s10, 5  ;;  %v12511_v1 = vlaneseq  ;;  %vm566_vm0 = vcmask 1040384   ;;  %v8790_v2 = vmov 1983009808   ;;  %v12512_v5 = vmov 0   ;;  %v401_v6 = vld [vmem:[%s12501_s2] sm:$0xff] }
  0x17   : > { %p384_p10 = scmp.lt.s32.totalorder %s8903_s30, 63  ;;  %v428_v3 = vunpack.c.l.s4 %v8790_v2  ;;  %698 = vmatprep.mubr.bf16.mxu0 %v12512_v5  ;;  %741 = vmatprep.mubr.bf16.mxu1 %v12512_v5  ;;  %vm567_vm1 = vcmask 1041408   ;;  %v8792_v8 = vmov 65535   ;;  %v402_v11 = vld [vmem:[%s12501_s2 + $0x8] sm:$0xff]  ;;  %s12661_s0 = sld [smem:[#allocation115_spill]]  ;;  %v1552_v22 = vld [vmem:[%s12503_s4 + $0x10] sm:$0xff] }
  0x18   : > { %v8907_v4 = vshrl.u32 %v12511_v1, 7  ;;  %v568_v9 = vsel %vm566_vm0, 4294967295, %v8792_v8  ;;  %7244 = vset.pattern.permute.xlu0 %v12512_v5  ;;  %7245 = vset.pattern.permute.xlu1 %v12512_v5  ;;  %v8951_v37 = vld [vmem:[%s12500_s1] sm:$0xff]   ;;  %vm562_vm2 = vcmask 23552   ;;  %vm1616_vm11 = vcmask 130048   ;;  %s380_s13 = sand.u32 1, %s8780_s20   ;;  %s7069_s10 = scalar_lea.hbm %s12510_s11, %s8903_s30 }
  0x19   : > { %s385_s14 = scalar_select %p384_p10, %s8903_s30, 63  ;;  %v429_v7 = vunpack.c.0.s8 %v428_v3  ;;  %405 = vperm.xlu0 %7244, %v401_v6   ;;  %v8929_v13 = vsel %vm567_vm1, %v568_v9, 0 }
  0x1a   : > { %12660 = vst [vmem:[#allocation6_spill] sm:$0xff] %v8907_v4  ;;  %s8794_s26 = smov [#allocation3]  }
  0x1b   : > { %s7136_s15 = sshll.u32 %s385_s14, 1  ;;  %v8918_v10 = vsub.s32 %v429_v7, %v8907_v4  ;;  %s7134_s14 = sshll.u32 %s380_s13, 1 }
  0x1c   : > { %s8732_s12 = sshll.u32 %s8794_s26, 4  ;;  %s8733_s12 = int_to_ptr.vmem [resolvable:$false] %s8732_s12 }
  0x1d   : > { %s8926_s23 = scalar_lea.vmem %s12661_s0, %s7136_s15  ;;  %410 = vperm.xlu0 %7244, %v402_v11   ;;  %s382_s15 = scalar_lea.vmem [#allocation3], %s7134_s14 }
  0x1e   : > { %v391_v12 = vld [vmem:[%s8926_s23] sm:$0xff]  ;;  %v392_v14 = vld [vmem:[%s8926_s23 + $0x8] sm:$0xff]  ;;  %v393_v15 = vld [vmem:[%s8926_s23 + $0x10] sm:$0xff]  ;;  %s7071_s16 = sshll.u32 %s382_s15, 4  ;;  %s8734_s14 = scalar_lea.vmem %s8733_s12, 64  ;;  %s7072_s16 = int_to_ptr.vmem [resolvable:$true] %s7071_s16 }
  0x1f   : > { %v433_v16 = vrot.slane %v391_v12, %v8918_v10  ;;  %v426_v17 = vcombine.high %v391_v12, %v391_v12  ;;  %v450_v18 = vrot.slane %v392_v14, %v8918_v10  ;;  %v443_v19 = vcombine.high %v392_v14, %v392_v14  ;;  %v394_v28 = vld [vmem:[%s8926_s23 + $0x18] sm:$0xff]  ;;  %v395_v47 = vld [vmem:[%s8926_s23 + $0x20] sm:$0xff]  ;;  %v396_v57 = vld [vmem:[%s8926_s23 + $0x28] sm:$0xff]  ;;  %s8728_s25 = scalar_lea.vmem %s7072_s16, 32  ;;  %p8735_p0 = scmp.lt.s32.totalorder %s7072_s16, %s8733_s12 }
  0x20   : > { %v467_v20 = vrot.slane %v393_v15, %v8918_v10  ;;  %v460_v21 = vcombine.high %v393_v15, %v393_v15  ;;  %v477_v38 = vcombine.high %v394_v28, %v394_v28  ;;  %v484_v43 = vrot.slane %v394_v28, %v8918_v10  ;;  %v397_v6 = vld [vmem:[%s8926_s23 + $0x30] sm:$0xff]  ;;  %p8729_p11 = scmp.ne.s32.totalorder %s7072_s16, %s8728_s25  ;;  %p8736_p1 = scmp.lt.s32.totalorder %s8734_s14, %s8728_s25 }
  0x21   : > { %v441_v23 = vcombine.high %v433_v16, %v433_v16  ;;  %v440_v24 = vrot.slane %v426_v17, %v8918_v10  ;;  %v458_v25 = vcombine.high %v450_v18, %v450_v18  ;;  %v571_v26 = vand.u32 %v8929_v13, %v433_v16  ;;  %1598 = vperm.xlu0 %7244, %v1552_v22  }
  0x22   : > { %v457_v27 = vrot.slane %v443_v19, %v8918_v10  ;;  %v475_v32 = vcombine.high %v467_v20, %v467_v20  ;;  %v474_v35 = vrot.slane %v460_v21, %v8918_v10  ;;  %v583_v39 = vand.u32 %v8929_v13, %v450_v18  ;;  %v398_v18 = vld [vmem:[%s8926_s23 + $0x38] sm:$0xff]  ;;  %s7057_s23 = scalar_lea.sflag [#allocation4], %s380_s13  ;;  %p8730_p12 = pnand %p8729_p11, %p8893_p5 }
  0x23   : > { %v574_v29 = vand.u32 %v8929_v13, %v441_v23  ;;  %v442_v30 = vcombine.high %v440_v24, %v440_v24  ;;  %v586_v31 = vand.u32 %v8929_v13, %v458_v25  ;;  %v577_v33 = vand.u32 %v8929_v13, %v440_v24  ;;  %p8737_p2 = por %p8736_p1, %p8735_p0 }
  0x24   : > { %v459_v34 = vcombine.high %v457_v27, %v457_v27  ;;  %v476_v41 = vcombine.high %v474_v35, %v474_v35  ;;  %v598_v42 = vand.u32 %v8929_v13, %v475_v32  ;;  %v589_v44 = vand.u32 %v8929_v13, %v457_v27  ;;  %p8731_p13 = pneg %p8730_p12 }
  0x25   : > { %680 = vmatprep.subr.bf16.mxu0 %v574_v29  ;;  %v580_v36 = vand.u32 %v8929_v13, %v442_v30  ;;  %v491_v46 = vrot.slane %v477_v38, %v8918_v10  ;;  %v492_v48 = vcombine.high %v484_v43, %v484_v43  ;;  %v494_v50 = vcombine.high %v395_v47, %v395_v47 }
  0x26   : > { %681 = vmatpush1.bf16.msra.mxu0 %v571_v26  ;;  %v592_v40 = vand.u32 %v8929_v13, %v459_v34  ;;  %v604_v45 = vand.u32 %v8929_v13, %v476_v41  ;;  %v595_v51 = vand.u32 %v8929_v13, %v467_v20  ;;  %v501_v53 = vrot.slane %v395_v47, %v8918_v10  ;;  %p8738_p3 = pnand %p8737_p2, %p8731_p13 }
  0x27   : > { %723 = vmatprep.subr.bf16.mxu1 %v580_v36  ;;  %766 = vmatprep.subr.bf16.mxu0 %v586_v31  ;;  %v493_v49 = vcombine.high %v491_v46, %v491_v46  ;;  %v610_v52 = vand.u32 %v8929_v13, %v492_v48  ;;  %v601_v54 = vand.u32 %v8929_v13, %v474_v35  ;;  %v1551_v35 = vld [vmem:[%s12503_s4 + $0x8] sm:$0xff]  ;;  %v1553_v36 = vld [vmem:[%s12503_s4 + $0x18] sm:$0xff] }
  0x28   : > { %724 = vmatpush1.bf16.msra.mxu1 %v577_v33  ;;  %v508_v56 = vrot.slane %v494_v50, %v8918_v10  ;;  %v509_v58 = vcombine.high %v501_v53, %v501_v53  ;;  %v511_v60 = vcombine.high %v396_v57, %v396_v57  ;;  %v607_v61 = vand.u32 %v8929_v13, %v484_v43 }
  0x29   : > { %7138 = vmatmul.mubr.msk.bf16.vlgmr.msra.gmra.mxu0 %vm562_vm2, %v8951_v37  ;;  %809 = vmatprep.subr.bf16.mxu1 %v592_v40  ;;  %v616_v55 = vand.u32 %v8929_v13, %v493_v49  ;;  %v518_v63 = vrot.slane %v396_v57, %v8918_v10  ;;  %v613_v0 = vand.u32 %v8929_v13, %v491_v46 }
  0x2a   : > { %767 = vmatpush1.bf16.msra.mxu0 %v583_v39  ;;  %784 = vmatprep.mubr.bf16.mxu0 %v12512_v5  ;;  %v510_v59 = vcombine.high %v508_v56, %v508_v56  ;;  %v622_v62 = vand.u32 %v8929_v13, %v509_v58  ;;  %v525_v3 = vrot.slane %v511_v60, %v8918_v10 }
  0x2b   : > { %7139 = vmatmul.mubr.msk.bf16.vlgmr.msra.gmra.mxu1 %vm562_vm2, %v8951_v37  ;;  %852 = vmatprep.subr.bf16.mxu0 %v598_v42  ;;  %v526_v7 = vcombine.high %v518_v63, %v518_v63  ;;  %v528_v9 = vcombine.high %v397_v6, %v397_v6  ;;  %v619_v11 = vand.u32 %v8929_v13, %v501_v53 }
  0x2c   : > { %810 = vmatpush1.bf16.msra.mxu1 %v589_v44  ;;  %827 = vmatprep.mubr.bf16.mxu1 %v12512_v5  ;;  %v628_v2 = vand.u32 %v8929_v13, %v510_v59  ;;  %v527_v8 = vcombine.high %v525_v3, %v525_v3  ;;  %v535_v14 = vrot.slane %v397_v6, %v8918_v10 }
  0x2d   : > { %895 = vmatprep.subr.bf16.mxu1 %v604_v45  ;;  %v634_v12 = vand.u32 %v8929_v13, %v526_v7  ;;  %v625_v15 = vand.u32 %v8929_v13, %v508_v56  ;;  %v542_v17 = vrot.slane %v528_v9, %v8918_v10  ;;  %v545_v21 = vcombine.high %v398_v18, %v398_v18 }
  0x2e   : > { %v640_v16 = vand.u32 %v8929_v13, %v527_v8  ;;  %v543_v19 = vcombine.high %v535_v14, %v535_v14  ;;  %v631_v22 = vand.u32 %v8929_v13, %v518_v63  ;;  %v552_v24 = vrot.slane %v398_v18, %v8918_v10 }
  0x2f   : > { %v544_v20 = vcombine.high %v542_v17, %v542_v17  ;;  %v637_v25 = vand.u32 %v8929_v13, %v525_v3  ;;  %v559_v27 = vrot.slane %v545_v21, %v8918_v10  ;;  %v643_v30 = vand.u32 %v8929_v13, %v535_v14 }
  0x30   : > { %v646_v23 = vand.u32 %v8929_v13, %v543_v19  ;;  %v560_v28 = vcombine.high %v552_v24, %v552_v24  ;;  %v649_v32 = vand.u32 %v8929_v13, %v542_v17  ;;  %v655_v33 = vand.u32 %v8929_v13, %v552_v24  ;;  %v9066_v19 = vld [vmem:[%s12502_s3] sm:$0xff]  }
  0x31   : > { %7140 = vmatmul.mubr.msk.bf16.vlgmr.msra.gmra.mxu0 %vm562_vm2, %v8951_v37  ;;  %v652_v26 = vand.u32 %v8929_v13, %v544_v20  ;;  %v561_v29 = vcombine.high %v559_v27, %v559_v27  ;;  %v661_v34 = vand.u32 %v8929_v13, %v559_v27 }
  0x32   : > { %853 = vmatpush1.bf16.msra.mxu0 %v595_v51  ;;  %870 = vmatprep.mubr.bf16.mxu0 %v12512_v5  ;;  %v658_v31 = vand.u32 %v8929_v13, %v560_v28 }
  0x33   : > { %7141 = vmatmul.mubr.msk.bf16.vlgmr.msra.gmra.mxu1 %vm562_vm2, %v8951_v37  ;;  %938 = vmatprep.subr.bf16.mxu0 %v610_v52  ;;  %v664_v10 = vand.u32 %v8929_v13, %v561_v29  ;;  %v1550_v13 = vld [vmem:[%s12503_s4] sm:$0xff] }
  0x34   : > { %896 = vmatpush1.bf16.msra.mxu1 %v601_v54  ;;  %913 = vmatprep.mubr.bf16.mxu1 %v12512_v5 }
  0x35   : > { %981 = vmatprep.subr.bf16.mxu1 %v616_v55  ;;  %1588 = vperm.xlu1 %7245, %v1550_v13  }
  0x39   : > { %7142 = vmatmul.mubr.msk.bf16.vlgmr.msra.gmra.mxu0 %vm562_vm2, %v8951_v37  ;;  %1593 = vperm.xlu1 %7245, %v1551_v35  }
  0x3a   : > { %939 = vmatpush1.bf16.msra.mxu0 %v607_v61  ;;  %956 = vmatprep.mubr.bf16.mxu0 %v12512_v5 }
  0x3b   : > { %7143 = vmatmul.mubr.msk.bf16.vlgmr.msra.gmra.mxu1 %vm562_vm2, %v8951_v37  ;;  %1024 = vmatprep.subr.bf16.mxu0 %v622_v62 }
  0x3c   : > { %982 = vmatpush1.bf16.msra.mxu1 %v613_v0  ;;  %999 = vmatprep.mubr.bf16.mxu1 %v12512_v5 }
  0x3d   : > { %1067 = vmatprep.subr.bf16.mxu1 %v628_v2  ;;  %1603 = vperm.xlu1 %7245, %v1553_v36  }
  0x41   : > { %7144 = vmatmul.mubr.msk.bf16.vlgmr.msra.gmra.mxu0 %vm562_vm2, %v8951_v37 }
  0x42   : > { %1025 = vmatpush1.bf16.msra.mxu0 %v619_v11  ;;  %1042 = vmatprep.mubr.bf16.mxu0 %v12512_v5 }
  0x43   : > { %7145 = vmatmul.mubr.msk.bf16.vlgmr.msra.gmra.mxu1 %vm562_vm2, %v8951_v37  ;;  %1110 = vmatprep.subr.bf16.mxu0 %v634_v12 }
  0x44   : > { %1068 = vmatpush1.bf16.msra.mxu1 %v625_v15  ;;  %1085 = vmatprep.mubr.bf16.mxu1 %v12512_v5 }
  0x45   : > { %1153 = vmatprep.subr.bf16.mxu1 %v640_v16 }
  0x49   : > { %7146 = vmatmul.mubr.msk.bf16.vlgmr.msra.gmra.mxu0 %vm562_vm2, %v8951_v37 }
  0x4a   : > { %1111 = vmatpush1.bf16.msra.mxu0 %v631_v22  ;;  %1128 = vmatprep.mubr.bf16.mxu0 %v12512_v5 }
  0x4b   : > { %7147 = vmatmul.mubr.msk.bf16.vlgmr.msra.gmra.mxu1 %vm562_vm2, %v8951_v37  ;;  %1196 = vmatprep.subr.bf16.mxu0 %v646_v23 }
  0x4c   : > { %1154 = vmatpush1.bf16.msra.mxu1 %v637_v25  ;;  %1171 = vmatprep.mubr.bf16.mxu1 %v12512_v5 }
  0x4d   : > { %1239 = vmatprep.subr.bf16.mxu1 %v652_v26 }
  0x51   : > { %7148 = vmatmul.mubr.msk.bf16.vlgmr.msra.gmra.mxu0 %vm562_vm2, %v8951_v37 }
  0x52   : > { %1197 = vmatpush1.bf16.msra.mxu0 %v643_v30  ;;  %1214 = vmatprep.mubr.bf16.mxu0 %v12512_v5 }
  0x53   : > { %7149 = vmatmul.mubr.msk.bf16.vlgmr.msra.gmra.mxu1 %vm562_vm2, %v8951_v37  ;;  %1282 = vmatprep.subr.bf16.mxu0 %v658_v31 }
  0x54   : > { %1240 = vmatpush1.bf16.msra.mxu1 %v649_v32  ;;  %1257 = vmatprep.mubr.bf16.mxu1 %v12512_v5 }
  0x55   : > { %1325 = vmatprep.subr.bf16.mxu1 %v664_v10 }
  0x59   : > { %7150 = vmatmul.mubr.msk.bf16.vlgmr.msra.gmra.mxu0 %vm562_vm2, %v8951_v37 }
  0x5a   : > { %1283 = vmatpush1.bf16.msra.mxu0 %v655_v33  ;;  %1300 = vmatprep.mubr.bf16.mxu0 %v12512_v5 }
  0x5b   : > { %7151 = vmatmul.mubr.msk.bf16.vlgmr.msra.gmra.mxu1 %vm562_vm2, %v8951_v37 }
  0x5c   : > { %1326 = vmatpush1.bf16.msra.mxu1 %v661_v34  ;;  %1343 = vmatprep.mubr.bf16.mxu1 %v12512_v5 }
  0x61   : > { %7152 = vmatmul.mubr.msk.bf16.vlgmr.msra.gmra.mxu0 %vm562_vm2, %v8951_v37 }
  0x62   : > { %1655 = vmatprep.mubr.bf16.mxu0 %v12512_v5 }
  0x63   : > { %7153 = vmatmul.mubr.msk.bf16.vlgmr.msra.gmra.mxu1 %vm562_vm2, %v8951_v37 }
  0x64   : > { %1708 = vmatprep.mubr.bf16.mxu1 %v12512_v5 }
  0x94   : > { %v9051_v38 = vpop.permute.xlu0 %405 }
  0x98   : > { %v9053_v43 = vpop.permute.xlu0 %410 }
  0xe9   : > { %v700_v37 = vpop.f32.mrf.mxu0 }
  0xea   : > { %v701_v48 = vadd.f32 %v700_v37, %v9051_v38 }
  0xeb   : > { %v702_v39 = vpop.f32.mrf.mxu0  ;;  %v743_v40 = vpop.f32.mrf.mxu1 }
  0xec   : > { %v703_v44 = vadd.f32 %v702_v39, %v9051_v38  ;;  %v1418_v57 = vmul.f32 0.2, %v701_v48  ;;  %vm1354_vm6 = vcmp.gt.f32.partialorder %v701_v48, 0.0  ;;  %v744_v0 = vadd.f32 %v743_v40, %v9051_v38 }
  0xed   : > { %v704_v41 = vpop.f32.mrf.mxu0  ;;  %v745_v42 = vpop.f32.mrf.mxu1 }
  0xee   : > { %v705_v45 = vadd.f32 %v704_v41, %v9053_v43  ;;  %v1419_v54 = vmul.f32 0.2, %v703_v44  ;;  %vm1355_vm5 = vcmp.gt.f32.partialorder %v703_v44, 0.0  ;;  %v746_v60 = vadd.f32 %v745_v42, %v9051_v38 }
  0xef   : > { %v706_v46 = vpop.f32.mrf.mxu0  ;;  %v747_v47 = vpop.f32.mrf.mxu1  ;;  %v1482_v8 = vsel %vm1354_vm6, %v701_v48, %v1418_v57  ;;  %v1420_v18 = vmul.f32 0.2, %v744_v0  ;;  %vm1356_vm10 = vcmp.gt.f32.partialorder %v744_v0, 0.0 }
  0xf0   : > { %v707_v49 = vadd.f32 %v706_v46, %v9053_v43  ;;  %v1450_v52 = vmul.f32 0.2, %v705_v45  ;;  %vm1386_vm4 = vcmp.gt.f32.partialorder %v705_v45, 0.0  ;;  %v748_v58 = vadd.f32 %v747_v47, %v9053_v43 }
  0xf1   : > { %v749_v50 = vpop.f32.mrf.mxu1  ;;  %v786_v51 = vpop.f32.mrf.mxu0  ;;  %v1483_v7 = vsel %vm1355_vm5, %v703_v44, %v1419_v54  ;;  %v1421_v15 = vmul.f32 0.2, %v746_v60  ;;  %vm1357_vm9 = vcmp.gt.f32.partialorder %v746_v60, 0.0  ;;  %v1484_v33 = vsel %vm1356_vm10, %v744_v0, %v1420_v18  ;;  %v9087_v44 = vld [vmem:[%s12502_s3 + $0x8] sm:$0xff]  }
  0xf2   : > { %vm1387_vm3 = vcmp.gt.f32.partialorder %v707_v49, 0.0  ;;  %v1451_v53 = vmul.f32 0.2, %v707_v49  ;;  %v750_v59 = vadd.f32 %v749_v50, %v9053_v43  ;;  %v1514_v2 = vsel %vm1386_vm4, %v705_v45, %v1450_v52 }
  0xf3   : > { %v788_v55 = vpop.f32.mrf.mxu0  ;;  %v829_v56 = vpop.f32.mrf.mxu1  ;;  %v1452_v9 = vmul.f32 0.2, %v748_v58  ;;  %v1554_v14 = vpack.c.bf16 %v1514_v2, %v1482_v8  ;;  %vm1388_vm7 = vcmp.gt.f32.partialorder %v748_v58, 0.0  ;;  %v787_v20 = vadd.f32 %v786_v51, %v9051_v38 }
  0xf4   : > { %v1515_v63 = vsel %vm1387_vm3, %v707_v49, %v1451_v53  ;;  %v1453_v11 = vmul.f32 0.2, %v750_v59  ;;  %vm1389_vm8 = vcmp.gt.f32.partialorder %v750_v59, 0.0  ;;  %v789_v25 = vadd.f32 %v788_v55, %v9051_v38 }
  0xf5   : > { %v790_v61 = vpop.f32.mrf.mxu0  ;;  %v831_v62 = vpop.f32.mrf.mxu1  ;;  %v1555_v12 = vpack.c.bf16 %v1515_v63, %v1483_v7  ;;  %v1516_v24 = vsel %vm1388_vm7, %v748_v58, %v1452_v9  ;;  %v830_v28 = vadd.f32 %v829_v56, %v9051_v38  ;;  %v1485_v31 = vsel %vm1357_vm9, %v746_v60, %v1421_v15 }
  0xf6   : > { %v791_v21 = vadd.f32 %v790_v61, %v9053_v43  ;;  %v1517_v27 = vsel %vm1389_vm8, %v750_v59, %v1453_v11  ;;  %v832_v34 = vadd.f32 %v831_v62, %v9051_v38  ;;  %v1556_v35 = vpack.c.bf16 %v1516_v24, %v1484_v33 }
  0xf7   : > { %v792_v3 = vpop.f32.mrf.mxu0  ;;  %v833_v6 = vpop.f32.mrf.mxu1  ;;  %1637 = vmatprep.subr.bf16.mxu0 %v1555_v12  ;;  %v1557_v13 = vpack.c.bf16 %v1517_v27, %v1485_v31  ;;  %vm1358_vm12 = vcmp.gt.f32.partialorder %v787_v20, 0.0  ;;  %v1422_v36 = vmul.f32 0.2, %v787_v20  ;;  %vm1359_vm13 = vcmp.gt.f32.partialorder %v789_v25, 0.0 }
  0xf8   : > { %1638 = vmatpush1.bf16.msra.mxu0 %v1554_v14  ;;  %v793_v26 = vadd.f32 %v792_v3, %v9053_v43  ;;  %v834_v29 = vadd.f32 %v833_v6, %v9053_v43  ;;  %v1454_v37 = vmul.f32 0.2, %v791_v21  ;;  %v1423_v41 = vmul.f32 0.2, %v789_v25 }
  0xf9   : > { %v835_v16 = vpop.f32.mrf.mxu1  ;;  %v872_v17 = vpop.f32.mrf.mxu0  ;;  %vm1390_vm14 = vcmp.gt.f32.partialorder %v791_v21, 0.0  ;;  %1690 = vmatprep.subr.bf16.mxu1 %v1557_v13  ;;  %vm1360_vm15 = vcmp.gt.f32.partialorder %v830_v28, 0.0  ;;  %v1424_v49 = vmul.f32 0.2, %v830_v28  ;;  %v1425_v50 = vmul.f32 0.2, %v832_v34 }
  0xfa   : > { %v836_v30 = vadd.f32 %v835_v16, %v9053_v43  ;;  %v1455_v42 = vmul.f32 0.2, %v793_v26  ;;  %vm1391_vm0 = vcmp.gt.f32.partialorder %v793_v26, 0.0  ;;  %v1456_v45 = vmul.f32 0.2, %v834_v29  ;;  %1691 = vmatpush1.bf16.msra.mxu1 %v1556_v35 }
  0xfb   : > { %v874_v22 = vpop.f32.mrf.mxu0  ;;  %v9070_v23 = vpop.f32.mrf.mxu1  ;;  %7156 = vmatmul.mubr.msk.bf16.vlgmr.msra.gmra.mxu0 %vm1616_vm11, %v9066_v19  ;;  %vm1392_vm1 = vcmp.gt.f32.partialorder %v834_v29, 0.0  ;;  %v1486_v51 = vsel %vm1358_vm12, %v787_v20, %v1422_v36  ;;  %v1518_v52 = vsel %vm1390_vm14, %v791_v21, %v1454_v37  ;;  %vm1361_vm3 = vcmp.gt.f32.partialorder %v832_v34, 0.0 }
  0xfc   : > { %1665 = vmatprep.mubr.bf16.mxu0 %v12512_v5  ;;  %v1457_v46 = vmul.f32 0.2, %v836_v30  ;;  %vm1393_vm2 = vcmp.gt.f32.partialorder %v836_v30, 0.0  ;;  %v873_v53 = vadd.f32 %v872_v17, %v9051_v38  ;;  %v875_v56 = vadd.f32 %v874_v22, %v9051_v38 }
  0xfd   : > { %v876_v32 = vpop.f32.mrf.mxu0  ;;  %v917_v10 = vpop.f32.mrf.mxu1  ;;  %7158 = vmatmul.mubr.msk.bf16.vlgmr.msra.gmra.mxu1 %vm1616_vm11, %v9066_v19  ;;  %v1487_v58 = vsel %vm1359_vm13, %v789_v25, %v1423_v41  ;;  %v1519_v59 = vsel %vm1391_vm0, %v793_v26, %v1455_v42  ;;  %v1520_v60 = vsel %vm1392_vm1, %v834_v29, %v1456_v45  ;;  %v1558_v3 = vpack.c.bf16 %v1518_v52, %v1486_v51 }
  0xfe   : > { %v877_v57 = vadd.f32 %v876_v32, %v9053_v43  ;;  %v1559_v62 = vpack.c.bf16 %v1519_v59, %v1487_v58  ;;  %v1521_v63 = vsel %vm1393_vm2, %v836_v30, %v1457_v46  ;;  %1718 = vmatprep.mubr.bf16.mxu1 %v12512_v5  ;;  %v1489_v7 = vsel %vm1361_vm3, %v832_v34, %v1425_v50 }
  0xff   : > { %v878_v39 = vpop.f32.mrf.mxu0  ;;  %v919_v40 = vpop.f32.mrf.mxu1  ;;  %v1488_v8 = vsel %vm1360_vm15, %v830_v28, %v1424_v49  ;;  %vm1362_vm4 = vcmp.gt.f32.partialorder %v873_v53, 0.0  ;;  %v918_v9 = vadd.f32 %v917_v10, %v9051_v38  ;;  %v1561_v11 = vpack.c.bf16 %v1521_v63, %v1489_v7 }
 0x100   : > { %v879_v61 = vadd.f32 %v878_v39, %v9053_v43  ;;  %1743 = vmatprep.subr.bf16.mxu0 %v1559_v62  ;;  %v1560_v15 = vpack.c.bf16 %v1520_v60, %v1488_v8  ;;  %v1426_v16 = vmul.f32 0.2, %v873_v53  ;;  %v1458_v17 = vmul.f32 0.2, %v877_v57 }
 0x101   : > { %v921_v47 = vpop.f32.mrf.mxu1  ;;  %v9089_v48 = vpop.f32.mrf.mxu0  ;;  %v920_v18 = vadd.f32 %v919_v40, %v9053_v43  ;;  %1744 = vmatpush1.bf16.msra.mxu0 %v1558_v3  ;;  %v1427_v20 = vmul.f32 0.2, %v875_v56  ;;  %v916_v21 = vadd.f32 %v9070_v23, %v9051_v38  ;;  %vm1394_vm5 = vcmp.gt.f32.partialorder %v877_v57, 0.0  ;;  %1796 = vmatprep.subr.bf16.mxu1 %v1561_v11 }
 0x102   : > { %v922_v6 = vadd.f32 %v921_v47, %v9053_v43  ;;  %v1459_v22 = vmul.f32 0.2, %v879_v61  ;;  %vm1363_vm6 = vcmp.gt.f32.partialorder %v875_v56, 0.0  ;;  %vm1395_vm7 = vcmp.gt.f32.partialorder %v879_v61, 0.0  ;;  %1797 = vmatpush1.bf16.msra.mxu1 %v1560_v15 }
 0x103   : > { %v960_v54 = vpop.f32.mrf.mxu0  ;;  %v9094_v55 = vpop.f32.mrf.mxu1  ;;  %7157 = vmatmul.mubr.msk.bf16.gmra.mxu0 %vm1616_vm11, %v9087_v44  ;;  %v1429_v27 = vmul.f32 0.2, %v918_v9  ;;  %v1490_v30 = vsel %vm1362_vm4, %v873_v53, %v1426_v16  ;;  %v1522_v31 = vsel %vm1394_vm5, %v877_v57, %v1458_v17  ;;  %vm1365_vm9 = vcmp.gt.f32.partialorder %v918_v9, 0.0 }
 0x104   : > { %1761 = vmatprep.mubr.bf16.mxu0 %v12512_v5  ;;  %v1461_v26 = vmul.f32 0.2, %v922_v6  ;;  %vm1397_vm8 = vcmp.gt.f32.partialorder %v922_v6, 0.0  ;;  %v1460_v23 = vmul.f32 0.2, %v920_v18  ;;  %vm1396_vm10 = vcmp.gt.f32.partialorder %v920_v18, 0.0 }
 0x105   : > { %v9104_v0 = vpop.f32.mrf.mxu0  ;;  %v1003_v2 = vpop.f32.mrf.mxu1  ;;  %7159 = vmatmul.mubr.msk.bf16.gmra.mxu1 %vm1616_vm11, %v9087_v44  ;;  %v1428_v32 = vmul.f32 0.2, %v916_v21  ;;  %v1491_v10 = vsel %vm1363_vm6, %v875_v56, %v1427_v20  ;;  %v1523_v33 = vsel %vm1395_vm7, %v879_v61, %v1459_v22  ;;  %v961_v13 = vadd.f32 %v960_v54, %v9051_v38 }
 0x106   : > { %1814 = vmatprep.mubr.bf16.mxu1 %v12512_v5  ;;  %v1563_v36 = vpack.c.bf16 %v1523_v33, %v1491_v10  ;;  %v1525_v37 = vsel %vm1397_vm8, %v922_v6, %v1461_v26  ;;  %vm1364_vm12 = vcmp.gt.f32.partialorder %v916_v21, 0.0  ;;  %v1562_v40 = vpack.c.bf16 %v1522_v31, %v1490_v30 }
 0x107   : > { %v964_v12 = vpop.f32.mrf.mxu0  ;;  %v9112_v14 = vpop.f32.mrf.mxu1  ;;  %v1493_v42 = vsel %vm1365_vm9, %v918_v9, %v1429_v27  ;;  %v1524_v45 = vsel %vm1396_vm10, %v920_v18, %v1460_v23  ;;  %v1004_v46 = vadd.f32 %v1003_v2, %v9051_v38  ;;  %v1492_v50 = vsel %vm1364_vm12, %v916_v21, %v1428_v32 }
 0x108   : > { %v965_v35 = vadd.f32 %v964_v12, %v9053_v43  ;;  %1849 = vmatprep.subr.bf16.mxu0 %v1563_v36  ;;  %v1565_v47 = vpack.c.bf16 %v1525_v37, %v1493_v42  ;;  %v1431_v51 = vmul.f32 0.2, %v961_v13  ;;  %v963_v52 = vadd.f32 %v9104_v0, %v9053_v43 }
 0x109   : > { %v1007_v24 = vpop.f32.mrf.mxu1  ;;  %v9118_v25 = vpop.f32.mrf.mxu0  ;;  %v1564_v56 = vpack.c.bf16 %v1524_v45, %v1492_v50  ;;  %vm1367_vm13 = vcmp.gt.f32.partialorder %v961_v13, 0.0  ;;  %v959_v58 = vadd.f32 %v9089_v48, %v9051_v38  ;;  %v1433_v59 = vmul.f32 0.2, %v1004_v46 }
 0x10a   : > { %v1008_v41 = vadd.f32 %v1007_v24, %v9053_v43  ;;  %v1463_v53 = vmul.f32 0.2, %v965_v35  ;;  %1902 = vmatprep.subr.bf16.mxu1 %v1565_v47  ;;  %vm1399_vm14 = vcmp.gt.f32.partialorder %v965_v35, 0.0  ;;  %vm1369_vm0 = vcmp.gt.f32.partialorder %v1004_v46, 0.0 }
 0x10b   : > { %v9120_v28 = vpop.f32.mrf.mxu0  ;;  %v9122_v29 = vpop.f32.mrf.mxu1  ;;  %7160 = vmatmul.mubr.msk.bf16.vlgmr.msra.gmra.mxu0 %vm1616_vm11, %v9066_v19  ;;  %v1462_v61 = vmul.f32 0.2, %v963_v52  ;;  %v1495_v62 = vsel %vm1367_vm13, %v961_v13, %v1431_v51  ;;  %vm1398_vm1 = vcmp.gt.f32.partialorder %v963_v52, 0.0  ;;  %v1430_v3 = vmul.f32 0.2, %v959_v58 }
 0x10c   : > { %1771 = vmatprep.mubr.bf16.mxu0 %v12512_v5  ;;  %1850 = vmatpush1.bf16.msra.mxu0 %v1562_v40  ;;  %v1465_v57 = vmul.f32 0.2, %v1008_v41  ;;  %vm1401_vm15 = vcmp.gt.f32.partialorder %v1008_v41, 0.0  ;;  %v1527_v63 = vsel %vm1399_vm14, %v965_v35, %v1463_v53  ;;  %v1006_v6 = vadd.f32 %v9112_v14, %v9053_v43 }
 0x10d   : > { %v9128_v34 = vpop.f32.mrf.mxu0  ;;  %v1089_v39 = vpop.f32.mrf.mxu1  ;;  %7162 = vmatmul.mubr.msk.bf16.vlgmr.msra.gmra.mxu1 %vm1616_vm11, %v9066_v19  ;;  %v1567_v48 = vpack.c.bf16 %v1527_v63, %v1495_v62  ;;  %v1497_v7 = vsel %vm1369_vm0, %v1004_v46, %v1433_v59  ;;  %vm1366_vm2 = vcmp.gt.f32.partialorder %v959_v58, 0.0  ;;  %v1002_v9 = vadd.f32 %v9094_v55, %v9051_v38 }
 0x10e   : > { %1903 = vmatpush1.bf16.msra.mxu1 %v1564_v56  ;;  %1824 = vmatprep.mubr.bf16.mxu1 %v12512_v5  ;;  %v1529_v2 = vsel %vm1401_vm15, %v1008_v41, %v1465_v57  ;;  %v1526_v12 = vsel %vm1398_vm1, %v963_v52, %v1462_v61  ;;  %v1047_v15 = vadd.f32 %v9120_v28, %v9051_v38  ;;  %v1464_v20 = vmul.f32 0.2, %v1006_v6 }
 0x10f   : > { %v1050_v49 = vpop.f32.mrf.mxu0  ;;  %v9142_v54 = vpop.f32.mrf.mxu1  ;;  %1955 = vmatprep.subr.bf16.mxu0 %v1567_v48  ;;  %v1569_v11 = vpack.c.bf16 %v1529_v2, %v1497_v7  ;;  %v1494_v18 = vsel %vm1366_vm2, %v959_v58, %v1430_v3  ;;  %v1432_v55 = vmul.f32 0.2, %v1002_v9  ;;  %vm1400_vm3 = vcmp.gt.f32.partialorder %v1006_v6, 0.0 }
 0x110   : > { %v1051_v16 = vadd.f32 %v1050_v49, %v9053_v43  ;;  %v1566_v22 = vpack.c.bf16 %v1526_v12, %v1494_v18  ;;  %v1090_v24 = vadd.f32 %v1089_v39, %v9051_v38  ;;  %vm1368_vm4 = vcmp.gt.f32.partialorder %v1002_v9, 0.0 }
 0x111   : > { %v9148_v60 = vpop.f32.mrf.mxu0  ;;  %v1093_v0 = vpop.f32.mrf.mxu1  ;;  %2008 = vmatprep.subr.bf16.mxu1 %v1569_v11  ;;  %v1435_v26 = vmul.f32 0.2, %v1047_v15  ;;  %vm1371_vm5 = vcmp.gt.f32.partialorder %v1047_v15, 0.0  ;;  %v1528_v30 = vsel %vm1400_vm3, %v1006_v6, %v1464_v20  ;;  %v1496_v32 = vsel %vm1368_vm4, %v1002_v9, %v1432_v55 }
 0x112   : > { %v1094_v14 = vadd.f32 %v1093_v0, %v9053_v43  ;;  %v1467_v27 = vmul.f32 0.2, %v1051_v16  ;;  %vm1403_vm6 = vcmp.gt.f32.partialorder %v1051_v16, 0.0  ;;  %v1437_v10 = vmul.f32 0.2, %v1090_v24 }
 0x113   : > { %7161 = vmatmul.mubr.msk.bf16.gmra.mxu0 %vm1616_vm11, %v9087_v44  ;;  %v1132_v8 = vpop.f32.mrf.mxu0  ;;  %v9161_v17 = vpop.f32.mrf.mxu1  ;;  %v1049_v33 = vadd.f32 %v9128_v34, %v9053_v43  ;;  %vm1373_vm8 = vcmp.gt.f32.partialorder %v1090_v24, 0.0  ;;  %v1499_v35 = vsel %vm1371_vm5, %v1047_v15, %v1435_v26  ;;  %v1568_v37 = vpack.c.bf16 %v1528_v30, %v1496_v32 }
 0x114   : > { %1867 = vmatprep.mubr.bf16.mxu0 %v12512_v5  ;;  %v1469_v31 = vmul.f32 0.2, %v1094_v14  ;;  %vm1405_vm7 = vcmp.gt.f32.partialorder %v1094_v14, 0.0  ;;  %v1531_v36 = vsel %vm1403_vm6, %v1051_v16, %v1467_v27  ;;  %v1045_v40 = vadd.f32 %v9118_v25, %v9051_v38 }
 0x115   : > { %v9164_v21 = vpop.f32.mrf.mxu0  ;;  %7163 = vmatmul.mubr.msk.bf16.gmra.mxu1 %vm1616_vm11, %v9087_v44  ;;  %v1175_v28 = vpop.f32.mrf.mxu1  ;;  %v1571_v39 = vpack.c.bf16 %v1531_v36, %v1499_v35  ;;  %v1501_v45 = vsel %vm1373_vm8, %v1090_v24, %v1437_v10  ;;  %v1466_v34 = vmul.f32 0.2, %v1049_v33  ;;  %vm1402_vm9 = vcmp.gt.f32.partialorder %v1049_v33, 0.0 }
 0x116   : > { %1920 = vmatprep.mubr.bf16.mxu1 %v12512_v5  ;;  %v1533_v42 = vsel %vm1405_vm7, %v1094_v14, %v1469_v31  ;;  %v1092_v25 = vadd.f32 %v9142_v54, %v9053_v43  ;;  %v1434_v49 = vmul.f32 0.2, %v1045_v40  ;;  %v1133_v50 = vadd.f32 %v1132_v8, %v9051_v38 }
 0x117   : > { %v1136_v23 = vpop.f32.mrf.mxu0  ;;  %v9175_v13 = vpop.f32.mrf.mxu1  ;;  %v1573_v47 = vpack.c.bf16 %v1533_v42, %v1501_v45  ;;  %vm1370_vm10 = vcmp.gt.f32.partialorder %v1045_v40, 0.0  ;;  %v1088_v56 = vadd.f32 %v9122_v29, %v9051_v38  ;;  %v1530_v57 = vsel %vm1402_vm9, %v1049_v33, %v1466_v34 }
 0x118   : > { %v1137_v51 = vadd.f32 %v1136_v23, %v9053_v43  ;;  %vm1404_vm12 = vcmp.gt.f32.partialorder %v1092_v25, 0.0  ;;  %v1176_v54 = vadd.f32 %v1175_v28, %v9051_v38  ;;  %v1498_v59 = vsel %vm1370_vm10, %v1045_v40, %v1434_v49 }
 0x119   : > { %v9179_v41 = vpop.f32.mrf.mxu0  ;;  %v1179_v46 = vpop.f32.mrf.mxu1  ;;  %v1468_v61 = vmul.f32 0.2, %v1092_v25  ;;  %v1439_v62 = vmul.f32 0.2, %v1133_v50  ;;  %v1570_v48 = vpack.c.bf16 %v1530_v57, %v1498_v59  ;;  %vm1375_vm13 = vcmp.gt.f32.partialorder %v1133_v50, 0.0 }
 0x11a   : > { %v1180_v53 = vadd.f32 %v1179_v46, %v9053_v43  ;;  %v1471_v63 = vmul.f32 0.2, %v1137_v51  ;;  %vm1407_vm14 = vcmp.gt.f32.partialorder %v1137_v51, 0.0  ;;  %v1436_v29 = vmul.f32 0.2, %v1088_v56 }
 0x11b   : > { %7164 = vmatmul.mubr.msk.bf16.vlgmr.msra.gmra.mxu0 %vm1616_vm11, %v9066_v19  ;;  %v1218_v52 = vpop.f32.mrf.mxu0  ;;  %v9194_v58 = vpop.f32.mrf.mxu1  ;;  %vm1372_vm0 = vcmp.gt.f32.partialorder %v1088_v56, 0.0  ;;  %v1441_v6 = vmul.f32 0.2, %v1176_v54  ;;  %v1532_v7 = vsel %vm1404_vm12, %v1092_v25, %v1468_v61  ;;  %vm1377_vm1 = vcmp.gt.f32.partialorder %v1176_v54, 0.0 }
 0x11c   : > { %1956 = vmatpush1.bf16.msra.mxu0 %v1566_v22  ;;  %1877 = vmatprep.mubr.bf16.mxu0 %v12512_v5  ;;  %v1473_v2 = vmul.f32 0.2, %v1180_v53  ;;  %vm1409_vm15 = vcmp.gt.f32.partialorder %v1180_v53, 0.0  ;;  %v1503_v9 = vsel %vm1375_vm13, %v1133_v50, %v1439_v62  ;;  %v1535_v11 = vsel %vm1407_vm14, %v1137_v51, %v1471_v63 }
 0x11d   : > { %7166 = vmatmul.mubr.msk.bf16.vlgmr.msra.gmra.mxu1 %vm1616_vm11, %v9066_v19  ;;  %2061 = vmatprep.subr.bf16.mxu0 %v1571_v39  ;;  %v9197_v0 = vpop.f32.mrf.mxu0  ;;  %v1261_v3 = vpop.f32.mrf.mxu1  ;;  %v1575_v12 = vpack.c.bf16 %v1535_v11, %v1503_v9  ;;  %v1500_v16 = vsel %vm1372_vm0, %v1088_v56, %v1436_v29  ;;  %v1135_v18 = vadd.f32 %v9164_v21, %v9053_v43 }
 0x11e   : > { %2009 = vmatpush1.bf16.msra.mxu1 %v1568_v37  ;;  %1930 = vmatprep.mubr.bf16.mxu1 %v12512_v5  ;;  %v1537_v15 = vsel %vm1409_vm15, %v1180_v53, %v1473_v2  ;;  %v1572_v14 = vpack.c.bf16 %v1532_v7, %v1500_v16  ;;  %v1505_v22 = vsel %vm1377_vm1, %v1176_v54, %v1441_v6 }
 0x11f   : > { %2114 = vmatprep.subr.bf16.mxu1 %v1573_v47  ;;  %v1222_v8 = vpop.f32.mrf.mxu0  ;;  %v9208_v20 = vpop.f32.mrf.mxu1  ;;  %v1131_v24 = vadd.f32 %v9148_v60, %v9051_v38  ;;  %v1577_v27 = vpack.c.bf16 %v1537_v15, %v1505_v22  ;;  %v1219_v28 = vadd.f32 %v1218_v52, %v9051_v38  ;;  %v1470_v21 = vmul.f32 0.2, %v1135_v18 }
 0x120   : > { %v1223_v55 = vadd.f32 %v1222_v8, %v9053_v43  ;;  %vm1406_vm2 = vcmp.gt.f32.partialorder %v1135_v18, 0.0  ;;  %v1178_v23 = vadd.f32 %v9175_v13, %v9053_v43  ;;  %v1174_v35 = vadd.f32 %v9161_v17, %v9051_v38 }
 0x121   : > { %v9213_v26 = vpop.f32.mrf.mxu0  ;;  %v1265_v30 = vpop.f32.mrf.mxu1  ;;  %v1438_v60 = vmul.f32 0.2, %v1131_v24  ;;  %vm1374_vm4 = vcmp.gt.f32.partialorder %v1131_v24, 0.0  ;;  %v1443_v10 = vmul.f32 0.2, %v1219_v28  ;;  %v1534_v36 = vsel %vm1406_vm2, %v1135_v18, %v1470_v21 }
 0x122   : > { %v1475_v31 = vmul.f32 0.2, %v1223_v55  ;;  %vm1411_vm3 = vcmp.gt.f32.partialorder %v1223_v55, 0.0  ;;  %v1266_v33 = vadd.f32 %v1265_v30, %v9053_v43  ;;  %vm1379_vm5 = vcmp.gt.f32.partialorder %v1219_v28, 0.0 }
 0x123   : > { %7165 = vmatmul.mubr.msk.bf16.gmra.mxu0 %vm1616_vm11, %v9087_v44  ;;  %v1304_v32 = vpop.f32.mrf.mxu0  ;;  %v9227_v37 = vpop.f32.mrf.mxu1  ;;  %v1262_v39 = vadd.f32 %v1261_v3, %v9051_v38  ;;  %v1502_v42 = vsel %vm1374_vm4, %v1131_v24, %v1438_v60  ;;  %v1472_v45 = vmul.f32 0.2, %v1178_v23  ;;  %vm1408_vm6 = vcmp.gt.f32.partialorder %v1178_v23, 0.0 }
 0x124   : > { %1973 = vmatprep.mubr.bf16.mxu0 %v12512_v5  ;;  %v1539_v40 = vsel %vm1411_vm3, %v1223_v55, %v1475_v31  ;;  %v1574_v13 = vpack.c.bf16 %v1534_v36, %v1502_v42  ;;  %v1477_v46 = vmul.f32 0.2, %v1266_v33  ;;  %v1507_v17 = vsel %vm1379_vm5, %v1219_v28, %v1443_v10 }
 0x125   : > { %7167 = vmatmul.mubr.msk.bf16.gmra.mxu1 %vm1616_vm11, %v9087_v44  ;;  %v9230_v34 = vpop.f32.mrf.mxu0  ;;  %v1440_v47 = vmul.f32 0.2, %v1174_v35  ;;  %vm1413_vm7 = vcmp.gt.f32.partialorder %v1266_v33, 0.0  ;;  %v1347_v25 = vpop.f32.mrf.mxu1  ;;  %v1579_v49 = vpack.c.bf16 %v1539_v40, %v1507_v17  ;;  %vm1376_vm8 = vcmp.gt.f32.partialorder %v1174_v35, 0.0 }
 0x126   : > { %2026 = vmatprep.mubr.bf16.mxu1 %v12512_v5  ;;  %v1445_v50 = vmul.f32 0.2, %v1262_v39  ;;  %v1536_v51 = vsel %vm1408_vm6, %v1178_v23, %v1472_v45  ;;  %vm1381_vm9 = vcmp.gt.f32.partialorder %v1262_v39, 0.0  ;;  %v1541_v53 = vsel %vm1413_vm7, %v1266_v33, %v1477_v46 }
 0x127   : > { %v1308_v52 = vpop.f32.mrf.mxu0  ;;  %v1504_v56 = vsel %vm1376_vm8, %v1174_v35, %v1440_v47  ;;  %v1221_v57 = vadd.f32 %v9197_v0, %v9053_v43  ;;  %v9240_v54 = vpop.f32.mrf.mxu1  ;;  %v1217_v63 = vadd.f32 %v9179_v41, %v9051_v38  ;;  %v1305_v2 = vadd.f32 %v1304_v32, %v9051_v38 }
 0x128   : > { %v1576_v59 = vpack.c.bf16 %v1536_v51, %v1504_v56  ;;  %v1309_v61 = vadd.f32 %v1308_v52, %v9053_v43  ;;  %v1509_v62 = vsel %vm1381_vm9, %v1262_v39, %v1445_v50  ;;  %v1264_v6 = vadd.f32 %v9208_v20, %v9053_v43 }
 0x129   : > { %v1474_v29 = vmul.f32 0.2, %v1221_v57  ;;  %v1351_v0 = vpop.f32.mrf.mxu1  ;;  %vm1410_vm10 = vcmp.gt.f32.partialorder %v1221_v57, 0.0  ;;  %v1442_v41 = vmul.f32 0.2, %v1217_v63  ;;  %vm1378_vm13 = vcmp.gt.f32.partialorder %v1217_v63, 0.0 }
 0x12a   : > { %v1479_v3 = vmul.f32 0.2, %v1309_v61  ;;  %vm1415_vm12 = vcmp.gt.f32.partialorder %v1309_v61, 0.0  ;;  %v1447_v7 = vmul.f32 0.2, %v1305_v2  ;;  %v1352_v8 = vadd.f32 %v1351_v0, %v9053_v43 }
 0x12b   : > { %7168 = vmatmul.mubr.msk.bf16.vlgmr.msra.gmra.mxu0 %vm1616_vm11, %v9066_v19  ;;  %v1260_v9 = vadd.f32 %v9194_v58, %v9051_v38  ;;  %v1538_v11 = vsel %vm1410_vm10, %v1221_v57, %v1474_v29  ;;  %vm1383_vm14 = vcmp.gt.f32.partialorder %v1305_v2, 0.0  ;;  %v1506_v16 = vsel %vm1378_vm13, %v1217_v63, %v1442_v41 }
 0x12c   : > { %2062 = vmatpush1.bf16.msra.mxu0 %v1570_v48  ;;  %1983 = vmatprep.mubr.bf16.mxu0 %v12512_v5  ;;  %v1581_v48 = vpack.c.bf16 %v1541_v53, %v1509_v62  ;;  %v1543_v15 = vsel %vm1415_vm12, %v1309_v61, %v1479_v3  ;;  %v1476_v18 = vmul.f32 0.2, %v1264_v6  ;;  %vm1412_vm15 = vcmp.gt.f32.partialorder %v1264_v6, 0.0  ;;  %v9314_v62 = vpop.permute.xlu0 %1598 }
 0x12d   : > { %2167 = vmatprep.subr.bf16.mxu0 %v1575_v12  ;;  %7170 = vmatmul.mubr.msk.bf16.vlgmr.msra.gmra.mxu1 %vm1616_vm11, %v9066_v19  ;;  %v1348_v12 = vadd.f32 %v1347_v25, %v9051_v38  ;;  %v1481_v20 = vmul.f32 0.2, %v1352_v8  ;;  %v1511_v55 = vsel %vm1383_vm14, %v1305_v2, %v1447_v7  ;;  %v1444_v22 = vmul.f32 0.2, %v1260_v9 }
 0x12e   : > { %2115 = vmatpush1.bf16.msra.mxu1 %v1572_v14  ;;  %2036 = vmatprep.mubr.bf16.mxu1 %v12512_v5  ;;  %v1578_v14 = vpack.c.bf16 %v1538_v11, %v1506_v16  ;;  %vm1417_vm0 = vcmp.gt.f32.partialorder %v1352_v8, 0.0  ;;  %v1583_v58 = vpack.c.bf16 %v1543_v15, %v1511_v55  ;;  %vm1380_vm1 = vcmp.gt.f32.partialorder %v1260_v9, 0.0 }
 0x12f   : > { %2220 = vmatprep.subr.bf16.mxu1 %v1577_v27  ;;  %v1449_v24 = vmul.f32 0.2, %v1348_v12  ;;  %v1540_v27 = vsel %vm1412_vm15, %v1264_v6, %v1476_v18  ;;  %vm1385_vm2 = vcmp.gt.f32.partialorder %v1348_v12, 0.0  ;;  %v1545_v28 = vsel %vm1417_vm0, %v1352_v8, %v1481_v20 }
 0x130   : > { %v1508_v21 = vsel %vm1380_vm1, %v1260_v9, %v1444_v22  ;;  %v1307_v30 = vadd.f32 %v9230_v34, %v9053_v43  ;;  %v1303_v23 = vadd.f32 %v9213_v26, %v9051_v38  ;;  %v1350_v35 = vadd.f32 %v9240_v54, %v9053_v43  ;;  %v9305_v34 = vpop.permute.xlu1 %1588 }
 0x131   : > { %v1580_v31 = vpack.c.bf16 %v1540_v27, %v1508_v21  ;;  %v1513_v60 = vsel %vm1385_vm2, %v1348_v12, %v1449_v24  ;;  %v1346_v26 = vadd.f32 %v9227_v37, %v9051_v38 }
 0x132   : > { %v1585_v32 = vpack.c.bf16 %v1545_v28, %v1513_v60  ;;  %v1478_v10 = vmul.f32 0.2, %v1307_v30  ;;  %vm1414_vm3 = vcmp.gt.f32.partialorder %v1307_v30, 0.0  ;;  %v1446_v33 = vmul.f32 0.2, %v1303_v23 }
 0x133   : > { %7169 = vmatmul.mubr.msk.bf16.gmra.mxu0 %vm1616_vm11, %v9087_v44  ;;  %vm1382_vm4 = vcmp.gt.f32.partialorder %v1303_v23, 0.0  ;;  %v1480_v40 = vmul.f32 0.2, %v1350_v35  ;;  %vm1416_vm5 = vcmp.gt.f32.partialorder %v1350_v35, 0.0  ;;  %v1448_v45 = vmul.f32 0.2, %v1346_v26 }
 0x134   : > { %2079 = vmatprep.mubr.bf16.mxu0 %v12512_v5  ;;  %v1542_v36 = vsel %vm1414_vm3, %v1307_v30, %v1478_v10  ;;  %v1510_v39 = vsel %vm1382_vm4, %v1303_v23, %v1446_v33  ;;  %vm1384_vm6 = vcmp.gt.f32.partialorder %v1346_v26, 0.0  ;;  %v9309_v47 = vpop.permute.xlu1 %1593 }
 0x135   : > { %7171 = vmatmul.mubr.msk.bf16.gmra.mxu1 %vm1616_vm11, %v9087_v44  ;;  %v1582_v42 = vpack.c.bf16 %v1542_v36, %v1510_v39  ;;  %v1544_v43 = vsel %vm1416_vm5, %v1350_v35, %v1480_v40  ;;  %v1512_v38 = vsel %vm1384_vm6, %v1346_v26, %v1448_v45 }
 0x136   : > { %2132 = vmatprep.mubr.bf16.mxu1 %v12512_v5  ;;  %v1584_v37 = vpack.c.bf16 %v1544_v43, %v1512_v38 }
 0x13b   : > { %7172 = vmatmul.mubr.msk.bf16.vlgmr.msra.gmra.mxu0 %vm1616_vm11, %v9066_v19 }
 0x13c   : > { %2168 = vmatpush1.bf16.msra.mxu0 %v1574_v13  ;;  %2089 = vmatprep.mubr.bf16.mxu0 %v12512_v5 }
 0x13d   : > { %2273 = vmatprep.subr.bf16.mxu0 %v1579_v49  ;;  %7174 = vmatmul.mubr.msk.bf16.vlgmr.msra.gmra.mxu1 %vm1616_vm11, %v9066_v19 }
 0x13e   : > { %2221 = vmatpush1.bf16.msra.mxu1 %v1576_v59  ;;  %2142 = vmatprep.mubr.bf16.mxu1 %v12512_v5 }
 0x13f   : > { %2326 = vmatprep.subr.bf16.mxu1 %v1581_v48 }
 0x143   : > { %7173 = vmatmul.mubr.msk.bf16.gmra.mxu0 %vm1616_vm11, %v9087_v44 }
 0x144   : > { %2185 = vmatprep.mubr.bf16.mxu0 %v12512_v5 }
 0x145   : > { %7175 = vmatmul.mubr.msk.bf16.gmra.mxu1 %vm1616_vm11, %v9087_v44 }
 0x146   : > { %2238 = vmatprep.mubr.bf16.mxu1 %v12512_v5 }
 0x14b   : > { %7176 = vmatmul.mubr.msk.bf16.vlgmr.msra.gmra.mxu0 %vm1616_vm11, %v9066_v19 }
 0x14c   : > { %2274 = vmatpush1.bf16.msra.mxu0 %v1578_v14  ;;  %2195 = vmatprep.mubr.bf16.mxu0 %v12512_v5  ;;  %v9320_v14 = vpop.permute.xlu1 %1603 }
 0x14d   : > { %2379 = vmatprep.subr.bf16.mxu0 %v1583_v58  ;;  %7178 = vmatmul.mubr.msk.bf16.vlgmr.msra.gmra.mxu1 %vm1616_vm11, %v9066_v19 }
 0x14e   : > { %2327 = vmatpush1.bf16.msra.mxu1 %v1580_v31  ;;  %2248 = vmatprep.mubr.bf16.mxu1 %v12512_v5 }
 0x14f   : > { %2432 = vmatprep.subr.bf16.mxu1 %v1585_v32 }
 0x153   : > { %7177 = vmatmul.mubr.msk.bf16.gmra.mxu0 %vm1616_vm11, %v9087_v44 }
 0x154   : > { %2291 = vmatprep.mubr.bf16.mxu0 %v12512_v5 }
 0x155   : > { %7179 = vmatmul.mubr.msk.bf16.gmra.mxu1 %vm1616_vm11, %v9087_v44 }
 0x156   : > { %2344 = vmatprep.mubr.bf16.mxu1 %v12512_v5 }
 0x15b   : > { %7180 = vmatmul.mubr.msk.bf16.vlgmr.msra.gmra.mxu0 %vm1616_vm11, %v9066_v19 }
 0x15c   : > { %2380 = vmatpush1.bf16.msra.mxu0 %v1582_v42  ;;  %2301 = vmatprep.mubr.bf16.mxu0 %v12512_v5 }
 0x15d   : > { %7182 = vmatmul.mubr.msk.bf16.vlgmr.msra.gmra.mxu1 %vm1616_vm11, %v9066_v19 }
 0x15e   : > { %2433 = vmatpush1.bf16.msra.mxu1 %v1584_v37  ;;  %2354 = vmatprep.mubr.bf16.mxu1 %v12512_v5 }
 0x163   : > { %7181 = vmatmul.mubr.msk.bf16.gmra.mxu0 %vm1616_vm11, %v9087_v44 }
 0x164   : > { %2397 = vmatprep.mubr.bf16.mxu0 %v12512_v5 }
 0x165   : > { %7183 = vmatmul.mubr.msk.bf16.gmra.mxu1 %vm1616_vm11, %v9087_v44 }
 0x166   : > { %2450 = vmatprep.mubr.bf16.mxu1 %v12512_v5 }
 0x16b   : > { %7184 = vmatmul.mubr.msk.bf16.vlgmr.msra.gmra.mxu0 %vm1616_vm11, %v9066_v19 }
 0x16c   : > { %2407 = vmatprep.mubr.bf16.mxu0 %v12512_v5 }
 0x16d   : > { %7186 = vmatmul.mubr.msk.bf16.vlgmr.msra.gmra.mxu1 %vm1616_vm11, %v9066_v19 }
 0x16e   : > { %2460 = vmatprep.mubr.bf16.mxu1 %v12512_v5 }
 0x173   : > { %7185 = vmatmul.mubr.msk.bf16.gmra.mxu0 %vm1616_vm11, %v9087_v44 }
 0x174   : > { %6847 = vmatprep.mubr.bf16.mxu0 %v12512_v5 }
 0x175   : > { %7187 = vmatmul.mubr.msk.bf16.gmra.mxu1 %vm1616_vm11, %v9087_v44 }
 0x176   : > { %6950 = vmatprep.mubr.bf16.mxu1 %v12512_v5 }
 0x1bb   : > { %v1657_v13 = vpop.f32.mrf.mxu0 }
 0x1bc   : > { %v1658_v46 = vadd.f32 %v1657_v13, %v9305_v34 }
 0x1bd   : > { %v1659_v17 = vpop.f32.mrf.mxu0  ;;  %v1710_v44 = vpop.f32.mrf.mxu1 }
 0x1be   : > { %v1660_v19 = vadd.f32 %v1659_v17, %v9305_v34  ;;  %v2599_v49 = vmul.f32 0.2, %v1658_v46  ;;  %vm2471_vm8 = vcmp.gt.f32.partialorder %v1658_v46, 0.0  ;;  %v1711_v53 = vadd.f32 %v1710_v44, %v9305_v34 }
 0x1bf   : > { %v1661_v25 = vpop.f32.mrf.mxu0  ;;  %v1712_v54 = vpop.f32.mrf.mxu1 }
 0x1c0   : > { %vm2472_vm7 = vcmp.gt.f32.partialorder %v1660_v19, 0.0  ;;  %v2600_v50 = vmul.f32 0.2, %v1660_v19  ;;  %v1662_v51 = vadd.f32 %v1661_v25, %v9309_v47  ;;  %v1713_v63 = vadd.f32 %v1712_v54, %v9305_v34 }
 0x1c1   : > { %v1663_v52 = vpop.f32.mrf.mxu0  ;;  %v2727_v48 = vsel %vm2471_vm8, %v1658_v46, %v2599_v49  ;;  %v1714_v29 = vpop.f32.mrf.mxu1  ;;  %vm2473_vm10 = vcmp.gt.f32.partialorder %v1711_v53, 0.0  ;;  %v2601_v6 = vmul.f32 0.2, %v1711_v53 }
 0x1c2   : > { %v1664_v56 = vadd.f32 %v1663_v52, %v9309_v47  ;;  %v2631_v57 = vmul.f32 0.2, %v1662_v51  ;;  %v2728_v61 = vsel %vm2472_vm7, %v1660_v19, %v2600_v50  ;;  %vm2503_vm11 = vcmp.gt.f32.partialorder %v1662_v51, 0.0 }
 0x1c3   : > { %v1667_v59 = vpop.f32.mrf.mxu0  ;;  %v7246_v41 = vpack.i.bf16 %v2728_v61, %v2727_v48  ;;  %v1715_v7 = vadd.f32 %v1714_v29, %v9309_v47  ;;  %v2602_v11 = vmul.f32 0.2, %v1713_v63  ;;  %v1716_v16 = vpop.f32.mrf.mxu1  ;;  %vm2474_vm12 = vcmp.gt.f32.partialorder %v1713_v63, 0.0 }
 0x1c4   : > { %vm2504_vm9 = vcmp.gt.f32.partialorder %v1664_v56, 0.0  ;;  %v2632_v2 = vmul.f32 0.2, %v1664_v56  ;;  %v1668_v0 = vadd.f32 %v1667_v59, %v9314_v62  ;;  %v2759_v9 = vsel %vm2503_vm11, %v1662_v51, %v2631_v57 }
 0x1c5   : > { %v1669_v3 = vpop.f32.mrf.mxu0  ;;  %7247 = vxpose.xlu0.b32.start [1/4] (short) %v7246_v41, 128  ;;  %v1717_v55 = vadd.f32 %v1716_v16, %v9309_v47  ;;  %v2633_v22 = vmul.f32 0.2, %v1715_v7  ;;  %v1720_v24 = vpop.f32.mrf.mxu1  ;;  %vm2505_vm15 = vcmp.gt.f32.partialorder %v1715_v7, 0.0  ;;  %v2730_v32 = vsel %vm2474_vm12, %v1713_v63, %v2602_v11 }
 0x1c6   : > { %v1670_v8 = vadd.f32 %v1669_v3, %v9314_v62  ;;  %v2760_v12 = vsel %vm2504_vm9, %v1664_v56, %v2632_v2  ;;  %v2663_v15 = vmul.f32 0.2, %v1668_v0  ;;  %vm2535_vm13 = vcmp.gt.f32.partialorder %v1668_v0, 0.0 }
 0x1c7   : > { %v1671_v18 = vpop.f32.mrf.mxu0  ;;  %v7248_v20 = vpack.i.bf16 %v2760_v12, %v2759_v9  ;;  %vm2506_vm0 = vcmp.gt.f32.partialorder %v1717_v55, 0.0  ;;  %v2634_v21 = vmul.f32 0.2, %v1717_v55  ;;  %v1721_v30 = vadd.f32 %v1720_v24, %v9314_v62  ;;  %v1722_v23 = vpop.f32.mrf.mxu1 }
 0x1c8   : > { %vm2536_vm14 = vcmp.gt.f32.partialorder %v1670_v8, 0.0  ;;  %v2664_v58 = vmul.f32 0.2, %v1670_v8  ;;  %v1672_v27 = vadd.f32 %v1671_v18, %v9320_v14  ;;  %v2791_v31 = vsel %vm2535_vm13, %v1668_v0, %v2663_v15 }
 0x1c9   : > { %v1673_v28 = vpop.f32.mrf.mxu0  ;;  %7249 = vxpose.xlu0.b32.cont [2/4] (short) %v7248_v20, 128  ;;  %v2762_v33 = vsel %vm2506_vm0, %v1717_v55, %v2634_v21  ;;  %v2729_v26 = vsel %vm2473_vm10, %v1711_v53, %v2601_v6  ;;  %v2761_v36 = vsel %vm2505_vm15, %v1715_v7, %v2633_v22  ;;  %v1723_v40 = vadd.f32 %v1722_v23, %v9314_v62  ;;  %v1724_v45 = vpop.f32.mrf.mxu1 }
 0x1ca   : > { %v2792_v60 = vsel %vm2536_vm14, %v1670_v8, %v2664_v58  ;;  %v2695_v39 = vmul.f32 0.2, %v1672_v27  ;;  %v7334_v42 = vpack.i.bf16 %v2730_v32, %v2729_v26  ;;  %v2665_v38 = vmul.f32 0.2, %v1721_v30 }
 0x1cb   : > { %v1763_v10 = vpop.f32.mrf.mxu0  ;;  %v7250_v35 = vpack.i.bf16 %v2792_v60, %v2791_v31  ;;  %vm2567_vm1 = vcmp.gt.f32.partialorder %v1672_v27, 0.0  ;;  %v1674_v37 = vadd.f32 %v1673_v28, %v9320_v14  ;;  %v1725_v13 = vadd.f32 %v1724_v45, %v9320_v14  ;;  %v1726_v19 = vpop.f32.mrf.mxu1 }
 0x1cc   : > { %v7336_v46 = vpack.i.bf16 %v2762_v33, %v2761_v36  ;;  %vm2537_vm2 = vcmp.gt.f32.partialorder %v1721_v30, 0.0  ;;  %vm2538_vm3 = vcmp.gt.f32.partialorder %v1723_v40, 0.0  ;;  %v2666_v17 = vmul.f32 0.2, %v1723_v40  ;;  %7335 = vxpose.xlu1.b32.start [1/4] (short) %v7334_v42, 128 }
 0x1cd   : > { %v1765_v43 = vpop.f32.mrf.mxu0  ;;  %7251 = vxpose.xlu0.b32.cont [3/4] (short) %v7250_v35, 128  ;;  %vm2568_vm4 = vcmp.gt.f32.partialorder %v1674_v37, 0.0  ;;  %v2696_v49 = vmul.f32 0.2, %v1674_v37  ;;  %v2823_v50 = vsel %vm2567_vm1, %v1672_v27, %v2695_v39  ;;  %v1727_v44 = vadd.f32 %v1726_v19, %v9320_v14  ;;  %v1816_v52 = vpop.f32.mrf.mxu1 }
 0x1ce   : > { %v2794_v51 = vsel %vm2538_vm3, %v1723_v40, %v2666_v17  ;;  %v2793_v56 = vsel %vm2537_vm2, %v1721_v30, %v2665_v38  ;;  %vm2569_vm5 = vcmp.gt.f32.partialorder %v1725_v13, 0.0  ;;  %v2697_v54 = vmul.f32 0.2, %v1725_v13 }
 0x1cf   : > { %v1767_v25 = vpop.f32.mrf.mxu0  ;;  %v2824_v57 = vsel %vm2568_vm4, %v1674_v37, %v2696_v49  ;;  %v7338_v59 = vpack.i.bf16 %v2794_v51, %v2793_v56  ;;  %vm2570_vm6 = vcmp.gt.f32.partialorder %v1727_v44, 0.0  ;;  %v2698_v63 = vmul.f32 0.2, %v1727_v44  ;;  %v1818_v48 = vpop.f32.mrf.mxu1 }
 0x1d0   : > { %v7252_v61 = vpack.i.bf16 %v2824_v57, %v2823_v50  ;;  %7337 = vxpose.xlu1.b32.cont [2/4] (short) %v7336_v46, 128  ;;  %v1764_v0 = vadd.f32 %v1763_v10, %v9305_v34  ;;  %v2825_v6 = vsel %vm2569_vm5, %v1725_v13, %v2697_v54  ;;  %v1766_v7 = vadd.f32 %v1765_v43, %v9305_v34 }
 0x1d1   : > { %v1769_v53 = vpop.f32.mrf.mxu0  ;;  %v2826_v29 = vsel %vm2570_vm6, %v1727_v44, %v2698_v63  ;;  %v1820_v3 = vpop.f32.mrf.mxu1  ;;  %v9334_v15 = vadd.f32 %v1816_v52, %v9305_v34  ;;  %v1768_v55 = vadd.f32 %v1767_v25, %v9309_v47  ;;  %v9345_v31 = vadd.f32 %v1818_v48, %v9305_v34 }
 0x1d2   : > { %7253 = vxpose.xlu0.b32.end [4/4] (short) %v7252_v61, 128  ;;  %v7340_v8 = vpack.i.bf16 %v2826_v29, %v2825_v6  ;;  %v2603_v12 = vmul.f32 0.2, %v1764_v0  ;;  %vm2475_vm7 = vcmp.gt.f32.partialorder %v1764_v0, 0.0  ;;  %v2604_v20 = vmul.f32 0.2, %v1766_v7 }
 0x1d3   : > { %v1773_v2 = vpop.f32.mrf.mxu0  ;;  %v1822_v9 = vpop.f32.mrf.mxu1  ;;  %v1770_v22 = vadd.f32 %v1769_v53, %v9309_v47  ;;  %vm2476_vm8 = vcmp.gt.f32.partialorder %v1766_v7, 0.0  ;;  %v9342_v30 = vmul.f32 0.2, %v9334_v15  ;;  %v1821_v60 = vadd.f32 %v1820_v3, %v9309_v47 }
 0x1d4   : > { %7339 = vxpose.xlu1.b32.cont [3/4] (short) %v7338_v59, 128  ;;  %v1774_v58 = vadd.f32 %v1773_v2, %v9314_v62  ;;  %v1823_v24 = vadd.f32 %v1822_v9, %v9309_v47  ;;  %v9349_v10 = vsel %vm2475_vm7, %v1764_v0, %v2603_v12  ;;  %vm2507_vm11 = vcmp.gt.f32.partialorder %v1768_v55, 0.0 }
 0x1d5   : > { %v1775_v41 = vpop.f32.mrf.mxu0  ;;  %v1826_v16 = vpop.f32.mrf.mxu1  ;;  %v2635_v33 = vmul.f32 0.2, %v1768_v55  ;;  %v2636_v35 = vmul.f32 0.2, %v1770_v22  ;;  %v9352_v26 = vsel %vm2476_vm8, %v1766_v7, %v2604_v20  ;;  %vm2508_vm9 = vcmp.gt.f32.partialorder %v1770_v22, 0.0 }
 0x1d6   : > { %v1776_v21 = vadd.f32 %v1775_v41, %v9314_v62  ;;  %v2667_v36 = vmul.f32 0.2, %v1774_v58  ;;  %v2638_v39 = vmul.f32 0.2, %v1823_v24  ;;  %vm2539_vm10 = vcmp.gt.f32.partialorder %v1774_v58, 0.0 }
 0x1d7   : > { %v1777_v11 = vpop.f32.mrf.mxu0  ;;  %v1828_v27 = vpop.f32.mrf.mxu1  ;;  %vm2510_vm12 = vcmp.gt.f32.partialorder %v1823_v24, 0.0  ;;  %v9357_v37 = vmul.f32 0.2, %v9345_v31  ;;  %v2637_v13 = vmul.f32 0.2, %v1821_v60  ;;  %v9361_v25 = vsel %vm2507_vm11, %v1768_v55, %v2635_v33 }
 0x1d8   : > { %7341 = vxpose.xlu1.b32.end [4/4] (short) %v7340_v8, 128  ;;  %v1778_v40 = vadd.f32 %v1777_v11, %v9320_v14  ;;  %v2668_v43 = vmul.f32 0.2, %v1776_v21  ;;  %v1829_v38 = vadd.f32 %v1828_v27, %v9314_v62  ;;  %vm2540_vm13 = vcmp.gt.f32.partialorder %v1776_v21, 0.0 }
 0x1d9   : > { %v1779_v18 = vpop.f32.mrf.mxu0  ;;  %v1830_v23 = vpop.f32.mrf.mxu1  ;;  %v9364_v49 = vsel %vm2508_vm9, %v1770_v22, %v2636_v35  ;;  %vm2509_vm14 = vcmp.gt.f32.partialorder %v1821_v60, 0.0  ;;  %v1827_v50 = vadd.f32 %v1826_v16, %v9314_v62  ;;  %v9367_v51 = vsel %vm2539_vm10, %v1774_v58, %v2667_v36 }
 0x1da   : > { %v1780_v46 = vadd.f32 %v1779_v18, %v9320_v14  ;;  %v9369_v44 = vsel %vm2510_vm12, %v1823_v24, %v2638_v39  ;;  %vm2571_vm15 = vcmp.gt.f32.partialorder %v1778_v40, 0.0  ;;  %v2699_v52 = vmul.f32 0.2, %v1778_v40 }
 0x1db   : > { %v1869_v28 = vpop.f32.mrf.mxu0  ;;  %v1832_v42 = vpop.f32.mrf.mxu1  ;;  %v9371_v57 = vsel %vm2540_vm13, %v1776_v21, %v2668_v43  ;;  %v2670_v54 = vmul.f32 0.2, %v1829_v38  ;;  %v9377_v48 = vsel %vm2509_vm14, %v1821_v60, %v2637_v13  ;;  %vm2542_vm0 = vcmp.gt.f32.partialorder %v1829_v38, 0.0 }
 0x1dc   : > { %v1833_v59 = vadd.f32 %v1832_v42, %v9320_v14  ;;  %v2700_v2 = vmul.f32 0.2, %v1780_v46  ;;  %v2669_v3 = vmul.f32 0.2, %v1827_v50  ;;  %vm2572_vm1 = vcmp.gt.f32.partialorder %v1780_v46, 0.0 }
 0x1dd   : > { %v1871_v32 = vpop.f32.mrf.mxu0  ;;  %v1922_v17 = vpop.f32.mrf.mxu1  ;;  %v1831_v41 = vadd.f32 %v1830_v23, %v9320_v14  ;;  %v1870_v6 = vadd.f32 %v1869_v28, %v9305_v34  ;;  %vm2541_vm2 = vcmp.gt.f32.partialorder %v1827_v50, 0.0  ;;  %v9386_v9 = vsel %vm2571_vm15, %v1778_v40, %v2699_v52 }
 0x1de   : > { %v1872_v61 = vadd.f32 %v1871_v32, %v9305_v34  ;;  %v9390_v16 = vsel %vm2542_vm0, %v1829_v38, %v2670_v54  ;;  %v2702_v18 = vmul.f32 0.2, %v1833_v59  ;;  %v9393_v22 = vsel %vm2572_vm1, %v1780_v46, %v2700_v2 }
 0x1df   : > { %v1873_v45 = vpop.f32.mrf.mxu0  ;;  %v1924_v53 = vpop.f32.mrf.mxu1  ;;  %vm2574_vm3 = vcmp.gt.f32.partialorder %v1833_v59, 0.0  ;;  %v9396_v28 = vsel %vm2541_vm2, %v1827_v50, %v2669_v3  ;;  %v2701_v21 = vmul.f32 0.2, %v1831_v41  ;;  %v2607_v60 = vmul.f32 0.2, %v1870_v6 }
 0x1e0   : > { %v2608_v20 = vmul.f32 0.2, %v1872_v61  ;;  %v1925_v55 = vadd.f32 %v1924_v53, %v9305_v34  ;;  %vm2480_vm4 = vcmp.gt.f32.partialorder %v1872_v61, 0.0  ;;  %v1923_v23 = vadd.f32 %v1922_v17, %v9305_v34 }
 0x1e1   : > { %v1875_v19 = vpop.f32.mrf.mxu0  ;;  %v1926_v29 = vpop.f32.mrf.mxu1  ;;  %vm2573_vm5 = vcmp.gt.f32.partialorder %v1831_v41, 0.0  ;;  %vm2479_vm6 = vcmp.gt.f32.partialorder %v1870_v6, 0.0  ;;  %v1874_v33 = vadd.f32 %v1873_v45, %v9309_v47  ;;  %v9407_v40 = vsel %vm2574_vm3, %v1833_v59, %v2702_v18 }
 0x1e2   : > { %v1876_v58 = vadd.f32 %v1875_v19, %v9309_v47  ;;  %v9410_v42 = vsel %vm2480_vm4, %v1872_v61, %v2608_v20  ;;  %v2610_v43 = vmul.f32 0.2, %v1925_v55  ;;  %vm2482_vm7 = vcmp.gt.f32.partialorder %v1925_v55, 0.0 }
 0x1e3   : > { %v1879_v56 = vpop.f32.mrf.mxu0  ;;  %v1928_v11 = vpop.f32.mrf.mxu1  ;;  %v9414_v19 = vsel %vm2573_vm5, %v1831_v41, %v2701_v21  ;;  %v9416_v50 = vsel %vm2479_vm6, %v1870_v6, %v2607_v60  ;;  %v2609_v52 = vmul.f32 0.2, %v1923_v23  ;;  %vm2481_vm11 = vcmp.gt.f32.partialorder %v1923_v23, 0.0 }
 0x1e4   : > { %v2640_v38 = vmul.f32 0.2, %v1876_v58  ;;  %v1929_v13 = vadd.f32 %v1928_v11, %v9309_v47  ;;  %vm2512_vm8 = vcmp.gt.f32.partialorder %v1876_v58, 0.0  ;;  %v2639_v53 = vmul.f32 0.2, %v1874_v33 }
 0x1e5   : > { %v1881_v0 = vpop.f32.mrf.mxu0  ;;  %v1932_v24 = vpop.f32.mrf.mxu1  ;;  %v1927_v54 = vadd.f32 %v1926_v29, %v9309_v47  ;;  %v1880_v59 = vadd.f32 %v1879_v56, %v9314_v62  ;;  %vm2511_vm9 = vcmp.gt.f32.partialorder %v1874_v33, 0.0  ;;  %v9427_v41 = vsel %vm2482_vm7, %v1925_v55, %v2610_v43 }
 0x1e6   : > { %v1882_v46 = vadd.f32 %v1881_v0, %v9314_v62  ;;  %v9429_v6 = vsel %vm2512_vm8, %v1876_v58, %v2640_v38  ;;  %v2642_v11 = vmul.f32 0.2, %v1929_v13  ;;  %v1933_v29 = vadd.f32 %v1932_v24, %v9314_v62 }
 0x1e7   : > { %v9388_v12 = vpop.f32.mrf.mxu0  ;;  %v1934_v35 = vpop.f32.mrf.mxu1  ;;  %v9433_v21 = vsel %vm2481_vm11, %v1923_v23, %v2609_v52  ;;  %vm2514_vm10 = vcmp.gt.f32.partialorder %v1929_v13, 0.0  ;;  %v9436_v1 = vsel %vm2511_vm9, %v1874_v33, %v2639_v53  ;;  %v2641_v5 = vmul.f32 0.2, %v1927_v54 }
 0x1e8   : > { %v2672_v18 = vmul.f32 0.2, %v1882_v46  ;;  %12662 = vst [vmem:[#allocation7_spill] sm:$0xff] %v9433_v21  ;;  %vm2544_vm12 = vcmp.gt.f32.partialorder %v1882_v46, 0.0  ;;  %v1935_v60 = vadd.f32 %v1934_v35, %v9314_v62  ;;  %v2671_v55 = vmul.f32 0.2, %v1880_v59 }
 0x1e9   : > { %v1885_v27 = vpop.f32.mrf.mxu0  ;;  %v1936_v45 = vpop.f32.mrf.mxu1  ;;  %vm2513_vm13 = vcmp.gt.f32.partialorder %v1927_v54, 0.0  ;;  %vm2543_vm14 = vcmp.gt.f32.partialorder %v1880_v59, 0.0  ;;  %v9445_v52 = vsel %vm2514_vm10, %v1929_v13, %v2642_v11  ;;  %v2673_v33 = vmul.f32 0.2, %v1933_v29 }
 0x1ea   : > { %v1886_v58 = vadd.f32 %v1885_v27, %v9320_v14  ;;  %12663 = vst [vmem:[#allocation8_spill] sm:$0xff] %v9445_v52  ;;  %v9447_v35 = vsel %vm2544_vm12, %v1882_v46, %v2672_v18  ;;  %v1884_v53 = vadd.f32 %v9388_v12, %v9320_v14  ;;  %vm2545_vm15 = vcmp.gt.f32.partialorder %v1933_v29, 0.0 }
 0x1eb   : > { %v9402_v36 = vpop.f32.mrf.mxu0  ;;  %v1938_v61 = vpop.f32.mrf.mxu1  ;;  %12664 = vst [vmem:[#allocation9_spill] sm:$0xff] %v9447_v35  ;;  %v2674_v0 = vmul.f32 0.2, %v1935_v60  ;;  %v9453_v39 = vsel %vm2513_vm13, %v1927_v54, %v2641_v5  ;;  %v9455_v23 = vsel %vm2543_vm14, %v1880_v59, %v2671_v55  ;;  %vm2546_vm0 = vcmp.gt.f32.partialorder %v1935_v60, 0.0 }
 0x1ec   : > { %v1939_v32 = vadd.f32 %v1938_v61, %v9320_v14  ;;  %12665 = vst [vmem:[#allocation10_spill] sm:$0xff] %v9453_v39  ;;  %12666 = vst [vmem:[#allocation11_spill] sm:$0xff] %v9455_v23  ;;  %v2704_v13 = vmul.f32 0.2, %v1886_v58  ;;  %vm2576_vm1 = vcmp.gt.f32.partialorder %v1886_v58, 0.0  ;;  %v1937_v18 = vadd.f32 %v1936_v45, %v9320_v14 }
 0x1ed   : > { %v1977_v17 = vpop.f32.mrf.mxu0  ;;  %v2028_v56 = vpop.f32.mrf.mxu1  ;;  %v1976_v61 = vadd.f32 %v9402_v36, %v9305_v34  ;;  %vm2575_vm2 = vcmp.gt.f32.partialorder %v1884_v53, 0.0  ;;  %v2703_v54 = vmul.f32 0.2, %v1884_v53  ;;  %v9470_v7 = vsel %vm2546_vm0, %v1935_v60, %v2674_v0 }
 0x1ee   : > { %v1978_v24 = vadd.f32 %v1977_v17, %v9305_v34  ;;  %v9466_v17 = vsel %vm2545_vm15, %v1933_v29, %v2673_v33  ;;  %12668 = vst [vmem:[#allocation13_spill] sm:$0xff] %v9470_v7  ;;  %v2706_v8 = vmul.f32 0.2, %v1939_v32  ;;  %v2029_v63 = vadd.f32 %v2028_v56, %v9305_v34 }
 0x1ef   : > { %v9420_v2 = vpop.f32.mrf.mxu0  ;;  %v2030_v43 = vpop.f32.mrf.mxu1  ;;  %12667 = vst [vmem:[#allocation12_spill] sm:$0xff] %v9466_v17  ;;  %v9473_v45 = vsel %vm2576_vm1, %v1886_v58, %v2704_v13  ;;  %vm2578_vm3 = vcmp.gt.f32.partialorder %v1939_v32, 0.0  ;;  %vm2577_vm5 = vcmp.gt.f32.partialorder %v1937_v18, 0.0  ;;  %v2705_v33 = vmul.f32 0.2, %v1937_v18 }
 0x1f0   : > { %v2612_v12 = vmul.f32 0.2, %v1978_v24  ;;  %12669 = vst [vmem:[#allocation14_spill] sm:$0xff] %v9473_v45  ;;  %vm2484_vm4 = vcmp.gt.f32.partialorder %v1978_v24, 0.0  ;;  %v2031_v36 = vadd.f32 %v2030_v43, %v9305_v34  ;;  %v2611_v4 = vmul.f32 0.2, %v1976_v61 }
 0x1f1   : > { %v1981_v20 = vpop.f32.mrf.mxu0  ;;  %v2032_v27 = vpop.f32.mrf.mxu1  ;;  %v9480_v0 = vsel %vm2575_vm2, %v1884_v53, %v2703_v54  ;;  %vm2483_vm6 = vcmp.gt.f32.partialorder %v1976_v61, 0.0  ;;  %v1980_v60 = vadd.f32 %v9420_v2, %v9309_v47  ;;  %v9491_v52 = vsel %vm2578_vm3, %v1939_v32, %v2706_v8 }
 0x1f2   : > { %v1982_v39 = vadd.f32 %v1981_v20, %v9309_v47  ;;  %12670 = vst [vmem:[#allocation15_spill] sm:$0xff] %v9480_v0  ;;  %v9494_v20 = vsel %vm2484_vm4, %v1978_v24, %v2612_v12  ;;  %v2613_v53 = vmul.f32 0.2, %v2029_v63  ;;  %vm2485_vm7 = vcmp.gt.f32.partialorder %v2029_v63, 0.0 }
 0x1f3   : > { %v9439_v38 = vpop.f32.mrf.mxu0  ;;  %v2034_v46 = vpop.f32.mrf.mxu1  ;;  %12671 = vst [vmem:[#allocation16_spill] sm:$0xff] %v9494_v20  ;;  %v2614_v54 = vmul.f32 0.2, %v2031_v36  ;;  %v9501_v23 = vsel %vm2577_vm5, %v1937_v18, %v2705_v33  ;;  %v9503_v13 = vsel %vm2483_vm6, %v1976_v61, %v2611_v4  ;;  %vm2486_vm8 = vcmp.gt.f32.partialorder %v2031_v36, 0.0 }
 0x1f4   : > { %v2035_v56 = vadd.f32 %v2034_v46, %v9309_v47  ;;  %12672 = vst [vmem:[#allocation17_spill] sm:$0xff] %v9501_v23  ;;  %12673 = vst [vmem:[#allocation18_spill] sm:$0xff] %v9503_v13  ;;  %v2644_v8 = vmul.f32 0.2, %v1982_v39  ;;  %v2643_v32 = vmul.f32 0.2, %v1980_v60  ;;  %v2033_v24 = vadd.f32 %v2032_v27, %v9309_v47 }
 0x1f5   : > { %v1987_v3 = vpop.f32.mrf.mxu0  ;;  %v2038_v59 = vpop.f32.mrf.mxu1  ;;  %vm2516_vm11 = vcmp.gt.f32.partialorder %v1982_v39, 0.0  ;;  %v1986_v12 = vadd.f32 %v9439_v38, %v9314_v62  ;;  %v9515_v4 = vsel %vm2485_vm7, %v2029_v63, %v2613_v53  ;;  %vm2515_vm9 = vcmp.gt.f32.partialorder %v1980_v60, 0.0 }
 0x1f6   : > { %v1988_v17 = vadd.f32 %v1987_v3, %v9314_v62  ;;  %12674 = vst [vmem:[#allocation19_spill] sm:$0xff] %v9515_v4  ;;  %v9517_v61 = vsel %vm2486_vm8, %v2031_v36, %v2614_v54  ;;  %v2646_v33 = vmul.f32 0.2, %v2035_v56  ;;  %v9522_v21 = vsel %vm2516_vm11, %v1982_v39, %v2644_v8 }
 0x1f7   : > { %v9457_v11 = vpop.f32.mrf.mxu0  ;;  %v2040_v5 = vpop.f32.mrf.mxu1  ;;  %12675 = vst [vmem:[#allocation20_spill] sm:$0xff] %v9517_v61  ;;  %vm2518_vm10 = vcmp.gt.f32.partialorder %v2035_v56, 0.0  ;;  %v2039_v3 = vadd.f32 %v2038_v59, %v9314_v62  ;;  %v9525_v18 = vsel %vm2515_vm9, %v1980_v60, %v2643_v32  ;;  %v2645_v63 = vmul.f32 0.2, %v2033_v24 }
 0x1f8   : > { %v2676_v27 = vmul.f32 0.2, %v1988_v17  ;;  %v2041_v45 = vadd.f32 %v2040_v5, %v9314_v62  ;;  %vm2548_vm12 = vcmp.gt.f32.partialorder %v1988_v17, 0.0  ;;  %12676 = vst [vmem:[#allocation21_spill] sm:$0xff] %v9525_v18  ;;  %v2675_v53 = vmul.f32 0.2, %v1986_v12 }
 0x1f9   : > { %v9468_v55 = vpop.f32.mrf.mxu0  ;;  %v2042_v58 = vpop.f32.mrf.mxu1  ;;  %v1990_v36 = vadd.f32 %v9457_v11, %v9320_v14  ;;  %vm2477_vm13 = vcmp.gt.f32.partialorder %v9334_v15, 0.0  ;;  %vm2478_vm14 = vcmp.gt.f32.partialorder %v9345_v31, 0.0  ;;  %vm2517_vm15 = vcmp.gt.f32.partialorder %v2033_v24, 0.0 }
 0x1fa   : > { %vm2547_vm0 = vcmp.gt.f32.partialorder %v1986_v12, 0.0  ;;  %v1992_v5 = vadd.f32 %v9468_v55, %v9320_v14  ;;  %v9542_v11 = vsel %vm2518_vm10, %v2035_v56, %v2646_v33  ;;  %v9545_v60 = vsel %vm2548_vm12, %v1988_v17, %v2676_v27 }
 0x1fb   : > { %v9476_v29 = vpop.f32.mrf.mxu0  ;;  %v2044_v2 = vpop.f32.mrf.mxu1  ;;  %12677 = vst [vmem:[#allocation22_spill] sm:$0xff] %v9542_v11  ;;  %12678 = vst [vmem:[#allocation23_spill] sm:$0xff] %v9545_v60  ;;  %v2678_v8 = vmul.f32 0.2, %v2041_v45  ;;  %v2677_v23 = vmul.f32 0.2, %v2039_v3  ;;  %v2043_v39 = vadd.f32 %v2042_v58, %v9320_v14  ;;  %v9551_v55 = vsel %vm2517_vm15, %v2033_v24, %v2645_v63 }
 0x1fc   : > { %vm2550_vm1 = vcmp.gt.f32.partialorder %v2041_v45, 0.0  ;;  %v2045_v4 = vadd.f32 %v2044_v2, %v9320_v14  ;;  %12679 = vst [vmem:[#allocation24_spill] sm:$0xff] %v9551_v55  ;;  %v9553_v61 = vsel %vm2547_vm0, %v1986_v12, %v2675_v53  ;;  %vm2549_vm2 = vcmp.gt.f32.partialorder %v2039_v3, 0.0 }
 0x1fd   : > { %v9486_v43 = vpop.f32.mrf.mxu0  ;;  %v2134_v46 = vpop.f32.mrf.mxu1  ;;  %12680 = vst [vmem:[#allocation25_spill] sm:$0xff] %v9553_v61  ;;  %v2707_v56 = vmul.f32 0.2, %v1990_v36  ;;  %vm2579_vm3 = vcmp.gt.f32.partialorder %v1990_v36, 0.0  ;;  %v2708_v58 = vmul.f32 0.2, %v1992_v5  ;;  %v9563_v18 = vsel %vm2550_vm1, %v2041_v45, %v2678_v8 }
 0x1fe   : > { %12681 = vst [vmem:[#allocation26_spill] sm:$0xff] %v9563_v18  ;;  %vm2580_vm4 = vcmp.gt.f32.partialorder %v1992_v5, 0.0  ;;  %v2082_v2 = vadd.f32 %v9476_v29, %v9305_v34  ;;  %v2084_v24 = vadd.f32 %v9486_v43, %v9305_v34  ;;  %v9571_v53 = vsel %vm2549_vm2, %v2039_v3, %v2677_v23 }
 0x1ff   : > { %v9498_v7 = vpop.f32.mrf.mxu0  ;;  %v2136_v38 = vpop.f32.mrf.mxu1  ;;  %12682 = vst [vmem:[#allocation27_spill] sm:$0xff] %v9571_v53  ;;  %vm2581_vm5 = vcmp.gt.f32.partialorder %v2043_v39, 0.0  ;;  %v2710_v27 = vmul.f32 0.2, %v2045_v4  ;;  %v2135_v59 = vadd.f32 %v2134_v46, %v9305_v34  ;;  %v9574_v55 = vsel %vm2579_vm3, %v1990_v36, %v2707_v56 }
 0x200   : > { %vm2582_vm6 = vcmp.gt.f32.partialorder %v2045_v4, 0.0  ;;  %v2137_v45 = vadd.f32 %v2136_v38, %v9305_v34  ;;  %v7422_v29 = vpack.i.bf16 %v9352_v26, %v9349_v10  ;;  %v9586_v3 = vsel %vm2580_vm4, %v1992_v5, %v2708_v58 }
 0x201   : > { %v9508_v0 = vpop.f32.mrf.mxu0  ;;  %v9529_v54 = vpop.f32.mrf.mxu1  ;;  %v2709_v11 = vmul.f32 0.2, %v2043_v39  ;;  %vm2487_vm7 = vcmp.gt.f32.partialorder %v2082_v2, 0.0  ;;  %v2615_v36 = vmul.f32 0.2, %v2082_v2  ;;  %vm2488_vm8 = vcmp.gt.f32.partialorder %v2084_v24, 0.0 }
 0x202   : > { %v2088_v46 = vadd.f32 %v9508_v0, %v9309_v47  ;;  %v2616_v38 = vmul.f32 0.2, %v2084_v24  ;;  %v9593_v56 = vsel %vm2582_vm6, %v2045_v4, %v2710_v27  ;;  %vm2489_vm11 = vcmp.gt.f32.partialorder %v2135_v59, 0.0 }
 0x203   : > { %v9520_v35 = vpop.f32.mrf.mxu0  ;;  %v2140_v32 = vpop.f32.mrf.mxu1  ;;  %7423 = vxpose.xlu0.b32.start [1/4] (short) %v7422_v29, 128  ;;  %v2617_v23 = vmul.f32 0.2, %v2135_v59  ;;  %v2086_v5 = vadd.f32 %v9498_v7, %v9309_v47  ;;  %vm2490_vm9 = vcmp.gt.f32.partialorder %v2137_v45, 0.0  ;;  %v2618_v58 = vmul.f32 0.2, %v2137_v45 }
 0x204   : > { %v2733_v0 = vsel %vm2477_vm13, %v9334_v15, %v9342_v30  ;;  %v2734_v29 = vsel %vm2478_vm14, %v9345_v31, %v9357_v37  ;;  %v2648_v27 = vmul.f32 0.2, %v2088_v46  ;;  %v2139_v7 = vadd.f32 %v9529_v54, %v9309_v47 }
 0x205   : > { %v9531_v13 = vpop.f32.mrf.mxu0  ;;  %v9555_v33 = vpop.f32.mrf.mxu1  ;;  %v2141_v18 = vadd.f32 %v2140_v32, %v9309_v47  ;;  %v7510_v61 = vpack.i.bf16 %v2734_v29, %v2733_v0  ;;  %v9615_v15 = vsel %vm2581_vm5, %v2043_v39, %v2709_v11  ;;  %vm2520_vm10 = vcmp.gt.f32.partialorder %v2088_v46, 0.0 }
 0x206   : > { %v2094_v30 = vadd.f32 %v9531_v13, %v9314_v62  ;;  %v12683_v31 = vpack.i.bf16 %v9364_v49, %v9361_v25  ;;  %v9629_v0 = vsel %vm2487_vm7, %v2082_v2, %v2615_v36  ;;  %v9632_v39 = vsel %vm2488_vm8, %v2084_v24, %v2616_v38 }
 0x207   : > { %v9547_v20 = vpop.f32.mrf.mxu0  ;;  %v2146_v12 = vpop.f32.mrf.mxu1  ;;  %v2647_v11 = vmul.f32 0.2, %v2086_v5  ;;  %v9635_v13 = vsel %vm2489_vm11, %v2135_v59, %v2617_v23  ;;  %vm2519_vm12 = vcmp.gt.f32.partialorder %v2086_v5, 0.0  ;;  %v9638_v25 = vsel %vm2490_vm9, %v2137_v45, %v2618_v58 }
 0x208   : > { %7425 = vxpose.xlu0.b32.cont [2/4] (short) %v12683_v31, 128  ;;  %v2092_v49 = vadd.f32 %v9520_v35, %v9314_v62  ;;  %v9647_v2 = vsel %vm2520_vm10, %v2088_v46, %v2648_v27  ;;  %vm2521_vm13 = vcmp.gt.f32.partialorder %v2139_v7, 0.0  ;;  %v2649_v24 = vmul.f32 0.2, %v2139_v7 }
 0x209   : > { %v9557_v17 = vpop.f32.mrf.mxu0  ;;  %v9579_v8 = vpop.f32.mrf.mxu1  ;;  %7511 = vxpose.xlu1.b32.start [1/4] (short) %v7510_v61, 128  ;;  %v2650_v61 = vmul.f32 0.2, %v2141_v18  ;;  %vm2522_vm14 = vcmp.gt.f32.partialorder %v2141_v18, 0.0  ;;  %v2680_v59 = vmul.f32 0.2, %v2094_v30  ;;  %v2147_v23 = vadd.f32 %v2146_v12, %v9314_v62 }
 0x20a   : > { %v2098_v45 = vadd.f32 %v9557_v17, %v9320_v14  ;;  %v12684_v35 = vpack.i.bf16 %v9371_v57, %v9367_v51  ;;  %v9662_v58 = vsel %vm2519_vm12, %v2086_v5, %v2647_v11  ;;  %vm2552_vm15 = vcmp.gt.f32.partialorder %v2094_v30, 0.0 }
 0x20b   : > { %v9569_v63 = vpop.f32.mrf.mxu0  ;;  %v2150_v10 = vpop.f32.mrf.mxu1  ;;  %v12685_v17 = vpack.i.bf16 %v9369_v44, %v9377_v48  ;;  %vm2551_vm0 = vcmp.gt.f32.partialorder %v2092_v49, 0.0  ;;  %v2679_v57 = vmul.f32 0.2, %v2092_v49  ;;  %v2145_v27 = vadd.f32 %v9555_v33, %v9314_v62 }
 0x20c   : > { %7427 = vxpose.xlu0.b32.cont [3/4] (short) %v12684_v35, 128  ;;  %v9678_v11 = vsel %vm2521_vm13, %v2139_v7, %v2649_v24  ;;  %v9681_v12 = vsel %vm2522_vm14, %v2141_v18, %v2650_v61  ;;  %v2096_v44 = vadd.f32 %v9547_v20, %v9320_v14  ;;  %v2151_v48 = vadd.f32 %v2150_v10, %v9320_v14 }
 0x20d   : > { %v9581_v43 = vpop.f32.mrf.mxu0  ;;  %v9605_v53 = vpop.f32.mrf.mxu1  ;;  %7513 = vxpose.xlu1.b32.cont [2/4] (short) %v12685_v17, 128  ;;  %12686 = vst [vmem:[#allocation28_spill] sm:$0xff] %v9678_v11  ;;  %12687 = vst [vmem:[#allocation29_spill] sm:$0xff] %v9681_v12  ;;  %v9686_v17 = vsel %vm2552_vm15, %v2094_v30, %v2680_v59  ;;  %v2682_v51 = vmul.f32 0.2, %v2147_v23  ;;  %v2712_v46 = vmul.f32 0.2, %v2098_v45  ;;  %v2149_v33 = vadd.f32 %v9579_v8, %v9320_v14 }
 0x20e   : > { %12688 = vst [vmem:[#allocation30_spill] sm:$0xff] %v9686_v17  ;;  %v12689_v32 = vpack.i.bf16 %v9393_v22, %v9386_v9  ;;  %vm2554_vm1 = vcmp.gt.f32.partialorder %v2147_v23, 0.0  ;;  %vm2584_vm2 = vcmp.gt.f32.partialorder %v2098_v45, 0.0  ;;  %v2188_v20 = vadd.f32 %v9569_v63, %v9305_v34 }
 0x20f   : > { %v9590_v26 = vpop.f32.mrf.mxu0  ;;  %v9622_v37 = vpop.f32.mrf.mxu1  ;;  %v12690_v10 = vpack.i.bf16 %v9390_v16, %v9396_v28  ;;  %v2190_v8 = vadd.f32 %v9581_v43, %v9305_v34  ;;  %v9705_v30 = vsel %vm2551_vm0, %v2092_v49, %v2679_v57  ;;  %vm2553_vm3 = vcmp.gt.f32.partialorder %v2145_v27, 0.0 }
 0x210   : > { %7429 = vxpose.xlu0.b32.end [4/4] (short) %v12689_v32, 128  ;;  %12691 = vst [vmem:[#allocation31_spill] sm:$0xff] %v9705_v30  ;;  %v2681_v22 = vmul.f32 0.2, %v2145_v27  ;;  %vm2583_vm4 = vcmp.gt.f32.partialorder %v2096_v44, 0.0  ;;  %v2711_v16 = vmul.f32 0.2, %v2096_v44  ;;  %v9715_v61 = vsel %vm2554_vm1, %v2147_v23, %v2682_v51 }
 0x211   : > { %v9607_v4 = vpop.f32.mrf.mxu0  ;;  %v9642_v29 = vpop.f32.mrf.mxu1  ;;  %7515 = vxpose.xlu1.b32.cont [3/4] (short) %v12690_v10, 128  ;;  %v2714_v28 = vmul.f32 0.2, %v2151_v48  ;;  %12692 = vst [vmem:[#allocation32_spill] sm:$0xff] %v9715_v61  ;;  %v9717_v43 = vsel %vm2584_vm2, %v2098_v45, %v2712_v46  ;;  %v2713_v49 = vmul.f32 0.2, %v2149_v33  ;;  %vm2586_vm5 = vcmp.gt.f32.partialorder %v2151_v48, 0.0 }
 0x212   : > { %12693 = vst [vmem:[#allocation33_spill] sm:$0xff] %v9717_v43  ;;  %vm2585_vm6 = vcmp.gt.f32.partialorder %v2149_v33, 0.0  ;;  %v2619_v10 = vmul.f32 0.2, %v2188_v20  ;;  %v2620_v9 = vmul.f32 0.2, %v2190_v8  ;;  %v2241_v60 = vadd.f32 %v9605_v53, %v9305_v34 }
 0x213   : > { %v9624_v54 = vpop.f32.mrf.mxu0  ;;  %v9655_v36 = vpop.f32.mrf.mxu1  ;;  %v12694_v63 = vpack.i.bf16 %v9407_v40, %v9414_v19  ;;  %v9729_v23 = vsel %vm2553_vm3, %v2145_v27, %v2681_v22  ;;  %vm2491_vm7 = vcmp.gt.f32.partialorder %v2188_v20, 0.0  ;;  %vm2492_vm8 = vcmp.gt.f32.partialorder %v2190_v8, 0.0 }
 0x214   : > { %12695 = vst [vmem:[#allocation34_spill] sm:$0xff] %v9729_v23  ;;  %v2243_v45 = vadd.f32 %v9622_v37, %v9305_v34  ;;  %v9738_v11 = vsel %vm2583_vm4, %v2096_v44, %v2711_v16  ;;  %v9740_v53 = vsel %vm2586_vm5, %v2151_v48, %v2714_v28  ;;  %v2192_v40 = vadd.f32 %v9590_v26, %v9309_v47 }
 0x215   : > { %v9644_v31 = vpop.f32.mrf.mxu0  ;;  %v9673_v35 = vpop.f32.mrf.mxu1  ;;  %7517 = vxpose.xlu1.b32.end [4/4] (short) %v12694_v63, 128  ;;  %12696 = vst [vmem:[#allocation35_spill] sm:$0xff] %v9738_v11  ;;  %12697 = vst [vmem:[#allocation36_spill] sm:$0xff] %v9740_v53  ;;  %v2194_v19 = vadd.f32 %v9607_v4, %v9309_v47  ;;  %v9751_v22 = vsel %vm2585_vm6, %v2149_v33, %v2713_v49  ;;  %v2247_v44 = vadd.f32 %v9655_v36, %v9309_v47 }
 0x216   : > { %12698 = vst [vmem:[#allocation37_spill] sm:$0xff] %v9751_v22  ;;  %v9759_v26 = vsel %vm2491_vm7, %v2188_v20, %v2619_v10  ;;  %v9761_v16 = vsel %vm2492_vm8, %v2190_v8, %v2620_v9  ;;  %v2621_v4 = vmul.f32 0.2, %v2241_v60  ;;  %v2245_v28 = vadd.f32 %v9642_v29, %v9309_v47 }
 0x217   : > { %v9657_v38 = vpop.f32.mrf.mxu0  ;;  %v9693_v7 = vpop.f32.mrf.mxu1  ;;  %12699 = vst [vmem:[#allocation38_spill] sm:$0xff] %v9759_v26  ;;  %12700 = vst [vmem:[#allocation39_spill] sm:$0xff] %v9761_v16  ;;  %vm2493_vm11 = vcmp.gt.f32.partialorder %v2241_v60, 0.0  ;;  %v2622_v33 = vmul.f32 0.2, %v2243_v45  ;;  %v2200_v36 = vadd.f32 %v9644_v31, %v9314_v62  ;;  %vm2494_vm9 = vcmp.gt.f32.partialorder %v2243_v45, 0.0 }
 0x218   : > { %v2651_v37 = vmul.f32 0.2, %v2192_v40  ;;  %v2652_v20 = vmul.f32 0.2, %v2194_v19  ;;  %v2198_v8 = vadd.f32 %v9624_v54, %v9314_v62  ;;  %vm2523_vm10 = vcmp.gt.f32.partialorder %v2192_v40, 0.0 }
 0x219   : > { %v9675_v5 = vpop.f32.mrf.mxu0  ;;  %v9709_v32 = vpop.f32.mrf.mxu1  ;;  %vm2524_vm12 = vcmp.gt.f32.partialorder %v2194_v19, 0.0  ;;  %v2654_v10 = vmul.f32 0.2, %v2247_v44  ;;  %v9779_v22 = vsel %vm2493_vm11, %v2241_v60, %v2621_v4  ;;  %v2653_v31 = vmul.f32 0.2, %v2245_v28 }
 0x21a   : > { %12701 = vst [vmem:[#allocation40_spill] sm:$0xff] %v9779_v22  ;;  %vm2526_vm13 = vcmp.gt.f32.partialorder %v2247_v44, 0.0  ;;  %v2253_v53 = vadd.f32 %v9693_v7, %v9314_v62  ;;  %v9783_v23 = vsel %vm2494_vm9, %v2243_v45, %v2622_v33  ;;  %vm2525_vm14 = vcmp.gt.f32.partialorder %v2245_v28, 0.0 }
 0x21b   : > { %v9695_v18 = vpop.f32.mrf.mxu0  ;;  %v9719_v59 = vpop.f32.mrf.mxu1  ;;  %12702 = vst [vmem:[#allocation41_spill] sm:$0xff] %v9783_v23  ;;  %v2684_v54 = vmul.f32 0.2, %v2200_v36  ;;  %v2204_v61 = vadd.f32 %v9675_v5, %v9320_v14  ;;  %v9789_v26 = vsel %vm2523_vm10, %v2192_v40, %v2651_v37  ;;  %v9791_v16 = vsel %vm2524_vm12, %v2194_v19, %v2652_v20 }
 0x21c   : > { %12703 = vst [vmem:[#allocation42_spill] sm:$0xff] %v9789_v26  ;;  %12704 = vst [vmem:[#allocation43_spill] sm:$0xff] %v9791_v16  ;;  %v2683_v60 = vmul.f32 0.2, %v2198_v8  ;;  %vm2556_vm15 = vcmp.gt.f32.partialorder %v2200_v36, 0.0  ;;  %vm2555_vm0 = vcmp.gt.f32.partialorder %v2198_v8, 0.0  ;;  %v9795_v11 = vsel %vm2526_vm13, %v2247_v44, %v2654_v10 }
 0x21d   : > { %v9711_v24 = vpop.f32.mrf.mxu0  ;;  %v9733_v46 = vpop.f32.mrf.mxu1  ;;  %12705 = vst [vmem:[#allocation44_spill] sm:$0xff] %v9795_v11  ;;  %v2251_v7 = vadd.f32 %v9673_v35, %v9314_v62  ;;  %v2202_v45 = vadd.f32 %v9657_v38, %v9320_v14  ;;  %v9803_v40 = vsel %vm2525_vm14, %v2245_v28, %v2653_v31  ;;  %vm2558_vm1 = vcmp.gt.f32.partialorder %v2253_v53, 0.0 }
 0x21e   : > { %12706 = vst [vmem:[#allocation45_spill] sm:$0xff] %v9803_v40  ;;  %v2686_v19 = vmul.f32 0.2, %v2253_v53  ;;  %v9805_v33 = vsel %vm2556_vm15, %v2200_v36, %v2684_v54  ;;  %v2716_v20 = vmul.f32 0.2, %v2204_v61  ;;  %v2255_v44 = vadd.f32 %v9709_v32, %v9320_v14 }
 0x21f   : > { %v9721_v57 = vpop.f32.mrf.mxu0  ;;  %v9755_v48 = vpop.f32.mrf.mxu1  ;;  %12707 = vst [vmem:[#allocation46_spill] sm:$0xff] %v9805_v33  ;;  %v2257_v35 = vadd.f32 %v9719_v59, %v9320_v14  ;;  %v9813_v10 = vsel %vm2555_vm0, %v2198_v8, %v2683_v60  ;;  %vm2588_vm2 = vcmp.gt.f32.partialorder %v2204_v61, 0.0  ;;  %vm2557_vm3 = vcmp.gt.f32.partialorder %v2251_v7, 0.0 }
 0x220   : > { %12708 = vst [vmem:[#allocation47_spill] sm:$0xff] %v9813_v10  ;;  %v2685_v36 = vmul.f32 0.2, %v2251_v7  ;;  %v2715_v54 = vmul.f32 0.2, %v2202_v45  ;;  %v2296_v5 = vadd.f32 %v9711_v24, %v9305_v34  ;;  %vm2587_vm4 = vcmp.gt.f32.partialorder %v2202_v45, 0.0 }
 0x221   : > { %v9735_v51 = vpop.f32.mrf.mxu0  ;;  %v9769_v49 = vpop.f32.mrf.mxu1  ;;  %v9822_v59 = vsel %vm2558_vm1, %v2253_v53, %v2686_v19  ;;  %v2294_v8 = vadd.f32 %v9695_v18, %v9305_v34  ;;  %v9828_v28 = vsel %vm2588_vm2, %v2204_v61, %v2716_v20  ;;  %v2717_v38 = vmul.f32 0.2, %v2255_v44 }
 0x222   : > { %12709 = vst [vmem:[#allocation48_spill] sm:$0xff] %v9822_v59  ;;  %12710 = vst [vmem:[#allocation49_spill] sm:$0xff] %v9828_v28  ;;  %v2718_v40 = vmul.f32 0.2, %v2257_v35  ;;  %v2349_v11 = vadd.f32 %v9755_v48, %v9305_v34  ;;  %vm2589_vm5 = vcmp.gt.f32.partialorder %v2255_v44, 0.0  ;;  %vm2590_vm6 = vcmp.gt.f32.partialorder %v2257_v35, 0.0 }
 0x223   : > { %v9757_v63 = vpop.f32.mrf.mxu0  ;;  %v9777_v27 = vpop.f32.mrf.mxu1  ;;  %v2347_v24 = vadd.f32 %v9733_v46, %v9305_v34  ;;  %v2300_v53 = vadd.f32 %v9735_v51, %v9309_v47  ;;  %v9839_v18 = vsel %vm2557_vm3, %v2251_v7, %v2685_v36  ;;  %v9841_v61 = vsel %vm2587_vm4, %v2202_v45, %v2715_v54 }
 0x224   : > { %12711 = vst [vmem:[#allocation50_spill] sm:$0xff] %v9839_v18  ;;  %12712 = vst [vmem:[#allocation51_spill] sm:$0xff] %v9841_v61  ;;  %v2624_v20 = vmul.f32 0.2, %v2296_v5  ;;  %v2298_v32 = vadd.f32 %v9721_v57, %v9309_v47  ;;  %v2623_v10 = vmul.f32 0.2, %v2294_v8  ;;  %v9849_v33 = vsel %vm2589_vm5, %v2255_v44, %v2717_v38 }
 0x225   : > { %v9773_v9 = vpop.f32.mrf.mxu0  ;;  %v9787_v29 = vpop.f32.mrf.mxu1  ;;  %vm2496_vm7 = vcmp.gt.f32.partialorder %v2296_v5, 0.0  ;;  %12713 = vst [vmem:[#allocation52_spill] sm:$0xff] %v9849_v33  ;;  %v9851_v22 = vsel %vm2590_vm6, %v2257_v35, %v2718_v40  ;;  %vm2495_vm8 = vcmp.gt.f32.partialorder %v2294_v8, 0.0  ;;  %v2626_v7 = vmul.f32 0.2, %v2349_v11 }
 0x226   : > { %12714 = vst [vmem:[#allocation53_spill] sm:$0xff] %v9851_v22  ;;  %vm2497_vm11 = vcmp.gt.f32.partialorder %v2347_v24, 0.0  ;;  %v2625_v45 = vmul.f32 0.2, %v2347_v24  ;;  %vm2498_vm9 = vcmp.gt.f32.partialorder %v2349_v11, 0.0  ;;  %v9853_v54 = vsel %vm2496_vm7, %v2296_v5, %v2624_v20 }
 0x227   : > { %v9793_v4 = vpop.f32.mrf.mxu0  ;;  %v2358_v37 = vpop.f32.mrf.mxu1  ;;  %v2656_v36 = vmul.f32 0.2, %v2300_v53  ;;  %12715 = vst [vmem:[#allocation54_spill] sm:$0xff] %v9853_v54  ;;  %v2655_v48 = vmul.f32 0.2, %v2298_v32  ;;  %vm2528_vm10 = vcmp.gt.f32.partialorder %v2300_v53, 0.0  ;;  %v2353_v46 = vadd.f32 %v9777_v27, %v9309_v47 }
 0x228   : > { %v9857_v18 = vsel %vm2495_vm8, %v2294_v8, %v2623_v10  ;;  %vm2527_vm12 = vcmp.gt.f32.partialorder %v2298_v32, 0.0  ;;  %v2351_v40 = vadd.f32 %v9769_v49, %v9309_v47  ;;  %v2306_v44 = vadd.f32 %v9773_v9, %v9314_v62 }
 0x229   : > { %v2309_v31 = vpop.f32.mrf.mxu0  ;;  %v9826_v60 = vpop.f32.mrf.mxu1  ;;  %12716 = vst [vmem:[#allocation55_spill] sm:$0xff] %v9857_v18  ;;  %v9865_v5 = vsel %vm2498_vm9, %v2349_v11, %v2626_v7  ;;  %v2359_v20 = vadd.f32 %v2358_v37, %v9314_v62  ;;  %v9872_v10 = vsel %vm2497_vm11, %v2347_v24, %v2625_v45  ;;  %v9874_v49 = vsel %vm2528_vm10, %v2300_v53, %v2656_v36 }
 0x22a   : > { %12717 = vst [vmem:[#allocation56_spill] sm:$0xff] %v9865_v5  ;;  %v2310_v59 = vadd.f32 %v2309_v31, %v9320_v14  ;;  %12718 = vst [vmem:[#allocation57_spill] sm:$0xff] %v9872_v10  ;;  %v2304_v9 = vadd.f32 %v9757_v63, %v9314_v62  ;;  %v9878_v61 = vsel %vm2527_vm12, %v2298_v32, %v2655_v48  ;;  %v2658_v11 = vmul.f32 0.2, %v2353_v46 }
 0x22b   : > { %v9836_v19 = vpop.f32.mrf.mxu0  ;;  %v2362_v51 = vpop.f32.mrf.mxu1  ;;  %12719 = vst [vmem:[#allocation58_spill] sm:$0xff] %v9874_v49  ;;  %12720 = vst [vmem:[#allocation59_spill] sm:$0xff] %v9878_v61  ;;  %v2357_v37 = vadd.f32 %v9787_v29, %v9314_v62  ;;  %v2308_v31 = vadd.f32 %v9793_v4, %v9320_v14  ;;  %v2657_v24 = vmul.f32 0.2, %v2351_v40  ;;  %vm2530_vm13 = vcmp.gt.f32.partialorder %v2353_v46, 0.0 }
 0x22c   : > { %v2688_v53 = vmul.f32 0.2, %v2306_v44  ;;  %vm2560_vm14 = vcmp.gt.f32.partialorder %v2306_v44, 0.0  ;;  %v2690_v32 = vmul.f32 0.2, %v2359_v20  ;;  %vm2529_vm15 = vcmp.gt.f32.partialorder %v2351_v40, 0.0 }
 0x22d   : > { %v2401_v57 = vpop.f32.mrf.mxu0  ;;  %v2452_v35 = vpop.f32.mrf.mxu1  ;;  %v2720_v48 = vmul.f32 0.2, %v2310_v59  ;;  %v2687_v36 = vmul.f32 0.2, %v2304_v9  ;;  %vm2562_vm0 = vcmp.gt.f32.partialorder %v2359_v20, 0.0  ;;  %vm2592_vm1 = vcmp.gt.f32.partialorder %v2310_v59, 0.0 }
 0x22e   : > { %vm2559_vm2 = vcmp.gt.f32.partialorder %v2304_v9, 0.0  ;;  %v9888_v4 = vsel %vm2530_vm13, %v2353_v46, %v2658_v11  ;;  %v2689_v27 = vmul.f32 0.2, %v2357_v37  ;;  %v2719_v7 = vmul.f32 0.2, %v2308_v31 }
 0x22f   : > { %v2403_v8 = vpop.f32.mrf.mxu0  ;;  %v2454_v45 = vpop.f32.mrf.mxu1  ;;  %12721 = vst [vmem:[#allocation60_spill] sm:$0xff] %v9888_v4  ;;  %v9890_v38 = vsel %vm2560_vm14, %v2306_v44, %v2688_v53  ;;  %vm2561_vm3 = vcmp.gt.f32.partialorder %v2357_v37, 0.0  ;;  %vm2591_vm4 = vcmp.gt.f32.partialorder %v2308_v31, 0.0  ;;  %v2361_v63 = vadd.f32 %v9826_v60, %v9320_v14 }
 0x230   : > { %12722 = vst [vmem:[#allocation61_spill] sm:$0xff] %v9890_v38  ;;  %v9894_v49 = vsel %vm2529_vm15, %v2351_v40, %v2657_v24  ;;  %v9896_v10 = vsel %vm2562_vm0, %v2359_v20, %v2690_v32  ;;  %v9898_v5 = vsel %vm2592_vm1, %v2310_v59, %v2720_v48  ;;  %v2363_v18 = vadd.f32 %v2362_v51, %v9320_v14 }
 0x231   : > { %v2405_v29 = vpop.f32.mrf.mxu0  ;;  %v2456_v61 = vpop.f32.mrf.mxu1  ;;  %12723 = vst [vmem:[#allocation62_spill] sm:$0xff] %v9894_v49  ;;  %12724 = vst [vmem:[#allocation63_spill] sm:$0xff] %v9896_v10  ;;  %v9901_v46 = vsel %vm2559_vm2, %v2304_v9, %v2687_v36  ;;  %v2402_v11 = vadd.f32 %v2401_v57, %v9305_v34  ;;  %v2455_v53 = vadd.f32 %v2454_v45, %v9305_v34  ;;  %vm2593_vm5 = vcmp.gt.f32.partialorder %v2361_v63, 0.0 }
 0x232   : > { %12725 = vst [vmem:[#allocation64_spill] sm:$0xff] %v9898_v5  ;;  %12726 = vst [vmem:[#allocation65_spill] sm:$0xff] %v9901_v46  ;;  %v9909_v40 = vsel %vm2561_vm3, %v2357_v37, %v2689_v27  ;;  %v9911_v20 = vsel %vm2591_vm4, %v2308_v31, %v2719_v7  ;;  %v2406_v59 = vadd.f32 %v2405_v29, %v9309_v47  ;;  %vm2594_vm6 = vcmp.gt.f32.partialorder %v2363_v18, 0.0 }
 0x233   : > { %v2409_v54 = vpop.f32.mrf.mxu0  ;;  %12727 = vst [vmem:[#allocation66_spill] sm:$0xff] %v9909_v40  ;;  %12728 = vst [vmem:[#allocation67_spill] sm:$0xff] %v9911_v20  ;;  %v2400_v57 = vadd.f32 %v9836_v19, %v9305_v34  ;;  %v2458_v24 = vpop.f32.mrf.mxu1  ;;  %v2722_v45 = vmul.f32 0.2, %v2363_v18  ;;  %v2453_v27 = vadd.f32 %v2452_v35, %v9305_v34  ;;  %v2404_v37 = vadd.f32 %v2403_v8, %v9309_v47 }
 0x234   : > { %vm2500_vm7 = vcmp.gt.f32.partialorder %v2402_v11, 0.0  ;;  %v2628_v7 = vmul.f32 0.2, %v2402_v11  ;;  %v2630_v32 = vmul.f32 0.2, %v2455_v53  ;;  %v2457_v48 = vadd.f32 %v2456_v61, %v9309_v47 }
 0x235   : > { %v2411_v36 = vpop.f32.mrf.mxu0  ;;  %vm2502_vm8 = vcmp.gt.f32.partialorder %v2455_v53, 0.0  ;;  %v2660_v29 = vmul.f32 0.2, %v2406_v59  ;;  %v2410_v9 = vadd.f32 %v2409_v54, %v9314_v62  ;;  %v2459_v19 = vadd.f32 %v2458_v24, %v9309_v47  ;;  %v2462_v44 = vpop.f32.mrf.mxu1 }
 0x236   : > { %v2721_v51 = vmul.f32 0.2, %v2361_v63  ;;  %vm2499_vm11 = vcmp.gt.f32.partialorder %v2400_v57, 0.0  ;;  %v2627_v60 = vmul.f32 0.2, %v2400_v57  ;;  %vm2532_vm9 = vcmp.gt.f32.partialorder %v2406_v59, 0.0 }
 0x237   : > { %v9928_v34 = vsel %vm2594_vm6, %v2363_v18, %v2722_v45  ;;  %vm2501_vm10 = vcmp.gt.f32.partialorder %v2453_v27, 0.0  ;;  %v2629_v35 = vmul.f32 0.2, %v2453_v27  ;;  %v2659_v8 = vmul.f32 0.2, %v2404_v37  ;;  %v2413_v24 = vpop.f32.mrf.mxu0 }
 0x238   : > { %12729 = vst [vmem:[#allocation68_spill] sm:$0xff] %v9928_v34  ;;  %v9931_v61 = vsel %vm2500_vm7, %v2402_v11, %v2628_v7  ;;  %vm2531_vm12 = vcmp.gt.f32.partialorder %v2404_v37, 0.0  ;;  %v9934_v54 = vsel %vm2502_vm8, %v2455_v53, %v2630_v32  ;;  %v2661_v47 = vmul.f32 0.2, %v2457_v48  ;;  %v12748_v53 = vld [vmem:[#allocation10_spill] sm:$0xff] }
 0x239   : > { %12730 = vst [vmem:[#allocation69_spill] sm:$0xff] %v9931_v61  ;;  %12731 = vst [vmem:[#allocation70_spill] sm:$0xff] %v9934_v54  ;;  %v9936_v5 = vsel %vm2532_vm9, %v2406_v59, %v2660_v29  ;;  %vm2533_vm13 = vcmp.gt.f32.partialorder %v2457_v48, 0.0  ;;  %v2691_v40 = vmul.f32 0.2, %v2410_v9  ;;  %v9939_v10 = vsel %vm2593_vm5, %v2361_v63, %v2721_v51  ;;  %v2415_v29 = vpop.f32.mrf.mxu0  ;;  %v12747_v59 = vld [vmem:[#allocation8_spill] sm:$0xff] }
 0x23a   : > { %12732 = vst [vmem:[#allocation71_spill] sm:$0xff] %v9936_v5  ;;  %v2662_v18 = vmul.f32 0.2, %v2459_v19  ;;  %12733 = vst [vmem:[#allocation72_spill] sm:$0xff] %v9939_v10  ;;  %v9942_v46 = vsel %vm2499_vm11, %v2400_v57, %v2627_v60  ;;  %vm2563_vm14 = vcmp.gt.f32.partialorder %v2410_v9, 0.0  ;;  %vm2534_vm15 = vcmp.gt.f32.partialorder %v2459_v19, 0.0  ;;  %v2464_v60 = vpop.f32.mrf.mxu1 }
 0x23b   : > { %12734 = vst [vmem:[#allocation73_spill] sm:$0xff] %v9942_v46  ;;  %v12735_v11 = vpack.i.bf16 %v9410_v42, %v9416_v50  ;;  %v9952_v7 = vsel %vm2501_vm10, %v2453_v27, %v2629_v35  ;;  %v9955_v63 = vsel %vm2531_vm12, %v2404_v37, %v2659_v8  ;;  %v9962_v50 = vsel %vm2533_vm13, %v2457_v48, %v2661_v47  ;;  %v12756_v10 = vld [vmem:[#allocation17_spill] sm:$0xff] }
 0x23c   : > { %12736 = vst [vmem:[#allocation74_spill] sm:$0xff] %v9952_v7  ;;  %12737 = vst [vmem:[#allocation75_spill] sm:$0xff] %v9955_v63  ;;  %v9965_v32 = vadd.f32 %v2411_v36, %v9314_v62  ;;  %v9967_v27 = vsel %vm2563_vm14, %v2410_v9, %v2691_v40  ;;  %v9969_v35 = vsel %vm2534_vm15, %v2459_v19, %v2662_v18  ;;  %vm3879_vm0 = vcmask 261120   ;;  %v12742_v9 = vld [vmem:[#allocation7_spill] sm:$0xff] }
 0x23d   : > { %12738 = vst [vmem:[#allocation76_spill] sm:$0xff] %v9962_v50  ;;  %12739 = vst [vmem:[#allocation77_spill] sm:$0xff] %v9967_v27  ;;  %v9972_v37 = vadd.f32 %v2462_v44, %v9314_v62  ;;  %v9975_v8 = vadd.f32 %v2413_v24, %v9320_v14  ;;  %v9978_v42 = vadd.f32 %v2464_v60, %v9314_v62  ;;  %vm6440_vm1 = vcmask 1041409  }
 0x23e   : > { %12740 = vst [vmem:[#allocation78_spill] sm:$0xff] %v9969_v35  ;;  %v12741_v36 = vpack.i.bf16 %v9429_v6, %v9436_v1  ;;  %v9985_v40 = vadd.f32 %v2415_v29, %v9320_v14  ;;  %v12743_v19 = vpack.i.bf16 %v9427_v41, %v12742_v9  ;;  %v9996_v18 = vmul.f32 0.2, %v9965_v32  ;;  %v12744_v9 = vld [vmem:[#allocation9_spill] sm:$0xff] }
 0x23f   : > { %v9999_v1 = vmul.f32 0.2, %v9972_v37  ;;  %v12749_v50 = vpack.i.bf16 %v12747_v59, %v12748_v53  ;;  %v12757_v34 = vpack.i.bf16 %v9491_v52, %v12756_v10  ;;  %vm6442_vm2 = vcmask 1042434  }
 0x240   : > { %vm2564_vm3 = vcmp.gt.f32.partialorder %v9965_v32, 0.0  ;;  %vm2565_vm4 = vcmp.gt.f32.partialorder %v9972_v37, 0.0  ;;  %vm2566_vm5 = vcmp.gt.f32.partialorder %v9978_v42, 0.0  ;;  %vm2596_vm6 = vcmp.gt.f32.partialorder %v9985_v40, 0.0 }
 0x241   : > { %7599 = vxpose.xlu0.b32.start [1/4] (short) %v12735_v11, 128  ;;  %vm2595_vm7 = vcmp.gt.f32.partialorder %v9975_v8, 0.0  ;;  %vm6444_vm9 = vcmask 1043459   ;;  %vm6446_vm10 = vcmask 1044484   ;;  %vm6448_vm12 = vcmask 1045509  }
 0x242   : > { %v9922_v31 = vpop.trf.xlu0  ;;  %vm6450_vm13 = vcmask 1046534   ;;  %vm6452_vm14 = vcmask 1047559  }
 0x243   : > { %v7258_v48 = vunpack.i.h.bf16 %v9922_v31  ;;  %v7255_v44 = vunpack.i.l.bf16 %v9922_v31 }
 0x245   : > { %7601 = vxpose.xlu0.b32.cont [2/4] (short) %v12741_v36, 128  ;;  %v3952_v6 = vsel %vm3879_vm0, %v7258_v48, -inf  ;;  %v3880_v31 = vsel %vm3879_vm0, %v7255_v44, -inf }
 0x246   : > { %v7259_v20 = vpop.trf.xlu0  ;;  %7687 = vxpose.xlu1.b32.start [1/4] (short) %v12743_v19, 128  ;;  %v12745_v19 = vld [vmem:[#allocation11_spill] sm:$0xff] }
 0x247   : > { %v7263_v41 = vunpack.i.h.bf16 %v7259_v20  ;;  %v7260_v36 = vunpack.i.l.bf16 %v7259_v20  ;;  %v12746_v57 = vpack.i.bf16 %v12744_v9, %v12745_v19  ;;  %v12751_v19 = vld [vmem:[#allocation15_spill] sm:$0xff] }
 0x248   : > { %v7342_v45 = vpop.trf.xlu1 }
 0x249   : > { %v7346_v47 = vunpack.i.h.bf16 %v7342_v45  ;;  %v7343_v60 = vunpack.i.l.bf16 %v7342_v45  ;;  %7603 = vxpose.xlu0.b32.cont [3/4] (short) %v12746_v57, 128  ;;  %v3953_v45 = vsel %vm3879_vm0, %v7263_v41, -inf  ;;  %v3881_v44 = vsel %vm3879_vm0, %v7260_v36, -inf  ;;  %v12753_v36 = vld [vmem:[#allocation13_spill] sm:$0xff] }
 0x24a   : > { %v7264_v51 = vpop.trf.xlu0  ;;  %7689 = vxpose.xlu1.b32.cont [2/4] (short) %v12749_v50, 128  ;;  %v3882_v5 = vmax.f32 %v3880_v31, %v3881_v44  ;;  %v3954_v7 = vmax.f32 %v3952_v6, %v3953_v45  ;;  %v12750_v50 = vld [vmem:[#allocation14_spill] sm:$0xff] }
 0x24b   : > { %v4096_v62 = vsel %vm3879_vm0, %v7346_v47, -inf  ;;  %v4024_v48 = vsel %vm3879_vm0, %v7343_v60, -inf  ;;  %v7268_v59 = vunpack.i.h.bf16 %v7264_v51  ;;  %v12752_v54 = vpack.i.bf16 %v12750_v50, %v12751_v19 }
 0x24c   : > { %v7347_v11 = vpop.trf.xlu1  ;;  %v3883_v60 = vrot.slane %v3882_v5, 4  ;;  %v3955_v46 = vrot.slane %v3954_v7, 4  ;;  %v7265_v61 = vunpack.i.l.bf16 %v7264_v51 }
 0x24d   : > { %v7351_v35 = vunpack.i.h.bf16 %v7347_v11  ;;  %v7348_v20 = vunpack.i.l.bf16 %v7347_v11  ;;  %7605 = vxpose.xlu0.b32.end [4/4] (short) %v12752_v54, 128  ;;  %v12754_v11 = vld [vmem:[#allocation12_spill] sm:$0xff]  ;;  %v3961_v51 = vsel %vm3879_vm0, %v7268_v59, -inf }
 0x24e   : > { %v9991_v24 = vpop.trf.xlu0  ;;  %v12755_v31 = vpack.i.bf16 %v12753_v36, %v12754_v11  ;;  %v3884_v44 = vmax.f32 %v3882_v5, %v3883_v60 }
 0x24f   : > { %v4097_v57 = vsel %vm3879_vm0, %v7351_v35, -inf  ;;  %v4025_v47 = vsel %vm3879_vm0, %v7348_v20, -inf  ;;  %v10030_v35 = vmul.f32 0.2, %v9975_v8  ;;  %v3956_v20 = vmax.f32 %v3954_v7, %v3955_v46 }
 0x250   : > { %v10003_v29 = vpop.trf.xlu1  ;;  %v4098_v53 = vmax.f32 %v4096_v62, %v4097_v57  ;;  %v4026_v41 = vmax.f32 %v4024_v48, %v4025_v47  ;;  %7691 = vxpose.xlu1.b32.cont [3/4] (short) %v12755_v31, 128  ;;  %v10033_v62 = vmul.f32 0.2, %v9978_v42  ;;  %v3889_v47 = vsel %vm3879_vm0, %v7265_v61, -inf }
 0x251   : > { %v7356_v50 = vunpack.i.h.bf16 %v10003_v29  ;;  %v3885_v19 = vrot.slane %v3884_v44, 2  ;;  %v3957_v36 = vrot.slane %v3956_v20, 2  ;;  %v7273_v31 = vunpack.i.h.bf16 %v9991_v24 }
 0x252   : > { %v10012_v63 = vpop.trf.xlu0  ;;  %v4099_v45 = vrot.slane %v4098_v53, 4  ;;  %v4027_v54 = vrot.slane %v4026_v41, 4  ;;  %v7353_v7 = vunpack.i.l.bf16 %v10003_v29 }
 0x253   : > { %v3958_v59 = vmax.f32 %v3956_v20, %v3957_v36  ;;  %v3962_v61 = vsel %vm3879_vm0, %v7273_v31, -inf  ;;  %v4105_v29 = vsel %vm3879_vm0, %v7356_v50, -inf }
 0x254   : > { %v10018_v9 = vpop.trf.xlu1  ;;  %v4100_v48 = vmax.f32 %v4098_v53, %v4099_v45  ;;  %v4028_v11 = vmax.f32 %v4026_v41, %v4027_v54  ;;  %7693 = vxpose.xlu1.b32.end [4/4] (short) %v12757_v34, 128  ;;  %v3886_v53 = vmax.f32 %v3884_v44, %v3885_v19  ;;  %v7270_v41 = vunpack.i.l.bf16 %v9991_v24 }
 0x255   : > { %v3963_v54 = vmax.f32 %v3961_v51, %v3962_v61  ;;  %v7361_v49 = vunpack.i.h.bf16 %v10018_v9  ;;  %v3959_v10 = vrot.slane %v3958_v59, 1 }
 0x256   : > { %v10027_v6 = vpop.trf.xlu0  ;;  %v4101_v46 = vrot.slane %v4100_v48, 2  ;;  %v4029_v60 = vrot.slane %v4028_v11, 2  ;;  %v3887_v52 = vrot.slane %v3886_v53, 1  ;;  %v3890_v44 = vsel %vm3879_vm0, %v7270_v41, -inf }
 0x257   : > { %v3964_v20 = vrot.slane %v3963_v54, 4  ;;  %v4106_v19 = vsel %vm3879_vm0, %v7361_v49, -inf  ;;  %v3891_v24 = vmax.f32 %v3889_v47, %v3890_v44  ;;  %v7278_v41 = vunpack.i.h.bf16 %v10012_v63 }
 0x258   : > { %v10035_v57 = vpop.trf.xlu1  ;;  %v4102_v38 = vmax.f32 %v4100_v48, %v4101_v46  ;;  %v4030_v34 = vmax.f32 %v4028_v11, %v4029_v60  ;;  %v3888_v36 = vmax.f32 %v3886_v53, %v3887_v52  ;;  %v4033_v48 = vsel %vm3879_vm0, %v7353_v7, -inf }
 0x259   : > { %v3960_v46 = vmax.f32 %v3958_v59, %v3959_v10  ;;  %v3965_v61 = vmax.f32 %v3963_v54, %v3964_v20  ;;  %v7358_v11 = vunpack.i.l.bf16 %v10018_v9  ;;  %v3892_v33 = vrot.slane %v3891_v24, 4 }
 0x25a   : > { %v10044_v5 = vpop.trf.xlu0  ;;  %v4103_v31 = vrot.slane %v4102_v38, 1  ;;  %v4031_v60 = vrot.slane %v4030_v34, 1  ;;  %v4107_v50 = vmax.f32 %v4105_v29, %v4106_v19  ;;  %v7275_v54 = vunpack.i.l.bf16 %v10012_v63 }
 0x25b   : > { %v3966_v49 = vrot.slane %v3965_v61, 2  ;;  %v4034_v53 = vsel %vm3879_vm0, %v7358_v11, -inf  ;;  %v3893_v7 = vmax.f32 %v3891_v24, %v3892_v33  ;;  %v7366_v9 = vunpack.i.h.bf16 %v10035_v57 }
 0x25c   : > { %v10048_v45 = vpop.trf.xlu1  ;;  %v4104_v52 = vmax.f32 %v4102_v38, %v4103_v31  ;;  %v4035_v28 = vmax.f32 %v4033_v48, %v4034_v53  ;;  %v4108_v47 = vrot.slane %v4107_v50, 4  ;;  %v4032_v23 = vmax.f32 %v4030_v34, %v4031_v60 }
 0x25d   : > { %v3967_v59 = vmax.f32 %v3965_v61, %v3966_v49  ;;  %v3894_v10 = vrot.slane %v3893_v7, 2  ;;  %v3970_v11 = vsel %vm3879_vm0, %v7278_v41, -inf  ;;  %v3898_v33 = vsel %vm3879_vm0, %v7275_v54, -inf }
 0x25e   : > { %v10052_v4 = vpop.trf.xlu0  ;;  %v4036_v29 = vrot.slane %v4035_v28, 4  ;;  %v4109_v20 = vmax.f32 %v4107_v50, %v4108_v47  ;;  %v4114_v24 = vsel %vm3879_vm0, %v7366_v9, -inf  ;;  %v7363_v49 = vunpack.i.l.bf16 %v10035_v57 }
 0x25f   : > { %v3968_v26 = vrot.slane %v3967_v59, 1  ;;  %v3895_v38 = vmax.f32 %v3893_v7, %v3894_v10  ;;  %v7283_v50 = vunpack.i.h.bf16 %v10027_v6  ;;  %v7280_v7 = vunpack.i.l.bf16 %v10027_v6 }
 0x260   : > { %v10058_v51 = vpop.trf.xlu1  ;;  %v4037_v31 = vmax.f32 %v4035_v28, %v4036_v29  ;;  %v4110_v48 = vrot.slane %v4109_v20, 2  ;;  %v7371_v54 = vunpack.i.h.bf16 %v10048_v45  ;;  %v4042_v6 = vsel %vm3879_vm0, %v7363_v49, -inf }
 0x261   : > { %v3969_v63 = vmax.f32 %v3967_v59, %v3968_v26  ;;  %v3896_v53 = vrot.slane %v3895_v38, 1  ;;  %v3971_v28 = vsel %vm3879_vm0, %v7283_v50, -inf  ;;  %v3899_v29 = vsel %vm3879_vm0, %v7280_v7, -inf }
 0x262   : > { %v10062_v22 = vpop.trf.xlu0  ;;  %v4038_v47 = vrot.slane %v4037_v31, 2  ;;  %v4111_v34 = vmax.f32 %v4109_v20, %v4110_v48  ;;  %v3972_v57 = vmax.f32 %v3970_v11, %v3971_v28  ;;  %v4115_v20 = vsel %vm3879_vm0, %v7371_v54, -inf }
 0x263   : > { %v10081_v41 = vsel %vm6440_vm1, %v3969_v63, %v3960_v46  ;;  %v3897_v9 = vmax.f32 %v3895_v38, %v3896_v53  ;;  %v3900_v16 = vmax.f32 %v3898_v33, %v3899_v29  ;;  %v7368_v38 = vunpack.i.l.bf16 %v10048_v45 }
 0x264   : > { %v10065_v44 = vpop.trf.xlu1  ;;  %v4039_v26 = vmax.f32 %v4037_v31, %v4038_v47  ;;  %v4112_v59 = vrot.slane %v4111_v34, 1  ;;  %v3973_v43 = vrot.slane %v3972_v57, 4  ;;  %v4116_v31 = vmax.f32 %v4114_v24, %v4115_v20 }
 0x265   : > { %v6441_v48 = vsel %vm6440_vm1, %v3897_v9, %v3888_v36  ;;  %v3901_v47 = vrot.slane %v3900_v16, 4  ;;  %v4043_v36 = vsel %vm3879_vm0, %v7368_v38, -inf  ;;  %v7288_v33 = vunpack.i.h.bf16 %v10044_v5 }
 0x266   : > { %v10069_v19 = vpop.trf.xlu0  ;;  %v4040_v46 = vrot.slane %v4039_v26, 1  ;;  %v4113_v63 = vmax.f32 %v4111_v34, %v4112_v59  ;;  %v3974_v7 = vmax.f32 %v3972_v57, %v3973_v43  ;;  %v4117_v34 = vrot.slane %v4116_v31, 4 }
 0x267   : > { %v3902_v49 = vmax.f32 %v3900_v16, %v3901_v47  ;;  %v4044_v9 = vmax.f32 %v4042_v6, %v4043_v36  ;;  %v7285_v24 = vunpack.i.l.bf16 %v10044_v5  ;;  %v7373_v5 = vunpack.i.l.bf16 %v10058_v51 }
 0x268   : > { %v10074_v61 = vpop.trf.xlu1  ;;  %v4041_v11 = vmax.f32 %v4039_v26, %v4040_v46  ;;  %v6468_v53 = vsel %vm6440_vm1, %v4113_v63, %v4104_v52  ;;  %v3975_v45 = vrot.slane %v3974_v7, 2  ;;  %v4118_v52 = vmax.f32 %v4116_v31, %v4117_v34 }
 0x269   : > { %v7376_v26 = vunpack.i.h.bf16 %v10058_v51  ;;  %v3903_v43 = vrot.slane %v3902_v49, 2  ;;  %v4045_v57 = vrot.slane %v4044_v9, 4  ;;  %v3907_v16 = vsel %vm3879_vm0, %v7285_v24, -inf  ;;  %v2466_v24 = vpop.f32.mrf.mxu1 }
 0x26a   : > { %v10078_v60 = vpop.trf.xlu0  ;;  %v6461_v54 = vsel %vm6440_vm1, %v4041_v11, %v4032_v23  ;;  %v3976_v20 = vmax.f32 %v3974_v7, %v3975_v45  ;;  %v4119_v46 = vrot.slane %v4118_v52, 2  ;;  %v3979_v23 = vsel %vm3879_vm0, %v7288_v33, -inf }
 0x26b   : > { %v3904_v63 = vmax.f32 %v3902_v49, %v3903_v43  ;;  %v4046_v6 = vmax.f32 %v4044_v9, %v4045_v57  ;;  %v7293_v38 = vunpack.i.h.bf16 %v10052_v4  ;;  %v4123_v34 = vsel %vm3879_vm0, %v7376_v26, -inf }
 0x26c   : > { %v10086_v10 = vpop.trf.xlu1  ;;  %v3977_v11 = vrot.slane %v3976_v20, 1  ;;  %v4120_v47 = vmax.f32 %v4118_v52, %v4119_v46  ;;  %v7290_v9 = vunpack.i.l.bf16 %v10052_v4  ;;  %v7381_v30 = vunpack.i.h.bf16 %v10065_v44 }
 0x26d   : > { %v3905_v7 = vrot.slane %v3904_v63, 1  ;;  %v4047_v36 = vrot.slane %v4046_v6, 2  ;;  %v3980_v33 = vsel %vm3879_vm0, %v7293_v38, -inf  ;;  %v4051_v26 = vsel %vm3879_vm0, %v7373_v5, -inf }
 0x26e   : > { %v10091_v50 = vpop.trf.xlu0  ;;  %v3978_v12 = vmax.f32 %v3976_v20, %v3977_v11  ;;  %v4121_v49 = vrot.slane %v4120_v47, 1  ;;  %v3981_v51 = vmax.f32 %v3979_v23, %v3980_v33  ;;  %v3908_v38 = vsel %vm3879_vm0, %v7290_v9, -inf }
 0x26f   : > { %v3906_v43 = vmax.f32 %v3904_v63, %v3905_v7  ;;  %v4048_v57 = vmax.f32 %v4046_v6, %v4047_v36  ;;  %v3909_v11 = vmax.f32 %v3907_v16, %v3908_v38  ;;  %v4124_v4 = vsel %vm3879_vm0, %v7381_v30, -inf  ;;  %v2468_v6 = vpop.f32.mrf.mxu1 }
 0x270   : > { %v10096_v28 = vpop.trf.xlu1  ;;  %v10124_v52 = vsel %vm6442_vm2, %v3978_v12, %v10081_v41  ;;  %v4122_v46 = vmax.f32 %v4120_v47, %v4121_v49  ;;  %v3982_v41 = vrot.slane %v3981_v51, 4  ;;  %v7378_v5 = vunpack.i.l.bf16 %v10065_v44 }
 0x271   : > { %12758 = vst [vmem:[#allocation7_spill] sm:$0xff] %v10124_v52  ;;  %v10129_v17 = vsel %vm6442_vm2, %v3906_v43, %v6441_v48  ;;  %v4049_v20 = vrot.slane %v4048_v57, 1  ;;  %v10144_v48 = vsel %vm2564_vm3, %v9965_v32, %v9996_v18  ;;  %v2724_v16 = vmul.f32 0.2, %v9985_v40 }
 0x272   : > { %v10101_v59 = vpop.trf.xlu0  ;;  %12759 = vst [vmem:[#allocation9_spill] sm:$0xff] %v10129_v17  ;;  %v10137_v12 = vsel %vm6442_vm2, %v4122_v46, %v6468_v53  ;;  %12761 = vst [vmem:[#allocation8_spill] sm:$0xff] %v10144_v48  ;;  %v4125_v47 = vmax.f32 %v4123_v34, %v4124_v4  ;;  %v2467_v7 = vadd.f32 %v2466_v24, %v9320_v14  ;;  %v4052_v36 = vsel %vm3879_vm0, %v7378_v5, -inf }
 0x273   : > { %12760 = vst [vmem:[#allocation11_spill] sm:$0xff] %v10137_v12  ;;  %v4050_v30 = vmax.f32 %v4048_v57, %v4049_v20  ;;  %v2469_v53 = vadd.f32 %v2468_v6, %v9320_v14  ;;  %v4053_v33 = vmax.f32 %v4051_v26, %v4052_v36  ;;  %v10160_v18 = vsel %vm2565_vm4, %v9972_v37, %v9999_v1  ;;  %v12766_v6 = vld [vmem:[#allocation16_spill] sm:$0xff]  ;;  %v12772_v12 = vld [vmem:[#allocation19_spill] sm:$0xff] }
 0x274   : > { %v10106_v29 = vpop.trf.xlu1  ;;  %12763 = vst [vmem:[#allocation14_spill] sm:$0xff] %v10160_v18  ;;  %v10167_v14 = vsel %vm2566_vm5, %v9978_v42, %v10033_v62  ;;  %v3910_v24 = vrot.slane %v3909_v11, 4  ;;  %v4126_v49 = vrot.slane %v4125_v47, 4  ;;  %v7298_v9 = vunpack.i.h.bf16 %v10062_v22 }
 0x275   : > { %v10152_v44 = vsel %vm6442_vm2, %v4050_v30, %v6461_v54  ;;  %12764 = vst [vmem:[#allocation15_spill] sm:$0xff] %v10167_v14  ;;  %v3983_v54 = vmax.f32 %v3981_v51, %v3982_v41  ;;  %v10175_v37 = vsel %vm2596_vm6, %v9985_v40, %v2724_v16  ;;  %vm2597_vm8 = vcmp.gt.f32.partialorder %v2467_v7, 0.0  ;;  %v12767_v40 = vld [vmem:[#allocation18_spill] sm:$0xff] }
 0x276   : > { %v10114_v31 = vpop.trf.xlu0  ;;  %12762 = vst [vmem:[#allocation10_spill] sm:$0xff] %v10152_v44  ;;  %12765 = vst [vmem:[#allocation13_spill] sm:$0xff] %v10175_v37  ;;  %v2725_v1 = vmul.f32 0.2, %v2467_v7  ;;  %vm2598_vm11 = vcmp.gt.f32.partialorder %v2469_v53, 0.0  ;;  %v7295_v57 = vunpack.i.l.bf16 %v10062_v22  ;;  %v7386_v42 = vunpack.i.h.bf16 %v10074_v61 }
 0x277   : > { %v7383_v62 = vunpack.i.l.bf16 %v10074_v61  ;;  %v3984_v51 = vrot.slane %v3983_v54, 2  ;;  %v7303_v46 = vunpack.i.h.bf16 %v10069_v19  ;;  %v3911_v26 = vmax.f32 %v3909_v11, %v3910_v24 }
 0x278   : > { %v10118_v45 = vpop.trf.xlu1  ;;  %v4054_v38 = vrot.slane %v4053_v33, 4  ;;  %v4127_v20 = vmax.f32 %v4125_v47, %v4126_v49  ;;  %v3988_v4 = vsel %vm3879_vm0, %v7298_v9, -inf  ;;  %v12768_v41 = vpack.i.bf16 %v12766_v6, %v12767_v40 }
 0x279   : > { %v3989_v5 = vsel %vm3879_vm0, %v7303_v46, -inf  ;;  %v7300_v22 = vunpack.i.l.bf16 %v10069_v19  ;;  %v7391_v16 = vunpack.i.h.bf16 %v10086_v10  ;;  %v3916_v61 = vsel %vm3879_vm0, %v7295_v57, -inf  ;;  %v12769_v57 = vld [vmem:[#allocation21_spill] sm:$0xff] }
 0x27a   : > { %v10134_v63 = vpop.trf.xlu0  ;;  %v4132_v11 = vsel %vm3879_vm0, %v7386_v42, -inf  ;;  %v4060_v47 = vsel %vm3879_vm0, %v7383_v62, -inf  ;;  %v3990_v36 = vmax.f32 %v3988_v4, %v3989_v5  ;;  %v7388_v46 = vunpack.i.l.bf16 %v10086_v10  ;;  %v12771_v5 = vld [vmem:[#allocation20_spill] sm:$0xff] }
 0x27b   : > { %v3917_v49 = vsel %vm3879_vm0, %v7300_v22, -inf  ;;  %v4133_v9 = vsel %vm3879_vm0, %v7391_v16, -inf  ;;  %v2726_v19 = vmul.f32 0.2, %v2469_v53  ;;  %v10198_v6 = vmax.f32 %v3983_v54, %v3984_v51 }
 0x27c   : > { %v10132_v23 = vpop.trf.xlu1  ;;  %v4055_v40 = vmax.f32 %v4053_v33, %v4054_v38  ;;  %v12770_v32 = vpack.i.bf16 %v9522_v21, %v12769_v57  ;;  %v3991_v42 = vrot.slane %v3990_v36, 4  ;;  %v4061_v62 = vsel %vm3879_vm0, %v7388_v46, -inf }
 0x27d   : > { %v4134_v4 = vmax.f32 %v4132_v11, %v4133_v9  ;;  %v12773_v22 = vpack.i.bf16 %v12771_v5, %v12772_v12  ;;  %v10211_v10 = vsel %vm2595_vm7, %v9975_v8, %v10030_v35  ;;  %v3912_v33 = vrot.slane %v3911_v26, 2  ;;  %v12781_v5 = vld [vmem:[#allocation24_spill] sm:$0xff] }
 0x27e   : > { %v10172_v43 = vpop.trf.xlu0  ;;  %7775 = vxpose.xlu0.b32.start [1/4] (short) %v12768_v41, 128  ;;  %v3918_v41 = vmax.f32 %v3916_v61, %v3917_v49  ;;  %12774 = vst [vmem:[#allocation12_spill] sm:$0xff] %v10211_v10  ;;  %v4062_v51 = vmax.f32 %v4060_v47, %v4061_v62  ;;  %v4128_v16 = vrot.slane %v4127_v20, 2  ;;  %v10222_v61 = vsel %vm2597_vm8, %v2467_v7, %v2725_v1  ;;  %v12777_v47 = vld [vmem:[#allocation23_spill] sm:$0xff]  ;;  %v12778_v49 = vld [vmem:[#allocation25_spill] sm:$0xff]  ;;  %v12780_v62 = vld [vmem:[#allocation22_spill] sm:$0xff] }
 0x27f   : > { %12775 = vst [vmem:[#allocation17_spill] sm:$0xff] %v10222_v61  ;;  %v10225_v8 = vsel %vm2598_vm11, %v2469_v53, %v2726_v19  ;;  %v4056_v35 = vrot.slane %v4055_v40, 2  ;;  %v7308_v11 = vunpack.i.h.bf16 %v10078_v60  ;;  %v12779_v9 = vpack.i.bf16 %v12777_v47, %v12778_v49 }
 0x280   : > { %v10169_v34 = vpop.trf.xlu1  ;;  %v3919_v54 = vrot.slane %v3918_v41, 4  ;;  %12776 = vst [vmem:[#allocation16_spill] sm:$0xff] %v10225_v8  ;;  %v3986_v46 = vrot.slane %v10198_v6, 1  ;;  %v3992_v57 = vmax.f32 %v3990_v36, %v3991_v42  ;;  %v4135_v1 = vrot.slane %v4134_v4, 4 }
 0x281   : > { %v7305_v53 = vunpack.i.l.bf16 %v10078_v60  ;;  %v4129_v21 = vmax.f32 %v4127_v20, %v4128_v16  ;;  %v7396_v44 = vunpack.i.h.bf16 %v10096_v28  ;;  %v7313_v47 = vunpack.i.h.bf16 %v10091_v50  ;;  %v12785_v16 = vld [vmem:[#allocation27_spill] sm:$0xff] }
 0x282   : > { %v10193_v24 = vpop.trf.xlu0  ;;  %7777 = vxpose.xlu0.b32.cont [2/4] (short) %v12770_v32, 128  ;;  %v3913_v32 = vmax.f32 %v3911_v26, %v3912_v33  ;;  %v3920_v7 = vmax.f32 %v3918_v41, %v3919_v54  ;;  %v4063_v36 = vrot.slane %v4062_v51, 4  ;;  %v3997_v42 = vsel %vm3879_vm0, %v7308_v11, -inf  ;;  %v12784_v54 = vld [vmem:[#allocation26_spill] sm:$0xff] }
 0x283   : > { %v12783_v26 = vpack.i.bf16 %v9586_v3, %v9574_v55  ;;  %v3993_v41 = vrot.slane %v3992_v57, 2  ;;  %v7393_v60 = vunpack.i.l.bf16 %v10096_v28  ;;  %v3998_v33 = vsel %vm3879_vm0, %v7313_v47, -inf }
 0x284   : > { %v10188_v30 = vpop.trf.xlu1  ;;  %v7310_v20 = vunpack.i.l.bf16 %v10091_v50  ;;  %v3999_v11 = vmax.f32 %v3997_v42, %v3998_v33  ;;  %v4141_v55 = vsel %vm3879_vm0, %v7396_v44, -inf  ;;  %v7401_v28 = vunpack.i.h.bf16 %v10106_v29 }
 0x285   : > { %7863 = vxpose.xlu1.b32.start [1/4] (short) %v12773_v22, 128  ;;  %v12782_v22 = vpack.i.bf16 %v12780_v62, %v12781_v5  ;;  %v12786_v62 = vpack.i.bf16 %v12784_v54, %v12785_v16  ;;  %v3921_v5 = vrot.slane %v3920_v7, 2  ;;  %v3914_v50 = vrot.slane %v3913_v32, 1 }
 0x286   : > { %v10213_v38 = vpop.trf.xlu0  ;;  %7779 = vxpose.xlu0.b32.cont [3/4] (short) %v12779_v9, 128  ;;  %v4057_v9 = vmax.f32 %v4055_v40, %v4056_v35  ;;  %v4136_v40 = vmax.f32 %v4134_v4, %v4135_v1  ;;  %v3925_v35 = vsel %vm3879_vm0, %v7305_v53, -inf  ;;  %v3926_v3 = vsel %vm3879_vm0, %v7310_v20, -inf }
 0x287   : > { %v4064_v52 = vmax.f32 %v4062_v51, %v4063_v36  ;;  %v3927_v54 = vmax.f32 %v3925_v35, %v3926_v3  ;;  %v4069_v16 = vsel %vm3879_vm0, %v7393_v60, -inf  ;;  %v4142_v4 = vsel %vm3879_vm0, %v7401_v28, -inf }
 0x288   : > { %v10219_v12 = vpop.trf.xlu1  ;;  %v7398_v1 = vunpack.i.l.bf16 %v10106_v29  ;;  %v12787_v53 = vpack.i.bf16 %v9593_v56, %v9615_v15  ;;  %v4058_v44 = vrot.slane %v4057_v9, 1  ;;  %v3994_v42 = vmax.f32 %v3992_v57, %v3993_v41 }
 0x289   : > { %7865 = vxpose.xlu1.b32.cont [2/4] (short) %v12782_v22, 128  ;;  %v4137_v33 = vrot.slane %v4136_v40, 2  ;;  %v4143_v20 = vmax.f32 %v4141_v55, %v4142_v4  ;;  %v3922_v17 = vmax.f32 %v3920_v7, %v3921_v5  ;;  %v10274_v29 = vmax.f32 %v10198_v6, %v3986_v46 }
 0x28a   : > { %v10236_v19 = vpop.trf.xlu0  ;;  %7781 = vxpose.xlu0.b32.end [4/4] (short) %v12783_v26, 128  ;;  %v4130_v26 = vrot.slane %v4129_v21, 1  ;;  %v4070_v51 = vsel %vm3879_vm0, %v7398_v1, -inf  ;;  %v4065_v35 = vrot.slane %v4064_v52, 2  ;;  %v10276_v15 = vmax.f32 %v3913_v32, %v3914_v50 }
 0x28b   : > { %12788 = vst [vmem:[#allocation18_spill] sm:$0xff] %v10274_v29  ;;  %v4071_v56 = vmax.f32 %v4069_v16, %v4070_v51  ;;  %v4000_v41 = vrot.slane %v3999_v11, 4  ;;  %v10280_v55 = vmax.f32 %v4057_v9, %v4058_v44  ;;  %v3928_v7 = vrot.slane %v3927_v54, 4 }
 0x28c   : > { %v10240_v49 = vpop.trf.xlu1  ;;  %12789 = vst [vmem:[#allocation21_spill] sm:$0xff] %v10276_v15  ;;  %v10278_v57 = vmax.f32 %v4129_v21, %v4130_v26  ;;  %v4144_v5 = vrot.slane %v4143_v20, 4  ;;  %v7318_v3 = vunpack.i.h.bf16 %v10101_v59  ;;  %v3923_v4 = vrot.slane %v3922_v17, 1 }
 0x28d   : > { %7867 = vxpose.xlu1.b32.cont [3/4] (short) %v12786_v62, 128  ;;  %12791 = vst [vmem:[#allocation19_spill] sm:$0xff] %v10280_v55  ;;  %v3995_v1 = vrot.slane %v3994_v42, 1  ;;  %v10289_v46 = vmax.f32 %v4064_v52, %v4065_v35  ;;  %v7315_v21 = vunpack.i.l.bf16 %v10101_v59  ;;  %v7406_v32 = vunpack.i.h.bf16 %v10118_v45 }
 0x28e   : > { %v10253_v22 = vpop.trf.xlu0  ;;  %12790 = vst [vmem:[#allocation20_spill] sm:$0xff] %v10278_v57  ;;  %v7403_v9 = vunpack.i.l.bf16 %v10118_v45  ;;  %v4001_v50 = vmax.f32 %v3999_v11, %v4000_v41  ;;  %v7323_v26 = vunpack.i.h.bf16 %v10114_v31  ;;  %v3929_v16 = vmax.f32 %v3927_v54, %v3928_v7 }
 0x28f   : > { %v4072_v44 = vrot.slane %v4071_v56, 4  ;;  %v4145_v51 = vmax.f32 %v4143_v20, %v4144_v5  ;;  %v4006_v60 = vsel %vm3879_vm0, %v7318_v3, -inf  ;;  %v7320_v52 = vunpack.i.l.bf16 %v10114_v31 }
 0x290   : > { %v10258_v47 = vpop.trf.xlu1  ;;  %v7411_v59 = vunpack.i.h.bf16 %v10132_v23  ;;  %v3934_v45 = vsel %vm3879_vm0, %v7315_v21, -inf  ;;  %v4150_v11 = vsel %vm3879_vm0, %v7406_v32, -inf  ;;  %v4078_v54 = vsel %vm3879_vm0, %v7403_v9, -inf }
 0x291   : > { %7869 = vxpose.xlu1.b32.end [4/4] (short) %v12787_v53, 128  ;;  %v10285_v53 = vmax.f32 %v4136_v40, %v4137_v33  ;;  %v4007_v33 = vsel %vm3879_vm0, %v7323_v26, -inf  ;;  %v3935_v20 = vsel %vm3879_vm0, %v7320_v52, -inf  ;;  %v7408_v5 = vunpack.i.l.bf16 %v10132_v23 }
 0x292   : > { %v10266_v62 = vpop.trf.xlu0  ;;  %v4008_v41 = vmax.f32 %v4006_v60, %v4007_v33  ;;  %v4151_v7 = vsel %vm3879_vm0, %v7411_v59, -inf  ;;  %v10309_v3 = vmax.f32 %v3994_v42, %v3995_v1  ;;  %v4073_v26 = vmax.f32 %v4071_v56, %v4072_v44 }
 0x293   : > { %v4139_v31 = vrot.slane %v10285_v53, 1  ;;  %v3936_v57 = vmax.f32 %v3934_v45, %v3935_v20  ;;  %v4002_v21 = vrot.slane %v4001_v50, 2  ;;  %v4079_v32 = vsel %vm3879_vm0, %v7408_v5, -inf }
 0x294   : > { %v10269_v36 = vpop.trf.xlu1  ;;  %12792 = vst [vmem:[#allocation23_spill] sm:$0xff] %v10309_v3  ;;  %v4152_v29 = vmax.f32 %v4150_v11, %v4151_v7  ;;  %v10317_v60 = vmax.f32 %v3922_v17, %v3923_v4  ;;  %v3930_v33 = vrot.slane %v3929_v16, 2  ;;  %v4009_v52 = vrot.slane %v4008_v41, 4 }
 0x295   : > { %v4080_v59 = vmax.f32 %v4078_v54, %v4079_v32  ;;  %v4067_v23 = vrot.slane %v10289_v46, 1  ;;  %v4146_v42 = vrot.slane %v4145_v51, 2  ;;  %v3937_v1 = vrot.slane %v3936_v57, 4 }
 0x296   : > { %v10283_v28 = vpop.trf.xlu0  ;;  %12793 = vst [vmem:[#allocation25_spill] sm:$0xff] %v10317_v60  ;;  %v4074_v3 = vrot.slane %v4073_v26, 2  ;;  %v4153_v44 = vrot.slane %v4152_v29, 4  ;;  %v4003_v20 = vmax.f32 %v4001_v50, %v4002_v21  ;;  %v7325_v5 = vunpack.i.l.bf16 %v10134_v63 }
 0x297   : > { %v4081_v56 = vrot.slane %v4080_v59, 4  ;;  %v7333_v11 = vunpack.i.h.bf16 %v10172_v43  ;;  %v3931_v17 = vmax.f32 %v3929_v16, %v3930_v33  ;;  %v4010_v4 = vmax.f32 %v4008_v41, %v4009_v52 }
 0x298   : > { %v10287_v6 = vpop.trf.xlu1  ;;  %v7328_v54 = vunpack.i.h.bf16 %v10134_v63  ;;  %v4147_v32 = vmax.f32 %v4145_v51, %v4146_v42  ;;  %v3938_v60 = vmax.f32 %v3936_v57, %v3937_v1  ;;  %v7330_v15 = vunpack.i.l.bf16 %v10172_v43 }
 0x299   : > { %v4075_v61 = vmax.f32 %v4073_v26, %v4074_v3  ;;  %v4082_v8 = vmax.f32 %v4080_v59, %v4081_v56  ;;  %v4154_v10 = vmax.f32 %v4152_v29, %v4153_v44  ;;  %v4016_v37 = vsel %vm3879_vm0, %v7333_v11, -inf }
 0x29a   : > { %v10296_v40 = vpop.trf.xlu0  ;;  %v7413_v21 = vunpack.i.l.bf16 %v10169_v34  ;;  %v3943_v18 = vsel %vm3879_vm0, %v7325_v5, -inf  ;;  %v3944_v16 = vsel %vm3879_vm0, %v7330_v15, -inf  ;;  %v7421_v41 = vunpack.i.h.bf16 %v10188_v30 }
 0x29b   : > { %v4011_v57 = vrot.slane %v4010_v4, 2  ;;  %v7416_v43 = vunpack.i.h.bf16 %v10169_v34  ;;  %v3945_v51 = vmax.f32 %v3943_v18, %v3944_v16  ;;  %v4015_v29 = vsel %vm3879_vm0, %v7328_v54, -inf }
 0x29c   : > { %v10301_v35 = vpop.trf.xlu1  ;;  %v4004_v3 = vrot.slane %v4003_v20, 1  ;;  %v3939_v26 = vrot.slane %v3938_v60, 2  ;;  %v4017_v33 = vmax.f32 %v4015_v29, %v4016_v37  ;;  %v4083_v52 = vrot.slane %v4082_v8, 2 }
 0x29d   : > { %v4155_v59 = vrot.slane %v4154_v10, 2  ;;  %v4160_v42 = vsel %vm3879_vm0, %v7421_v41, -inf  ;;  %v3932_v15 = vrot.slane %v3931_v17, 1  ;;  %v4148_v56 = vrot.slane %v4147_v32, 1 }
 0x29e   : > { %v10312_v55 = vpop.trf.xlu0  ;;  %v7418_v44 = vunpack.i.l.bf16 %v10188_v30  ;;  %v4087_v5 = vsel %vm3879_vm0, %v7413_v21, -inf  ;;  %v10347_v18 = vmax.f32 %v10285_v53, %v4139_v31  ;;  %v4076_v34 = vrot.slane %v4075_v61, 1 }
 0x29f   : > { %v10349_v54 = vmax.f32 %v4010_v4, %v4011_v57  ;;  %v4159_v37 = vsel %vm3879_vm0, %v7416_v43, -inf  ;;  %v10352_v16 = vmax.f32 %v3938_v60, %v3939_v26  ;;  %v10357_v14 = vmax.f32 %v4082_v8, %v4083_v52 }
 0x2a0   : > { %v10315_v9 = vpop.trf.xlu1  ;;  %12794 = vst [vmem:[#allocation22_spill] sm:$0xff] %v10347_v18  ;;  %v4088_v41 = vsel %vm3879_vm0, %v7418_v44, -inf  ;;  %v10355_v29 = vmax.f32 %v4159_v37, %v4160_v42  ;;  %v10359_v30 = vmax.f32 %v4154_v10, %v4155_v59  ;;  %v10366_v53 = vmax.f32 %v10289_v46, %v4067_v23 }
 0x2a1   : > { %v10361_v21 = vmax.f32 %v4087_v5, %v4088_v41  ;;  %v10368_v31 = vmax.f32 %v3931_v17, %v3932_v15  ;;  %v10370_v4 = vmax.f32 %v4003_v20, %v4004_v3  ;;  %v10372_v60 = vmax.f32 %v4147_v32, %v4148_v56 }
 0x2a2   : > { %v10320_v45 = vpop.trf.xlu0  ;;  %12795 = vst [vmem:[#allocation24_spill] sm:$0xff] %v10366_v53  ;;  %v7434_v8 = vunpack.i.h.bf16 %v10193_v24  ;;  %v7431_v10 = vunpack.i.l.bf16 %v10193_v24  ;;  %v10378_v43 = vmax.f32 %v4075_v61, %v4076_v34  ;;  %v7522_v46 = vunpack.i.h.bf16 %v10219_v12 }
 0x2a3   : > { %12796 = vst [vmem:[#allocation26_spill] sm:$0xff] %v10368_v31  ;;  %12797 = vst [vmem:[#allocation27_spill] sm:$0xff] %v10370_v4  ;;  %v7519_v17 = vunpack.i.l.bf16 %v10219_v12  ;;  %v7439_v32 = vunpack.i.h.bf16 %v10213_v38  ;;  %v3946_v59 = vrot.slane %v3945_v51, 4  ;;  %v4018_v24 = vrot.slane %v4017_v33, 4  ;;  %v12803_v4 = vld [vmem:[#allocation30_spill] sm:$0xff] }
 0x2a4   : > { %v10324_v7 = vpop.trf.xlu1  ;;  %12798 = vst [vmem:[#allocation79_spill] sm:$0xff] %v10372_v60  ;;  %12799 = vst [vmem:[#allocation80_spill] sm:$0xff] %v10378_v43  ;;  %v4240_v42 = vsel %vm3879_vm0, %v7434_v8, -inf  ;;  %v4168_v15 = vsel %vm3879_vm0, %v7431_v10, -inf  ;;  %v7436_v44 = vunpack.i.l.bf16 %v10213_v38  ;;  %v4384_v5 = vsel %vm3879_vm0, %v7522_v46, -inf }
 0x2a5   : > { %v4241_v56 = vsel %vm3879_vm0, %v7439_v32, -inf  ;;  %v7527_v12 = vunpack.i.h.bf16 %v10240_v49  ;;  %v4312_v37 = vsel %vm3879_vm0, %v7519_v17, -inf  ;;  %v7524_v20 = vunpack.i.l.bf16 %v10240_v49 }
 0x2a6   : > { %v10329_v50 = vpop.trf.xlu0  ;;  %v4242_v34 = vmax.f32 %v4240_v42, %v4241_v56  ;;  %v4169_v41 = vsel %vm3879_vm0, %v7436_v44, -inf  ;;  %v10402_v8 = vmax.f32 %v3945_v51, %v3946_v59  ;;  %v10407_v46 = vmax.f32 %v4017_v33, %v4018_v24 }
 0x2a7   : > { %v4170_v10 = vmax.f32 %v4168_v15, %v4169_v41  ;;  %v4385_v32 = vsel %vm3879_vm0, %v7527_v12, -inf  ;;  %v4313_v42 = vsel %vm3879_vm0, %v7524_v20, -inf  ;;  %v7444_v17 = vunpack.i.h.bf16 %v10236_v19 }
 0x2a8   : > { %v10335_v63 = vpop.trf.xlu1  ;;  %v4243_v26 = vrot.slane %v4242_v34, 4  ;;  %v4386_v56 = vmax.f32 %v4384_v5, %v4385_v32  ;;  %v4314_v49 = vmax.f32 %v4312_v37, %v4313_v42  ;;  %v7441_v59 = vunpack.i.l.bf16 %v10236_v19 }
 0x2a9   : > { %v4171_v44 = vrot.slane %v4170_v10, 4  ;;  %v4249_v33 = vsel %vm3879_vm0, %v7444_v17, -inf  ;;  %v7532_v5 = vunpack.i.h.bf16 %v10258_v47  ;;  %v12800_v19 = vpack.i.bf16 %v9632_v39, %v9629_v0 }
 0x2aa   : > { %v10340_v1 = vpop.trf.xlu0  ;;  %v4244_v52 = vmax.f32 %v4242_v34, %v4243_v26  ;;  %v4387_v51 = vrot.slane %v4386_v56, 4  ;;  %v4315_v18 = vrot.slane %v4314_v49, 4  ;;  %v4177_v37 = vsel %vm3879_vm0, %v7441_v59, -inf }
 0x2ab   : > { %v4172_v12 = vmax.f32 %v4170_v10, %v4171_v44  ;;  %v7529_v10 = vunpack.i.l.bf16 %v10258_v47  ;;  %v7449_v44 = vunpack.i.h.bf16 %v10253_v22  ;;  %v7446_v0 = vunpack.i.l.bf16 %v10253_v22 }
 0x2ac   : > { %v10344_v11 = vpop.trf.xlu1  ;;  %v4245_v41 = vrot.slane %v4244_v52, 2  ;;  %v4388_v20 = vmax.f32 %v4386_v56, %v4387_v51  ;;  %v4316_v34 = vmax.f32 %v4314_v49, %v4315_v18  ;;  %v4393_v18 = vsel %vm3879_vm0, %v7532_v5, -inf }
 0x2ad   : > { %v4173_v32 = vrot.slane %v4172_v12, 2  ;;  %v4250_v49 = vsel %vm3879_vm0, %v7449_v44, -inf  ;;  %v4321_v47 = vsel %vm3879_vm0, %v7529_v10, -inf  ;;  %v12802_v5 = vpack.i.bf16 %v9638_v25, %v9635_v13  ;;  %v12804_v13 = vld [vmem:[#allocation31_spill] sm:$0xff] }
 0x2ae   : > { %v10363_v27 = vpop.trf.xlu0  ;;  %v4246_v26 = vmax.f32 %v4244_v52, %v4245_v41  ;;  %v4389_v42 = vrot.slane %v4388_v20, 2  ;;  %v4317_v51 = vrot.slane %v4316_v34, 2  ;;  %v4251_v41 = vmax.f32 %v4249_v33, %v4250_v49 }
 0x2af   : > { %v4174_v60 = vmax.f32 %v4172_v12, %v4173_v32  ;;  %v4178_v32 = vsel %vm3879_vm0, %v7446_v0, -inf  ;;  %v12805_v25 = vpack.i.bf16 %v12803_v4, %v12804_v13  ;;  %v7451_v4 = vunpack.i.l.bf16 %v10266_v62 }
 0x2b0   : > { %v10374_v57 = vpop.trf.xlu1  ;;  %v4247_v56 = vrot.slane %v4246_v26, 1  ;;  %v4390_v52 = vmax.f32 %v4388_v20, %v4389_v42  ;;  %v4318_v59 = vmax.f32 %v4316_v34, %v4317_v51  ;;  %v7537_v20 = vunpack.i.h.bf16 %v10269_v36 }
 0x2b1   : > { %v4175_v39 = vrot.slane %v4174_v60, 1  ;;  %v4179_v44 = vmax.f32 %v4177_v37, %v4178_v32  ;;  %v4252_v10 = vrot.slane %v4251_v41, 4  ;;  %v12806_v37 = vld [vmem:[#allocation29_spill] sm:$0xff] }
 0x2b2   : > { %v10387_v3 = vpop.trf.xlu0  ;;  %v4391_v12 = vrot.slane %v4390_v52, 1  ;;  %v4248_v34 = vmax.f32 %v4246_v26, %v4247_v56  ;;  %v4319_v51 = vrot.slane %v4318_v59, 1  ;;  %v7454_v26 = vunpack.i.h.bf16 %v10266_v62  ;;  %v12807_v56 = vld [vmem:[#allocation28_spill] sm:$0xff] }
 0x2b3   : > { %v4176_v22 = vmax.f32 %v4174_v60, %v4175_v39  ;;  %v4180_v0 = vrot.slane %v4179_v44, 4  ;;  %v12808_v39 = vpack.i.bf16 %v12806_v37, %v12807_v56  ;;  %v12810_v37 = vld [vmem:[#allocation35_spill] sm:$0xff] }
 0x2b4   : > { %v10389_v61 = vpop.trf.xlu1  ;;  %v4392_v49 = vmax.f32 %v4390_v52, %v4391_v12 }
 0x2b6   : > { %v10400_v23 = vpop.trf.xlu0 }
 0x2b8   : > { %v10405_v38 = vpop.trf.xlu1 }
 0x2ba   : > { %v10413_v15 = vpop.trf.xlu0 }
 0x2bb   : > { %7951 = vxpose.xlu0.b32.start [1/4] (short) %v12800_v19, 128  ;;  %v12801_v19 = vpack.i.bf16 %v9647_v2, %v9662_v58  ;;  %v4394_v2 = vsel %vm3879_vm0, %v7537_v20, -inf  ;;  %v7534_v58 = vunpack.i.l.bf16 %v10269_v36  ;;  %v4181_v20 = vmax.f32 %v4179_v44, %v4180_v0 }
 0x2bc   : > { %v10416_v24 = vpop.trf.xlu1  ;;  %v4395_v53 = vmax.f32 %v4393_v18, %v4394_v2  ;;  %v4320_v18 = vmax.f32 %v4318_v59, %v4319_v51  ;;  %v4258_v44 = vsel %vm3879_vm0, %v7454_v26, -inf  ;;  %v12813_v59 = vld [vmem:[#allocation34_spill] sm:$0xff]  ;;  %v7459_v26 = vunpack.i.h.bf16 %v10283_v28 }
 0x2bd   : > { %v4322_v60 = vsel %vm3879_vm0, %v7534_v58, -inf }
 0x2be   : > { %v10425_v17 = vpop.trf.xlu0  ;;  %v4323_v52 = vmax.f32 %v4321_v47, %v4322_v60  ;;  %v4396_v12 = vrot.slane %v4395_v53, 4  ;;  %v4186_v47 = vsel %vm3879_vm0, %v7451_v4, -inf  ;;  %v12812_v60 = vld [vmem:[#allocation32_spill] sm:$0xff]  ;;  %v4259_v31 = vsel %vm3879_vm0, %v7459_v26, -inf }
 0x2bf   : > { %7953 = vxpose.xlu0.b32.cont [2/4] (short) %v12801_v19, 128  ;;  %v4253_v19 = vmax.f32 %v4251_v41, %v4252_v10  ;;  %v4182_v10 = vrot.slane %v4181_v20, 2  ;;  %v12814_v51 = vpack.i.bf16 %v12812_v60, %v12813_v59  ;;  %v7456_v60 = vunpack.i.l.bf16 %v10283_v28 }
 0x2c0   : > { %v10427_v43 = vpop.trf.xlu1  ;;  %v4324_v58 = vrot.slane %v4323_v52, 4  ;;  %v4397_v13 = vmax.f32 %v4395_v53, %v4396_v12  ;;  %v7547_v59 = vunpack.i.h.bf16 %v10301_v35 }
 0x2c1   : > { %v4254_v36 = vrot.slane %v4253_v19, 2 }
 0x2c2   : > { %8039 = vxpose.xlu1.b32.start [1/4] (short) %v12802_v5, 128  ;;  %v10441_v42 = vpop.trf.xlu0  ;;  %v7542_v5 = vunpack.i.h.bf16 %v10287_v6  ;;  %v4398_v53 = vrot.slane %v4397_v13, 2  ;;  %v4403_v28 = vsel %vm3879_vm0, %v7547_v59, -inf  ;;  %v7461_v59 = vunpack.i.l.bf16 %v10296_v40 }
 0x2c3   : > { %7955 = vxpose.xlu0.b32.cont [3/4] (short) %v12805_v25, 128  ;;  %v4255_v2 = vmax.f32 %v4253_v19, %v4254_v36  ;;  %v12809_v25 = vld [vmem:[#allocation33_spill] sm:$0xff]  ;;  %v4325_v36 = vmax.f32 %v4323_v52, %v4324_v58 }
 0x2c4   : > { %v10443_v33 = vpop.trf.xlu1  ;;  %v12811_v56 = vpack.i.bf16 %v12809_v25, %v12810_v37  ;;  %v4402_v0 = vsel %vm3879_vm0, %v7542_v5, -inf  ;;  %v7539_v25 = vunpack.i.l.bf16 %v10287_v6  ;;  %v4399_v5 = vmax.f32 %v4397_v13, %v4398_v53 }
 0x2c5   : > { %v4256_v19 = vrot.slane %v4255_v2, 1  ;;  %v4187_v13 = vsel %vm3879_vm0, %v7456_v60, -inf }
 0x2c6   : > { %8041 = vxpose.xlu1.b32.cont [2/4] (short) %v12808_v39, 128  ;;  %v10455_v32 = vpop.trf.xlu0  ;;  %v4183_v39 = vmax.f32 %v4181_v20, %v4182_v10  ;;  %v12817_v20 = vld [vmem:[#allocation36_spill] sm:$0xff]  ;;  %v12818_v10 = vld [vmem:[#allocation37_spill] sm:$0xff] }
 0x2c7   : > { %7957 = vxpose.xlu0.b32.end [4/4] (short) %v12811_v56, 128  ;;  %v4257_v4 = vmax.f32 %v4255_v2, %v4256_v19  ;;  %v4326_v56 = vrot.slane %v4325_v36, 2  ;;  %v12819_v52 = vpack.i.bf16 %v12817_v20, %v12818_v10  ;;  %v4260_v19 = vmax.f32 %v4258_v44, %v4259_v31 }
 0x2c8   : > { %v10457_v41 = vpop.trf.xlu1  ;;  %v4184_v37 = vrot.slane %v4183_v39, 1  ;;  %v4188_v20 = vmax.f32 %v4186_v47, %v4187_v13  ;;  %v4330_v10 = vsel %vm3879_vm0, %v7539_v25, -inf  ;;  %v7464_v47 = vunpack.i.h.bf16 %v10296_v40 }
 0x2c9   : > { %v6482_v6 = vsel %vm6440_vm1, %v4257_v4, %v4248_v34  ;;  %v4327_v48 = vmax.f32 %v4325_v36, %v4326_v56  ;;  %v4404_v34 = vmax.f32 %v4402_v0, %v4403_v28  ;;  %v7469_v40 = vunpack.i.h.bf16 %v10312_v55 }
 0x2ca   : > { %8043 = vxpose.xlu1.b32.cont [3/4] (short) %v12814_v51, 128  ;;  %v10470_v62 = vpop.trf.xlu0  ;;  %v4185_v51 = vmax.f32 %v4183_v39, %v4184_v37  ;;  %v7544_v39 = vunpack.i.l.bf16 %v10301_v35  ;;  %v4189_v56 = vrot.slane %v4188_v20, 4 }
 0x2cb   : > { %12815 = vst [vmem:[#allocation30_spill] sm:$0xff] %v10470_v62  ;;  %v4400_v62 = vrot.slane %v4399_v5, 1  ;;  %v4328_v26 = vrot.slane %v4327_v48, 1  ;;  %v4405_v60 = vrot.slane %v4404_v34, 4 }
 0x2cc   : > { %v10472_v12 = vpop.trf.xlu1  ;;  %v6475_v53 = vsel %vm6440_vm1, %v4185_v51, %v4176_v22  ;;  %v4331_v22 = vsel %vm3879_vm0, %v7544_v39, -inf  ;;  %v4190_v25 = vmax.f32 %v4188_v20, %v4189_v56 }
 0x2cd   : > { %12816 = vst [vmem:[#allocation31_spill] sm:$0xff] %v10472_v12  ;;  %v4401_v12 = vmax.f32 %v4399_v5, %v4400_v62  ;;  %v4329_v37 = vmax.f32 %v4327_v48, %v4328_v26  ;;  %v4332_v5 = vmax.f32 %v4330_v10, %v4331_v22  ;;  %v4406_v0 = vmax.f32 %v4404_v34, %v4405_v60 }
 0x2ce   : > { %8045 = vxpose.xlu1.b32.end [4/4] (short) %v12819_v52, 128  ;;  %v10482_v58 = vpop.trf.xlu0  ;;  %v4261_v52 = vrot.slane %v4260_v19, 4  ;;  %v7552_v48 = vunpack.i.h.bf16 %v10315_v9  ;;  %v4267_v26 = vsel %vm3879_vm0, %v7464_v47, -inf }
 0x2cf   : > { %v6496_v4 = vsel %vm6440_vm1, %v4401_v12, %v4392_v49  ;;  %v6489_v62 = vsel %vm6440_vm1, %v4329_v37, %v4320_v18  ;;  %v4191_v12 = vrot.slane %v4190_v25, 2  ;;  %v4333_v51 = vrot.slane %v4332_v5, 4 }
 0x2d0   : > { %v10485_v2 = vpop.trf.xlu1  ;;  %v4262_v44 = vmax.f32 %v4260_v19, %v4261_v52  ;;  %v4407_v28 = vrot.slane %v4406_v0, 2  ;;  %v4195_v18 = vsel %vm3879_vm0, %v7461_v59, -inf  ;;  %v7549_v52 = vunpack.i.l.bf16 %v10315_v9 }
 0x2d1   : > { %v4192_v20 = vmax.f32 %v4190_v25, %v4191_v12  ;;  %v4334_v10 = vmax.f32 %v4332_v5, %v4333_v51  ;;  %v4411_v60 = vsel %vm3879_vm0, %v7552_v48, -inf  ;;  %v7466_v25 = vunpack.i.l.bf16 %v10312_v55 }
 0x2d2   : > { %v10492_v36 = vpop.trf.xlu0  ;;  %v4263_v35 = vrot.slane %v4262_v44, 2  ;;  %v4408_v34 = vmax.f32 %v4406_v0, %v4407_v28  ;;  %v7557_v51 = vunpack.i.h.bf16 %v10324_v7 }
 0x2d3   : > { %v4193_v56 = vrot.slane %v4192_v20, 1  ;;  %v4335_v22 = vrot.slane %v4334_v10, 2  ;;  %v4196_v48 = vsel %vm3879_vm0, %v7466_v25, -inf }
 0x2d4   : > { %v10495_v31 = vpop.trf.xlu1  ;;  %v4264_v19 = vmax.f32 %v4262_v44, %v4263_v35  ;;  %v4268_v44 = vsel %vm3879_vm0, %v7469_v40, -inf  ;;  %v4409_v59 = vrot.slane %v4408_v34, 1  ;;  %v4197_v55 = vmax.f32 %v4195_v18, %v4196_v48 }
 0x2d5   : > { %v4269_v5 = vmax.f32 %v4267_v26, %v4268_v44  ;;  %v4194_v9 = vmax.f32 %v4192_v20, %v4193_v56  ;;  %v4336_v12 = vmax.f32 %v4334_v10, %v4335_v22  ;;  %v4412_v26 = vsel %vm3879_vm0, %v7557_v51, -inf }
 0x2d6   : > { %v10502_v49 = vpop.trf.xlu0  ;;  %v4265_v39 = vrot.slane %v4264_v19, 1  ;;  %v4410_v28 = vmax.f32 %v4408_v34, %v4409_v59  ;;  %v7554_v34 = vunpack.i.l.bf16 %v10324_v7  ;;  %v4198_v22 = vrot.slane %v4197_v55, 4 }
 0x2d7   : > { %v4413_v44 = vmax.f32 %v4411_v60, %v4412_v26  ;;  %v12824_v59 = vrot.slane %v10349_v54, 1  ;;  %v12828_v51 = vrot.slane %v10352_v16, 1  ;;  %v12830_v48 = vrot.slane %v10357_v14, 1 }
 0x2d8   : > { %v10504_v13 = vpop.trf.xlu1  ;;  %v4266_v47 = vmax.f32 %v4264_v19, %v4265_v39  ;;  %v10526_v19 = vsel %vm6442_vm2, %v4194_v9, %v6475_v53  ;;  %v4337_v39 = vrot.slane %v4336_v12, 1  ;;  %v10532_v10 = vsel %vm6442_vm2, %v4410_v28, %v6496_v4 }
 0x2d9   : > { %12822 = vst [vmem:[#allocation33_spill] sm:$0xff] %v10526_v19  ;;  %12823 = vst [vmem:[#allocation35_spill] sm:$0xff] %v10532_v10  ;;  %v4090_v53 = vrot.slane %v10361_v21, 4  ;;  %v10543_v25 = vmax.f32 %v10349_v54, %v12824_v59  ;;  %v12826_v4 = vrot.slane %v10355_v29, 4  ;;  %v10556_v28 = vmax.f32 %v10352_v16, %v12828_v51 }
 0x2da   : > { %v10510_v37 = vpop.trf.xlu0  ;;  %v10519_v0 = vsel %vm6442_vm2, %v4266_v47, %v6482_v6  ;;  %v4270_v6 = vrot.slane %v4269_v5, 4  ;;  %v4338_v56 = vmax.f32 %v4336_v12, %v4337_v39  ;;  %v4340_v47 = vsel %vm3879_vm0, %v7554_v34, -inf }
 0x2db   : > { %12820 = vst [vmem:[#allocation29_spill] sm:$0xff] %v10510_v37  ;;  %12821 = vst [vmem:[#allocation28_spill] sm:$0xff] %v10519_v0  ;;  %v4339_v37 = vsel %vm3879_vm0, %v7549_v52, -inf  ;;  %v3948_v52 = vrot.slane %v10402_v8, 2  ;;  %v4163_v7 = vmax.f32 %v10355_v29, %v12826_v4  ;;  %v10561_v54 = vmax.f32 %v10357_v14, %v12830_v48 }
 0x2dc   : > { %v10514_v35 = vpop.trf.xlu1  ;;  %12825 = vst [vmem:[#allocation32_spill] sm:$0xff] %v10543_v25  ;;  %v10549_v9 = vsel %vm6442_vm2, %v4338_v56, %v6489_v62  ;;  %v4341_v12 = vmax.f32 %v4339_v37, %v4340_v47  ;;  %12829 = vst [vmem:[#allocation36_spill] sm:$0xff] %v10556_v28  ;;  %v12832_v39 = vrot.slane %v10359_v30, 1  ;;  %v4271_v62 = vmax.f32 %v4269_v5, %v4270_v6 }
 0x2dd   : > { %12827 = vst [vmem:[#allocation34_spill] sm:$0xff] %v10549_v9  ;;  %12831 = vst [vmem:[#allocation37_spill] sm:$0xff] %v10561_v54  ;;  %v4199_v26 = vmax.f32 %v4197_v55, %v4198_v22  ;;  %v4414_v37 = vrot.slane %v4413_v44, 4  ;;  %v7474_v34 = vunpack.i.h.bf16 %v10320_v45  ;;  %v10570_v56 = vmax.f32 %v10402_v8, %v3948_v52 }
 0x2de   : > { %v10523_v40 = vpop.trf.xlu0  ;;  %v10566_v29 = vmax.f32 %v10359_v30, %v12832_v39  ;;  %v4020_v16 = vrot.slane %v10407_v46, 2  ;;  %v4091_v47 = vmax.f32 %v10361_v21, %v4090_v53  ;;  %v4164_v14 = vrot.slane %v4163_v7, 2 }
 0x2df   : > { %12834 = vst [vmem:[#allocation82_spill] sm:$0xff] %v10570_v56  ;;  %v7471_v4 = vunpack.i.l.bf16 %v10320_v45  ;;  %v7562_v30 = vunpack.i.h.bf16 %v10335_v63  ;;  %v7559_v5 = vunpack.i.l.bf16 %v10335_v63  ;;  %v4272_v6 = vrot.slane %v4271_v62, 2 }
 0x2e0   : > { %v10529_v20 = vpop.trf.xlu1  ;;  %12833 = vst [vmem:[#allocation81_spill] sm:$0xff] %v10566_v29  ;;  %v7479_v22 = vunpack.i.h.bf16 %v10329_v50  ;;  %v4200_v8 = vrot.slane %v4199_v26, 2  ;;  %v4342_v52 = vrot.slane %v4341_v12, 4  ;;  %v4415_v51 = vmax.f32 %v4413_v44, %v4414_v37 }
 0x2e1   : > { %v4276_v48 = vsel %vm3879_vm0, %v7474_v34, -inf  ;;  %v7476_v53 = vunpack.i.l.bf16 %v10329_v50  ;;  %v7567_v45 = vunpack.i.h.bf16 %v10344_v11  ;;  %v4204_v63 = vsel %vm3879_vm0, %v7471_v4, -inf }
 0x2e2   : > { %v10538_v18 = vpop.trf.xlu0  ;;  %v4277_v21 = vsel %vm3879_vm0, %v7479_v22, -inf  ;;  %v4420_v10 = vsel %vm3879_vm0, %v7562_v30, -inf  ;;  %v4348_v9 = vsel %vm3879_vm0, %v7559_v5, -inf  ;;  %v7564_v34 = vunpack.i.l.bf16 %v10344_v11 }
 0x2e3   : > { %v4278_v0 = vmax.f32 %v4276_v48, %v4277_v21  ;;  %v4205_v44 = vsel %vm3879_vm0, %v7476_v53, -inf  ;;  %v4421_v37 = vsel %vm3879_vm0, %v7567_v45, -inf  ;;  %v10597_v50 = vmax.f32 %v10407_v46, %v4020_v16 }
 0x2e4   : > { %v10551_v60 = vpop.trf.xlu1  ;;  %v4092_v22 = vrot.slane %v4091_v47, 2  ;;  %v10599_v29 = vmax.f32 %v4163_v7, %v4164_v14  ;;  %v4206_v4 = vmax.f32 %v4204_v63, %v4205_v44  ;;  %v4343_v54 = vmax.f32 %v4341_v12, %v4342_v52 }
 0x2e5   : > { %12835 = vst [vmem:[#allocation83_spill] sm:$0xff] %v10597_v50  ;;  %v4349_v30 = vsel %vm3879_vm0, %v7564_v34, -inf  ;;  %v4422_v5 = vmax.f32 %v4420_v10, %v4421_v37  ;;  %v4273_v21 = vmax.f32 %v4271_v62, %v4272_v6  ;;  %v4279_v53 = vrot.slane %v4278_v0, 4 }
 0x2e6   : > { %v10574_v59 = vpop.trf.xlu0  ;;  %12836 = vst [vmem:[#allocation84_spill] sm:$0xff] %v10599_v29  ;;  %v4207_v25 = vrot.slane %v4206_v4, 4  ;;  %v4350_v28 = vmax.f32 %v4348_v9, %v4349_v30  ;;  %v4201_v46 = vmax.f32 %v4199_v26, %v4200_v8  ;;  %v4416_v16 = vrot.slane %v4415_v51, 2 }
 0x2e7   : > { %v10608_v14 = vmax.f32 %v4091_v47, %v4092_v22  ;;  %v4423_v52 = vrot.slane %v4422_v5, 4  ;;  %v4344_v10 = vrot.slane %v4343_v54, 2  ;;  %v7484_v63 = vunpack.i.h.bf16 %v10340_v1 }
 0x2e8   : > { %v10579_v55 = vpop.trf.xlu1  ;;  %v4274_v6 = vrot.slane %v4273_v21, 1  ;;  %v4208_v9 = vmax.f32 %v4206_v4, %v4207_v25  ;;  %v4280_v44 = vmax.f32 %v4278_v0, %v4279_v53  ;;  %v4351_v37 = vrot.slane %v4350_v28, 4 }
 0x2e9   : > { %12837 = vst [vmem:[#allocation85_spill] sm:$0xff] %v10608_v14  ;;  %v4202_v26 = vrot.slane %v4201_v46, 1  ;;  %v4417_v8 = vmax.f32 %v4415_v51, %v4416_v16  ;;  %v7489_v30 = vunpack.i.h.bf16 %v10363_v27  ;;  %v4424_v47 = vmax.f32 %v4422_v5, %v4423_v52 }
 0x2ea   : > { %v10586_v39 = vpop.trf.xlu0  ;;  %v7481_v22 = vunpack.i.l.bf16 %v10340_v1  ;;  %v7572_v12 = vunpack.i.h.bf16 %v10374_v57  ;;  %v10619_v7 = vmax.f32 %v4343_v54, %v4344_v10  ;;  %v4285_v11 = vsel %vm3879_vm0, %v7484_v63, -inf }
 0x2eb   : > { %v4286_v29 = vsel %vm3879_vm0, %v7489_v30, -inf  ;;  %v7486_v0 = vunpack.i.l.bf16 %v10363_v27  ;;  %v4209_v4 = vrot.slane %v4208_v9, 2  ;;  %v4281_v53 = vrot.slane %v4280_v44, 2 }
 0x2ec   : > { %v10591_v19 = vpop.trf.xlu1  ;;  %v4352_v51 = vmax.f32 %v4350_v28, %v4351_v37  ;;  %v4287_v16 = vmax.f32 %v4285_v11, %v4286_v29  ;;  %v7569_v1 = vunpack.i.l.bf16 %v10374_v57  ;;  %v7577_v54 = vunpack.i.h.bf16 %v10389_v61  ;;  %v12842_v11 = vld [vmem:[#allocation39_spill] sm:$0xff]  ;;  %v12843_v37 = vld [vmem:[#allocation38_spill] sm:$0xff] }
 0x2ed   : > { %v4214_v5 = vsel %vm3879_vm0, %v7486_v0, -inf  ;;  %v4418_v52 = vrot.slane %v4417_v8, 1  ;;  %v4425_v10 = vrot.slane %v4424_v47, 2  ;;  %v4213_v63 = vsel %vm3879_vm0, %v7481_v22, -inf }
 0x2ee   : > { %v10602_v48 = vpop.trf.xlu0  ;;  %v4429_v27 = vsel %vm3879_vm0, %v7572_v12, -inf  ;;  %v4215_v30 = vmax.f32 %v4213_v63, %v4214_v5  ;;  %v4430_v56 = vsel %vm3879_vm0, %v7577_v54, -inf  ;;  %v7574_v28 = vunpack.i.l.bf16 %v10389_v61 }
 0x2ef   : > { %v12844_v57 = vpack.i.bf16 %v12842_v11, %v12843_v37  ;;  %v10640_v0 = vmax.f32 %v4208_v9, %v4209_v4  ;;  %v4357_v12 = vsel %vm3879_vm0, %v7569_v1, -inf  ;;  %v10649_v54 = vmax.f32 %v4273_v21, %v4274_v6  ;;  %v12848_v4 = vld [vmem:[#allocation43_spill] sm:$0xff]  ;;  %v12853_v21 = vld [vmem:[#allocation41_spill] sm:$0xff]  ;;  %v12854_v6 = vld [vmem:[#allocation40_spill] sm:$0xff] }
 0x2f0   : > { %v10604_v45 = vpop.trf.xlu1  ;;  %v4358_v5 = vsel %vm3879_vm0, %v7574_v28, -inf  ;;  %v4426_v63 = vmax.f32 %v4424_v47, %v4425_v10  ;;  %v10651_v11 = vmax.f32 %v4201_v46, %v4202_v26  ;;  %v4346_v9 = vrot.slane %v10619_v7, 1 }
 0x2f1   : > { %12846 = vst [vmem:[#allocation38_spill] sm:$0xff] %v10649_v54  ;;  %v7494_v28 = vunpack.i.h.bf16 %v10387_v3  ;;  %v4211_v26 = vrot.slane %v10640_v0, 1  ;;  %v7587_v54 = vunpack.i.h.bf16 %v10416_v24 }
 0x2f2   : > { %v10612_v62 = vpop.trf.xlu0  ;;  %12847 = vst [vmem:[#allocation90_spill] sm:$0xff] %v10651_v11 }
 0x2f3   : > { %12838 = vst [vmem:[#allocation86_spill] sm:$0xff] %v10612_v62  ;;  %v4288_v62 = vrot.slane %v4287_v16, 4 }
 0x2f4   : > { %v10614_v34 = vpop.trf.xlu1 }
 0x2f5   : > { %v4289_v1 = vmax.f32 %v4287_v16, %v4288_v62  ;;  %v7491_v62 = vunpack.i.l.bf16 %v10387_v3  ;;  %v7582_v16 = vunpack.i.h.bf16 %v10405_v38 }
 0x2f6   : > { %v10624_v25 = vpop.trf.xlu0 }
 0x2f7   : > { %12839 = vst [vmem:[#allocation87_spill] sm:$0xff] %v10624_v25  ;;  %v10642_v25 = vmax.f32 %v4280_v44, %v4281_v53  ;;  %v4216_v44 = vrot.slane %v4215_v30, 4  ;;  %v12849_v53 = vld [vmem:[#allocation42_spill] sm:$0xff] }
 0x2f8   : > { %v10626_v50 = vpop.trf.xlu1  ;;  %v12850_v37 = vpack.i.bf16 %v12848_v4, %v12849_v53  ;;  %v12857_v4 = vld [vmem:[#allocation47_spill] sm:$0xff] }
 0x2f9   : > { %12840 = vst [vmem:[#allocation88_spill] sm:$0xff] %v10626_v50  ;;  %v4353_v50 = vrot.slane %v4352_v51, 2  ;;  %v4283_v47 = vrot.slane %v10642_v25, 1 }
 0x2fa   : > { %v10635_v29 = vpop.trf.xlu0  ;;  %8127 = vxpose.xlu0.b32.start [1/4] (short) %v12844_v57, 128  ;;  %v10657_v57 = vmax.f32 %v4417_v8, %v4418_v52  ;;  %v4217_v52 = vmax.f32 %v4215_v30, %v4216_v44  ;;  %v7496_v44 = vunpack.i.l.bf16 %v10400_v23 }
 0x2fb   : > { %12841 = vst [vmem:[#allocation89_spill] sm:$0xff] %v10635_v29  ;;  %v4431_v29 = vmax.f32 %v4429_v27, %v4430_v56  ;;  %v12855_v56 = vpack.i.bf16 %v12853_v21, %v12854_v6  ;;  %v4354_v10 = vmax.f32 %v4352_v51, %v4353_v50  ;;  %v4427_v27 = vrot.slane %v4426_v63, 1  ;;  %v12859_v50 = vld [vmem:[#allocation44_spill] sm:$0xff]  ;;  %v12860_v51 = vld [vmem:[#allocation45_spill] sm:$0xff] }
 0x2fc   : > { %v10644_v22 = vpop.trf.xlu1  ;;  %12851 = vst [vmem:[#allocation43_spill] sm:$0xff] %v10657_v57  ;;  %v4294_v6 = vsel %vm3879_vm0, %v7494_v28, -inf  ;;  %v12861_v57 = vpack.i.bf16 %v12859_v50, %v12860_v51  ;;  %v7584_v50 = vunpack.i.l.bf16 %v10416_v24  ;;  %v12864_v51 = vld [vmem:[#allocation49_spill] sm:$0xff] }
 0x2fd   : > { %12845 = vst [vmem:[#allocation39_spill] sm:$0xff] %v10644_v22  ;;  %v4359_v22 = vmax.f32 %v4357_v12, %v4358_v5  ;;  %v4432_v8 = vrot.slane %v4431_v29, 4  ;;  %v7499_v12 = vunpack.i.h.bf16 %v10400_v23  ;;  %v12856_v5 = vld [vmem:[#allocation46_spill] sm:$0xff]  ;;  %v4218_v23 = vrot.slane %v4217_v52, 2 }
 0x2fe   : > { %8129 = vxpose.xlu0.b32.cont [2/4] (short) %v12850_v37, 128  ;;  %v10665_v46 = vpop.trf.xlu0  ;;  %v12858_v53 = vpack.i.bf16 %v12856_v5, %v12857_v4  ;;  %v4290_v37 = vrot.slane %v4289_v1, 2  ;;  %v4222_v4 = vsel %vm3879_vm0, %v7491_v62, -inf  ;;  %v12867_v62 = vld [vmem:[#allocation48_spill] sm:$0xff]  ;;  %v4355_v24 = vrot.slane %v4354_v10, 1 }
 0x2ff   : > { %v4360_v21 = vrot.slane %v4359_v22, 4  ;;  %v4295_v30 = vsel %vm3879_vm0, %v7499_v12, -inf  ;;  %v4433_v5 = vmax.f32 %v4431_v29, %v4432_v8  ;;  %v12865_v12 = vld [vmem:[#allocation51_spill] sm:$0xff] }
 0x300   : > { %v10660_v61 = vpop.trf.xlu1  ;;  %8215 = vxpose.xlu1.b32.start [1/4] (short) %v12855_v56, 128  ;;  %v7579_v56 = vunpack.i.l.bf16 %v10405_v38  ;;  %v4296_v28 = vmax.f32 %v4294_v6, %v4295_v30  ;;  %v4223_v38 = vsel %vm3879_vm0, %v7496_v44, -inf  ;;  %v12866_v14 = vpack.i.bf16 %v12864_v51, %v12865_v12 }
 0x301   : > { %12852 = vst [vmem:[#allocation42_spill] sm:$0xff] %v10660_v61  ;;  %v4361_v61 = vmax.f32 %v4359_v22, %v4360_v21  ;;  %v4224_v29 = vmax.f32 %v4222_v4, %v4223_v38  ;;  %v4367_v30 = vsel %vm3879_vm0, %v7584_v50, -inf  ;;  %v10706_v22 = vmax.f32 %v10640_v0, %v4211_v26 }
 0x302   : > { %8131 = vxpose.xlu0.b32.cont [3/4] (short) %v12858_v53, 128  ;;  %v4438_v53 = vsel %vm3879_vm0, %v7582_v16, -inf  ;;  %v10687_v11 = vpop.trf.xlu0  ;;  %v4297_v8 = vrot.slane %v4296_v28, 4  ;;  %v4366_v6 = vsel %vm3879_vm0, %v7579_v56, -inf  ;;  %v10709_v21 = vmax.f32 %v10642_v25, %v4283_v47 }
 0x303   : > { %12863 = vst [vmem:[#allocation40_spill] sm:$0xff] %v10687_v11  ;;  %v4434_v11 = vrot.slane %v4433_v5, 2  ;;  %v4225_v51 = vrot.slane %v4224_v29, 4  ;;  %12871 = vst [vmem:[#allocation47_spill] sm:$0xff] %v10706_v22  ;;  %v4219_v4 = vmax.f32 %v4217_v52, %v4218_v23  ;;  %v4291_v56 = vmax.f32 %v4289_v1, %v4290_v37 }
 0x304   : > { %8217 = vxpose.xlu1.b32.cont [2/4] (short) %v12861_v57, 128  ;;  %v10680_v3 = vpop.trf.xlu1  ;;  %v4439_v57 = vsel %vm3879_vm0, %v7587_v54, -inf  ;;  %v10701_v54 = vmax.f32 %v10619_v7, %v4346_v9  ;;  %12872 = vst [vmem:[#allocation44_spill] sm:$0xff] %v10709_v21  ;;  %v4368_v38 = vmax.f32 %v4366_v6, %v4367_v30  ;;  %v12874_v7 = vld [vmem:[#allocation52_spill] sm:$0xff]  ;;  %v4362_v12 = vrot.slane %v4361_v61, 2 }
 0x305   : > { %12862 = vst [vmem:[#allocation41_spill] sm:$0xff] %v10680_v3  ;;  %v12868_v3 = vld [vmem:[#allocation50_spill] sm:$0xff]  ;;  %v4440_v44 = vmax.f32 %v4438_v53, %v4439_v57  ;;  %v12873_v53 = vld [vmem:[#allocation53_spill] sm:$0xff]  ;;  %v10716_v57 = vmax.f32 %v4426_v63, %v4427_v27  ;;  %v4435_v0 = vmax.f32 %v4433_v5, %v4434_v11  ;;  %v4226_v26 = vmax.f32 %v4224_v29, %v4225_v51 }
 0x306   : > { %8133 = vxpose.xlu0.b32.end [4/4] (short) %v12866_v14, 128  ;;  %v12869_v16 = vpack.i.bf16 %v12867_v62, %v12868_v3  ;;  %12870 = vst [vmem:[#allocation46_spill] sm:$0xff] %v10701_v54  ;;  %v4298_v3 = vmax.f32 %v4296_v28, %v4297_v8  ;;  %v10711_v50 = vpop.trf.xlu0  ;;  %v12875_v9 = vpack.i.bf16 %v12873_v53, %v12874_v7  ;;  %v7501_v47 = vunpack.i.l.bf16 %v10413_v15 }
 0x307   : > { %12876 = vst [vmem:[#allocation45_spill] sm:$0xff] %v10716_v57  ;;  %v4441_v62 = vrot.slane %v4440_v44, 4  ;;  %v7506_v1 = vunpack.i.l.bf16 %v10425_v17  ;;  %v4220_v52 = vrot.slane %v4219_v4, 1  ;;  %v4292_v37 = vrot.slane %v4291_v56, 1 }
 0x308   : > { %8219 = vxpose.xlu1.b32.cont [3/4] (short) %v12869_v16, 128  ;;  %v10703_v14 = vpop.trf.xlu1  ;;  %v10718_v16 = vmax.f32 %v4354_v10, %v4355_v24  ;;  %v4299_v25 = vrot.slane %v4298_v3, 2  ;;  %v4369_v28 = vrot.slane %v4368_v38, 4  ;;  %v7509_v23 = vunpack.i.h.bf16 %v10425_v17 }
 0x309   : > { %v4363_v63 = vmax.f32 %v4361_v61, %v4362_v12  ;;  %v4442_v27 = vmax.f32 %v4440_v44, %v4441_v62  ;;  %v4232_v6 = vsel %vm3879_vm0, %v7506_v1, -inf  ;;  %v7597_v10 = vunpack.i.h.bf16 %v10443_v33 }
 0x30a   : > { %12877 = vst [vmem:[#allocation49_spill] sm:$0xff] %v10718_v16  ;;  %v4227_v11 = vrot.slane %v4226_v26, 2  ;;  %v7504_v5 = vunpack.i.h.bf16 %v10413_v15  ;;  %v7592_v29 = vunpack.i.h.bf16 %v10427_v43  ;;  %v7589_v30 = vunpack.i.l.bf16 %v10427_v43  ;;  %v10730_v24 = vpop.trf.xlu0 }
 0x30b   : > { %v4436_v51 = vrot.slane %v4435_v0, 1  ;;  %v4300_v53 = vmax.f32 %v4298_v3, %v4299_v25  ;;  %v4231_v17 = vsel %vm3879_vm0, %v7501_v47, -inf  ;;  %v4370_v7 = vmax.f32 %v4368_v38, %v4369_v28 }
 0x30c   : > { %8221 = vxpose.xlu1.b32.end [4/4] (short) %v12875_v9, 128  ;;  %v10723_v8 = vpop.trf.xlu1  ;;  %v4304_v61 = vsel %vm3879_vm0, %v7509_v23, -inf  ;;  %v4233_v44 = vmax.f32 %v4231_v17, %v4232_v6  ;;  %v4364_v9 = vrot.slane %v4363_v63, 1  ;;  %v4443_v12 = vrot.slane %v4442_v27, 2 }
 0x30d   : > { %v4448_v62 = vsel %vm3879_vm0, %v7597_v10, -inf  ;;  %v7594_v15 = vunpack.i.l.bf16 %v10443_v33  ;;  %v4228_v1 = vmax.f32 %v4226_v26, %v4227_v11  ;;  %v4303_v57 = vsel %vm3879_vm0, %v7504_v5, -inf }
 0x30e   : > { %v4375_v43 = vsel %vm3879_vm0, %v7589_v30, -inf  ;;  %v4447_v16 = vsel %vm3879_vm0, %v7592_v29, -inf  ;;  %v4301_v25 = vrot.slane %v4300_v53, 1  ;;  %v4305_v38 = vmax.f32 %v4303_v57, %v4304_v61  ;;  %v10742_v17 = vpop.trf.xlu0 }
 0x30f   : > { %v4376_v47 = vsel %vm3879_vm0, %v7594_v15, -inf  ;;  %v4371_v28 = vrot.slane %v4370_v7, 2  ;;  %v4234_v23 = vrot.slane %v4233_v44, 4  ;;  %v4449_v6 = vmax.f32 %v4447_v16, %v4448_v62 }
 0x310   : > { %v10739_v3 = vpop.trf.xlu1  ;;  %v10744_v10 = vmax.f32 %v4219_v4, %v4220_v52  ;;  %v10746_v33 = vmax.f32 %v4291_v56, %v4292_v37  ;;  %v4377_v26 = vmax.f32 %v4375_v43, %v4376_v47  ;;  %v7610_v11 = vunpack.i.h.bf16 %v10441_v42 }
 0x311   : > { %v10749_v5 = vmax.f32 %v4363_v63, %v4364_v9  ;;  %v10751_v29 = vmax.f32 %v4435_v0, %v4436_v51  ;;  %v4229_v30 = vrot.slane %v4228_v1, 1  ;;  %v10753_v57 = vmax.f32 %v4300_v53, %v4301_v25  ;;  %v12883_v9 = vld [vmem:[#allocation31_spill] sm:$0xff] }
 0x312   : > { %12878 = vst [vmem:[#allocation51_spill] sm:$0xff] %v10744_v10  ;;  %12879 = vst [vmem:[#allocation48_spill] sm:$0xff] %v10746_v33  ;;  %v4444_v61 = vmax.f32 %v4442_v27, %v4443_v12  ;;  %v4306_v15 = vrot.slane %v4305_v38, 4  ;;  %v10755_v54 = vmax.f32 %v4370_v7, %v4371_v28  ;;  %v4235_v16 = vmax.f32 %v4233_v44, %v4234_v23  ;;  %v10765_v53 = vpop.trf.xlu0 }
 0x313   : > { %12880 = vst [vmem:[#allocation50_spill] sm:$0xff] %v10749_v5  ;;  %12881 = vst [vmem:[#allocation53_spill] sm:$0xff] %v10751_v29  ;;  %v4450_v62 = vrot.slane %v4449_v6, 4  ;;  %v7615_v4 = vunpack.i.h.bf16 %v10455_v32  ;;  %v4378_v52 = vrot.slane %v4377_v26, 4  ;;  %v4528_v37 = vsel %vm3879_vm0, %v7610_v11, -inf }
 0x314   : > { %12882 = vst [vmem:[#allocation52_spill] sm:$0xff] %v10753_v57  ;;  %v10758_v56 = vpop.trf.xlu1  ;;  %v7607_v63 = vunpack.i.l.bf16 %v10441_v42  ;;  %v7698_v0 = vunpack.i.h.bf16 %v10457_v41  ;;  %v7612_v27 = vunpack.i.l.bf16 %v10455_v32  ;;  %v4307_v7 = vmax.f32 %v4305_v38, %v4306_v15 }
 0x315   : > { %v4529_v51 = vsel %vm3879_vm0, %v7615_v4, -inf  ;;  %v7703_v12 = vunpack.i.h.bf16 %v12883_v9  ;;  %v4445_v43 = vrot.slane %v4444_v61, 1  ;;  %v4451_v25 = vmax.f32 %v4449_v6, %v4450_v62 }
 0x316   : > { %v4530_v44 = vmax.f32 %v4528_v37, %v4529_v51  ;;  %v4457_v47 = vsel %vm3879_vm0, %v7612_v27, -inf  ;;  %v10769_v28 = vmax.f32 %v4228_v1, %v4229_v30  ;;  %v4236_v23 = vrot.slane %v4235_v16, 2 }
 0x317   : > { %v4379_v42 = vmax.f32 %v4377_v26, %v4378_v52  ;;  %v7695_v11 = vunpack.i.l.bf16 %v10457_v41  ;;  %v4456_v4 = vsel %vm3879_vm0, %v7607_v63, -inf  ;;  %v4672_v32 = vsel %vm3879_vm0, %v7698_v0, -inf  ;;  %v10781_v52 = vpop.trf.xlu0 }
 0x318   : > { %12884 = vst [vmem:[#allocation31_spill] sm:$0xff] %v10769_v28  ;;  %v4673_v29 = vsel %vm3879_vm0, %v7703_v12, -inf  ;;  %v7700_v38 = vunpack.i.l.bf16 %v12883_v9  ;;  %v10776_v15 = vpop.trf.xlu1  ;;  %v4308_v37 = vrot.slane %v4307_v7, 2  ;;  %v4458_v6 = vmax.f32 %v4456_v4, %v4457_v47  ;;  %v12887_v9 = vld [vmem:[#allocation30_spill] sm:$0xff] }
 0x319   : > { %v4531_v62 = vrot.slane %v4530_v44, 4  ;;  %v4373_v1 = vrot.slane %v10755_v54, 1  ;;  %v10779_v30 = vmax.f32 %v4444_v61, %v4445_v43  ;;  %v4452_v26 = vrot.slane %v4451_v25, 2 }
 0x31a   : > { %v10783_v41 = vmax.f32 %v4235_v16, %v4236_v23  ;;  %v4380_v63 = vrot.slane %v4379_v42, 2  ;;  %v4600_v0 = vsel %vm3879_vm0, %v7695_v11, -inf  ;;  %v4674_v51 = vmax.f32 %v4672_v32, %v4673_v29 }
 0x31b   : > { %12885 = vst [vmem:[#allocation91_spill] sm:$0xff] %v10779_v30  ;;  %v4601_v27 = vsel %vm3879_vm0, %v7700_v38, -inf  ;;  %v7620_v12 = vunpack.i.h.bf16 %v12887_v9  ;;  %v10788_v5 = vmax.f32 %v4307_v7, %v4308_v37  ;;  %v4459_v47 = vrot.slane %v4458_v6, 4 }
 0x31c   : > { %12886 = vst [vmem:[#allocation92_spill] sm:$0xff] %v10783_v41  ;;  %v4532_v4 = vmax.f32 %v4530_v44, %v4531_v62  ;;  %v7617_v61 = vunpack.i.l.bf16 %v12887_v9  ;;  %v10791_v43 = vmax.f32 %v4451_v25, %v4452_v26  ;;  %v7708_v30 = vunpack.i.h.bf16 %v10485_v2  ;;  %v10795_v23 = vpop.trf.xlu1  ;;  %v10803_v25 = vpop.trf.xlu0 }
 0x31d   : > { %12888 = vst [vmem:[#allocation30_spill] sm:$0xff] %v10788_v5  ;;  %v7625_v16 = vunpack.i.h.bf16 %v10482_v58  ;;  %v10797_v11 = vmax.f32 %v4379_v42, %v4380_v63  ;;  %v4602_v29 = vmax.f32 %v4600_v0, %v4601_v27  ;;  %v4675_v32 = vrot.slane %v4674_v51, 4 }
 0x31e   : > { %12889 = vst [vmem:[#allocation93_spill] sm:$0xff] %v10791_v43  ;;  %v4537_v38 = vsel %vm3879_vm0, %v7620_v12, -inf  ;;  %v7705_v7 = vunpack.i.l.bf16 %v10485_v2  ;;  %v7622_v37 = vunpack.i.l.bf16 %v10482_v58  ;;  %v4460_v62 = vmax.f32 %v4458_v6, %v4459_v47 }
 0x31f   : > { %12890 = vst [vmem:[#allocation94_spill] sm:$0xff] %v10797_v11  ;;  %v4538_v44 = vsel %vm3879_vm0, %v7625_v16, -inf  ;;  %v4533_v26 = vrot.slane %v4532_v4, 2  ;;  %v4465_v9 = vsel %vm3879_vm0, %v7617_v61, -inf  ;;  %v4681_v42 = vsel %vm3879_vm0, %v7708_v30, -inf }
 0x320   : > { %v4539_v57 = vmax.f32 %v4537_v38, %v4538_v44  ;;  %v4466_v63 = vsel %vm3879_vm0, %v7622_v37, -inf  ;;  %v7713_v0 = vunpack.i.h.bf16 %v10495_v31  ;;  %v4603_v27 = vrot.slane %v4602_v29, 4  ;;  %v10812_v47 = vpop.trf.xlu1  ;;  %v10815_v28 = vpop.trf.xlu0 }
 0x321   : > { %v4676_v12 = vmax.f32 %v4674_v51, %v4675_v32  ;;  %v4467_v2 = vmax.f32 %v4465_v9, %v4466_v63  ;;  %v4609_v16 = vsel %vm3879_vm0, %v7705_v7, -inf  ;;  %v7710_v6 = vunpack.i.l.bf16 %v10495_v31  ;;  %12891 = vst [vmem:[#allocation95_spill] sm:$0xff] %v10812_v47 }
 0x322   : > { %v4540_v33 = vrot.slane %v4539_v57, 4  ;;  %v4682_v58 = vsel %vm3879_vm0, %v7713_v0, -inf  ;;  %v4461_v61 = vrot.slane %v4460_v62, 2  ;;  %v4534_v21 = vmax.f32 %v4532_v4, %v4533_v26 }
 0x323   : > { %v4468_v38 = vrot.slane %v4467_v2, 4  ;;  %v4683_v30 = vmax.f32 %v4681_v42, %v4682_v58  ;;  %v4610_v37 = vsel %vm3879_vm0, %v7710_v6, -inf  ;;  %v10818_v51 = vmax.f32 %v10755_v54, %v4373_v1 }
 0x324   : > { %v4541_v44 = vmax.f32 %v4539_v57, %v4540_v33  ;;  %v4604_v7 = vmax.f32 %v4602_v29, %v4603_v27  ;;  %v4611_v9 = vmax.f32 %v4609_v16, %v4610_v37  ;;  %v4677_v0 = vrot.slane %v4676_v12, 2  ;;  %v10825_v54 = vpop.trf.xlu1 }
 0x325   : > { %12892 = vst [vmem:[#allocation96_spill] sm:$0xff] %v10818_v51  ;;  %v4469_v10 = vmax.f32 %v4467_v2, %v4468_v38  ;;  %v4684_v57 = vrot.slane %v4683_v30, 4  ;;  %v7630_v4 = vunpack.i.h.bf16 %v10492_v36  ;;  %v4462_v42 = vmax.f32 %v4460_v62, %v4461_v61  ;;  %12893 = vst [vmem:[#allocation97_spill] sm:$0xff] %v10825_v54  ;;  %v10830_v2 = vpop.trf.xlu0 }
 0x326   : > { %v4542_v33 = vrot.slane %v4541_v44, 2  ;;  %v4535_v58 = vrot.slane %v4534_v21, 1  ;;  %v4605_v1 = vrot.slane %v4604_v7, 2  ;;  %v4612_v6 = vrot.slane %v4611_v9, 4  ;;  %12894 = vst [vmem:[#allocation98_spill] sm:$0xff] %v10830_v2 }
 0x327   : > { %v7627_v29 = vunpack.i.l.bf16 %v10492_v36  ;;  %v7718_v27 = vunpack.i.h.bf16 %v10504_v13  ;;  %v4678_v16 = vmax.f32 %v4676_v12, %v4677_v0  ;;  %v7635_v37 = vunpack.i.h.bf16 %v10502_v49 }
 0x328   : > { %v4470_v38 = vrot.slane %v4469_v10, 2  ;;  %v4543_v63 = vmax.f32 %v4541_v44, %v4542_v33  ;;  %v4685_v31 = vmax.f32 %v4683_v30, %v4684_v57  ;;  %v4546_v26 = vsel %vm3879_vm0, %v7630_v4, -inf  ;;  %v10841_v30 = vpop.trf.xlu1 }
 0x329   : > { %v4547_v62 = vsel %vm3879_vm0, %v7635_v37, -inf  ;;  %v7632_v61 = vunpack.i.l.bf16 %v10502_v49  ;;  %v7723_v32 = vunpack.i.h.bf16 %v10514_v35  ;;  %v4613_v43 = vmax.f32 %v4611_v9, %v4612_v6  ;;  %12895 = vst [vmem:[#allocation99_spill] sm:$0xff] %v10841_v30 }
 0x32a   : > { %v4474_v36 = vsel %vm3879_vm0, %v7627_v29, -inf  ;;  %v4690_v12 = vsel %vm3879_vm0, %v7718_v27, -inf  ;;  %v7715_v0 = vunpack.i.l.bf16 %v10504_v13  ;;  %v4548_v11 = vmax.f32 %v4546_v26, %v4547_v62  ;;  %v10846_v27 = vpop.trf.xlu0 }
 0x32b   : > { %v4475_v51 = vsel %vm3879_vm0, %v7632_v61, -inf  ;;  %v4691_v44 = vsel %vm3879_vm0, %v7723_v32, -inf  ;;  %v4463_v33 = vrot.slane %v4462_v42, 1  ;;  %v10843_v57 = vmax.f32 %v4604_v7, %v4605_v1  ;;  %12896 = vst [vmem:[#allocation100_spill] sm:$0xff] %v10846_v27 }
 0x32c   : > { %v4686_v49 = vrot.slane %v4685_v31, 2  ;;  %v4476_v4 = vmax.f32 %v4474_v36, %v4475_v51  ;;  %v4679_v37 = vrot.slane %v4678_v16, 1  ;;  %v4549_v9 = vrot.slane %v4548_v11, 4 }
 0x32d   : > { %v7720_v6 = vunpack.i.l.bf16 %v10514_v35  ;;  %v4692_v29 = vmax.f32 %v4690_v12, %v4691_v44  ;;  %v4471_v13 = vmax.f32 %v4469_v10, %v4470_v38  ;;  %v4618_v61 = vsel %vm3879_vm0, %v7715_v0, -inf  ;;  %v10851_v12 = vpop.trf.xlu1  ;;  %v12897_v10 = vld [vmem:[#allocation29_spill] sm:$0xff] }
 0x32e   : > { %v4477_v26 = vrot.slane %v4476_v4, 4  ;;  %v4544_v62 = vrot.slane %v4543_v63, 1  ;;  %v4614_v32 = vrot.slane %v4613_v43, 2  ;;  %v4687_v7 = vmax.f32 %v4685_v31, %v4686_v49  ;;  %v10854_v47 = vpop.trf.xlu0 }
 0x32f   : > { %v4619_v5 = vsel %vm3879_vm0, %v7720_v6, -inf  ;;  %v4693_v41 = vrot.slane %v4692_v29, 4  ;;  %v4550_v22 = vmax.f32 %v4548_v11, %v4549_v9  ;;  %v4464_v51 = vmax.f32 %v4462_v42, %v4463_v33 }
 0x330   : > { %v4478_v1 = vmax.f32 %v4476_v4, %v4477_v26  ;;  %v4536_v36 = vmax.f32 %v4534_v21, %v4535_v58  ;;  %v4607_v30 = vrot.slane %v10843_v57, 1  ;;  %v4620_v35 = vmax.f32 %v4618_v61, %v4619_v5 }
 0x331   : > { %v4694_v44 = vmax.f32 %v4692_v29, %v4693_v41  ;;  %v7640_v38 = vunpack.i.h.bf16 %v12897_v10  ;;  %v4680_v0 = vmax.f32 %v4678_v16, %v4679_v37  ;;  %v4472_v27 = vrot.slane %v4471_v13, 1  ;;  %v10863_v37 = vpop.trf.xlu1 }
 0x332   : > { %v4545_v2 = vmax.f32 %v4543_v63, %v4544_v62  ;;  %v4615_v54 = vmax.f32 %v4613_v43, %v4614_v32  ;;  %v4688_v6 = vrot.slane %v4687_v7, 1  ;;  %v4479_v31 = vrot.slane %v4478_v1, 2 }
 0x333   : > { %v4551_v49 = vrot.slane %v4550_v22, 2  ;;  %v7645_v11 = vunpack.i.h.bf16 %v10523_v40  ;;  %v4621_v21 = vrot.slane %v4620_v35, 4  ;;  %v7728_v42 = vunpack.i.h.bf16 %v10529_v20 }
 0x334   : > { %v4695_v5 = vrot.slane %v4694_v44, 2  ;;  %v4555_v58 = vsel %vm3879_vm0, %v7640_v38, -inf  ;;  %v7637_v41 = vunpack.i.l.bf16 %v12897_v10  ;;  %v4473_v33 = vmax.f32 %v4471_v13, %v4472_v27  ;;  %v10868_v38 = vpop.trf.xlu0 }
 0x335   : > { %v4556_v16 = vsel %vm3879_vm0, %v7645_v11, -inf  ;;  %v7725_v43 = vunpack.i.l.bf16 %v10529_v20  ;;  %v7642_v63 = vunpack.i.l.bf16 %v10523_v40  ;;  %v4480_v9 = vmax.f32 %v4478_v1, %v4479_v31 }
 0x336   : > { %v4557_v4 = vmax.f32 %v4555_v58, %v4556_v16  ;;  %v4552_v29 = vmax.f32 %v4550_v22, %v4551_v49  ;;  %v7733_v61 = vunpack.i.h.bf16 %v10551_v60  ;;  %v4616_v26 = vrot.slane %v4615_v54, 1  ;;  %v10875_v16 = vpop.trf.xlu1 }
 0x337   : > { %v4622_v62 = vmax.f32 %v4620_v35, %v4621_v21  ;;  %v4699_v32 = vsel %vm3879_vm0, %v7728_v42, -inf  ;;  %v4484_v10 = vsel %vm3879_vm0, %v7642_v63, -inf  ;;  %v4689_v27 = vmax.f32 %v4687_v7, %v4688_v6  ;;  %12898 = vst [vmem:[#allocation29_spill] sm:$0xff] %v10875_v16 }
 0x338   : > { %v4696_v13 = vmax.f32 %v4694_v44, %v4695_v5  ;;  %v4483_v20 = vsel %vm3879_vm0, %v7637_v41, -inf  ;;  %v4700_v40 = vsel %vm3879_vm0, %v7733_v61, -inf  ;;  %v4627_v11 = vsel %vm3879_vm0, %v7725_v43, -inf  ;;  %v10881_v61 = vpop.trf.xlu0 }
 0x339   : > { %v4558_v1 = vrot.slane %v4557_v4, 4  ;;  %v7730_v22 = vunpack.i.l.bf16 %v10551_v60  ;;  %v4481_v31 = vrot.slane %v4480_v9, 1  ;;  %v4553_v49 = vrot.slane %v4552_v29, 1 }
 0x33a   : > { %v4485_v35 = vmax.f32 %v4483_v20, %v4484_v10  ;;  %v4701_v21 = vmax.f32 %v4699_v32, %v4700_v40  ;;  %v4623_v42 = vrot.slane %v4622_v62, 2  ;;  %v4608_v7 = vmax.f32 %v10843_v57, %v4607_v30 }
 0x33b   : > { %v4628_v58 = vsel %vm3879_vm0, %v7730_v22, -inf  ;;  %v6510_v44 = vsel %vm6440_vm1, %v4545_v2, %v4536_v36  ;;  %v4697_v6 = vrot.slane %v4696_v13, 1  ;;  %v6503_v41 = vsel %vm6440_vm1, %v4473_v33, %v4464_v51 }
 0x33c   : > { %v4629_v5 = vmax.f32 %v4627_v11, %v4628_v58  ;;  %v4617_v43 = vmax.f32 %v4615_v54, %v4616_v26  ;;  %v6524_v60 = vsel %vm6440_vm1, %v4689_v27, %v4680_v0  ;;  %v4559_v63 = vmax.f32 %v4557_v4, %v4558_v1  ;;  %v10887_v0 = vpop.trf.xlu1 }
 0x33d   : > { %v4486_v32 = vrot.slane %v4485_v35, 4  ;;  %v4702_v10 = vrot.slane %v4701_v21, 4  ;;  %v7650_v20 = vunpack.i.h.bf16 %v10538_v18  ;;  %v4482_v40 = vmax.f32 %v4480_v9, %v4481_v31 }
 0x33e   : > { %v4554_v22 = vmax.f32 %v4552_v29, %v4553_v49  ;;  %v4624_v16 = vmax.f32 %v4622_v62, %v4623_v42  ;;  %v4698_v30 = vmax.f32 %v4696_v13, %v4697_v6  ;;  %v4630_v57 = vrot.slane %v4629_v5, 4 }
 0x33f   : > { %v7647_v2 = vunpack.i.l.bf16 %v10538_v18  ;;  %v7738_v36 = vunpack.i.h.bf16 %v10579_v55  ;;  %v4560_v51 = vrot.slane %v4559_v63, 2  ;;  %v7655_v54 = vunpack.i.h.bf16 %v10574_v59  ;;  %v10894_v18 = vpop.trf.xlu0 }
 0x340   : > { %v4487_v33 = vmax.f32 %v4485_v35, %v4486_v32  ;;  %v4703_v4 = vmax.f32 %v4701_v21, %v4702_v10  ;;  %v4564_v26 = vsel %vm3879_vm0, %v7650_v20, -inf  ;;  %v7735_v27 = vunpack.i.l.bf16 %v10579_v55  ;;  %v10903_v10 = vpop.trf.xlu1 }
 0x341   : > { %v4565_v9 = vsel %vm3879_vm0, %v7655_v54, -inf  ;;  %v7652_v29 = vunpack.i.l.bf16 %v10574_v59  ;;  %v7743_v62 = vunpack.i.h.bf16 %v10591_v19  ;;  %v4631_v13 = vmax.f32 %v4629_v5, %v4630_v57 }
 0x342   : > { %v4492_v11 = vsel %vm3879_vm0, %v7647_v2, -inf  ;;  %v4708_v1 = vsel %vm3879_vm0, %v7738_v36, -inf  ;;  %v4566_v31 = vmax.f32 %v4564_v26, %v4565_v9  ;;  %v7740_v55 = vunpack.i.l.bf16 %v10591_v19 }
 0x343   : > { %v4493_v49 = vsel %vm3879_vm0, %v7652_v29, -inf  ;;  %v4709_v35 = vsel %vm3879_vm0, %v7743_v62, -inf  ;;  %v4488_v21 = vrot.slane %v4487_v33, 2  ;;  %v4704_v42 = vrot.slane %v4703_v4, 2  ;;  %v10909_v9 = vpop.trf.xlu0  ;;  %v12900_v29 = vld [vmem:[#allocation54_spill] sm:$0xff]  ;;  %v12901_v62 = vld [vmem:[#allocation55_spill] sm:$0xff] }
 0x344   : > { %v4494_v58 = vmax.f32 %v4492_v11, %v4493_v49  ;;  %v4567_v59 = vrot.slane %v4566_v31, 4  ;;  %v4636_v6 = vsel %vm3879_vm0, %v7735_v27, -inf  ;;  %v4637_v32 = vsel %vm3879_vm0, %v7740_v55, -inf }
 0x345   : > { %v4710_v5 = vmax.f32 %v4708_v1, %v4709_v35  ;;  %v4625_v20 = vrot.slane %v4624_v16, 1  ;;  %v4561_v57 = vmax.f32 %v4559_v63, %v4560_v51  ;;  %v6517_v54 = vsel %vm6440_vm1, %v4617_v43, %v4608_v7 }
 0x346   : > { %v4495_v2 = vrot.slane %v4494_v58, 4  ;;  %v4568_v36 = vmax.f32 %v4566_v31, %v4567_v59  ;;  %v10907_v26 = vsel %vm6442_vm2, %v4554_v22, %v6510_v44  ;;  %v4632_v19 = vrot.slane %v4631_v13, 2 }
 0x347   : > { %12899 = vst [vmem:[#allocation101_spill] sm:$0xff] %v10907_v26  ;;  %v12902_v27 = vpack.i.bf16 %v12900_v29, %v12901_v62  ;;  %v10915_v11 = vsel %vm6442_vm2, %v4482_v40, %v6503_v41  ;;  %v10918_v1 = vsel %vm6442_vm2, %v4698_v30, %v6524_v60  ;;  %v4489_v63 = vmax.f32 %v4487_v33, %v4488_v21  ;;  %v10922_v29 = vpop.trf.xlu1  ;;  %v12905_v41 = vld [vmem:[#allocation56_spill] sm:$0xff]  ;;  %v12906_v40 = vld [vmem:[#allocation57_spill] sm:$0xff]  ;;  %v12908_v60 = vld [vmem:[#allocation58_spill] sm:$0xff] }
 0x348   : > { %12903 = vst [vmem:[#allocation54_spill] sm:$0xff] %v10915_v11  ;;  %12904 = vst [vmem:[#allocation55_spill] sm:$0xff] %v10918_v1  ;;  %v4638_v51 = vmax.f32 %v4636_v6, %v4637_v32  ;;  %v4705_v31 = vmax.f32 %v4703_v4, %v4704_v42  ;;  %v4711_v7 = vrot.slane %v4710_v5, 4  ;;  %v4626_v43 = vmax.f32 %v4624_v16, %v4625_v20  ;;  %v12909_v30 = vld [vmem:[#allocation59_spill] sm:$0xff] }
 0x349   : > { %8303 = vxpose.xlu0.b32.start [1/4] (short) %v12902_v27, 128  ;;  %v4562_v44 = vrot.slane %v4561_v57, 1  ;;  %v4496_v22 = vmax.f32 %v4494_v58, %v4495_v2  ;;  %v4569_v49 = vrot.slane %v4568_v36, 2  ;;  %v4633_v35 = vmax.f32 %v4631_v13, %v4632_v19 }
 0x34a   : > { %v7660_v55 = vunpack.i.h.bf16 %v10586_v39  ;;  %v7665_v59 = vunpack.i.h.bf16 %v10602_v48  ;;  %v12907_v62 = vpack.i.bf16 %v12905_v41, %v12906_v40  ;;  %v12910_v33 = vpack.i.bf16 %v12908_v60, %v12909_v30  ;;  %v12914_v30 = vld [vmem:[#allocation61_spill] sm:$0xff] }
 0x34b   : > { %v4639_v4 = vrot.slane %v4638_v51, 4  ;;  %v7657_v16 = vunpack.i.l.bf16 %v10586_v39  ;;  %v7748_v21 = vunpack.i.h.bf16 %v10604_v45  ;;  %v4490_v13 = vrot.slane %v4489_v63, 1  ;;  %v12912_v39 = vld [vmem:[#allocation62_spill] sm:$0xff] }
 0x34c   : > { %8391 = vxpose.xlu1.b32.start [1/4] (short) %v12907_v62, 128  ;;  %v4706_v42 = vrot.slane %v4705_v31, 1  ;;  %v4712_v58 = vmax.f32 %v4710_v5, %v4711_v7  ;;  %v7662_v6 = vunpack.i.l.bf16 %v10602_v48  ;;  %v4497_v32 = vrot.slane %v4496_v22, 2  ;;  %v12911_v62 = vld [vmem:[#allocation60_spill] sm:$0xff] }
 0x34d   : > { %8305 = vxpose.xlu0.b32.cont [2/4] (short) %v12910_v33, 128  ;;  %v4570_v20 = vmax.f32 %v4568_v36, %v4569_v49  ;;  %v7745_v2 = vunpack.i.l.bf16 %v10604_v45  ;;  %v4574_v19 = vsel %vm3879_vm0, %v7665_v59, -inf  ;;  %v4634_v27 = vrot.slane %v4633_v35, 1  ;;  %v12915_v33 = vld [vmem:[#allocation65_spill] sm:$0xff] }
 0x34e   : > { %v4502_v41 = vsel %vm3879_vm0, %v7662_v6, -inf  ;;  %v7753_v40 = vunpack.i.h.bf16 %v10614_v34  ;;  %v12913_v60 = vpack.i.bf16 %v12911_v62, %v12912_v39  ;;  %v12916_v5 = vpack.i.bf16 %v12914_v30, %v12915_v33  ;;  %v12921_v33 = vld [vmem:[#allocation67_spill] sm:$0xff] }
 0x34f   : > { %v4640_v48 = vmax.f32 %v4638_v51, %v4639_v4  ;;  %v4573_v36 = vsel %vm3879_vm0, %v7660_v55, -inf  ;;  %v4501_v45 = vsel %vm3879_vm0, %v7657_v16, -inf  ;;  %v4717_v7 = vsel %vm3879_vm0, %v7748_v21, -inf  ;;  %v12917_v51 = vld [vmem:[#allocation63_spill] sm:$0xff]  ;;  %v12918_v4 = vld [vmem:[#allocation66_spill] sm:$0xff]  ;;  %v12920_v16 = vld [vmem:[#allocation64_spill] sm:$0xff] }
 0x350   : > { %8393 = vxpose.xlu1.b32.cont [2/4] (short) %v12913_v60, 128  ;;  %v4713_v49 = vrot.slane %v4712_v58, 2  ;;  %v4575_v59 = vmax.f32 %v4573_v36, %v4574_v19  ;;  %v7750_v6 = vunpack.i.l.bf16 %v10614_v34  ;;  %v4498_v1 = vmax.f32 %v4496_v22, %v4497_v32 }
 0x351   : > { %8307 = vxpose.xlu0.b32.cont [3/4] (short) %v12916_v5, 128  ;;  %v4571_v26 = vrot.slane %v4570_v20, 1  ;;  %v4645_v62 = vsel %vm3879_vm0, %v7745_v2, -inf  ;;  %v4503_v39 = vmax.f32 %v4501_v45, %v4502_v41  ;;  %v4718_v60 = vsel %vm3879_vm0, %v7753_v40, -inf }
 0x352   : > { %v4646_v30 = vsel %vm3879_vm0, %v7750_v6, -inf  ;;  %v12919_v55 = vpack.i.bf16 %v12917_v51, %v12918_v4  ;;  %v12922_v21 = vpack.i.bf16 %v12920_v16, %v12921_v33  ;;  %v10957_v19 = vsel %vm6442_vm2, %v4626_v43, %v6517_v54  ;;  %v12928_v6 = vld [vmem:[#allocation86_spill] sm:$0xff]  ;;  %v10968_v4 = vpop.trf.xlu0  ;;  %v12930_v43 = vld [vmem:[#allocation68_spill] sm:$0xff] }
 0x353   : > { %12923 = vst [vmem:[#allocation56_spill] sm:$0xff] %v10957_v19  ;;  %v10959_v34 = vmax.f32 %v4489_v63, %v4490_v13  ;;  %v10961_v22 = vmax.f32 %v4561_v57, %v4562_v44  ;;  %v4641_v32 = vrot.slane %v4640_v48, 2  ;;  %v10963_v2 = vmax.f32 %v4633_v35, %v4634_v27  ;;  %v12931_v57 = vld [vmem:[#allocation72_spill] sm:$0xff] }
 0x354   : > { %8395 = vxpose.xlu1.b32.cont [3/4] (short) %v12919_v55, 128  ;;  %v10965_v41 = vmax.f32 %v4705_v31, %v4706_v42  ;;  %v4576_v40 = vrot.slane %v4575_v59, 4  ;;  %v4504_v5 = vrot.slane %v4503_v39, 4  ;;  %v4647_v36 = vmax.f32 %v4645_v62, %v4646_v30  ;;  %v12933_v13 = vld [vmem:[#allocation88_spill] sm:$0xff]  ;;  %v12934_v62 = vld [vmem:[#allocation87_spill] sm:$0xff] }
 0x355   : > { %8309 = vxpose.xlu0.b32.end [4/4] (short) %v12922_v21, 128  ;;  %12924 = vst [vmem:[#allocation57_spill] sm:$0xff] %v10959_v34  ;;  %12925 = vst [vmem:[#allocation58_spill] sm:$0xff] %v10961_v22  ;;  %v4719_v45 = vmax.f32 %v4717_v7, %v4718_v60  ;;  %v7670_v51 = vunpack.i.h.bf16 %v12928_v6  ;;  %v4499_v55 = vrot.slane %v4498_v1, 1  ;;  %v10970_v54 = vmax.f32 %v4570_v20, %v4571_v26 }
 0x356   : > { %12926 = vst [vmem:[#allocation59_spill] sm:$0xff] %v10963_v2  ;;  %12927 = vst [vmem:[#allocation60_spill] sm:$0xff] %v10965_v41  ;;  %v4714_v63 = vmax.f32 %v4712_v58, %v4713_v49  ;;  %v12932_v44 = vpack.i.bf16 %v12930_v43, %v12931_v57  ;;  %v4642_v35 = vmax.f32 %v4640_v48, %v4641_v32  ;;  %v7667_v31 = vunpack.i.l.bf16 %v12928_v6  ;;  %v10980_v58 = vpop.trf.xlu1  ;;  %v12935_v49 = vld [vmem:[#allocation39_spill] sm:$0xff] }
 0x357   : > { %12929 = vst [vmem:[#allocation62_spill] sm:$0xff] %v10970_v54  ;;  %v7758_v42 = vunpack.i.h.bf16 %v12933_v13  ;;  %v7755_v27 = vunpack.i.l.bf16 %v12933_v13  ;;  %v4577_v7 = vmax.f32 %v4575_v59, %v4576_v40  ;;  %v7675_v60 = vunpack.i.h.bf16 %v12934_v62 }
 0x358   : > { %8397 = vxpose.xlu1.b32.end [4/4] (short) %v12932_v44, 128  ;;  %v4505_v30 = vmax.f32 %v4503_v39, %v4504_v5  ;;  %v4648_v16 = vrot.slane %v4647_v36, 4  ;;  %v4720_v33 = vrot.slane %v4719_v45, 4  ;;  %v4582_v26 = vsel %vm3879_vm0, %v7670_v51, -inf  ;;  %v10988_v39 = vpop.trf.xlu0 }
 0x359   : > { %v4583_v20 = vsel %vm3879_vm0, %v7675_v60, -inf  ;;  %v7672_v48 = vunpack.i.l.bf16 %v12934_v62  ;;  %v7763_v21 = vunpack.i.h.bf16 %v12935_v49  ;;  %v4510_v32 = vsel %vm3879_vm0, %v7667_v31, -inf }
 0x35a   : > { %v4726_v6 = vsel %vm3879_vm0, %v7758_v42, -inf  ;;  %v4654_v59 = vsel %vm3879_vm0, %v7755_v27, -inf  ;;  %v4584_v40 = vmax.f32 %v4582_v26, %v4583_v20  ;;  %v7760_v43 = vunpack.i.l.bf16 %v12935_v49  ;;  %v10994_v20 = vpop.trf.xlu1 }
 0x35b   : > { %v4511_v5 = vsel %vm3879_vm0, %v7672_v48, -inf  ;;  %v4727_v51 = vsel %vm3879_vm0, %v7763_v21, -inf  ;;  %v4578_v57 = vrot.slane %v4577_v7, 2  ;;  %v4721_v44 = vmax.f32 %v4719_v45, %v4720_v33 }
 0x35c   : > { %v4512_v13 = vmax.f32 %v4510_v32, %v4511_v5  ;;  %v4585_v62 = vrot.slane %v4584_v40, 4  ;;  %v4649_v60 = vmax.f32 %v4647_v36, %v4648_v16  ;;  %v4655_v31 = vsel %vm3879_vm0, %v7760_v43, -inf  ;;  %v10998_v45 = vpop.trf.xlu0 }
 0x35d   : > { %v4728_v41 = vmax.f32 %v4726_v6, %v4727_v51  ;;  %v4715_v42 = vrot.slane %v4714_v63, 1  ;;  %v4656_v26 = vmax.f32 %v4654_v59, %v4655_v31  ;;  %v10996_v19 = vmax.f32 %v4498_v1, %v4499_v55 }
 0x35e   : > { %v4513_v2 = vrot.slane %v4512_v13, 4  ;;  %v4586_v27 = vmax.f32 %v4584_v40, %v4585_v62  ;;  %v4643_v48 = vrot.slane %v4642_v35, 1  ;;  %v4506_v54 = vrot.slane %v4505_v30, 2  ;;  %v12937_v40 = vld [vmem:[#allocation89_spill] sm:$0xff]  ;;  %v11008_v62 = vpop.trf.xlu1 }
 0x35f   : > { %12936 = vst [vmem:[#allocation61_spill] sm:$0xff] %v10996_v19  ;;  %v4729_v21 = vrot.slane %v4728_v41, 4  ;;  %v4579_v49 = vmax.f32 %v4577_v7, %v4578_v57  ;;  %v4722_v22 = vrot.slane %v4721_v44, 2  ;;  %v4650_v33 = vrot.slane %v4649_v60, 2 }
 0x360   : > { %v4514_v36 = vmax.f32 %v4512_v13, %v4513_v2  ;;  %v7685_v16 = vunpack.i.h.bf16 %v10665_v46  ;;  %v4587_v32 = vrot.slane %v4586_v27, 2  ;;  %v4657_v6 = vrot.slane %v4656_v26, 4  ;;  %v11012_v11 = vpop.trf.xlu0 }
 0x361   : > { %v4730_v5 = vmax.f32 %v4728_v41, %v4729_v21  ;;  %v7680_v59 = vunpack.i.h.bf16 %v12937_v40  ;;  %v7677_v51 = vunpack.i.l.bf16 %v12937_v40  ;;  %v7682_v1 = vunpack.i.l.bf16 %v10665_v46 }
 0x362   : > { %v11004_v55 = vmax.f32 %v4642_v35, %v4643_v48  ;;  %v11006_v43 = vmax.f32 %v4714_v63, %v4715_v42  ;;  %v4507_v7 = vmax.f32 %v4505_v30, %v4506_v54  ;;  %v4580_v57 = vrot.slane %v4579_v49, 1  ;;  %v12940_v54 = vld [vmem:[#allocation41_spill] sm:$0xff]  ;;  %v12941_v30 = vld [vmem:[#allocation42_spill] sm:$0xff] }
 0x363   : > { %v4651_v2 = vmax.f32 %v4649_v60, %v4650_v33  ;;  %v4723_v13 = vmax.f32 %v4721_v44, %v4722_v22  ;;  %v4592_v31 = vsel %vm3879_vm0, %v7685_v16, -inf  ;;  %v4520_v41 = vsel %vm3879_vm0, %v7682_v1, -inf }
 0x364   : > { %12938 = vst [vmem:[#allocation65_spill] sm:$0xff] %v11004_v55  ;;  %12939 = vst [vmem:[#allocation63_spill] sm:$0xff] %v11006_v43  ;;  %v4515_v21 = vrot.slane %v4514_v36, 2  ;;  %v4588_v19 = vmax.f32 %v4586_v27, %v4587_v32  ;;  %v4658_v34 = vmax.f32 %v4656_v26, %v4657_v6  ;;  %v4731_v40 = vrot.slane %v4730_v5, 2 }
 0x365   : > { %v4519_v46 = vsel %vm3879_vm0, %v7677_v51, -inf  ;;  %v4591_v63 = vsel %vm3879_vm0, %v7680_v59, -inf  ;;  %v7773_v35 = vunpack.i.h.bf16 %v12940_v54  ;;  %v7768_v42 = vunpack.i.h.bf16 %v12941_v30  ;;  %v11022_v51 = vpop.trf.xlu1 }
 0x366   : > { %v4521_v60 = vmax.f32 %v4519_v46, %v4520_v41  ;;  %v4593_v22 = vmax.f32 %v4591_v63, %v4592_v31  ;;  %v4508_v44 = vrot.slane %v4507_v7, 1  ;;  %v4652_v48 = vrot.slane %v4651_v2, 1  ;;  %12943 = vst [vmem:[#allocation64_spill] sm:$0xff] %v11022_v51  ;;  %v11026_v46 = vpop.trf.xlu0 }
 0x367   : > { %v4724_v33 = vrot.slane %v4723_v13, 1  ;;  %v7765_v16 = vunpack.i.l.bf16 %v12941_v30  ;;  %v11019_v27 = vmax.f32 %v4579_v49, %v4580_v57  ;;  %v4516_v26 = vmax.f32 %v4514_v36, %v4515_v21  ;;  %12944 = vst [vmem:[#allocation67_spill] sm:$0xff] %v11026_v46 }
 0x368   : > { %v4589_v32 = vrot.slane %v4588_v19, 1  ;;  %v7770_v6 = vunpack.i.l.bf16 %v12940_v54  ;;  %v4659_v59 = vrot.slane %v4658_v34, 2  ;;  %v4732_v1 = vmax.f32 %v4730_v5, %v4731_v40  ;;  %v12948_v54 = vld [vmem:[#allocation40_spill] sm:$0xff] }
 0x369   : > { %12942 = vst [vmem:[#allocation66_spill] sm:$0xff] %v11019_v27  ;;  %v4736_v43 = vsel %vm3879_vm0, %v7773_v35, -inf  ;;  %v4522_v55 = vrot.slane %v4521_v60, 4  ;;  %v4594_v41 = vrot.slane %v4593_v22, 4  ;;  %v4735_v31 = vsel %vm3879_vm0, %v7768_v42, -inf }
 0x36a   : > { %v11028_v63 = vmax.f32 %v4507_v7, %v4508_v44  ;;  %v11030_v49 = vmax.f32 %v4651_v2, %v4652_v48  ;;  %v11032_v36 = vmax.f32 %v4723_v13, %v4724_v33  ;;  %v4663_v57 = vsel %vm3879_vm0, %v7765_v16, -inf  ;;  %v11040_v2 = vpop.trf.xlu1 }
 0x36b   : > { %v4664_v21 = vsel %vm3879_vm0, %v7770_v6, -inf  ;;  %v7786_v5 = vunpack.i.h.bf16 %v12948_v54  ;;  %v4517_v40 = vrot.slane %v4516_v26, 1  ;;  %v11037_v35 = vmax.f32 %v4588_v19, %v4589_v32 }
 0x36c   : > { %12945 = vst [vmem:[#allocation86_spill] sm:$0xff] %v11028_v63  ;;  %12946 = vst [vmem:[#allocation68_spill] sm:$0xff] %v11030_v49  ;;  %v4660_v30 = vmax.f32 %v4658_v34, %v4659_v59  ;;  %v4737_v27 = vmax.f32 %v4735_v31, %v4736_v43  ;;  %v4733_v42 = vrot.slane %v4732_v1, 1  ;;  %v4523_v51 = vmax.f32 %v4521_v60, %v4522_v55  ;;  %v11047_v34 = vpop.trf.xlu0 }
 0x36d   : > { %12947 = vst [vmem:[#allocation72_spill] sm:$0xff] %v11032_v36  ;;  %12949 = vst [vmem:[#allocation88_spill] sm:$0xff] %v11037_v35  ;;  %v4595_v46 = vmax.f32 %v4593_v22, %v4594_v41  ;;  %v7791_v7 = vunpack.i.h.bf16 %v10711_v50  ;;  %v4665_v13 = vmax.f32 %v4663_v57, %v4664_v21  ;;  %v7783_v44 = vunpack.i.l.bf16 %v12948_v54 }
 0x36e   : > { %v4816_v48 = vsel %vm3879_vm0, %v7786_v5, -inf  ;;  %v7874_v33 = vunpack.i.h.bf16 %v10703_v14  ;;  %v7788_v19 = vunpack.i.l.bf16 %v10711_v50  ;;  %v4738_v43 = vrot.slane %v4737_v27, 4 }
 0x36f   : > { %v4817_v16 = vsel %vm3879_vm0, %v7791_v7, -inf  ;;  %v7879_v60 = vunpack.i.h.bf16 %v10723_v8  ;;  %v7871_v22 = vunpack.i.l.bf16 %v10703_v14  ;;  %v7876_v6 = vunpack.i.l.bf16 %v10723_v8  ;;  %v11058_v7 = vpop.trf.xlu1 }
 0x370   : > { %v4818_v55 = vmax.f32 %v4816_v48, %v4817_v16  ;;  %v4745_v32 = vsel %vm3879_vm0, %v7788_v19, -inf  ;;  %v11053_v59 = vmax.f32 %v4516_v26, %v4517_v40  ;;  %v4661_v41 = vrot.slane %v4660_v30, 1  ;;  %v11064_v40 = vpop.trf.xlu0 }
 0x371   : > { %v4666_v31 = vrot.slane %v4665_v13, 4  ;;  %v4744_v57 = vsel %vm3879_vm0, %v7783_v44, -inf  ;;  %v4524_v21 = vrot.slane %v4523_v51, 2  ;;  %v4960_v50 = vsel %vm3879_vm0, %v7874_v33, -inf }
 0x372   : > { %12950 = vst [vmem:[#allocation87_spill] sm:$0xff] %v11053_v59  ;;  %v4746_v54 = vmax.f32 %v4744_v57, %v4745_v32  ;;  %v4961_v5 = vsel %vm3879_vm0, %v7879_v60, -inf  ;;  %v11060_v48 = vmax.f32 %v4732_v1, %v4733_v42  ;;  %v4596_v14 = vrot.slane %v4595_v46, 2 }
 0x373   : > { %v4819_v16 = vrot.slane %v4818_v55, 4  ;;  %v4739_v19 = vmax.f32 %v4737_v27, %v4738_v43  ;;  %v4888_v8 = vsel %vm3879_vm0, %v7871_v22, -inf  ;;  %v4889_v26 = vsel %vm3879_vm0, %v7876_v6, -inf }
 0x374   : > { %12951 = vst [vmem:[#allocation39_spill] sm:$0xff] %v11060_v48  ;;  %v11066_v44 = vmax.f32 %v4660_v30, %v4661_v41  ;;  %v4667_v36 = vmax.f32 %v4665_v13, %v4666_v31  ;;  %v4962_v33 = vmax.f32 %v4960_v50, %v4961_v5  ;;  %v7796_v32 = vunpack.i.h.bf16 %v10730_v24  ;;  %v11076_v30 = vpop.trf.xlu1  ;;  %v11082_v50 = vpop.trf.xlu0 }
 0x375   : > { %v11069_v60 = vmax.f32 %v4523_v51, %v4524_v21  ;;  %v4747_v57 = vrot.slane %v4746_v54, 4  ;;  %v11071_v1 = vmax.f32 %v4595_v46, %v4596_v14  ;;  %v4820_v42 = vmax.f32 %v4818_v55, %v4819_v16  ;;  %12955 = vst [vmem:[#allocation40_spill] sm:$0xff] %v11082_v50 }
 0x376   : > { %12952 = vst [vmem:[#allocation89_spill] sm:$0xff] %v11066_v44  ;;  %v4890_v48 = vmax.f32 %v4888_v8, %v4889_v26  ;;  %v7793_v27 = vunpack.i.l.bf16 %v10730_v24  ;;  %v4740_v43 = vrot.slane %v4739_v19, 2  ;;  %v7884_v22 = vunpack.i.h.bf16 %v10739_v3 }
 0x377   : > { %12953 = vst [vmem:[#allocation41_spill] sm:$0xff] %v11069_v60  ;;  %12954 = vst [vmem:[#allocation42_spill] sm:$0xff] %v11071_v1  ;;  %v7801_v6 = vunpack.i.h.bf16 %v10742_v17  ;;  %v4668_v13 = vrot.slane %v4667_v36, 2  ;;  %v4963_v41 = vrot.slane %v4962_v33, 4  ;;  %v4825_v31 = vsel %vm3879_vm0, %v7796_v32, -inf }
 0x378   : > { %v4748_v51 = vmax.f32 %v4746_v54, %v4747_v57  ;;  %v7881_v21 = vunpack.i.l.bf16 %v10739_v3  ;;  %v7798_v55 = vunpack.i.l.bf16 %v10742_v17  ;;  %v4821_v24 = vrot.slane %v4820_v42, 2  ;;  %v11093_v35 = vpop.trf.xlu1 }
 0x379   : > { %v4826_v46 = vsel %vm3879_vm0, %v7801_v6, -inf  ;;  %v4891_v5 = vrot.slane %v4890_v48, 4  ;;  %v4753_v14 = vsel %vm3879_vm0, %v7793_v27, -inf  ;;  %v4969_v8 = vsel %vm3879_vm0, %v7884_v22, -inf  ;;  %12957 = vst [vmem:[#allocation103_spill] sm:$0xff] %v11093_v35 }
 0x37a   : > { %v4827_v16 = vmax.f32 %v4825_v31, %v4826_v46  ;;  %v4754_v26 = vsel %vm3879_vm0, %v7798_v55, -inf  ;;  %v7889_v32 = vunpack.i.h.bf16 %v10758_v56  ;;  %v11088_v54 = vmax.f32 %v4739_v19, %v4740_v43  ;;  %v11096_v19 = vpop.trf.xlu0 }
 0x37b   : > { %v4964_v3 = vmax.f32 %v4962_v33, %v4963_v41  ;;  %v4755_v57 = vmax.f32 %v4753_v14, %v4754_v26  ;;  %v4897_v17 = vsel %vm3879_vm0, %v7881_v21, -inf  ;;  %v7886_v49 = vunpack.i.l.bf16 %v10758_v56  ;;  %12958 = vst [vmem:[#allocation104_spill] sm:$0xff] %v11096_v19 }
 0x37c   : > { %12956 = vst [vmem:[#allocation102_spill] sm:$0xff] %v11088_v54  ;;  %v4828_v6 = vrot.slane %v4827_v16, 4  ;;  %v4970_v44 = vsel %vm3879_vm0, %v7889_v32, -inf  ;;  %v4749_v27 = vrot.slane %v4748_v51, 2  ;;  %v4892_v31 = vmax.f32 %v4890_v48, %v4891_v5  ;;  %v11104_v5 = vpop.trf.xlu1 }
 0x37d   : > { %v4756_v22 = vrot.slane %v4755_v57, 4  ;;  %v4971_v46 = vmax.f32 %v4969_v8, %v4970_v44  ;;  %v4822_v55 = vmax.f32 %v4820_v42, %v4821_v24  ;;  %v4898_v59 = vsel %vm3879_vm0, %v7886_v49, -inf  ;;  %12960 = vst [vmem:[#allocation106_spill] sm:$0xff] %v11104_v5 }
 0x37e   : > { %v4965_v33 = vrot.slane %v4964_v3, 2  ;;  %v4829_v41 = vmax.f32 %v4827_v16, %v4828_v6  ;;  %v4899_v14 = vmax.f32 %v4897_v17, %v4898_v59  ;;  %v11100_v32 = vmax.f32 %v4667_v36, %v4668_v13  ;;  %v11108_v36 = vpop.trf.xlu0 }
 0x37f   : > { %v4757_v43 = vmax.f32 %v4755_v57, %v4756_v22  ;;  %v4972_v56 = vrot.slane %v4971_v46, 4  ;;  %v4893_v63 = vrot.slane %v4892_v31, 2  ;;  %v7806_v44 = vunpack.i.h.bf16 %v10765_v53  ;;  %12961 = vst [vmem:[#allocation107_spill] sm:$0xff] %v11108_v36 }
 0x380   : > { %12959 = vst [vmem:[#allocation105_spill] sm:$0xff] %v11100_v32  ;;  %v4900_v48 = vrot.slane %v4899_v14, 4  ;;  %v4750_v49 = vmax.f32 %v4748_v51, %v4749_v27  ;;  %v4823_v24 = vrot.slane %v4822_v55, 1  ;;  %v4966_v8 = vmax.f32 %v4964_v3, %v4965_v33 }
 0x381   : > { %v4758_v16 = vrot.slane %v4757_v43, 2  ;;  %v4830_v59 = vrot.slane %v4829_v41, 2  ;;  %v7803_v57 = vunpack.i.l.bf16 %v10765_v53  ;;  %v4973_v6 = vmax.f32 %v4971_v46, %v4972_v56 }
 0x382   : > { %v7811_v17 = vunpack.i.h.bf16 %v10781_v52  ;;  %v4894_v13 = vmax.f32 %v4892_v31, %v4893_v63  ;;  %v4901_v22 = vmax.f32 %v4899_v14, %v4900_v48  ;;  %v4834_v26 = vsel %vm3879_vm0, %v7806_v44, -inf  ;;  %v11118_v14 = vpop.trf.xlu1 }
 0x383   : > { %v7894_v42 = vunpack.i.h.bf16 %v10776_v15  ;;  %v7808_v27 = vunpack.i.l.bf16 %v10781_v52  ;;  %v7899_v3 = vunpack.i.h.bf16 %v10795_v23  ;;  %v4759_v33 = vmax.f32 %v4757_v43, %v4758_v16  ;;  %12962 = vst [vmem:[#allocation108_spill] sm:$0xff] %v11118_v14  ;;  %v11123_v16 = vpop.trf.xlu0 }
 0x384   : > { %v4835_v51 = vsel %vm3879_vm0, %v7811_v17, -inf  ;;  %v4831_v21 = vmax.f32 %v4829_v41, %v4830_v59  ;;  %v4762_v53 = vsel %vm3879_vm0, %v7803_v57, -inf  ;;  %v7891_v46 = vunpack.i.l.bf16 %v10776_v15  ;;  %12963 = vst [vmem:[#allocation109_spill] sm:$0xff] %v11123_v16 }
 0x385   : > { %v4974_v56 = vrot.slane %v4973_v6, 2  ;;  %v4763_v63 = vsel %vm3879_vm0, %v7808_v27, -inf  ;;  %v4836_v31 = vmax.f32 %v4834_v26, %v4835_v51  ;;  %v4751_v48 = vrot.slane %v4750_v49, 1 }
 0x386   : > { %v4967_v44 = vrot.slane %v4966_v8, 1  ;;  %v4978_v17 = vsel %vm3879_vm0, %v7894_v42, -inf  ;;  %v4764_v54 = vmax.f32 %v4762_v53, %v4763_v63  ;;  %v4902_v52 = vrot.slane %v4901_v22, 2 }
 0x387   : > { %v4837_v1 = vrot.slane %v4836_v31, 4  ;;  %v4979_v43 = vsel %vm3879_vm0, %v7899_v3, -inf  ;;  %v7896_v41 = vunpack.i.l.bf16 %v10795_v23  ;;  %v4895_v59 = vrot.slane %v4894_v13, 1  ;;  %v11128_v23 = vpop.trf.xlu1 }
 0x388   : > { %v4832_v57 = vrot.slane %v4831_v21, 1  ;;  %v4760_v26 = vrot.slane %v4759_v33, 1  ;;  %v4975_v51 = vmax.f32 %v4973_v6, %v4974_v56  ;;  %v4906_v27 = vsel %vm3879_vm0, %v7891_v46, -inf  ;;  %v11131_v56 = vpop.trf.xlu0 }
 0x389   : > { %v4907_v60 = vsel %vm3879_vm0, %v7896_v41, -inf  ;;  %v4765_v42 = vrot.slane %v4764_v54, 4  ;;  %v4838_v53 = vmax.f32 %v4836_v31, %v4837_v1  ;;  %v4980_v63 = vmax.f32 %v4978_v17, %v4979_v43 }
 0x38a   : > { %v4752_v14 = vmax.f32 %v4750_v49, %v4751_v48  ;;  %v4824_v36 = vmax.f32 %v4822_v55, %v4823_v24  ;;  %v4968_v3 = vmax.f32 %v4966_v8, %v4967_v44  ;;  %v4903_v5 = vmax.f32 %v4901_v22, %v4902_v52  ;;  %v12964_v49 = vld [vmem:[#allocation95_spill] sm:$0xff]  ;;  %v12965_v52 = vld [vmem:[#allocation97_spill] sm:$0xff] }
 0x38b   : > { %v4908_v16 = vmax.f32 %v4906_v27, %v4907_v60  ;;  %v7816_v15 = vunpack.i.h.bf16 %v10803_v25  ;;  %v4896_v32 = vmax.f32 %v4894_v13, %v4895_v59  ;;  %v4761_v35 = vmax.f32 %v4759_v33, %v4760_v26  ;;  %v11140_v48 = vpop.trf.xlu1 }
 0x38c   : > { %v4833_v19 = vmax.f32 %v4831_v21, %v4832_v57  ;;  %v4976_v6 = vrot.slane %v4975_v51, 1  ;;  %v4766_v46 = vmax.f32 %v4764_v54, %v4765_v42  ;;  %v4839_v41 = vrot.slane %v4838_v53, 2  ;;  %v11146_v26 = vpop.trf.xlu0 }
 0x38d   : > { %v4981_v50 = vrot.slane %v4980_v63, 4  ;;  %v7821_v1 = vunpack.i.h.bf16 %v10815_v28  ;;  %v7813_v55 = vunpack.i.l.bf16 %v10803_v25  ;;  %v7904_v24 = vunpack.i.h.bf16 %v12964_v49 }
 0x38e   : > { %v4904_v8 = vrot.slane %v4903_v5, 1  ;;  %v4909_v22 = vrot.slane %v4908_v16, 4  ;;  %v4843_v60 = vsel %vm3879_vm0, %v7816_v15, -inf  ;;  %v4977_v33 = vmax.f32 %v4975_v51, %v4976_v6 }
 0x38f   : > { %v4844_v13 = vsel %vm3879_vm0, %v7821_v1, -inf  ;;  %v7901_v21 = vunpack.i.l.bf16 %v12964_v49  ;;  %v7818_v31 = vunpack.i.l.bf16 %v10815_v28  ;;  %v4767_v44 = vrot.slane %v4766_v46, 2 }
 0x390   : > { %v4845_v54 = vmax.f32 %v4843_v60, %v4844_v13  ;;  %v4982_v17 = vmax.f32 %v4980_v63, %v4981_v50  ;;  %v7909_v25 = vunpack.i.h.bf16 %v12965_v52  ;;  %v4840_v43 = vmax.f32 %v4838_v53, %v4839_v41  ;;  %v11152_v60 = vpop.trf.xlu1 }
 0x391   : > { %v4771_v59 = vsel %vm3879_vm0, %v7813_v55, -inf  ;;  %v4987_v57 = vsel %vm3879_vm0, %v7904_v24, -inf  ;;  %v4772_v15 = vsel %vm3879_vm0, %v7818_v31, -inf  ;;  %v4905_v51 = vmax.f32 %v4903_v5, %v4904_v8  ;;  %v12967_v31 = vld [vmem:[#allocation98_spill] sm:$0xff] }
 0x392   : > { %v4910_v27 = vmax.f32 %v4908_v16, %v4909_v22  ;;  %v4773_v42 = vmax.f32 %v4771_v59, %v4772_v15  ;;  %v4988_v28 = vsel %vm3879_vm0, %v7909_v25, -inf  ;;  %v4915_v6 = vsel %vm3879_vm0, %v7901_v21, -inf }
 0x393   : > { %v4846_v1 = vrot.slane %v4845_v54, 4  ;;  %v7906_v50 = vunpack.i.l.bf16 %v12965_v52  ;;  %v4768_v63 = vmax.f32 %v4766_v46, %v4767_v44  ;;  %v4983_v53 = vrot.slane %v4982_v17, 2  ;;  %v11163_v52 = vpop.trf.xlu0 }
 0x394   : > { %v4774_v41 = vrot.slane %v4773_v42, 4  ;;  %v4989_v55 = vmax.f32 %v4987_v57, %v4988_v28  ;;  %v4841_v49 = vrot.slane %v4840_v43, 1  ;;  %v6531_v5 = vsel %vm6440_vm1, %v4761_v35, %v4752_v14  ;;  %v12968_v28 = vld [vmem:[#allocation99_spill] sm:$0xff] }
 0x395   : > { %v4916_v24 = vsel %vm3879_vm0, %v7906_v50, -inf  ;;  %v6538_v16 = vsel %vm6440_vm1, %v4833_v19, %v4824_v36  ;;  %v4911_v8 = vrot.slane %v4910_v27, 2  ;;  %v11157_v13 = vsel %vm6440_vm1, %v4905_v51, %v4896_v32 }
 0x396   : > { %v4917_v22 = vmax.f32 %v4915_v6, %v4916_v24  ;;  %v11160_v21 = vsel %vm6440_vm1, %v4977_v33, %v4968_v3  ;;  %v4847_v46 = vmax.f32 %v4845_v54, %v4846_v1  ;;  %v7826_v44 = vunpack.i.h.bf16 %v12967_v31  ;;  %v12969_v33 = vld [vmem:[#allocation100_spill] sm:$0xff]  ;;  %v11169_v6 = vpop.trf.xlu1 }
 0x397   : > { %12966 = vst [vmem:[#allocation95_spill] sm:$0xff] %v11160_v21  ;;  %v4775_v25 = vmax.f32 %v4773_v42, %v4774_v41  ;;  %v4990_v59 = vrot.slane %v4989_v55, 4  ;;  %v7823_v57 = vunpack.i.l.bf16 %v12967_v31  ;;  %v4769_v35 = vrot.slane %v4768_v63, 1  ;;  %12970 = vst [vmem:[#allocation97_spill] sm:$0xff] %v11169_v6 }
 0x398   : > { %v4842_v14 = vmax.f32 %v4840_v43, %v4841_v49  ;;  %v4984_v19 = vmax.f32 %v4982_v17, %v4983_v53  ;;  %v4912_v36 = vmax.f32 %v4910_v27, %v4911_v8  ;;  %v4918_v15 = vrot.slane %v4917_v22, 4  ;;  %v11176_v53 = vpop.trf.xlu0 }
 0x399   : > { %v7914_v32 = vunpack.i.h.bf16 %v12968_v28  ;;  %v7911_v51 = vunpack.i.l.bf16 %v12968_v28  ;;  %v4848_v3 = vrot.slane %v4847_v46, 2  ;;  %v7831_v54 = vunpack.i.h.bf16 %v12969_v33  ;;  %12971 = vst [vmem:[#allocation98_spill] sm:$0xff] %v11176_v53 }
 0x39a   : > { %v4776_v1 = vrot.slane %v4775_v25, 2  ;;  %v4991_v50 = vmax.f32 %v4989_v55, %v4990_v59  ;;  %v4852_v42 = vsel %vm3879_vm0, %v7826_v44, -inf  ;;  %v4780_v41 = vsel %vm3879_vm0, %v7823_v57, -inf }
 0x39b   : > { %v4853_v43 = vsel %vm3879_vm0, %v7831_v54, -inf  ;;  %v7828_v17 = vunpack.i.l.bf16 %v12969_v33  ;;  %v7919_v27 = vunpack.i.h.bf16 %v10851_v12  ;;  %v4919_v49 = vmax.f32 %v4917_v22, %v4918_v15  ;;  %v11184_v22 = vpop.trf.xlu1 }
 0x39c   : > { %v4996_v24 = vsel %vm3879_vm0, %v7914_v32, -inf  ;;  %v4924_v8 = vsel %vm3879_vm0, %v7911_v51, -inf  ;;  %v4854_v31 = vmax.f32 %v4852_v42, %v4853_v43  ;;  %v7916_v59 = vunpack.i.l.bf16 %v10851_v12  ;;  %v11189_v12 = vpop.trf.xlu0 }
 0x39d   : > { %v4781_v55 = vsel %vm3879_vm0, %v7828_v17, -inf  ;;  %v4997_v44 = vsel %vm3879_vm0, %v7919_v27, -inf  ;;  %v4770_v57 = vmax.f32 %v4768_v63, %v4769_v35  ;;  %v4985_v28 = vrot.slane %v4984_v19, 1  ;;  %v12973_v63 = vld [vmem:[#allocation69_spill] sm:$0xff] }
 0x39e   : > { %v4782_v54 = vmax.f32 %v4780_v41, %v4781_v55  ;;  %v4855_v33 = vrot.slane %v4854_v31, 4  ;;  %v4913_v21 = vrot.slane %v4912_v36, 1  ;;  %v4925_v6 = vsel %vm3879_vm0, %v7916_v59, -inf  ;;  %v12974_v35 = vld [vmem:[#allocation73_spill] sm:$0xff] }
 0x39f   : > { %v4998_v53 = vmax.f32 %v4996_v24, %v4997_v44  ;;  %v4777_v15 = vmax.f32 %v4775_v25, %v4776_v1  ;;  %v4849_v32 = vmax.f32 %v4847_v46, %v4848_v3  ;;  %v4926_v42 = vmax.f32 %v4924_v8, %v4925_v6 }
 0x3a0   : > { %v4783_v51 = vrot.slane %v4782_v54, 4  ;;  %v11187_v43 = vsel %vm6442_vm2, %v4842_v14, %v6538_v16  ;;  %v4920_v17 = vrot.slane %v4919_v49, 2  ;;  %v4992_v27 = vrot.slane %v4991_v50, 2 }
 0x3a1   : > { %12972 = vst [vmem:[#allocation99_spill] sm:$0xff] %v11187_v43  ;;  %v12975_v41 = vpack.i.bf16 %v12973_v63, %v12974_v35  ;;  %v11195_v55 = vsel %vm6442_vm2, %v4770_v57, %v6531_v5  ;;  %v11197_v24 = vmax.f32 %v4984_v19, %v4985_v28  ;;  %v4856_v25 = vmax.f32 %v4854_v31, %v4855_v33  ;;  %v11201_v63 = vpop.trf.xlu1  ;;  %v12979_v35 = vld [vmem:[#allocation70_spill] sm:$0xff]  ;;  %v12982_v19 = vld [vmem:[#allocation71_spill] sm:$0xff] }
 0x3a2   : > { %12976 = vst [vmem:[#allocation100_spill] sm:$0xff] %v11195_v55  ;;  %v4999_v46 = vrot.slane %v4998_v53, 4  ;;  %v4914_v3 = vmax.f32 %v4912_v36, %v4913_v21  ;;  %v7836_v6 = vunpack.i.h.bf16 %v10854_v47  ;;  %v4778_v16 = vrot.slane %v4777_v15, 1  ;;  %12978 = vst [vmem:[#allocation73_spill] sm:$0xff] %v11201_v63  ;;  %v12980_v5 = vld [vmem:[#allocation74_spill] sm:$0xff]  ;;  %v12983_v31 = vld [vmem:[#allocation75_spill] sm:$0xff] }
 0x3a3   : > { %8479 = vxpose.xlu0.b32.start [1/4] (short) %v12975_v41, 128  ;;  %12977 = vst [vmem:[#allocation69_spill] sm:$0xff] %v11197_v24  ;;  %v4850_v14 = vrot.slane %v4849_v32, 1  ;;  %v4784_v1 = vmax.f32 %v4782_v54, %v4783_v51  ;;  %v4927_v8 = vrot.slane %v4926_v42, 4  ;;  %v4921_v44 = vmax.f32 %v4919_v49, %v4920_v17 }
 0x3a4   : > { %v4993_v59 = vmax.f32 %v4991_v50, %v4992_v27  ;;  %v7841_v43 = vunpack.i.h.bf16 %v10868_v38  ;;  %v12981_v57 = vpack.i.bf16 %v12979_v35, %v12980_v5  ;;  %v12984_v28 = vpack.i.bf16 %v12982_v19, %v12983_v31  ;;  %v12985_v19 = vld [vmem:[#allocation29_spill] sm:$0xff] }
 0x3a5   : > { %v4857_v21 = vrot.slane %v4856_v25, 2  ;;  %v5000_v36 = vmax.f32 %v4998_v53, %v4999_v46  ;;  %v7833_v33 = vunpack.i.l.bf16 %v10854_v47  ;;  %v4861_v54 = vsel %vm3879_vm0, %v7836_v6, -inf  ;;  %v12986_v46 = vld [vmem:[#allocation78_spill] sm:$0xff]  ;;  %v12987_v47 = vld [vmem:[#allocation76_spill] sm:$0xff] }
 0x3a6   : > { %8567 = vxpose.xlu1.b32.start [1/4] (short) %v12981_v57, 128  ;;  %v7924_v50 = vunpack.i.h.bf16 %v10863_v37  ;;  %v4862_v49 = vsel %vm3879_vm0, %v7841_v43, -inf  ;;  %v7838_v51 = vunpack.i.l.bf16 %v10868_v38  ;;  %v4785_v17 = vrot.slane %v4784_v1, 2  ;;  %v12989_v6 = vld [vmem:[#allocation8_spill] sm:$0xff] }
 0x3a7   : > { %8481 = vxpose.xlu0.b32.cont [2/4] (short) %v12984_v28, 128  ;;  %v4928_v27 = vmax.f32 %v4926_v42, %v4927_v8  ;;  %v7921_v41 = vunpack.i.l.bf16 %v10863_v37  ;;  %v4863_v35 = vmax.f32 %v4861_v54, %v4862_v49  ;;  %v4994_v5 = vrot.slane %v4993_v59, 1  ;;  %v12990_v28 = vld [vmem:[#allocation77_spill] sm:$0xff] }
 0x3a8   : > { %v4790_v57 = vsel %vm3879_vm0, %v7838_v51, -inf  ;;  %v7929_v53 = vunpack.i.h.bf16 %v12985_v19  ;;  %v12988_v31 = vpack.i.bf16 %v12986_v46, %v12987_v47  ;;  %v12991_v24 = vpack.i.bf16 %v12989_v6, %v12990_v28  ;;  %v12993_v6 = vld [vmem:[#allocation14_spill] sm:$0xff] }
 0x3a9   : > { %v4922_v43 = vrot.slane %v4921_v44, 1  ;;  %v4858_v38 = vmax.f32 %v4856_v25, %v4857_v21  ;;  %v5001_v55 = vrot.slane %v5000_v36, 2  ;;  %v4789_v42 = vsel %vm3879_vm0, %v7833_v33, -inf  ;;  %v12995_v21 = vld [vmem:[#allocation13_spill] sm:$0xff]  ;;  %v12996_v33 = vld [vmem:[#allocation12_spill] sm:$0xff] }
 0x3aa   : > { %8569 = vxpose.xlu1.b32.cont [2/4] (short) %v12988_v31, 128  ;;  %v5005_v37 = vsel %vm3879_vm0, %v7924_v50, -inf  ;;  %v4791_v8 = vmax.f32 %v4789_v42, %v4790_v57  ;;  %v7926_v54 = vunpack.i.l.bf16 %v12985_v19  ;;  %v4786_v49 = vmax.f32 %v4784_v1, %v4785_v17 }
 0x3ab   : > { %8483 = vxpose.xlu0.b32.cont [3/4] (short) %v12991_v24, 128  ;;  %v4929_v51 = vrot.slane %v4928_v27, 2  ;;  %v4933_v63 = vsel %vm3879_vm0, %v7921_v41, -inf  ;;  %v4864_v46 = vrot.slane %v4863_v35, 4  ;;  %v5006_v47 = vsel %vm3879_vm0, %v7929_v53, -inf  ;;  %v12992_v24 = vld [vmem:[#allocation15_spill] sm:$0xff] }
 0x3ac   : > { %v4934_v31 = vsel %vm3879_vm0, %v7926_v54, -inf  ;;  %v12994_v25 = vpack.i.bf16 %v12992_v24, %v12993_v6  ;;  %v12997_v28 = vpack.i.bf16 %v12995_v21, %v12996_v33  ;;  %v11237_v50 = vsel %vm6442_vm2, %v4914_v3, %v11157_v13  ;;  %v13003_v13 = vld [vmem:[#allocation16_spill] sm:$0xff] }
 0x3ad   : > { %12998 = vst [vmem:[#allocation70_spill] sm:$0xff] %v11237_v50  ;;  %v11239_v1 = vmax.f32 %v4777_v15, %v4778_v16  ;;  %v11241_v17 = vmax.f32 %v4849_v32, %v4850_v14  ;;  %v5002_v41 = vmax.f32 %v5000_v36, %v5001_v55  ;;  %v11243_v57 = vmax.f32 %v4921_v44, %v4922_v43  ;;  %v13004_v15 = vld [vmem:[#allocation17_spill] sm:$0xff] }
 0x3ae   : > { %8571 = vxpose.xlu1.b32.cont [3/4] (short) %v12994_v25, 128  ;;  %v11245_v19 = vmax.f32 %v4993_v59, %v4994_v5  ;;  %v4792_v53 = vrot.slane %v4791_v8, 4  ;;  %v4865_v42 = vmax.f32 %v4863_v35, %v4864_v46  ;;  %v4935_v54 = vmax.f32 %v4933_v63, %v4934_v31 }
 0x3af   : > { %8485 = vxpose.xlu0.b32.end [4/4] (short) %v12997_v28, 128  ;;  %12999 = vst [vmem:[#allocation74_spill] sm:$0xff] %v11239_v1  ;;  %13000 = vst [vmem:[#allocation71_spill] sm:$0xff] %v11241_v17  ;;  %v5007_v24 = vmax.f32 %v5005_v37, %v5006_v47  ;;  %v7846_v6 = vunpack.i.h.bf16 %v10881_v61  ;;  %v4787_v25 = vrot.slane %v4786_v49, 1  ;;  %v4859_v21 = vrot.slane %v4858_v38, 1 }
 0x3b0   : > { %13001 = vst [vmem:[#allocation75_spill] sm:$0xff] %v11243_v57  ;;  %13002 = vst [vmem:[#allocation29_spill] sm:$0xff] %v11245_v19  ;;  %v11248_v33 = vmax.f32 %v4928_v27, %v4929_v51  ;;  %v13005_v3 = vpack.i.bf16 %v13003_v13, %v13004_v15  ;;  %v5003_v32 = vrot.slane %v5002_v41, 1  ;;  %v7843_v55 = vunpack.i.l.bf16 %v10881_v61  ;;  %v13024_v19 = vld [vmem:[#allocation40_spill] sm:$0xff] }
 0x3b1   : > { %v7934_v16 = vunpack.i.h.bf16 %v10887_v0  ;;  %v7931_v14 = vunpack.i.l.bf16 %v10887_v0  ;;  %v4793_v44 = vmax.f32 %v4791_v8, %v4792_v53  ;;  %v7851_v59 = vunpack.i.h.bf16 %v10894_v18 }
 0x3b2   : > { %8573 = vxpose.xlu1.b32.end [4/4] (short) %v13005_v3, 128  ;;  %v4866_v63 = vrot.slane %v4865_v42, 2  ;;  %v4936_v36 = vrot.slane %v4935_v54, 4  ;;  %v5008_v35 = vrot.slane %v5007_v24, 4  ;;  %v4870_v27 = vsel %vm3879_vm0, %v7846_v6, -inf }
 0x3b3   : > { %v4871_v5 = vsel %vm3879_vm0, %v7851_v59, -inf  ;;  %v7848_v43 = vunpack.i.l.bf16 %v10894_v18  ;;  %v7939_v37 = vunpack.i.h.bf16 %v10903_v10  ;;  %v4798_v61 = vsel %vm3879_vm0, %v7843_v55, -inf }
 0x3b4   : > { %v5014_v51 = vsel %vm3879_vm0, %v7934_v16, -inf  ;;  %v4942_v0 = vsel %vm3879_vm0, %v7931_v14, -inf  ;;  %v4872_v8 = vmax.f32 %v4870_v27, %v4871_v5  ;;  %v7936_v31 = vunpack.i.l.bf16 %v10903_v10 }
 0x3b5   : > { %v4799_v46 = vsel %vm3879_vm0, %v7848_v43, -inf  ;;  %v5015_v47 = vsel %vm3879_vm0, %v7939_v37, -inf  ;;  %v4937_v28 = vmax.f32 %v4935_v54, %v4936_v36  ;;  %v5009_v53 = vmax.f32 %v5007_v24, %v5008_v35 }
 0x3b6   : > { %v4800_v6 = vmax.f32 %v4798_v61, %v4799_v46  ;;  %v4873_v13 = vrot.slane %v4872_v8, 4  ;;  %v4794_v18 = vrot.slane %v4793_v44, 2  ;;  %v4943_v15 = vsel %vm3879_vm0, %v7936_v31, -inf }
 0x3b7   : > { %v5016_v3 = vmax.f32 %v5014_v51, %v5015_v47  ;;  %v11268_v55 = vmax.f32 %v4786_v49, %v4787_v25  ;;  %v11270_v16 = vmax.f32 %v4858_v38, %v4859_v21  ;;  %v4944_v59 = vmax.f32 %v4942_v0, %v4943_v15 }
 0x3b8   : > { %v4801_v14 = vrot.slane %v4800_v6, 4  ;;  %v4931_v27 = vrot.slane %v11248_v33, 1  ;;  %v11273_v5 = vmax.f32 %v5002_v41, %v5003_v32  ;;  %v4867_v43 = vmax.f32 %v4865_v42, %v4866_v63 }
 0x3b9   : > { %13006 = vst [vmem:[#allocation78_spill] sm:$0xff] %v11268_v55  ;;  %13007 = vst [vmem:[#allocation76_spill] sm:$0xff] %v11270_v16  ;;  %v4938_v10 = vrot.slane %v4937_v28, 2  ;;  %v5010_v54 = vrot.slane %v5009_v53, 2  ;;  %v4874_v24 = vmax.f32 %v4872_v8, %v4873_v13  ;;  %v4795_v36 = vmax.f32 %v4793_v44, %v4794_v18 }
 0x3ba   : > { %13008 = vst [vmem:[#allocation8_spill] sm:$0xff] %v11273_v5  ;;  %v5017_v35 = vrot.slane %v5016_v3, 4  ;;  %v7861_v37 = vunpack.i.h.bf16 %v10968_v4  ;;  %v4802_v61 = vmax.f32 %v4800_v6, %v4801_v14  ;;  %v4945_v51 = vrot.slane %v4944_v59, 4 }
 0x3bb   : > { %v7853_v49 = vunpack.i.l.bf16 %v10909_v9  ;;  %v4868_v38 = vrot.slane %v4867_v43, 1  ;;  %v7856_v25 = vunpack.i.h.bf16 %v10909_v9  ;;  %v7858_v21 = vunpack.i.l.bf16 %v10968_v4 }
 0x3bc   : > { %v4939_v0 = vmax.f32 %v4937_v28, %v4938_v10  ;;  %v5011_v41 = vmax.f32 %v5009_v53, %v5010_v54  ;;  %v4875_v32 = vrot.slane %v4874_v24, 2  ;;  %v7944_v42 = vunpack.i.h.bf16 %v10922_v29 }
 0x3bd   : > { %v5018_v63 = vmax.f32 %v5016_v3, %v5017_v35  ;;  %v4880_v44 = vsel %vm3879_vm0, %v7861_v37, -inf  ;;  %v4808_v8 = vsel %vm3879_vm0, %v7858_v21, -inf  ;;  %v7949_v46 = vunpack.i.h.bf16 %v10980_v58 }
 0x3be   : > { %v4803_v47 = vrot.slane %v4802_v61, 2  ;;  %v4946_v31 = vmax.f32 %v4944_v59, %v4945_v51  ;;  %v7941_v6 = vunpack.i.l.bf16 %v10922_v29  ;;  %v4807_v9 = vsel %vm3879_vm0, %v7853_v49, -inf }
 0x3bf   : > { %v4796_v13 = vrot.slane %v4795_v36, 1  ;;  %v4809_v4 = vmax.f32 %v4807_v9, %v4808_v8  ;;  %v4879_v28 = vsel %vm3879_vm0, %v7856_v25, -inf  ;;  %v4876_v53 = vmax.f32 %v4874_v24, %v4875_v32 }
 0x3c0   : > { %v4881_v18 = vmax.f32 %v4879_v28, %v4880_v44  ;;  %v5024_v15 = vsel %vm3879_vm0, %v7949_v46, -inf  ;;  %v4940_v3 = vrot.slane %v4939_v0, 1  ;;  %v5012_v14 = vrot.slane %v5011_v41, 1 }
 0x3c1   : > { %v5019_v10 = vrot.slane %v5018_v63, 2  ;;  %v7946_v54 = vunpack.i.l.bf16 %v10980_v58  ;;  %v4804_v35 = vmax.f32 %v4802_v61, %v4803_v47  ;;  %v4947_v37 = vrot.slane %v4946_v31, 2 }
 0x3c2   : > { %v4951_v59 = vsel %vm3879_vm0, %v7941_v6, -inf  ;;  %v5023_v29 = vsel %vm3879_vm0, %v7944_v42, -inf  ;;  %v4810_v51 = vrot.slane %v4809_v4, 4  ;;  %v11292_v24 = vmax.f32 %v11248_v33, %v4931_v27 }
 0x3c3   : > { %v4952_v49 = vsel %vm3879_vm0, %v7946_v54, -inf  ;;  %v5025_v21 = vmax.f32 %v5023_v29, %v5024_v15  ;;  %v4877_v25 = vrot.slane %v4876_v53, 1  ;;  %v4882_v32 = vrot.slane %v4881_v18, 4 }
 0x3c4   : > { %13009 = vst [vmem:[#allocation77_spill] sm:$0xff] %v11292_v24  ;;  %v11294_v44 = vmax.f32 %v4795_v36, %v4796_v13  ;;  %v11296_v8 = vmax.f32 %v4867_v43, %v4868_v38  ;;  %v11298_v58 = vmax.f32 %v5011_v41, %v5012_v14  ;;  %v4953_v61 = vmax.f32 %v4951_v59, %v4952_v49 }
 0x3c5   : > { %v11300_v46 = vmax.f32 %v4939_v0, %v4940_v3  ;;  %v4948_v47 = vmax.f32 %v4946_v31, %v4947_v37  ;;  %v4805_v42 = vrot.slane %v4804_v35, 1  ;;  %v11302_v6 = vmax.f32 %v5018_v63, %v5019_v10 }
 0x3c6   : > { %13010 = vst [vmem:[#allocation15_spill] sm:$0xff] %v11294_v44  ;;  %13011 = vst [vmem:[#allocation14_spill] sm:$0xff] %v11296_v8  ;;  %v4811_v9 = vmax.f32 %v4809_v4, %v4810_v51  ;;  %v5026_v28 = vrot.slane %v5025_v21, 4  ;;  %v11304_v15 = vmax.f32 %v4876_v53, %v4877_v25  ;;  %v4883_v33 = vmax.f32 %v4881_v18, %v4882_v32 }
 0x3c7   : > { %13012 = vst [vmem:[#allocation13_spill] sm:$0xff] %v11298_v58  ;;  %13013 = vst [vmem:[#allocation12_spill] sm:$0xff] %v11300_v46  ;;  %v7962_v27 = vunpack.i.h.bf16 %v10988_v39  ;;  %v7967_v36 = vunpack.i.h.bf16 %v10998_v45  ;;  %v4954_v43 = vrot.slane %v4953_v61, 4  ;;  %v7959_v38 = vunpack.i.l.bf16 %v10988_v39 }
 0x3c8   : > { %13014 = vst [vmem:[#allocation16_spill] sm:$0xff] %v11302_v6  ;;  %13015 = vst [vmem:[#allocation17_spill] sm:$0xff] %v11304_v15  ;;  %v4949_v41 = vrot.slane %v4948_v47, 1  ;;  %v8050_v0 = vunpack.i.h.bf16 %v10994_v20  ;;  %v8047_v31 = vunpack.i.l.bf16 %v10994_v20  ;;  %v7964_v63 = vunpack.i.l.bf16 %v10998_v45 }
 0x3c9   : > { %v4812_v13 = vrot.slane %v4811_v9, 2  ;;  %v5027_v4 = vmax.f32 %v5025_v21, %v5026_v28  ;;  %v8055_v53 = vunpack.i.h.bf16 %v11008_v62  ;;  %v5105_v18 = vsel %vm3879_vm0, %v7967_v36, -inf }
 0x3ca   : > { %v5033_v3 = vsel %vm3879_vm0, %v7964_v63, -inf  ;;  %v8052_v14 = vunpack.i.l.bf16 %v11008_v62  ;;  %v4884_v10 = vrot.slane %v4883_v33, 2  ;;  %v4955_v54 = vmax.f32 %v4953_v61, %v4954_v43 }
 0x3cb   : > { %v5104_v39 = vsel %vm3879_vm0, %v7962_v27, -inf  ;;  %v5032_v37 = vsel %vm3879_vm0, %v7959_v38, -inf  ;;  %v5248_v20 = vsel %vm3879_vm0, %v8050_v0, -inf  ;;  %v5176_v45 = vsel %vm3879_vm0, %v8047_v31, -inf }
 0x3cc   : > { %v5249_v59 = vsel %vm3879_vm0, %v8055_v53, -inf  ;;  %v5177_v29 = vsel %vm3879_vm0, %v8052_v14, -inf  ;;  %v11322_v51 = vmax.f32 %v4811_v9, %v4812_v13  ;;  %v5034_v49 = vmax.f32 %v5032_v37, %v5033_v3  ;;  %v13022_v53 = vld [vmem:[#allocation67_spill] sm:$0xff] }
 0x3cd   : > { %v5106_v21 = vmax.f32 %v5104_v39, %v5105_v18  ;;  %v11324_v25 = vmax.f32 %v4804_v35, %v4805_v42  ;;  %v5028_v32 = vrot.slane %v5027_v4, 2  ;;  %v11327_v61 = vmax.f32 %v4948_v47, %v4949_v41  ;;  %v13021_v42 = vld [vmem:[#allocation64_spill] sm:$0xff] }
 0x3ce   : > { %13016 = vst [vmem:[#allocation110_spill] sm:$0xff] %v11322_v51  ;;  %v4956_v28 = vrot.slane %v4955_v54, 2  ;;  %v5178_v27 = vmax.f32 %v5176_v45, %v5177_v29  ;;  %v5250_v36 = vmax.f32 %v5248_v20, %v5249_v59  ;;  %v11329_v43 = vmax.f32 %v4883_v33, %v4884_v10 }
 0x3cf   : > { %13017 = vst [vmem:[#allocation111_spill] sm:$0xff] %v11324_v25  ;;  %13018 = vst [vmem:[#allocation112_spill] sm:$0xff] %v11327_v61  ;;  %v7972_v38 = vunpack.i.h.bf16 %v11012_v11  ;;  %v5035_v9 = vrot.slane %v5034_v49, 4  ;;  %v5107_v31 = vrot.slane %v5106_v21, 4  ;;  %v7969_v63 = vunpack.i.l.bf16 %v11012_v11 }
 0x3d0   : > { %13019 = vst [vmem:[#allocation113_spill] sm:$0xff] %v11329_v43  ;;  %v11334_v35 = vmax.f32 %v5027_v4, %v5028_v32  ;;  %v8060_v13 = vunpack.i.h.bf16 %v13021_v42  ;;  %v7977_v47 = vunpack.i.h.bf16 %v13022_v53  ;;  %v11338_v41 = vmax.f32 %v4955_v54, %v4956_v28 }
 0x3d1   : > { %v5179_v18 = vrot.slane %v5178_v27, 4  ;;  %v5251_v3 = vrot.slane %v5250_v36, 4  ;;  %v5113_v33 = vsel %vm3879_vm0, %v7972_v38, -inf  ;;  %v8057_v14 = vunpack.i.l.bf16 %v13021_v42 }
 0x3d2   : > { %13020 = vst [vmem:[#allocation114_spill] sm:$0xff] %v11334_v35  ;;  %13023 = vst [vmem:[#allocation64_spill] sm:$0xff] %v11338_v41  ;;  %v5114_v10 = vsel %vm3879_vm0, %v7977_v47, -inf  ;;  %v7974_v39 = vunpack.i.l.bf16 %v13022_v53  ;;  %v5036_v37 = vmax.f32 %v5034_v49, %v5035_v9  ;;  %v5108_v11 = vmax.f32 %v5106_v21, %v5107_v31 }
 0x3d3   : > { %v5041_v4 = vsel %vm3879_vm0, %v7969_v63, -inf  ;;  %v5115_v20 = vmax.f32 %v5113_v33, %v5114_v10  ;;  %v5257_v45 = vsel %vm3879_vm0, %v8060_v13, -inf  ;;  %v8065_v59 = vunpack.i.h.bf16 %v11040_v2 }
 0x3d4   : > { %v5042_v54 = vsel %vm3879_vm0, %v7974_v39, -inf  ;;  %v5180_v29 = vmax.f32 %v5178_v27, %v5179_v18  ;;  %v5252_v32 = vmax.f32 %v5250_v36, %v5251_v3  ;;  %v5185_v42 = vsel %vm3879_vm0, %v8057_v14, -inf }
 0x3d5   : > { %v5043_v28 = vmax.f32 %v5041_v4, %v5042_v54  ;;  %v5116_v38 = vrot.slane %v5115_v20, 4  ;;  %v5258_v47 = vsel %vm3879_vm0, %v8065_v59, -inf  ;;  %v8062_v49 = vunpack.i.l.bf16 %v11040_v2 }
 0x3d6   : > { %v5109_v21 = vrot.slane %v5108_v11, 2  ;;  %v5259_v63 = vmax.f32 %v5257_v45, %v5258_v47  ;;  %v5037_v53 = vrot.slane %v5036_v37, 2  ;;  %v5253_v33 = vrot.slane %v5252_v32, 2 }
 0x3d7   : > { %v5044_v9 = vrot.slane %v5043_v28, 4  ;;  %v5117_v31 = vmax.f32 %v5115_v20, %v5116_v38  ;;  %v5186_v13 = vsel %vm3879_vm0, %v8062_v49, -inf  ;;  %v5181_v3 = vrot.slane %v5180_v29, 2 }
 0x3d8   : > { %v5187_v39 = vmax.f32 %v5185_v42, %v5186_v13  ;;  %v5260_v27 = vrot.slane %v5259_v63, 4  ;;  %v7982_v2 = vunpack.i.h.bf16 %v11047_v34  ;;  %v7979_v54 = vunpack.i.l.bf16 %v11047_v34 }
 0x3d9   : > { %v5045_v10 = vmax.f32 %v5043_v28, %v5044_v9  ;;  %v5118_v14 = vrot.slane %v5117_v31, 2  ;;  %v5038_v45 = vmax.f32 %v5036_v37, %v5037_v53  ;;  %v5110_v59 = vmax.f32 %v5108_v11, %v5109_v21 }
 0x3da   : > { %v5188_v4 = vrot.slane %v5187_v39, 4  ;;  %v5254_v38 = vmax.f32 %v5252_v32, %v5253_v33  ;;  %v5261_v28 = vmax.f32 %v5259_v63, %v5260_v27  ;;  %v8070_v42 = vunpack.i.h.bf16 %v11058_v7 }
 0x3db   : > { %v5046_v47 = vrot.slane %v5045_v10, 2  ;;  %v5182_v49 = vmax.f32 %v5180_v29, %v5181_v3  ;;  %v7987_v9 = vunpack.i.h.bf16 %v11064_v40  ;;  %v5119_v13 = vmax.f32 %v5117_v31, %v5118_v14 }
 0x3dc   : > { %v5189_v18 = vmax.f32 %v5187_v39, %v5188_v4  ;;  %v5122_v62 = vsel %vm3879_vm0, %v7982_v2, -inf  ;;  %v5050_v36 = vsel %vm3879_vm0, %v7979_v54, -inf  ;;  %v7984_v20 = vunpack.i.l.bf16 %v11064_v40 }
 0x3dd   : > { %v5123_v34 = vsel %vm3879_vm0, %v7987_v9, -inf  ;;  %v8075_v37 = vunpack.i.h.bf16 %v11076_v30  ;;  %v5047_v11 = vmax.f32 %v5045_v10, %v5046_v47  ;;  %v5262_v32 = vrot.slane %v5261_v28, 2 }
 0x3de   : > { %v5266_v21 = vsel %vm3879_vm0, %v8070_v42, -inf  ;;  %v8067_v29 = vunpack.i.l.bf16 %v11058_v7  ;;  %v5051_v63 = vsel %vm3879_vm0, %v7984_v20, -inf  ;;  %v5124_v31 = vmax.f32 %v5122_v62, %v5123_v34 }
 0x3df   : > { %v5267_v53 = vsel %vm3879_vm0, %v8075_v37, -inf  ;;  %v5039_v33 = vrot.slane %v5038_v45, 1  ;;  %v5111_v39 = vrot.slane %v5110_v59, 1  ;;  %v5255_v27 = vrot.slane %v5254_v38, 1 }
 0x3e0   : > { %v5052_v3 = vmax.f32 %v5050_v36, %v5051_v63  ;;  %v5190_v14 = vrot.slane %v5189_v18, 2  ;;  %v5125_v4 = vrot.slane %v5124_v31, 4  ;;  %v8072_v40 = vunpack.i.l.bf16 %v11076_v30 }
 0x3e1   : > { %v5268_v2 = vmax.f32 %v5266_v21, %v5267_v53  ;;  %v5183_v10 = vrot.slane %v5182_v49, 1  ;;  %v5120_v54 = vrot.slane %v5119_v13, 1  ;;  %v5048_v42 = vrot.slane %v5047_v11, 1 }
 0x3e2   : > { %v5053_v47 = vrot.slane %v5052_v3, 4  ;;  %v5263_v9 = vmax.f32 %v5261_v28, %v5262_v32  ;;  %v5194_v7 = vsel %vm3879_vm0, %v8067_v29, -inf  ;;  %v5195_v62 = vsel %vm3879_vm0, %v8072_v40, -inf  ;;  %v13025_v29 = vld [vmem:[#allocation104_spill] sm:$0xff] }
 0x3e3   : > { %v5112_v20 = vmax.f32 %v5110_v59, %v5111_v39  ;;  %v5126_v34 = vmax.f32 %v5124_v31, %v5125_v4  ;;  %v5269_v37 = vrot.slane %v5268_v2, 4  ;;  %v5040_v0 = vmax.f32 %v5038_v45, %v5039_v33  ;;  %v13026_v31 = vld [vmem:[#allocation103_spill] sm:$0xff] }
 0x3e4   : > { %v5256_v58 = vmax.f32 %v5254_v38, %v5255_v27  ;;  %v5191_v36 = vmax.f32 %v5189_v18, %v5190_v14  ;;  %v5054_v63 = vmax.f32 %v5052_v3, %v5053_v47  ;;  %v5196_v5 = vmax.f32 %v5194_v7, %v5195_v62 }
 0x3e5   : > { %v7992_v30 = vunpack.i.h.bf16 %v13024_v19  ;;  %v5184_v21 = vmax.f32 %v5182_v49, %v5183_v10  ;;  %v5049_v53 = vmax.f32 %v5047_v11, %v5048_v42  ;;  %v5121_v35 = vmax.f32 %v5119_v13, %v5120_v54 }
 0x3e6   : > { %v5264_v61 = vrot.slane %v5263_v9, 1  ;;  %v5127_v6 = vrot.slane %v5126_v34, 2  ;;  %v5270_v28 = vmax.f32 %v5268_v2, %v5269_v37  ;;  %v7989_v32 = vunpack.i.l.bf16 %v13024_v19  ;;  %v13027_v19 = vld [vmem:[#allocation106_spill] sm:$0xff] }
 0x3e7   : > { %v7997_v40 = vunpack.i.h.bf16 %v13025_v29  ;;  %v5055_v59 = vrot.slane %v5054_v63, 2  ;;  %v8080_v39 = vunpack.i.h.bf16 %v13026_v31  ;;  %v5192_v45 = vrot.slane %v5191_v36, 1 }
 0x3e8   : > { %v5197_v38 = vrot.slane %v5196_v5, 4  ;;  %v5131_v18 = vsel %vm3879_vm0, %v7992_v30, -inf  ;;  %v5265_v27 = vmax.f32 %v5263_v9, %v5264_v61  ;;  %v8077_v49 = vunpack.i.l.bf16 %v13026_v31 }
 0x3e9   : > { %v5132_v33 = vsel %vm3879_vm0, %v7997_v40, -inf  ;;  %v7994_v13 = vunpack.i.l.bf16 %v13025_v29  ;;  %v5128_v3 = vmax.f32 %v5126_v34, %v5127_v6  ;;  %v5271_v14 = vrot.slane %v5270_v28, 2 }
 0x3ea   : > { %v5133_v11 = vmax.f32 %v5131_v18, %v5132_v33  ;;  %v8085_v4 = vunpack.i.h.bf16 %v13027_v19  ;;  %v5056_v2 = vmax.f32 %v5054_v63, %v5055_v59  ;;  %v5059_v10 = vsel %vm3879_vm0, %v7989_v32, -inf  ;;  %v13028_v18 = vld [vmem:[#allocation107_spill] sm:$0xff] }
 0x3eb   : > { %v5275_v54 = vsel %vm3879_vm0, %v8080_v39, -inf  ;;  %v5060_v47 = vsel %vm3879_vm0, %v7994_v13, -inf  ;;  %v5193_v42 = vmax.f32 %v5191_v36, %v5192_v45  ;;  %v5198_v7 = vmax.f32 %v5196_v5, %v5197_v38 }
 0x3ec   : > { %v5061_v62 = vmax.f32 %v5059_v10, %v5060_v47  ;;  %v5276_v61 = vsel %vm3879_vm0, %v8085_v4, -inf  ;;  %v5203_v9 = vsel %vm3879_vm0, %v8077_v49, -inf  ;;  %v5134_v37 = vrot.slane %v5133_v11, 4 }
 0x3ed   : > { %v8082_v6 = vunpack.i.l.bf16 %v13027_v19  ;;  %v5129_v34 = vrot.slane %v5128_v3, 1  ;;  %v5272_v30 = vmax.f32 %v5270_v28, %v5271_v14  ;;  %v5277_v63 = vmax.f32 %v5275_v54, %v5276_v61  ;;  %v13030_v54 = vld [vmem:[#allocation109_spill] sm:$0xff] }
 0x3ee   : > { %v5062_v29 = vrot.slane %v5061_v62, 4  ;;  %v5057_v40 = vrot.slane %v5056_v2, 1  ;;  %v6559_v59 = vsel %vm6440_vm1, %v5049_v53, %v5040_v0  ;;  %v6566_v36 = vsel %vm6440_vm1, %v5121_v35, %v5112_v20  ;;  %v13029_v35 = vld [vmem:[#allocation108_spill] sm:$0xff] }
 0x3ef   : > { %v5204_v32 = vsel %vm3879_vm0, %v8082_v6, -inf  ;;  %v5199_v5 = vrot.slane %v5198_v7, 2  ;;  %v11390_v39 = vsel %vm6440_vm1, %v5193_v42, %v5184_v21  ;;  %v6580_v45 = vsel %vm6440_vm1, %v5265_v27, %v5256_v58 }
 0x3f0   : > { %v5205_v31 = vmax.f32 %v5203_v9, %v5204_v32  ;;  %v5135_v38 = vmax.f32 %v5133_v11, %v5134_v37  ;;  %v8002_v33 = vunpack.i.h.bf16 %v13028_v18  ;;  %v5063_v28 = vmax.f32 %v5061_v62, %v5062_v29 }
 0x3f1   : > { %v5278_v49 = vrot.slane %v5277_v63, 4  ;;  %v7999_v13 = vunpack.i.l.bf16 %v13028_v18  ;;  %v5058_v14 = vmax.f32 %v5056_v2, %v5057_v40  ;;  %v5130_v19 = vmax.f32 %v5128_v3, %v5129_v34 }
 0x3f2   : > { %v5273_v4 = vrot.slane %v5272_v30, 1  ;;  %v5200_v0 = vmax.f32 %v5198_v7, %v5199_v5  ;;  %v5206_v53 = vrot.slane %v5205_v31, 4  ;;  %v8090_v20 = vunpack.i.h.bf16 %v13029_v35 }
 0x3f3   : > { %v8087_v10 = vunpack.i.l.bf16 %v13029_v35  ;;  %v5136_v21 = vrot.slane %v5135_v38, 2  ;;  %v8007_v47 = vunpack.i.h.bf16 %v13030_v54  ;;  %v5064_v58 = vrot.slane %v5063_v28, 2 }
 0x3f4   : > { %v5279_v27 = vmax.f32 %v5277_v63, %v5278_v49  ;;  %v5140_v11 = vsel %vm3879_vm0, %v8002_v33, -inf  ;;  %v5068_v42 = vsel %vm3879_vm0, %v7999_v13, -inf  ;;  %v8004_v3 = vunpack.i.l.bf16 %v13030_v54 }
 0x3f5   : > { %v5141_v62 = vsel %vm3879_vm0, %v8007_v47, -inf  ;;  %v8095_v2 = vunpack.i.h.bf16 %v11128_v23  ;;  %v5207_v7 = vmax.f32 %v5205_v31, %v5206_v53  ;;  %v5284_v61 = vsel %vm3879_vm0, %v8090_v20, -inf }
 0x3f6   : > { %v5212_v9 = vsel %vm3879_vm0, %v8087_v10, -inf  ;;  %v5142_v37 = vmax.f32 %v5140_v11, %v5141_v62  ;;  %v5069_v6 = vsel %vm3879_vm0, %v8004_v3, -inf  ;;  %v8092_v29 = vunpack.i.l.bf16 %v11128_v23 }
 0x3f7   : > { %v5285_v34 = vsel %vm3879_vm0, %v8095_v2, -inf  ;;  %v5201_v63 = vrot.slane %v5200_v0, 1  ;;  %v5274_v40 = vmax.f32 %v5272_v30, %v5273_v4  ;;  %v5070_v32 = vmax.f32 %v5068_v42, %v5069_v6 }
 0x3f8   : > { %v5143_v5 = vrot.slane %v5142_v37, 4  ;;  %v5137_v18 = vmax.f32 %v5135_v38, %v5136_v21  ;;  %v5213_v33 = vsel %vm3879_vm0, %v8092_v29, -inf  ;;  %v5286_v49 = vmax.f32 %v5284_v61, %v5285_v34 }
 0x3f9   : > { %v5065_v31 = vmax.f32 %v5063_v28, %v5064_v58  ;;  %v5071_v13 = vrot.slane %v5070_v32, 4  ;;  %v5214_v35 = vmax.f32 %v5212_v9, %v5213_v33  ;;  %v11410_v20 = vsel %vm6442_vm2, %v5130_v19, %v6566_v36 }
 0x3fa   : > { %v5144_v53 = vmax.f32 %v5142_v37, %v5143_v5  ;;  %v5208_v10 = vrot.slane %v5207_v7, 2  ;;  %v5280_v54 = vrot.slane %v5279_v27, 2  ;;  %v11413_v47 = vsel %vm6442_vm2, %v5058_v14, %v6559_v59 }
 0x3fb   : > { %v5202_v23 = vmax.f32 %v5200_v0, %v5201_v63  ;;  %v11416_v30 = vsel %vm6442_vm2, %v5274_v40, %v6580_v45  ;;  %v5287_v38 = vrot.slane %v5286_v49, 4  ;;  %v5072_v4 = vmax.f32 %v5070_v32, %v5071_v13 }
 0x3fc   : > { %v8012_v21 = vunpack.i.h.bf16 %v11131_v56  ;;  %v5066_v28 = vrot.slane %v5065_v31, 1  ;;  %v5138_v58 = vrot.slane %v5137_v18, 1  ;;  %v5145_v11 = vrot.slane %v5144_v53, 2 }
 0x3fd   : > { %v5215_v42 = vrot.slane %v5214_v35, 4  ;;  %v5209_v62 = vmax.f32 %v5207_v7, %v5208_v10  ;;  %v5281_v36 = vmax.f32 %v5279_v27, %v5280_v54  ;;  %v8017_v19 = vunpack.i.h.bf16 %v11146_v26 }
 0x3fe   : > { %v5288_v3 = vmax.f32 %v5286_v49, %v5287_v38  ;;  %v8009_v59 = vunpack.i.l.bf16 %v11131_v56  ;;  %v8100_v14 = vunpack.i.h.bf16 %v11140_v48  ;;  %v5073_v0 = vrot.slane %v5072_v4, 2 }
 0x3ff   : > { %v5149_v45 = vsel %vm3879_vm0, %v8012_v21, -inf  ;;  %v5150_v2 = vsel %vm3879_vm0, %v8017_v19, -inf  ;;  %v8014_v61 = vunpack.i.l.bf16 %v11146_v26  ;;  %v5146_v9 = vmax.f32 %v5144_v53, %v5145_v11 }
 0x400   : > { %v5216_v37 = vmax.f32 %v5214_v35, %v5215_v42  ;;  %v8097_v6 = vunpack.i.l.bf16 %v11140_v48  ;;  %v5151_v7 = vmax.f32 %v5149_v45, %v5150_v2  ;;  %v5282_v27 = vrot.slane %v5281_v36, 1 }
 0x401   : > { %v5078_v34 = vsel %vm3879_vm0, %v8014_v61, -inf  ;;  %v8105_v29 = vunpack.i.h.bf16 %v11152_v60  ;;  %v5210_v56 = vrot.slane %v5209_v62, 1  ;;  %v5289_v63 = vrot.slane %v5288_v3, 2 }
 0x402   : > { %v5077_v40 = vsel %vm3879_vm0, %v8009_v59, -inf  ;;  %v5293_v32 = vsel %vm3879_vm0, %v8100_v14, -inf  ;;  %v5074_v5 = vmax.f32 %v5072_v4, %v5073_v0  ;;  %v8102_v26 = vunpack.i.l.bf16 %v11152_v60 }
 0x403   : > { %v5079_v33 = vmax.f32 %v5077_v40, %v5078_v34  ;;  %v5147_v49 = vrot.slane %v5146_v9, 1  ;;  %v5217_v13 = vrot.slane %v5216_v37, 2  ;;  %v5221_v48 = vsel %vm3879_vm0, %v8097_v6, -inf }
 0x404   : > { %v5152_v53 = vrot.slane %v5151_v7, 4  ;;  %v5294_v35 = vsel %vm3879_vm0, %v8105_v29, -inf  ;;  %v5222_v10 = vsel %vm3879_vm0, %v8102_v26, -inf  ;;  %v11436_v54 = vsel %vm6442_vm2, %v5202_v23, %v11390_v39 }
 0x405   : > { %v11438_v38 = vmax.f32 %v5065_v31, %v5066_v28  ;;  %v11440_v21 = vmax.f32 %v5137_v18, %v5138_v58  ;;  %v5290_v4 = vmax.f32 %v5288_v3, %v5289_v63  ;;  %v11442_v11 = vmax.f32 %v5209_v62, %v5210_v56  ;;  %v13031_v18 = vld [vmem:[#allocation97_spill] sm:$0xff] }
 0x406   : > { %v11444_v60 = vmax.f32 %v5281_v36, %v5282_v27  ;;  %v5080_v42 = vrot.slane %v5079_v33, 4  ;;  %v5153_v19 = vmax.f32 %v5151_v7, %v5152_v53  ;;  %v5223_v59 = vmax.f32 %v5221_v48, %v5222_v10  ;;  %v13032_v36 = vld [vmem:[#allocation98_spill] sm:$0xff] }
 0x407   : > { %v5295_v14 = vmax.f32 %v5293_v32, %v5294_v35  ;;  %v8022_v0 = vunpack.i.h.bf16 %v11163_v52  ;;  %v5075_v45 = vrot.slane %v5074_v5, 1  ;;  %v11447_v2 = vmax.f32 %v5146_v9, %v5147_v49 }
 0x408   : > { %v5218_v39 = vmax.f32 %v5216_v37, %v5217_v13  ;;  %v5291_v23 = vrot.slane %v5290_v4, 1  ;;  %v8019_v31 = vunpack.i.l.bf16 %v11163_v52  ;;  %v8110_v28 = vunpack.i.h.bf16 %v13031_v18 }
 0x409   : > { %v8107_v58 = vunpack.i.l.bf16 %v13031_v18  ;;  %v5081_v62 = vmax.f32 %v5079_v33, %v5080_v42  ;;  %v8027_v3 = vunpack.i.h.bf16 %v13032_v36  ;;  %v5154_v61 = vrot.slane %v5153_v19, 2 }
 0x40a   : > { %v5224_v6 = vrot.slane %v5223_v59, 4  ;;  %v5296_v7 = vrot.slane %v5295_v14, 4  ;;  %v5158_v27 = vsel %vm3879_vm0, %v8022_v0, -inf  ;;  %v8024_v9 = vunpack.i.l.bf16 %v13032_v36 }
 0x40b   : > { %v5159_v34 = vsel %vm3879_vm0, %v8027_v3, -inf  ;;  %v8115_v37 = vunpack.i.h.bf16 %v11184_v22  ;;  %v5086_v52 = vsel %vm3879_vm0, %v8019_v31, -inf  ;;  %v5302_v29 = vsel %vm3879_vm0, %v8110_v28, -inf  ;;  %v8033_v3 = vpop.trf.xlu0 }
 0x40c   : > { %v5230_v56 = vsel %vm3879_vm0, %v8107_v58, -inf  ;;  %v5160_v63 = vmax.f32 %v5158_v27, %v5159_v34  ;;  %v5087_v40 = vsel %vm3879_vm0, %v8024_v9, -inf  ;;  %v8112_v33 = vunpack.i.l.bf16 %v11184_v22 }
 0x40d   : > { %v5303_v32 = vsel %vm3879_vm0, %v8115_v37, -inf  ;;  %v5219_v26 = vrot.slane %v5218_v39, 1  ;;  %v5082_v49 = vrot.slane %v5081_v62, 2  ;;  %v5297_v13 = vmax.f32 %v5295_v14, %v5296_v7 }
 0x40e   : > { %v5088_v48 = vmax.f32 %v5086_v52, %v5087_v40  ;;  %v5225_v53 = vmax.f32 %v5223_v59, %v5224_v6  ;;  %v5231_v35 = vsel %vm3879_vm0, %v8112_v33, -inf  ;;  %v5304_v10 = vmax.f32 %v5302_v29, %v5303_v32 }
 0x40f   : > { %v11464_v42 = vmax.f32 %v5074_v5, %v5075_v45  ;;  %v5161_v31 = vrot.slane %v5160_v63, 4  ;;  %v5232_v18 = vmax.f32 %v5230_v56, %v5231_v35  ;;  %v11466_v28 = vmax.f32 %v5290_v4, %v5291_v23  ;;  %v8121_v4 = vpop.trf.xlu1  ;;  %v13033_v56 = vld [vmem:[#allocation73_spill] sm:$0xff]  ;;  %v8134_v33 = vpop.trf.xlu0 }
 0x410   : > { %v5089_v0 = vrot.slane %v5088_v48, 4  ;;  %v5155_v58 = vmax.f32 %v5153_v19, %v5154_v61  ;;  %v5305_v36 = vrot.slane %v5304_v10, 4  ;;  %v5083_v27 = vmax.f32 %v5081_v62, %v5082_v49 }
 0x411   : > { %v5298_v22 = vrot.slane %v5297_v13, 2  ;;  %v5233_v34 = vrot.slane %v5232_v18, 4  ;;  %v11468_v9 = vmax.f32 %v5218_v39, %v5219_v26  ;;  %v5226_v14 = vrot.slane %v5225_v53, 2 }
 0x412   : > { %v8032_v59 = vunpack.i.h.bf16 %v11189_v12  ;;  %v5090_v6 = vmax.f32 %v5088_v48, %v5089_v0  ;;  %v5162_v7 = vmax.f32 %v5160_v63, %v5161_v31  ;;  %v5306_v5 = vmax.f32 %v5304_v10, %v5305_v36 }
 0x413   : > { %v8037_v45 = vunpack.i.h.bf16 %v8033_v3  ;;  %v5234_v37 = vmax.f32 %v5232_v18, %v5233_v34  ;;  %v8029_v52 = vunpack.i.l.bf16 %v11189_v12  ;;  %v5084_v23 = vrot.slane %v5083_v27, 1 }
 0x414   : > { %v5156_v19 = vrot.slane %v5155_v58, 1  ;;  %v5299_v61 = vmax.f32 %v5297_v13, %v5298_v22  ;;  %v5227_v29 = vmax.f32 %v5225_v53, %v5226_v14  ;;  %v8120_v39 = vunpack.i.h.bf16 %v13033_v56  ;;  %v8222_v22 = vpop.trf.xlu1 }
 0x415   : > { %v5168_v62 = vsel %vm3879_vm0, %v8037_v45, -inf  ;;  %v8034_v40 = vunpack.i.l.bf16 %v8033_v3  ;;  %v5167_v32 = vsel %vm3879_vm0, %v8032_v59, -inf  ;;  %v5091_v26 = vrot.slane %v5090_v6, 2 }
 0x416   : > { %v5163_v63 = vrot.slane %v5162_v7, 2  ;;  %v5307_v49 = vrot.slane %v5306_v5, 2  ;;  %v5169_v48 = vmax.f32 %v5167_v32, %v5168_v62  ;;  %v5235_v35 = vrot.slane %v5234_v37, 2  ;;  %v8139_v32 = vpop.trf.xlu0 }
 0x417   : > { %v5095_v12 = vsel %vm3879_vm0, %v8029_v52, -inf  ;;  %v5096_v10 = vsel %vm3879_vm0, %v8034_v40, -inf  ;;  %v11477_v0 = vmax.f32 %v5155_v58, %v5156_v19  ;;  %v8125_v53 = vunpack.i.h.bf16 %v8121_v4 }
 0x418   : > { %v5097_v13 = vmax.f32 %v5095_v12, %v5096_v10  ;;  %v5170_v31 = vrot.slane %v5169_v48, 4  ;;  %v5228_v18 = vrot.slane %v5227_v29, 1  ;;  %v5300_v36 = vrot.slane %v5299_v61, 1 }
 0x419   : > { %v8117_v3 = vunpack.i.l.bf16 %v13033_v56  ;;  %v11480_v34 = vmax.f32 %v5083_v27, %v5084_v23  ;;  %v5092_v14 = vmax.f32 %v5090_v6, %v5091_v26  ;;  %v5164_v59 = vmax.f32 %v5162_v7, %v5163_v63 }
 0x41a   : > { %v5311_v45 = vsel %vm3879_vm0, %v8120_v39, -inf  ;;  %v5236_v62 = vmax.f32 %v5234_v37, %v5235_v35  ;;  %v5308_v52 = vmax.f32 %v5306_v5, %v5307_v49  ;;  %v5098_v40 = vrot.slane %v5097_v13, 4  ;;  %v8227_v5 = vpop.trf.xlu1 }
 0x41b   : > { %v5171_v58 = vmax.f32 %v5169_v48, %v5170_v31  ;;  %v5312_v19 = vsel %vm3879_vm0, %v8125_v53, -inf  ;;  %v8122_v12 = vunpack.i.l.bf16 %v8121_v4  ;;  %v11484_v10 = vmax.f32 %v5227_v29, %v5228_v18  ;;  %v8144_v31 = vpop.trf.xlu0 }
 0x41c   : > { %v11486_v46 = vmax.f32 %v5299_v61, %v5300_v36  ;;  %v5239_v56 = vsel %vm3879_vm0, %v8117_v3, -inf  ;;  %v5093_v27 = vrot.slane %v5092_v14, 1  ;;  %v5165_v23 = vrot.slane %v5164_v59, 1 }
 0x41d   : > { %v8138_v6 = vunpack.i.h.bf16 %v8134_v33  ;;  %v8226_v7 = vunpack.i.h.bf16 %v8222_v22  ;;  %v5237_v26 = vrot.slane %v5236_v62, 1  ;;  %v5309_v39 = vrot.slane %v5308_v52, 1 }
 0x41e   : > { %v5313_v37 = vmax.f32 %v5311_v45, %v5312_v19  ;;  %v5099_v63 = vmax.f32 %v5097_v13, %v5098_v40  ;;  %v5172_v49 = vrot.slane %v5171_v58, 2  ;;  %v5240_v48 = vsel %vm3879_vm0, %v8122_v12, -inf  ;;  %v8232_v12 = vpop.trf.xlu1 }
 0x41f   : > { %v8135_v35 = vunpack.i.l.bf16 %v8134_v33  ;;  %v8223_v4 = vunpack.i.l.bf16 %v8222_v22  ;;  %v8143_v29 = vunpack.i.h.bf16 %v8139_v32  ;;  %v5392_v61 = vsel %vm3879_vm0, %v8138_v6, -inf }
 0x420   : > { %v5536_v53 = vsel %vm3879_vm0, %v8226_v7, -inf  ;;  %v8140_v18 = vunpack.i.l.bf16 %v8139_v32  ;;  %v8231_v36 = vunpack.i.h.bf16 %v8227_v5  ;;  %v8228_v24 = vunpack.i.l.bf16 %v8227_v5 }
 0x421   : > { %v5393_v3 = vsel %vm3879_vm0, %v8143_v29, -inf  ;;  %v5241_v57 = vmax.f32 %v5239_v56, %v5240_v48  ;;  %v5314_v19 = vrot.slane %v5313_v37, 4  ;;  %v5320_v33 = vsel %vm3879_vm0, %v8135_v35, -inf  ;;  %v8149_v48 = vpop.trf.xlu0 }
 0x422   : > { %v5321_v45 = vsel %vm3879_vm0, %v8140_v18, -inf  ;;  %v5394_v13 = vmax.f32 %v5392_v61, %v5393_v3  ;;  %v5537_v40 = vsel %vm3879_vm0, %v8231_v36, -inf  ;;  %v5464_v22 = vsel %vm3879_vm0, %v8223_v4, -inf }
 0x423   : > { %v5322_v6 = vmax.f32 %v5320_v33, %v5321_v45  ;;  %v5465_v7 = vsel %vm3879_vm0, %v8228_v24, -inf  ;;  %v5538_v32 = vmax.f32 %v5536_v53, %v5537_v40  ;;  %v11498_v50 = vmax.f32 %v5092_v14, %v5093_v27 }
 0x424   : > { %v11500_v29 = vmax.f32 %v5164_v59, %v5165_v23  ;;  %v11502_v56 = vmax.f32 %v5308_v52, %v5309_v39  ;;  %v5100_v5 = vrot.slane %v5099_v63, 2  ;;  %v5395_v61 = vrot.slane %v5394_v13, 4  ;;  %v8237_v23 = vpop.trf.xlu1 }
 0x425   : > { %v8148_v18 = vunpack.i.h.bf16 %v8144_v31  ;;  %v11504_v36 = vmax.f32 %v5236_v62, %v5237_v26  ;;  %v11506_v35 = vmax.f32 %v5171_v58, %v5172_v49  ;;  %v5242_v4 = vrot.slane %v5241_v57, 4 }
 0x426   : > { %13034 = vst [vmem:[#allocation67_spill] sm:$0xff] %v11502_v56  ;;  %v5466_v3 = vmax.f32 %v5464_v22, %v5465_v7  ;;  %v11508_v45 = vmax.f32 %v5313_v37, %v5314_v19  ;;  %v5323_v24 = vrot.slane %v5322_v6, 4  ;;  %v5539_v53 = vrot.slane %v5538_v32, 4 }
 0x427   : > { %v8153_v14 = vunpack.i.h.bf16 %v8149_v48  ;;  %v8145_v27 = vunpack.i.l.bf16 %v8144_v31  ;;  %v8236_v59 = vunpack.i.h.bf16 %v8232_v12  ;;  %v11510_v52 = vmax.f32 %v5099_v63, %v5100_v5 }
 0x428   : > { %v5396_v39 = vmax.f32 %v5394_v13, %v5395_v61  ;;  %v5401_v40 = vsel %vm3879_vm0, %v8148_v18, -inf  ;;  %v5467_v26 = vrot.slane %v5466_v3, 4  ;;  %v8150_v49 = vunpack.i.l.bf16 %v8149_v48  ;;  %v8154_v13 = vpop.trf.xlu0 }
 0x429   : > { %v5402_v62 = vsel %vm3879_vm0, %v8153_v14, -inf  ;;  %v5324_v37 = vmax.f32 %v5322_v6, %v5323_v24  ;;  %v5540_v19 = vmax.f32 %v5538_v32, %v5539_v53  ;;  %v8241_v22 = vunpack.i.h.bf16 %v8237_v23 }
 0x42a   : > { %v5403_v33 = vmax.f32 %v5401_v40, %v5402_v62  ;;  %v5329_v7 = vsel %vm3879_vm0, %v8145_v27, -inf  ;;  %v5545_v31 = vsel %vm3879_vm0, %v8236_v59, -inf  ;;  %v5330_v63 = vsel %vm3879_vm0, %v8150_v49, -inf  ;;  %v8242_v59 = vpop.trf.xlu1 }
 0x42b   : > { %v5397_v61 = vrot.slane %v5396_v39, 2  ;;  %v8233_v18 = vunpack.i.l.bf16 %v8232_v12  ;;  %v5331_v41 = vmax.f32 %v5329_v7, %v5330_v63  ;;  %v5546_v14 = vsel %vm3879_vm0, %v8241_v22, -inf }
 0x42c   : > { %v5404_v5 = vrot.slane %v5403_v33, 4  ;;  %v11519_v58 = vmax.f32 %v5241_v57, %v5242_v4  ;;  %v5468_v48 = vmax.f32 %v5466_v3, %v5467_v26  ;;  %v5325_v6 = vrot.slane %v5324_v37, 2  ;;  %v8159_v26 = vpop.trf.xlu0 }
 0x42d   : > { %v5332_v32 = vrot.slane %v5331_v41, 4  ;;  %v8238_v24 = vunpack.i.l.bf16 %v8237_v23  ;;  %v5547_v53 = vmax.f32 %v5545_v31, %v5546_v14  ;;  %v5541_v27 = vrot.slane %v5540_v19, 2 }
 0x42e   : > { %v5405_v40 = vmax.f32 %v5403_v33, %v5404_v5  ;;  %v5398_v15 = vmax.f32 %v5396_v39, %v5397_v61  ;;  %v5473_v49 = vsel %vm3879_vm0, %v8233_v18, -inf  ;;  %v5469_v4 = vrot.slane %v5468_v48, 2 }
 0x42f   : > { %v5333_v8 = vmax.f32 %v5331_v41, %v5332_v32  ;;  %v5474_v12 = vsel %vm3879_vm0, %v8238_v24, -inf  ;;  %v5548_v3 = vrot.slane %v5547_v53, 4  ;;  %v5326_v23 = vmax.f32 %v5324_v37, %v5325_v6  ;;  %v8247_v24 = vpop.trf.xlu1 }
 0x430   : > { %v5406_v62 = vrot.slane %v5405_v40, 2  ;;  %v8158_v22 = vunpack.i.h.bf16 %v8154_v13  ;;  %v5542_v31 = vmax.f32 %v5540_v19, %v5541_v27  ;;  %v5475_v5 = vmax.f32 %v5473_v49, %v5474_v12 }
 0x431   : > { %v5399_v39 = vrot.slane %v5398_v15, 1  ;;  %v5334_v61 = vrot.slane %v5333_v8, 2  ;;  %v8155_v18 = vunpack.i.l.bf16 %v8154_v13  ;;  %v8163_v41 = vunpack.i.h.bf16 %v8159_v26 }
 0x432   : > { %v5407_v63 = vmax.f32 %v5405_v40, %v5406_v62  ;;  %v5470_v14 = vmax.f32 %v5468_v48, %v5469_v4  ;;  %v5549_v32 = vmax.f32 %v5547_v53, %v5548_v3  ;;  %v5327_v7 = vrot.slane %v5326_v23, 1  ;;  %v8164_v62 = vpop.trf.xlu0 }
 0x433   : > { %v5410_v57 = vsel %vm3879_vm0, %v8158_v22, -inf  ;;  %v8246_v16 = vunpack.i.h.bf16 %v8242_v59  ;;  %v5411_v43 = vsel %vm3879_vm0, %v8163_v41, -inf  ;;  %v5476_v33 = vrot.slane %v5475_v5, 4 }
 0x434   : > { %v5408_v17 = vrot.slane %v5407_v63, 1  ;;  %v8160_v37 = vunpack.i.l.bf16 %v8159_v26  ;;  %v5412_v6 = vmax.f32 %v5410_v57, %v5411_v43  ;;  %v5335_v19 = vmax.f32 %v5333_v8, %v5334_v61  ;;  %v8252_v43 = vpop.trf.xlu1 }
 0x435   : > { %v5338_v40 = vsel %vm3879_vm0, %v8155_v18, -inf  ;;  %v8251_v27 = vunpack.i.h.bf16 %v8247_v24  ;;  %v5550_v13 = vrot.slane %v5549_v32, 2  ;;  %v5471_v49 = vrot.slane %v5470_v14, 1 }
 0x436   : > { %v5339_v48 = vsel %vm3879_vm0, %v8160_v37, -inf  ;;  %v5413_v53 = vrot.slane %v5412_v6, 4  ;;  %v5543_v12 = vrot.slane %v5542_v31, 1  ;;  %v5554_v4 = vsel %vm3879_vm0, %v8246_v16, -inf  ;;  %v8169_v16 = vpop.trf.xlu0 }
 0x437   : > { %v5340_v3 = vmax.f32 %v5338_v40, %v5339_v48  ;;  %v5409_v22 = vmax.f32 %v5407_v63, %v5408_v17  ;;  %v5477_v41 = vmax.f32 %v5475_v5, %v5476_v33  ;;  %v8243_v25 = vunpack.i.l.bf16 %v8242_v59 }
 0x438   : > { %v5555_v26 = vsel %vm3879_vm0, %v8251_v27, -inf  ;;  %v5336_v8 = vrot.slane %v5335_v19, 1  ;;  %v8248_v57 = vunpack.i.l.bf16 %v8247_v24  ;;  %v5328_v61 = vmax.f32 %v5326_v23, %v5327_v7 }
 0x439   : > { %v5400_v18 = vmax.f32 %v5398_v15, %v5399_v39  ;;  %v5551_v44 = vmax.f32 %v5549_v32, %v5550_v13  ;;  %v5414_v55 = vmax.f32 %v5412_v6, %v5413_v53  ;;  %v11532_v1 = vmax.f32 %v5470_v14, %v5471_v49  ;;  %v8257_v14 = vpop.trf.xlu1  ;;  %v6773_v49 = vld [vmem:[%s12505_s6 + $0x10] sm:$0xff] }
 0x43a   : > { %v11534_v37 = vmax.f32 %v5542_v31, %v5543_v12  ;;  %v5341_v51 = vrot.slane %v5340_v3, 4  ;;  %v5556_v56 = vmax.f32 %v5554_v4, %v5555_v26  ;;  %v5478_v40 = vrot.slane %v5477_v41, 2  ;;  %6791 = vperm.xlu1 %7245, %v6773_v49  }
 0x43b   : > { %13035 = vst [vmem:[#allocation40_spill] sm:$0xff] %v11532_v1  ;;  %v5482_v17 = vsel %vm3879_vm0, %v8243_v25, -inf  ;;  %v8168_v59 = vunpack.i.h.bf16 %v8164_v62  ;;  %v5337_v33 = vmax.f32 %v5335_v19, %v5336_v8  ;;  %v11538_v63 = vsel %vm6440_vm1, %v5409_v22, %v5400_v18  ;;  %v8174_v8 = vpop.trf.xlu0 }
 0x43c   : > { %13036 = vst [vmem:[#allocation104_spill] sm:$0xff] %v11534_v37  ;;  %v5483_v7 = vsel %vm3879_vm0, %v8248_v57, -inf  ;;  %v5552_v15 = vrot.slane %v5551_v44, 1  ;;  %v5415_v23 = vrot.slane %v5414_v55, 2  ;;  %v8165_v5 = vunpack.i.l.bf16 %v8164_v62 }
 0x43d   : > { %v8173_v39 = vunpack.i.h.bf16 %v8169_v16  ;;  %v5342_v31 = vmax.f32 %v5340_v3, %v5341_v51  ;;  %v5557_v32 = vrot.slane %v5556_v56, 4  ;;  %v5484_v24 = vmax.f32 %v5482_v17, %v5483_v7 }
 0x43e   : > { %v5419_v6 = vsel %vm3879_vm0, %v8168_v59, -inf  ;;  %v8170_v25 = vunpack.i.l.bf16 %v8169_v16  ;;  %v5479_v13 = vmax.f32 %v5477_v41, %v5478_v40  ;;  %v8256_v19 = vunpack.i.h.bf16 %v8252_v43 }
 0x43f   : > { %v5420_v27 = vsel %vm3879_vm0, %v8173_v39, -inf  ;;  %v8261_v53 = vunpack.i.h.bf16 %v8257_v14  ;;  %v5347_v62 = vsel %vm3879_vm0, %v8165_v5, -inf  ;;  %v8253_v12 = vunpack.i.l.bf16 %v8252_v43  ;;  %v8262_v39 = vpop.trf.xlu1 }
 0x440   : > { %v5421_v48 = vmax.f32 %v5419_v6, %v5420_v27  ;;  %v5348_v51 = vsel %vm3879_vm0, %v8170_v25, -inf  ;;  %v5343_v4 = vrot.slane %v5342_v31, 2  ;;  %v5416_v3 = vmax.f32 %v5414_v55, %v5415_v23 }
 0x441   : > { %v5558_v22 = vmax.f32 %v5556_v56, %v5557_v32  ;;  %v5349_v26 = vmax.f32 %v5347_v62, %v5348_v51  ;;  %v11548_v57 = vmax.f32 %v5551_v44, %v5552_v15  ;;  %v5485_v41 = vrot.slane %v5484_v24, 4 }
 0x442   : > { %v8258_v18 = vunpack.i.l.bf16 %v8257_v14  ;;  %v5480_v16 = vrot.slane %v5479_v13, 1  ;;  %v11551_v40 = vsel %vm6440_vm1, %v5337_v33, %v5328_v61  ;;  %v5422_v17 = vrot.slane %v5421_v48, 4  ;;  %v6774_v61 = vld [vmem:[%s12505_s6 + $0x18] sm:$0xff] }
 0x443   : > { %13037 = vst [vmem:[#allocation103_spill] sm:$0xff] %v11548_v57  ;;  %v5564_v59 = vsel %vm3879_vm0, %v8261_v53, -inf  ;;  %v5350_v43 = vrot.slane %v5349_v26, 4  ;;  %v5491_v7 = vsel %vm3879_vm0, %v8253_v12, -inf  ;;  %v5563_v55 = vsel %vm3879_vm0, %v8256_v19, -inf  ;;  %v8179_v53 = vpop.trf.xlu0  ;;  %6796 = vperm.xlu1 %7245, %v6774_v61  }
 0x444   : > { %v5492_v5 = vsel %vm3879_vm0, %v8258_v18, -inf  ;;  %v5344_v56 = vmax.f32 %v5342_v31, %v5343_v4  ;;  %v5417_v23 = vrot.slane %v5416_v3, 1  ;;  %v5559_v44 = vrot.slane %v5558_v22, 2 }
 0x445   : > { %v5493_v15 = vmax.f32 %v5491_v7, %v5492_v5  ;;  %v5486_v14 = vmax.f32 %v5484_v24, %v5485_v41  ;;  %v5565_v32 = vmax.f32 %v5563_v55, %v5564_v59  ;;  %v11560_v33 = vmax.f32 %v5479_v13, %v5480_v16  ;;  %v8267_v16 = vpop.trf.xlu1 }
 0x446   : > { %v5423_v6 = vmax.f32 %v5421_v48, %v5422_v17  ;;  %v8178_v25 = vunpack.i.h.bf16 %v8174_v8  ;;  %v5351_v49 = vmax.f32 %v5349_v26, %v5350_v43  ;;  %v8175_v19 = vunpack.i.l.bf16 %v8174_v8 }
 0x447   : > { %13038 = vst [vmem:[#allocation106_spill] sm:$0xff] %v11560_v33  ;;  %v5494_v27 = vrot.slane %v5493_v15, 4  ;;  %v5418_v31 = vmax.f32 %v5416_v3, %v5417_v23  ;;  %v5560_v62 = vmax.f32 %v5558_v22, %v5559_v44  ;;  %v5566_v12 = vrot.slane %v5565_v32, 4  ;;  %v8184_v23 = vpop.trf.xlu0 }
 0x448   : > { %v8266_v51 = vunpack.i.h.bf16 %v8262_v39  ;;  %v5345_v4 = vrot.slane %v5344_v56, 1  ;;  %v5487_v24 = vrot.slane %v5486_v14, 2  ;;  %v8183_v18 = vunpack.i.h.bf16 %v8179_v53 }
 0x449   : > { %v5495_v41 = vmax.f32 %v5493_v15, %v5494_v27  ;;  %v5424_v59 = vrot.slane %v5423_v6, 2  ;;  %v5428_v7 = vsel %vm3879_vm0, %v8178_v25, -inf  ;;  %v8263_v13 = vunpack.i.l.bf16 %v8262_v39  ;;  %v8272_v33 = vpop.trf.xlu1 }
 0x44a   : > { %v5352_v48 = vrot.slane %v5351_v49, 2  ;;  %v5356_v17 = vsel %vm3879_vm0, %v8175_v19, -inf  ;;  %v5429_v5 = vsel %vm3879_vm0, %v8183_v18, -inf  ;;  %v5567_v26 = vmax.f32 %v5565_v32, %v5566_v12 }
 0x44b   : > { %v5572_v3 = vsel %vm3879_vm0, %v8266_v51, -inf  ;;  %v8180_v22 = vunpack.i.l.bf16 %v8179_v53  ;;  %v5430_v8 = vmax.f32 %v5428_v7, %v5429_v5  ;;  %v5496_v43 = vrot.slane %v5495_v41, 2 }
 0x44c   : > { %v8271_v55 = vunpack.i.h.bf16 %v8267_v16  ;;  %v5500_v44 = vsel %vm3879_vm0, %v8263_v13, -inf  ;;  %v8268_v39 = vunpack.i.l.bf16 %v8267_v16  ;;  %v5346_v27 = vmax.f32 %v5344_v56, %v5345_v4  ;;  %v6771_v13 = vld [vmem:[%s12505_s6] sm:$0xff] }
 0x44d   : > { %v5357_v15 = vsel %vm3879_vm0, %v8180_v22, -inf  ;;  %v5431_v61 = vrot.slane %v5430_v8, 4  ;;  %v5561_v25 = vrot.slane %v5560_v62, 1  ;;  %v5488_v18 = vmax.f32 %v5486_v14, %v5487_v24  ;;  %6781 = vperm.xlu1 %7245, %v6771_v13   ;;  %v8189_v24 = vpop.trf.xlu0 }
 0x44e   : > { %v5358_v57 = vmax.f32 %v5356_v17, %v5357_v15  ;;  %v5573_v19 = vsel %vm3879_vm0, %v8271_v55, -inf  ;;  %v5501_v12 = vsel %vm3879_vm0, %v8268_v39, -inf  ;;  %v5353_v51 = vmax.f32 %v5351_v49, %v5352_v48 }
 0x44f   : > { %v5432_v32 = vmax.f32 %v5430_v8, %v5431_v61  ;;  %v5574_v53 = vmax.f32 %v5572_v3, %v5573_v19  ;;  %v5425_v7 = vmax.f32 %v5423_v6, %v5424_v59  ;;  %v5568_v5 = vrot.slane %v5567_v26, 2  ;;  %v8277_v61 = vpop.trf.xlu1 }
 0x450   : > { %v5502_v37 = vmax.f32 %v5500_v44, %v5501_v12  ;;  %v5497_v16 = vmax.f32 %v5495_v41, %v5496_v43  ;;  %v8188_v56 = vunpack.i.h.bf16 %v8184_v23  ;;  %v11575_v4 = vsel %vm6442_vm2, %v5346_v27, %v11551_v40  ;;  %v6772_v27 = vld [vmem:[%s12505_s6 + $0x8] sm:$0xff] }
 0x451   : > { %v11579_v14 = vsel %vm6442_vm2, %v5418_v31, %v11538_v63  ;;  %v11581_v49 = vmax.f32 %v5560_v62, %v5561_v25  ;;  %v5359_v6 = vrot.slane %v5358_v57, 4  ;;  %v5433_v59 = vrot.slane %v5432_v32, 2  ;;  %6786 = vperm.xlu1 %7245, %v6772_v27  }
 0x452   : > { %v5575_v48 = vrot.slane %v5574_v53, 4  ;;  %v5489_v17 = vrot.slane %v5488_v18, 1  ;;  %v5354_v3 = vrot.slane %v5353_v51, 1  ;;  %v5426_v22 = vrot.slane %v5425_v7, 1 }
 0x453   : > { %13039 = vst [vmem:[#allocation107_spill] sm:$0xff] %v11581_v49  ;;  %v5503_v41 = vrot.slane %v5502_v37, 4  ;;  %v5498_v8 = vrot.slane %v5497_v16, 1  ;;  %v5569_v43 = vmax.f32 %v5567_v26, %v5568_v5  ;;  %v5437_v55 = vsel %vm3879_vm0, %v8188_v56, -inf  ;;  %v8194_v56 = vpop.trf.xlu0  ;;  %v11598_v1 = vpop.trf.xlu1 }
 0x454   : > { %v8193_v40 = vunpack.i.h.bf16 %v8189_v24  ;;  %v5360_v44 = vmax.f32 %v5358_v57, %v5359_v6  ;;  %v8185_v15 = vunpack.i.l.bf16 %v8184_v23  ;;  %v5434_v63 = vmax.f32 %v5432_v32, %v5433_v59 }
 0x455   : > { %v5576_v31 = vmax.f32 %v5574_v53, %v5575_v48  ;;  %v8276_v62 = vunpack.i.h.bf16 %v8272_v33  ;;  %v5504_v25 = vmax.f32 %v5502_v37, %v5503_v41  ;;  %v8273_v19 = vunpack.i.l.bf16 %v8272_v33 }
 0x456   : > { %v5438_v39 = vsel %vm3879_vm0, %v8193_v40, -inf  ;;  %v8190_v12 = vunpack.i.l.bf16 %v8189_v24  ;;  %v5570_v26 = vrot.slane %v5569_v43, 1  ;;  %v8281_v5 = vunpack.i.h.bf16 %v8277_v61 }
 0x457   : > { %v5439_v13 = vmax.f32 %v5437_v55, %v5438_v39  ;;  %v5361_v57 = vrot.slane %v5360_v44, 2  ;;  %v5365_v23 = vsel %vm3879_vm0, %v8185_v15, -inf  ;;  %v5581_v6 = vsel %vm3879_vm0, %v8276_v62, -inf }
 0x458   : > { %v5366_v32 = vsel %vm3879_vm0, %v8190_v12, -inf  ;;  %v5582_v48 = vsel %vm3879_vm0, %v8281_v5, -inf  ;;  %v8278_v40 = vunpack.i.l.bf16 %v8277_v61  ;;  %v5435_v37 = vrot.slane %v5434_v63, 1 }
 0x459   : > { %v5440_v53 = vrot.slane %v5439_v13, 4  ;;  %v5367_v59 = vmax.f32 %v5365_v23, %v5366_v32  ;;  %v5505_v33 = vrot.slane %v5504_v25, 2  ;;  %v5577_v24 = vrot.slane %v5576_v31, 2  ;;  %v8199_v23 = vpop.trf.xlu0 }
 0x45a   : > { %v5509_v41 = vsel %vm3879_vm0, %v8273_v19, -inf  ;;  %v5510_v39 = vsel %vm3879_vm0, %v8278_v40, -inf  ;;  %v11594_v27 = vmax.f32 %v5488_v18, %v5489_v17  ;;  %v11596_v15 = vmax.f32 %v5425_v7, %v5426_v22  ;;  %v6894_v18 = vld [vmem:[%s12507_s8] sm:$0xff] }
 0x45b   : > { %v5441_v55 = vmax.f32 %v5439_v13, %v5440_v53  ;;  %v5368_v12 = vrot.slane %v5367_v59, 4  ;;  %v5583_v49 = vmax.f32 %v5581_v6, %v5582_v48  ;;  %v11600_v62 = vmax.f32 %v5353_v51, %v5354_v3  ;;  %6902 = vperm.xlu1 %7245, %v6894_v18  }
 0x45c   : > { %v11602_v5 = vmax.f32 %v5497_v16, %v5498_v8  ;;  %v11604_v61 = vmax.f32 %v5360_v44, %v5361_v57  ;;  %v11606_v32 = vmax.f32 %v5576_v31, %v5577_v24  ;;  %v5511_v19 = vmax.f32 %v5509_v41, %v5510_v39  ;;  %v6895_v31 = vld [vmem:[%s12507_s8 + $0x8] sm:$0xff] }
 0x45d   : > { %v8198_v13 = vunpack.i.h.bf16 %v8194_v56  ;;  %v11611_v7 = vmax.f32 %v5569_v43, %v5570_v26  ;;  %v11613_v17 = vmax.f32 %v5434_v63, %v5435_v37  ;;  %v11615_v22 = vmax.f32 %v5504_v25, %v5505_v33 }
 0x45e   : > { %v5442_v51 = vrot.slane %v5441_v55, 2  ;;  %v5369_v16 = vmax.f32 %v5367_v59, %v5368_v12  ;;  %v5584_v3 = vrot.slane %v5583_v49, 4  ;;  %v8195_v8 = vunpack.i.l.bf16 %v8194_v56  ;;  %v13040_v12 = vld [vmem:[#allocation9_spill] sm:$0xff] }
 0x45f   : > { %v8203_v44 = vunpack.i.h.bf16 %v8199_v23  ;;  %v5363_v57 = vrot.slane %v11604_v61, 1  ;;  %v8286_v53 = vunpack.i.h.bf16 %v11598_v1  ;;  %v5579_v43 = vrot.slane %v11606_v32, 1  ;;  %6907 = vperm.xlu1 %7245, %v6895_v31  }
 0x460   : > { %v5512_v63 = vrot.slane %v5511_v19, 4  ;;  %v5446_v25 = vsel %vm3879_vm0, %v8198_v13, -inf  ;;  %v5507_v6 = vrot.slane %v11615_v22, 1  ;;  %v11626_v59 = vmax.f32 %v5441_v55, %v5442_v51  ;;  %v13041_v13 = vld [vmem:[#allocation21_spill] sm:$0xff] }
 0x461   : > { %v5447_v26 = vsel %vm3879_vm0, %v8203_v44, -inf  ;;  %v8200_v56 = vunpack.i.l.bf16 %v8199_v23  ;;  %v5370_v40 = vrot.slane %v5369_v16, 2  ;;  %v5585_v37 = vmax.f32 %v5583_v49, %v5584_v3  ;;  %v13042_v23 = vld [vmem:[#allocation82_spill] sm:$0xff]  ;;  %v8287_v49 = vpop.trf.xlu1 }
 0x462   : > { %v5448_v48 = vmax.f32 %v5446_v25, %v5447_v26  ;;  %v5374_v33 = vsel %vm3879_vm0, %v8195_v8, -inf  ;;  %v5590_v24 = vsel %vm3879_vm0, %v8286_v53, -inf  ;;  %v8283_v41 = vunpack.i.l.bf16 %v11598_v1  ;;  %v13044_v8 = vld [vmem:[#allocation25_spill] sm:$0xff]  ;;  %v13045_v26 = vld [vmem:[#allocation26_spill] sm:$0xff] }
 0x463   : > { %v5375_v39 = vsel %vm3879_vm0, %v8200_v56, -inf  ;;  %v6445_v18 = vsel %vm6444_vm9, %v13041_v13, %v13040_v12  ;;  %v5513_v55 = vmax.f32 %v5511_v19, %v5512_v63  ;;  %v13043_v44 = vrot.slane %v13042_v23, 1  ;;  %v13047_v12 = vld [vmem:[#allocation36_spill] sm:$0xff] }
 0x464   : > { %v5449_v51 = vrot.slane %v5448_v48, 4  ;;  %v5376_v3 = vmax.f32 %v5374_v33, %v5375_v39  ;;  %v6447_v53 = vsel %vm6446_vm10, %v13044_v8, %v6445_v18  ;;  %v11640_v1 = vmax.f32 %v5369_v16, %v5370_v40 }
 0x465   : > { %v3951_v31 = vmax.f32 %v13042_v23, %v13043_v44  ;;  %v5586_v25 = vrot.slane %v5585_v37, 2  ;;  %v6449_v56 = vsel %vm6448_vm12, %v13045_v26, %v6447_v53  ;;  %v13046_v19 = vrot.slane %v11510_v52, 1  ;;  %v8204_v23 = vpop.trf.xlu0  ;;  %v6974_v53 = vld [vmem:[%s12508_s9 + $0x8] sm:$0xff] }
 0x466   : > { %v6451_v13 = vsel %vm6450_vm13, %v13047_v12, %v6449_v56  ;;  %v6561_v33 = vsel %vm6444_vm9, %v11438_v38, %v11413_v47  ;;  %v8291_v39 = vunpack.i.h.bf16 %v8287_v49  ;;  %v5450_v18 = vmax.f32 %v5448_v48, %v5449_v51  ;;  %6983 = vperm.xlu1 %7245, %v6974_v53  }
 0x467   : > { %v5103_v63 = vmax.f32 %v11510_v52, %v13046_v19  ;;  %v6453_v16 = vsel %vm6452_vm14, %v3951_v31, %v6451_v13  ;;  %v6562_v40 = vsel %vm6446_vm10, %v11464_v42, %v6561_v33  ;;  %v5377_v44 = vrot.slane %v5376_v3, 4 }
 0x468   : > { %v6563_v8 = vsel %vm6448_vm12, %v11480_v34, %v6562_v40  ;;  %v5591_v52 = vsel %vm3879_vm0, %v8291_v39, -inf  ;;  %v5514_v26 = vrot.slane %v5513_v55, 2  ;;  %v8288_v38 = vunpack.i.l.bf16 %v8287_v49  ;;  %v13051_v39 = vld [vmem:[#allocation18_spill] sm:$0xff]  ;;  %v13053_v40 = vld [vmem:[#allocation23_spill] sm:$0xff] }
 0x469   : > { %v6564_v47 = vsel %vm6450_vm13, %v11498_v50, %v6563_v8  ;;  %v5592_v48 = vmax.f32 %v5590_v24, %v5591_v52  ;;  %v11664_v42 = vmax.f32 %v11604_v61, %v5363_v57  ;;  %v11666_v51 = vmax.f32 %v5585_v37, %v5586_v25  ;;  %v6975_v24 = vld [vmem:[#allocation2] sm:$0x1] }
 0x46a   : > { %v6565_v34 = vsel %vm6452_vm14, %v5103_v63, %v6564_v47  ;;  %v5518_v31 = vsel %vm3879_vm0, %v8283_v41, -inf  ;;  %v5451_v56 = vrot.slane %v5450_v18, 2  ;;  %v5519_v12 = vsel %vm3879_vm0, %v8288_v38, -inf  ;;  %7006 = vperm.xlu1 %7245, %v6975_v24   ;;  %v13048_v63 = vld [vmem:[#allocation83_spill] sm:$0xff]  ;;  %v11702_v38 = vpop.trf.xlu1 }
 0x46b   : > { %v8654_v19 = vpack.i.bf16 %v6453_v16, %v6565_v34  ;;  %v11672_v13 = vmax.f32 %v11606_v32, %v5579_v43  ;;  %v5378_v50 = vmax.f32 %v5376_v3, %v5377_v44  ;;  %v5593_v49 = vrot.slane %v5592_v48, 4  ;;  %v13050_v3 = vld [vmem:[#allocation7_spill] sm:$0xff] }
 0x46c   : > { %v11675_v33 = vmax.f32 %v11615_v22, %v5507_v6  ;;  %v5372_v61 = vrot.slane %v11640_v1, 1  ;;  %v5444_v57 = vrot.slane %v11626_v59, 1  ;;  %v11679_v37 = vmax.f32 %v5513_v55, %v5514_v26  ;;  %v13054_v26 = vld [vmem:[#allocation27_spill] sm:$0xff] }
 0x46d   : > { %8655 = vxpose.xlu0.b32.start [1/16] (narrow) %v8654_v19, 32  ;;  %v5588_v41 = vrot.slane %v11666_v51, 1  ;;  %v5520_v25 = vmax.f32 %v5518_v31, %v5519_v12  ;;  %v13049_v32 = vrot.slane %v13048_v63, 1  ;;  %v6456_v22 = vsel %vm6444_vm9, %v13051_v39, %v13050_v3  ;;  %v13055_v31 = vld [vmem:[#allocation32_spill] sm:$0xff]  ;;  %v8209_v19 = vpop.trf.xlu0 }
 0x46e   : > { %v11688_v6 = vmax.f32 %v5450_v18, %v5451_v56  ;;  %v13052_v16 = vrot.slane %v11506_v35, 1  ;;  %v6457_v44 = vsel %vm6446_vm10, %v13053_v40, %v6456_v22  ;;  %v6568_v8 = vsel %vm6444_vm9, %v11440_v21, %v11410_v20 }
 0x46f   : > { %v4023_v43 = vmax.f32 %v13048_v63, %v13049_v32  ;;  %v5379_v52 = vrot.slane %v5378_v50, 2  ;;  %v5594_v53 = vmax.f32 %v5592_v48, %v5593_v49  ;;  %v6458_v47 = vsel %vm6448_vm12, %v13054_v26, %v6457_v44  ;;  %v8297_v44 = vpop.trf.xlu1 }
 0x470   : > { %v5175_v55 = vmax.f32 %v11506_v35, %v13052_v16  ;;  %v6569_v18 = vsel %vm6446_vm10, %v11447_v2, %v6568_v8  ;;  %v8208_v34 = vunpack.i.h.bf16 %v8204_v23  ;;  %v6459_v35 = vsel %vm6450_vm13, %v13055_v31, %v6458_v47  ;;  %v13059_v47 = vld [vmem:[#allocation10_spill] sm:$0xff] }
 0x471   : > { %v6570_v56 = vsel %vm6448_vm12, %v11477_v0, %v6569_v18  ;;  %v5521_v12 = vrot.slane %v5520_v25, 4  ;;  %v8205_v20 = vunpack.i.l.bf16 %v8204_v23  ;;  %v6460_v21 = vsel %vm6452_vm14, %v4023_v43, %v6459_v35  ;;  %v13061_v35 = vld [vmem:[#allocation24_spill] sm:$0xff] }
 0x472   : > { %v6571_v48 = vsel %vm6450_vm13, %v11500_v29, %v6570_v56  ;;  %v5516_v49 = vrot.slane %v11679_v37, 1  ;;  %v5453_v2 = vrot.slane %v11688_v6, 1  ;;  %v5595_v63 = vrot.slane %v5594_v53, 2 }
 0x473   : > { %v6572_v24 = vsel %vm6452_vm14, %v5175_v55, %v6571_v48  ;;  %v8213_v3 = vunpack.i.h.bf16 %v8209_v19  ;;  %v11714_v39 = vmax.f32 %v5378_v50, %v5379_v52  ;;  %v5455_v0 = vsel %vm3879_vm0, %v8208_v34, -inf  ;;  %v13057_v50 = vld [vmem:[#allocation85_spill] sm:$0xff] }
 0x474   : > { %v8656_v32 = vpack.i.bf16 %v6460_v21, %v6572_v24  ;;  %v8210_v22 = vunpack.i.l.bf16 %v8209_v19  ;;  %v5522_v23 = vmax.f32 %v5520_v25, %v5521_v12  ;;  %v5383_v43 = vsel %vm3879_vm0, %v8205_v20, -inf  ;;  %v13060_v25 = vld [vmem:[#allocation19_spill] sm:$0xff]  ;;  %v13062_v12 = vld [vmem:[#allocation80_spill] sm:$0xff] }
 0x475   : > { %v5456_v29 = vsel %vm3879_vm0, %v8213_v3, -inf  ;;  %v13056_v16 = vrot.slane %v11519_v58, 2  ;;  %v8296_v55 = vunpack.i.h.bf16 %v11702_v38  ;;  %v13058_v52 = vrot.slane %v13057_v50, 1 }
 0x476   : > { %8657 = vxpose.xlu0.b32.cont [2/16] (narrow) %v8656_v32, 32  ;;  %v5384_v8 = vsel %vm3879_vm0, %v8210_v22, -inf  ;;  %v6463_v18 = vsel %vm6444_vm9, %v13060_v25, %v13059_v47  ;;  %v11730_v34 = vmax.f32 %v5594_v53, %v5595_v63  ;;  %v5457_v19 = vmax.f32 %v5455_v0, %v5456_v29  ;;  %v13063_v53 = vld [vmem:[#allocation37_spill] sm:$0xff]  ;;  %v8310_v0 = vpop.trf.xlu0 }
 0x477   : > { %v5245_v40 = vmax.f32 %v11519_v58, %v13056_v16  ;;  %v4095_v26 = vmax.f32 %v13057_v50, %v13058_v52  ;;  %v6464_v56 = vsel %vm6446_vm10, %v13061_v35, %v6463_v18  ;;  %v6575_v58 = vsel %vm6444_vm9, %v11442_v11, %v11436_v54 }
 0x478   : > { %v6465_v20 = vsel %vm6448_vm12, %v13062_v12, %v6464_v56  ;;  %v6576_v21 = vsel %vm6446_vm10, %v11468_v9, %v6575_v58  ;;  %v8301_v48 = vunpack.i.h.bf16 %v8297_v44  ;;  %v5385_v24 = vmax.f32 %v5383_v43, %v5384_v8 }
 0x479   : > { %v5246_v31 = vrot.slane %v5245_v40, 1  ;;  %v6466_v63 = vsel %vm6450_vm13, %v13063_v53, %v6465_v20  ;;  %v6577_v3 = vsel %vm6448_vm12, %v11484_v10, %v6576_v21  ;;  %v5523_v22 = vrot.slane %v5522_v23, 2 }
 0x47a   : > { %v5599_v16 = vsel %vm3879_vm0, %v8296_v55, -inf  ;;  %v6467_v54 = vsel %vm6452_vm14, %v4095_v26, %v6466_v63  ;;  %v6578_v11 = vsel %vm6450_vm13, %v11504_v36, %v6577_v3  ;;  %v5600_v43 = vsel %vm3879_vm0, %v8301_v48, -inf  ;;  %v8315_v58 = vpop.trf.xlu0 }
 0x47b   : > { %v5247_v32 = vmax.f32 %v5245_v40, %v5246_v31  ;;  %v8293_v29 = vunpack.i.l.bf16 %v11702_v38  ;;  %v5458_v40 = vrot.slane %v5457_v19, 4  ;;  %v8298_v50 = vunpack.i.l.bf16 %v8297_v44  ;;  %v13065_v31 = vld [vmem:[#allocation84_spill] sm:$0xff] }
 0x47c   : > { %v11755_v10 = vmax.f32 %v11626_v59, %v5444_v57  ;;  %v5386_v55 = vrot.slane %v5385_v24, 4  ;;  %v11760_v36 = vmax.f32 %v11640_v1, %v5372_v61  ;;  %v11763_v52 = vmax.f32 %v11679_v37, %v5516_v49  ;;  %v8398_v61 = vpop.trf.xlu1 }
 0x47d   : > { %v6579_v9 = vsel %vm6452_vm14, %v5247_v32, %v6578_v11  ;;  %v11768_v38 = vmax.f32 %v11666_v51, %v5588_v41  ;;  %v5601_v44 = vmax.f32 %v5599_v16, %v5600_v43  ;;  %v5381_v26 = vrot.slane %v11714_v39, 1  ;;  %v13070_v32 = vld [vmem:[#allocation79_spill] sm:$0xff] }
 0x47e   : > { %v8658_v8 = vpack.i.bf16 %v6467_v54, %v6579_v9  ;;  %v11772_v59 = vmax.f32 %v11688_v6, %v5453_v2  ;;  %v11774_v57 = vmax.f32 %v5522_v23, %v5523_v22  ;;  %v5597_v1 = vrot.slane %v11730_v34, 1  ;;  %v13067_v2 = vld [vmem:[#allocation11_spill] sm:$0xff]  ;;  %v13068_v23 = vld [vmem:[#allocation20_spill] sm:$0xff]  ;;  %v13071_v22 = vld [vmem:[#allocation81_spill] sm:$0xff] }
 0x47f   : > { %v5527_v37 = vsel %vm3879_vm0, %v8293_v29, -inf  ;;  %v5459_v49 = vmax.f32 %v5457_v19, %v5458_v40  ;;  %v5528_v47 = vsel %vm3879_vm0, %v8298_v50, -inf  ;;  %v13064_v51 = vrot.slane %v11508_v45, 2  ;;  %v13069_v19 = vld [vmem:[#allocation22_spill] sm:$0xff] }
 0x480   : > { %8659 = vxpose.xlu0.b32.cont [3/16] (narrow) %v8658_v8, 32  ;;  %v5387_v25 = vmax.f32 %v5385_v24, %v5386_v55  ;;  %v8314_v18 = vunpack.i.h.bf16 %v8310_v0  ;;  %v13066_v35 = vrot.slane %v13065_v31, 1  ;;  %v6470_v56 = vsel %vm6444_vm9, %v13068_v23, %v13067_v2  ;;  %v8403_v43 = vpop.trf.xlu1 }
 0x481   : > { %v5317_v41 = vmax.f32 %v11508_v45, %v13064_v51  ;;  %v5602_v12 = vrot.slane %v5601_v44, 4  ;;  %v6471_v21 = vsel %vm6446_vm10, %v13069_v19, %v6470_v56  ;;  %v6582_v45 = vsel %vm6444_vm9, %v11444_v60, %v11416_v30  ;;  %v13072_v60 = vld [vmem:[#allocation67_spill] sm:$0xff] }
 0x482   : > { %v4167_v6 = vmax.f32 %v13065_v31, %v13066_v35  ;;  %v5529_v48 = vmax.f32 %v5527_v37, %v5528_v47  ;;  %v8311_v24 = vunpack.i.l.bf16 %v8310_v0  ;;  %v6472_v53 = vsel %vm6448_vm12, %v13070_v32, %v6471_v21  ;;  %v8320_v37 = vpop.trf.xlu0 }
 0x483   : > { %v5318_v20 = vrot.slane %v5317_v41, 1  ;;  %v6583_v63 = vsel %vm6446_vm10, %v11466_v28, %v6582_v45  ;;  %v6473_v16 = vsel %vm6450_vm13, %v13071_v22, %v6472_v53  ;;  %v8402_v11 = vunpack.i.h.bf16 %v8398_v61 }
 0x484   : > { %v6584_v54 = vsel %vm6448_vm12, %v11486_v46, %v6583_v63  ;;  %v5680_v9 = vsel %vm3879_vm0, %v8314_v18, -inf  ;;  %v6474_v30 = vsel %vm6452_vm14, %v4167_v6, %v6473_v16  ;;  %v5603_v29 = vmax.f32 %v5601_v44, %v5602_v12  ;;  %v8408_v56 = vpop.trf.xlu1 }
 0x485   : > { %v5319_v3 = vmax.f32 %v5317_v41, %v5318_v20  ;;  %v6585_v0 = vsel %vm6450_vm13, %v13072_v60, %v6584_v54  ;;  %v8399_v28 = vunpack.i.l.bf16 %v8398_v61  ;;  %v5608_v8 = vsel %vm3879_vm0, %v8311_v24, -inf }
 0x486   : > { %v8319_v55 = vunpack.i.h.bf16 %v8315_v58  ;;  %v5824_v46 = vsel %vm3879_vm0, %v8402_v11, -inf  ;;  %v8316_v47 = vunpack.i.l.bf16 %v8315_v58  ;;  %v8407_v51 = vunpack.i.h.bf16 %v8403_v43  ;;  %v8325_v32 = vpop.trf.xlu0 }
 0x487   : > { %v6586_v40 = vsel %vm6452_vm14, %v5319_v3, %v6585_v0  ;;  %v5752_v41 = vsel %vm3879_vm0, %v8399_v28, -inf  ;;  %v8404_v61 = vunpack.i.l.bf16 %v8403_v43  ;;  %v11813_v6 = vmax.f32 %v11714_v39, %v5381_v26 }
 0x488   : > { %v8660_v50 = vpack.i.bf16 %v6474_v30, %v6586_v40  ;;  %v5681_v18 = vsel %vm3879_vm0, %v8319_v55, -inf  ;;  %v5609_v31 = vsel %vm3879_vm0, %v8316_v47, -inf  ;;  %v5825_v35 = vsel %vm3879_vm0, %v8407_v51, -inf }
 0x489   : > { %v5682_v44 = vmax.f32 %v5680_v9, %v5681_v18  ;;  %v5610_v2 = vmax.f32 %v5608_v8, %v5609_v31  ;;  %v5826_v23 = vmax.f32 %v5824_v46, %v5825_v35  ;;  %v5388_v12 = vrot.slane %v5387_v25, 2 }
 0x48a   : > { %8661 = vxpose.xlu0.b32.cont [4/16] (narrow) %v8660_v50, 32  ;;  %v5460_v58 = vrot.slane %v5459_v49, 2  ;;  %v5753_v20 = vsel %vm3879_vm0, %v8404_v61, -inf  ;;  %v11817_v19 = vmax.f32 %v11730_v34, %v5597_v1  ;;  %v5530_v21 = vrot.slane %v5529_v48, 4  ;;  %v8413_v1 = vpop.trf.xlu1 }
 0x48b   : > { %v5683_v45 = vrot.slane %v5682_v44, 4  ;;  %v5754_v24 = vmax.f32 %v5752_v41, %v5753_v20  ;;  %v5525_v53 = vrot.slane %v11774_v57, 1  ;;  %v5604_v63 = vrot.slane %v5603_v29, 2 }
 0x48c   : > { %v5611_v3 = vrot.slane %v5610_v2, 4  ;;  %v5827_v26 = vrot.slane %v5826_v23, 4  ;;  %v8324_v22 = vunpack.i.h.bf16 %v8320_v37  ;;  %v5389_v16 = vmax.f32 %v5387_v25, %v5388_v12 }
 0x48d   : > { %v5755_v39 = vrot.slane %v5754_v24, 4  ;;  %v11820_v54 = vmax.f32 %v5459_v49, %v5460_v58  ;;  %v8321_v11 = vunpack.i.l.bf16 %v8320_v37  ;;  %v8329_v9 = vunpack.i.h.bf16 %v8325_v32 }
 0x48e   : > { %v5531_v30 = vmax.f32 %v5529_v48, %v5530_v21  ;;  %v5684_v60 = vmax.f32 %v5682_v44, %v5683_v45  ;;  %v8412_v34 = vunpack.i.h.bf16 %v8408_v56  ;;  %v11822_v0 = vmax.f32 %v5603_v29, %v5604_v63  ;;  %v8330_v44 = vpop.trf.xlu0 }
 0x48f   : > { %v5612_v43 = vmax.f32 %v5610_v2, %v5611_v3  ;;  %v5690_v40 = vsel %vm3879_vm0, %v8329_v9, -inf  ;;  %v5756_v28 = vmax.f32 %v5754_v24, %v5755_v39  ;;  %v5828_v8 = vmax.f32 %v5826_v23, %v5827_v26 }
 0x490   : > { %v5689_v50 = vsel %vm3879_vm0, %v8324_v22, -inf  ;;  %v8326_v55 = vunpack.i.l.bf16 %v8325_v32  ;;  %v5617_v25 = vsel %vm3879_vm0, %v8321_v11, -inf  ;;  %v8417_v46 = vunpack.i.h.bf16 %v8413_v1 }
 0x491   : > { %v5691_v49 = vmax.f32 %v5689_v50, %v5690_v40  ;;  %v5685_v37 = vrot.slane %v5684_v60, 2  ;;  %v5833_v48 = vsel %vm3879_vm0, %v8412_v34, -inf  ;;  %v8409_v47 = vunpack.i.l.bf16 %v8408_v56  ;;  %v13073_v50 = vld [vmem:[#allocation33_spill] sm:$0xff] }
 0x492   : > { %v5618_v51 = vsel %vm3879_vm0, %v8326_v55, -inf  ;;  %v5613_v29 = vrot.slane %v5612_v43, 2  ;;  %v5834_v31 = vsel %vm3879_vm0, %v8417_v46, -inf  ;;  %v5532_v35 = vrot.slane %v5531_v30, 2  ;;  %v13074_v55 = vld [vmem:[#allocation90_spill] sm:$0xff] }
 0x493   : > { %v5619_v41 = vmax.f32 %v5617_v25, %v5618_v51  ;;  %v5692_v18 = vrot.slane %v5691_v49, 4  ;;  %v5757_v61 = vrot.slane %v5756_v28, 2  ;;  %v5829_v2 = vrot.slane %v5828_v8, 2 }
 0x494   : > { %v8414_v58 = vunpack.i.l.bf16 %v8413_v1  ;;  %v5835_v20 = vmax.f32 %v5833_v48, %v5834_v31  ;;  %v11830_v21 = vmax.f32 %v5684_v60, %v5685_v37  ;;  %v5761_v45 = vsel %vm3879_vm0, %v8409_v47, -inf }
 0x495   : > { %v5620_v23 = vrot.slane %v5619_v41, 4  ;;  %v5693_v12 = vmax.f32 %v5691_v49, %v5692_v18  ;;  %v11833_v56 = vmax.f32 %v5612_v43, %v5613_v29  ;;  %v11837_v3 = vmax.f32 %v11774_v57, %v5525_v53  ;;  %v13075_v49 = vld [vmem:[#allocation47_spill] sm:$0xff] }
 0x496   : > { %v5762_v63 = vsel %vm3879_vm0, %v8414_v58, -inf  ;;  %v5390_v39 = vrot.slane %v5389_v16, 1  ;;  %v5462_v26 = vrot.slane %v11820_v54, 1  ;;  %v11840_v22 = vmax.f32 %v5828_v8, %v5829_v2  ;;  %v13078_v2 = vld [vmem:[#allocation51_spill] sm:$0xff] }
 0x497   : > { %v5621_v24 = vmax.f32 %v5619_v41, %v5620_v23  ;;  %v5694_v32 = vrot.slane %v5693_v12, 2  ;;  %v11842_v11 = vmax.f32 %v5531_v30, %v5532_v35  ;;  %v5606_v9 = vrot.slane %v11822_v0, 1 }
 0x498   : > { %v11845_v60 = vmax.f32 %v5756_v28, %v5757_v61  ;;  %v5836_v34 = vrot.slane %v5835_v20, 4  ;;  %v5687_v1 = vrot.slane %v11830_v21, 1  ;;  %v5763_v43 = vmax.f32 %v5761_v45, %v5762_v63  ;;  %v13076_v28 = vld [vmem:[#allocation92_spill] sm:$0xff]  ;;  %v8335_v45 = vpop.trf.xlu0 }
 0x499   : > { %v8334_v40 = vunpack.i.h.bf16 %v8330_v44  ;;  %v6477_v57 = vsel %vm6444_vm9, %v13074_v55, %v13073_v50  ;;  %v5615_v53 = vrot.slane %v11833_v56, 1  ;;  %v5622_v25 = vrot.slane %v5621_v24, 2 }
 0x49a   : > { %v5695_v8 = vmax.f32 %v5693_v12, %v5694_v32  ;;  %v6478_v30 = vsel %vm6446_vm10, %v13075_v49, %v6477_v57  ;;  %v5831_v46 = vrot.slane %v11840_v22, 1  ;;  %v13077_v37 = vrot.slane %v13076_v28, 1  ;;  %v8418_v12 = vpop.trf.xlu1  ;;  %v13080_v49 = vld [vmem:[#allocation30_spill] sm:$0xff] }
 0x49b   : > { %v5391_v47 = vmax.f32 %v5389_v16, %v5390_v39  ;;  %v6589_v51 = vsel %vm6444_vm9, %v11600_v62, %v11575_v4  ;;  %v5759_v29 = vrot.slane %v11845_v60, 1  ;;  %v11862_v41 = vmax.f32 %v5835_v20, %v5836_v34  ;;  %v13079_v62 = vld [vmem:[#allocation31_spill] sm:$0xff] }
 0x49c   : > { %v4239_v48 = vmax.f32 %v13076_v28, %v13077_v37  ;;  %v8331_v18 = vunpack.i.l.bf16 %v8330_v44  ;;  %v6590_v31 = vsel %vm6446_vm10, %v11664_v42, %v6589_v51  ;;  %v5764_v35 = vrot.slane %v5763_v43, 4 }
 0x49d   : > { %v5698_v61 = vsel %vm3879_vm0, %v8334_v40, -inf  ;;  %v6479_v23 = vsel %vm6448_vm12, %v13078_v2, %v6478_v30  ;;  %v6591_v16 = vsel %vm6448_vm12, %v11760_v36, %v6590_v31  ;;  %v5623_v58 = vmax.f32 %v5621_v24, %v5622_v25 }
 0x49e   : > { %v5696_v4 = vrot.slane %v5695_v8, 1  ;;  %v6480_v20 = vsel %vm6450_vm13, %v13079_v62, %v6479_v23  ;;  %v6592_v44 = vsel %vm6450_vm13, %v11813_v6, %v6591_v16  ;;  %v5838_v63 = vrot.slane %v11862_v41, 2 }
 0x49f   : > { %v6481_v42 = vsel %vm6452_vm14, %v4239_v48, %v6480_v20  ;;  %v6593_v32 = vsel %vm6452_vm14, %v5391_v47, %v6592_v44  ;;  %v5626_v39 = vsel %vm3879_vm0, %v8331_v18, -inf  ;;  %v8422_v36 = vunpack.i.h.bf16 %v8418_v12  ;;  %v13082_v48 = vld [vmem:[#allocation28_spill] sm:$0xff]  ;;  %v13083_v47 = vld [vmem:[#allocation38_spill] sm:$0xff]  ;;  %v8423_v18 = vpop.trf.xlu1 }
 0x4a0   : > { %v8662_v34 = vpack.i.bf16 %v6481_v42, %v6593_v32  ;;  %v8419_v40 = vunpack.i.l.bf16 %v8418_v12  ;;  %v8339_v24 = vunpack.i.h.bf16 %v8335_v45  ;;  %v5624_v50 = vrot.slane %v5623_v58, 1  ;;  %v8340_v42 = vpop.trf.xlu0 }
 0x4a1   : > { %v5697_v55 = vmax.f32 %v5695_v8, %v5696_v4  ;;  %v5765_v57 = vmax.f32 %v5763_v43, %v5764_v35  ;;  %v8336_v25 = vunpack.i.l.bf16 %v8335_v45  ;;  %v13081_v30 = vrot.slane %v13080_v49, 1  ;;  %v13084_v8 = vld [vmem:[#allocation44_spill] sm:$0xff] }
 0x4a2   : > { %8663 = vxpose.xlu0.b32.cont [5/16] (narrow) %v8662_v34, 32  ;;  %v5699_v6 = vsel %vm3879_vm0, %v8339_v24, -inf  ;;  %v5463_v37 = vmax.f32 %v11820_v54, %v5462_v26  ;;  %v6484_v51 = vsel %vm6444_vm9, %v13083_v47, %v13082_v48  ;;  %v6596_v35 = vsel %vm6444_vm9, %v11596_v15, %v11579_v14  ;;  %v13085_v4 = vld [vmem:[#allocation48_spill] sm:$0xff] }
 0x4a3   : > { %v4311_v28 = vmax.f32 %v13080_v49, %v13081_v30  ;;  %v5627_v31 = vsel %vm3879_vm0, %v8336_v25, -inf  ;;  %v5700_v2 = vmax.f32 %v5698_v61, %v5699_v6  ;;  %v6485_v43 = vsel %vm6446_vm10, %v13084_v8, %v6484_v51  ;;  %v13086_v45 = vld [vmem:[#allocation52_spill] sm:$0xff]  ;;  %v13092_v8 = vld [vmem:[#allocation106_spill] sm:$0xff] }
 0x4a4   : > { %v5842_v23 = vsel %vm3879_vm0, %v8422_v36, -inf  ;;  %v5770_v16 = vsel %vm3879_vm0, %v8419_v40, -inf  ;;  %v5628_v54 = vmax.f32 %v5626_v39, %v5627_v31  ;;  %v6597_v26 = vsel %vm6446_vm10, %v11613_v17, %v6596_v35 }
 0x4a5   : > { %v5701_v12 = vrot.slane %v5700_v2, 4  ;;  %v6486_v62 = vsel %vm6448_vm12, %v13085_v4, %v6485_v43  ;;  %v6598_v61 = vsel %vm6448_vm12, %v11755_v10, %v6597_v26  ;;  %v8427_v20 = vunpack.i.h.bf16 %v8423_v18  ;;  %v13094_v4 = vld [vmem:[#allocation50_spill] sm:$0xff] }
 0x4a6   : > { %v5629_v44 = vrot.slane %v5628_v54, 4  ;;  %v6487_v14 = vsel %vm6450_vm13, %v13086_v45, %v6486_v62  ;;  %v6599_v15 = vsel %vm6450_vm13, %v11772_v59, %v6598_v61  ;;  %v8424_v40 = vunpack.i.l.bf16 %v8423_v18  ;;  %v13087_v18 = vld [vmem:[#allocation94_spill] sm:$0xff]  ;;  %v8428_v45 = vpop.trf.xlu1 }
 0x4a7   : > { %v6488_v32 = vsel %vm6452_vm14, %v4311_v28, %v6487_v14  ;;  %v6600_v17 = vsel %vm6452_vm14, %v5463_v37, %v6599_v15  ;;  %v5843_v39 = vsel %vm3879_vm0, %v8427_v20, -inf  ;;  %v5702_v34 = vmax.f32 %v5700_v2, %v5701_v12  ;;  %v13090_v2 = vld [vmem:[#allocation46_spill] sm:$0xff] }
 0x4a8   : > { %v8664_v36 = vpack.i.bf16 %v6488_v32, %v6600_v17  ;;  %v5844_v24 = vmax.f32 %v5842_v23, %v5843_v39  ;;  %v5534_v10 = vrot.slane %v11842_v11, 1  ;;  %v5630_v25 = vmax.f32 %v5628_v54, %v5629_v44  ;;  %v8345_v32 = vpop.trf.xlu0 }
 0x4a9   : > { %v11912_v6 = vmax.f32 %v11833_v56, %v5615_v53  ;;  %v5688_v59 = vmax.f32 %v11830_v21, %v5687_v1  ;;  %v5771_v49 = vsel %vm3879_vm0, %v8424_v40, -inf  ;;  %v11921_v28 = vmax.f32 %v11840_v22, %v5831_v46  ;;  %v13089_v46 = vld [vmem:[#allocation34_spill] sm:$0xff] }
 0x4aa   : > { %8665 = vxpose.xlu0.b32.cont [6/16] (narrow) %v8664_v36, 32  ;;  %v5845_v30 = vrot.slane %v5844_v24, 4  ;;  %v5766_v37 = vrot.slane %v5765_v57, 2  ;;  %v5839_v48 = vmax.f32 %v11862_v41, %v5838_v63  ;;  %v5772_v47 = vmax.f32 %v5770_v16, %v5771_v49  ;;  %v13091_v63 = vld [vmem:[#allocation40_spill] sm:$0xff] }
 0x4ab   : > { %v11927_v56 = vmax.f32 %v11845_v60, %v5759_v29  ;;  %v11929_v53 = vmax.f32 %v5623_v58, %v5624_v50  ;;  %v11932_v21 = vsel %vm6440_vm1, %v5697_v55, %v5688_v59  ;;  %v5703_v1 = vrot.slane %v5702_v34, 2  ;;  %v13093_v50 = vld [vmem:[#allocation49_spill] sm:$0xff] }
 0x4ac   : > { %v5631_v51 = vrot.slane %v5630_v25, 2  ;;  %v13088_v31 = vrot.slane %v13087_v18, 1  ;;  %v6491_v41 = vsel %vm6444_vm9, %v13090_v2, %v13089_v46  ;;  %v6601_v60 = vsel %vm6440_vm1, %v13092_v8, %v13091_v63  ;;  %v13099_v2 = vld [vmem:[#allocation104_spill] sm:$0xff] }
 0x4ad   : > { %v5773_v29 = vrot.slane %v5772_v47, 4  ;;  %v5846_v58 = vmax.f32 %v5844_v24, %v5845_v30  ;;  %v6492_v55 = vsel %vm6446_vm10, %v13093_v50, %v6491_v41  ;;  %v6602_v43 = vsel %vm6442_vm2, %v11594_v27, %v6601_v60  ;;  %v13095_v27 = vld [vmem:[#allocation96_spill] sm:$0xff]  ;;  %v13100_v41 = vld [vmem:[#allocation103_spill] sm:$0xff] }
 0x4ae   : > { %v4383_v22 = vmax.f32 %v13087_v18, %v13088_v31  ;;  %v11947_v35 = vmax.f32 %v5765_v57, %v5766_v37  ;;  %v5840_v23 = vrot.slane %v5839_v48, 1  ;;  %v5535_v16 = vmax.f32 %v11842_v11, %v5534_v10 }
 0x4af   : > { %v6603_v54 = vsel %vm6444_vm9, %v11602_v5, %v6602_v43  ;;  %v8344_v26 = vunpack.i.h.bf16 %v8340_v42  ;;  %v8341_v12 = vunpack.i.l.bf16 %v8340_v42  ;;  %v6493_v62 = vsel %vm6448_vm12, %v13094_v4, %v6492_v55  ;;  %v13103_v55 = vld [vmem:[#allocation107_spill] sm:$0xff]  ;;  %v13104_v4 = vld [vmem:[#allocation53_spill] sm:$0xff] }
 0x4b0   : > { %v6604_v61 = vsel %vm6446_vm10, %v11675_v33, %v6603_v54  ;;  %v11956_v20 = vmax.f32 %v5630_v25, %v5631_v51  ;;  %v11958_v44 = vmax.f32 %v5702_v34, %v5703_v1  ;;  %v6494_v57 = vsel %vm6450_vm13, %v13095_v27, %v6493_v62  ;;  %v8433_v51 = vpop.trf.xlu1  ;;  %v8350_v27 = vpop.trf.xlu0 }
 0x4b1   : > { %v6605_v11 = vsel %vm6448_vm12, %v11763_v52, %v6604_v61  ;;  %v5774_v5 = vmax.f32 %v5772_v47, %v5773_v29  ;;  %v5847_v14 = vrot.slane %v5846_v58, 2  ;;  %v6495_v15 = vsel %vm6452_vm14, %v4383_v22, %v6494_v57  ;;  %v13096_v47 = vld [vmem:[#allocation35_spill] sm:$0xff]  ;;  %v13098_v22 = vld [vmem:[#allocation45_spill] sm:$0xff] }
 0x4b2   : > { %v6606_v42 = vsel %vm6450_vm13, %v11837_v3, %v6605_v11  ;;  %v8432_v17 = vunpack.i.h.bf16 %v8428_v45  ;;  %v5768_v39 = vrot.slane %v11947_v35, 1  ;;  %v5841_v34 = vmax.f32 %v5839_v48, %v5840_v23  ;;  %v13097_v48 = vld [vmem:[#allocation43_spill] sm:$0xff]  ;;  %v13101_v29 = vld [vmem:[#allocation93_spill] sm:$0xff] }
 0x4b3   : > { %v6607_v33 = vsel %vm6452_vm14, %v5535_v16, %v6606_v42  ;;  %v5707_v36 = vsel %vm3879_vm0, %v8344_v26, -inf  ;;  %v5635_v52 = vsel %vm3879_vm0, %v8341_v12, -inf  ;;  %v8349_v24 = vunpack.i.h.bf16 %v8345_v32 }
 0x4b4   : > { %v8666_v40 = vpack.i.bf16 %v6495_v15, %v6607_v33  ;;  %v5633_v10 = vrot.slane %v11956_v20, 1  ;;  %v5705_v25 = vrot.slane %v11958_v44, 1  ;;  %v5848_v59 = vmax.f32 %v5846_v58, %v5847_v14  ;;  %v13105_v14 = vld [vmem:[#allocation91_spill] sm:$0xff]  ;;  %v8438_v33 = vpop.trf.xlu1 }
 0x4b5   : > { %v8346_v3 = vunpack.i.l.bf16 %v8345_v32  ;;  %v5775_v49 = vrot.slane %v5774_v5, 2  ;;  %v5851_v30 = vsel %vm3879_vm0, %v8432_v17, -inf  ;;  %v5708_v37 = vsel %vm3879_vm0, %v8349_v24, -inf }
 0x4b6   : > { %8667 = vxpose.xlu0.b32.cont [7/16] (narrow) %v8666_v40, 32  ;;  %v6498_v1 = vsel %vm6444_vm9, %v13097_v48, %v13096_v47  ;;  %v5709_v31 = vmax.f32 %v5707_v36, %v5708_v37  ;;  %v6608_v63 = vsel %vm6440_vm1, %v13100_v41, %v13099_v2  ;;  %v8429_v8 = vunpack.i.l.bf16 %v8428_v45 }
 0x4b7   : > { %v5636_v18 = vsel %vm3879_vm0, %v8346_v3, -inf  ;;  %v6499_v46 = vsel %vm6446_vm10, %v13098_v22, %v6498_v1  ;;  %v13102_v58 = vrot.slane %v13101_v29, 1  ;;  %v6609_v43 = vsel %vm6442_vm2, %v13103_v55, %v6608_v63 }
 0x4b8   : > { %v5637_v60 = vmax.f32 %v5635_v52, %v5636_v18  ;;  %v5710_v23 = vrot.slane %v5709_v31, 4  ;;  %v5607_v16 = vmax.f32 %v11822_v0, %v5606_v9  ;;  %v6610_v54 = vsel %vm6444_vm9, %v11611_v7, %v6609_v43 }
 0x4b9   : > { %v4455_v50 = vmax.f32 %v13101_v29, %v13102_v58  ;;  %v8437_v26 = vunpack.i.h.bf16 %v8433_v51  ;;  %v6500_v62 = vsel %vm6448_vm12, %v13104_v4, %v6499_v46  ;;  %v6611_v61 = vsel %vm6446_vm10, %v11672_v13, %v6610_v54 }
 0x4ba   : > { %v5638_v12 = vrot.slane %v5637_v60, 4  ;;  %v5711_v57 = vmax.f32 %v5709_v31, %v5710_v23  ;;  %v6612_v11 = vsel %vm6448_vm12, %v11768_v38, %v6611_v61  ;;  %v6501_v0 = vsel %vm6450_vm13, %v13105_v14, %v6500_v62 }
 0x4bb   : > { %v5852_v45 = vsel %vm3879_vm0, %v8437_v26, -inf  ;;  %v6613_v7 = vsel %vm6450_vm13, %v11817_v19, %v6612_v11  ;;  %v8434_v9 = vunpack.i.l.bf16 %v8433_v51  ;;  %v5849_v42 = vrot.slane %v5848_v59, 1 }
 0x4bc   : > { %v5853_v15 = vmax.f32 %v5851_v30, %v5852_v45  ;;  %v6502_v32 = vsel %vm6452_vm14, %v4455_v50, %v6501_v0  ;;  %v6614_v13 = vsel %vm6452_vm14, %v5607_v16, %v6613_v7  ;;  %v5776_v17 = vmax.f32 %v5774_v5, %v5775_v49  ;;  %v8355_v49 = vpop.trf.xlu0 }
 0x4bd   : > { %v5779_v36 = vsel %vm3879_vm0, %v8429_v8, -inf  ;;  %v8668_v38 = vpack.i.bf16 %v6502_v32, %v6614_v13  ;;  %v5780_v40 = vsel %vm3879_vm0, %v8434_v9, -inf  ;;  %v6615_v52 = vsel %vm6440_vm1, %v11929_v53, %v11912_v6 }
 0x4be   : > { %v5639_v24 = vmax.f32 %v5637_v60, %v5638_v12  ;;  %v5712_v19 = vrot.slane %v5711_v57, 2  ;;  %v5769_v3 = vmax.f32 %v11947_v35, %v5768_v39  ;;  %v6636_v30 = vsel %vm6440_vm1, %v5841_v34, %v11921_v28  ;;  %v8443_v35 = vpop.trf.xlu1 }
 0x4bf   : > { %v5706_v37 = vmax.f32 %v11958_v44, %v5705_v25  ;;  %8669 = vxpose.xlu0.b32.cont [8/16] (narrow) %v8668_v38, 32  ;;  %v5854_v5 = vrot.slane %v5853_v15, 4  ;;  %v5781_v47 = vmax.f32 %v5779_v36, %v5780_v40  ;;  %v8354_v48 = vunpack.i.h.bf16 %v8350_v27 }
 0x4c0   : > { %v5634_v1 = vmax.f32 %v11956_v20, %v5633_v10  ;;  %v5777_v51 = vrot.slane %v5776_v17, 1  ;;  %v5850_v18 = vmax.f32 %v5848_v59, %v5849_v42  ;;  %v8442_v31 = vunpack.i.h.bf16 %v8438_v33  ;;  %v8360_v10 = vpop.trf.xlu0 }
 0x4c1   : > { %v5640_v6 = vrot.slane %v5639_v24, 2  ;;  %v5713_v53 = vmax.f32 %v5711_v57, %v5712_v19  ;;  %v8351_v22 = vunpack.i.l.bf16 %v8350_v27  ;;  %v8359_v46 = vunpack.i.h.bf16 %v8355_v49 }
 0x4c2   : > { %v5855_v39 = vmax.f32 %v5853_v15, %v5854_v5  ;;  %v8439_v2 = vunpack.i.l.bf16 %v8438_v33  ;;  %v5782_v28 = vrot.slane %v5781_v47, 4  ;;  %v5716_v44 = vsel %vm3879_vm0, %v8354_v48, -inf  ;;  %v8448_v62 = vpop.trf.xlu1 }
 0x4c3   : > { %v5717_v34 = vsel %vm3879_vm0, %v8359_v46, -inf  ;;  %v8356_v25 = vunpack.i.l.bf16 %v8355_v49  ;;  %v5860_v41 = vsel %vm3879_vm0, %v8442_v31, -inf  ;;  %v8447_v20 = vunpack.i.h.bf16 %v8443_v35 }
 0x4c4   : > { %v5718_v63 = vmax.f32 %v5716_v44, %v5717_v34  ;;  %v5644_v59 = vsel %vm3879_vm0, %v8351_v22, -inf  ;;  %v8444_v60 = vunpack.i.l.bf16 %v8443_v35  ;;  %v5856_v29 = vrot.slane %v5855_v39, 2  ;;  %v8365_v0 = vpop.trf.xlu0 }
 0x4c5   : > { %v5645_v8 = vsel %vm3879_vm0, %v8356_v25, -inf  ;;  %v5788_v58 = vsel %vm3879_vm0, %v8439_v2, -inf  ;;  %v5861_v55 = vsel %vm3879_vm0, %v8447_v20, -inf  ;;  %v6629_v43 = vsel %vm6440_vm1, %v5769_v3, %v11927_v56 }
 0x4c6   : > { %v5646_v50 = vmax.f32 %v5644_v59, %v5645_v8  ;;  %v5778_v23 = vmax.f32 %v5776_v17, %v5777_v51  ;;  %v5789_v16 = vsel %vm3879_vm0, %v8444_v60, -inf  ;;  %v5862_v54 = vmax.f32 %v5860_v41, %v5861_v55 }
 0x4c7   : > { %v5641_v26 = vmax.f32 %v5639_v24, %v5640_v6  ;;  %v5719_v4 = vrot.slane %v5718_v63, 4  ;;  %v5714_v61 = vrot.slane %v5713_v53, 1  ;;  %v5783_v27 = vmax.f32 %v5781_v47, %v5782_v28  ;;  %v8453_v24 = vpop.trf.xlu1 }
 0x4c8   : > { %v5647_v12 = vrot.slane %v5646_v50, 4  ;;  %v5790_v57 = vmax.f32 %v5788_v58, %v5789_v16  ;;  %v12028_v11 = vsel %vm6442_vm2, %v5634_v1, %v6615_v52  ;;  %v12032_v45 = vsel %vm6442_vm2, %v5706_v37, %v11932_v21 }
 0x4c9   : > { %v12035_v56 = vsel %vm6442_vm2, %v5850_v18, %v6636_v30  ;;  %v5857_v14 = vmax.f32 %v5855_v39, %v5856_v29  ;;  %v5863_v7 = vrot.slane %v5862_v54, 4  ;;  %v8364_v9 = vunpack.i.h.bf16 %v8360_v10  ;;  %v8370_v18 = vpop.trf.xlu0 }
 0x4ca   : > { %v12038_v15 = vsel %vm6442_vm2, %v5778_v23, %v6629_v43  ;;  %v5642_v42 = vrot.slane %v5641_v26, 1  ;;  %v5648_v32 = vmax.f32 %v5646_v50, %v5647_v12  ;;  %v5720_v13 = vmax.f32 %v5718_v63, %v5719_v4 }
 0x4cb   : > { %v12040_v33 = vmax.f32 %v5713_v53, %v5714_v61  ;;  %v5784_v17 = vrot.slane %v5783_v27, 2  ;;  %v5791_v36 = vrot.slane %v5790_v57, 4  ;;  %v8369_v38 = vunpack.i.h.bf16 %v8365_v0  ;;  %v8458_v63 = vpop.trf.xlu1 }
 0x4cc   : > { %v5858_v21 = vrot.slane %v5857_v14, 1  ;;  %v8361_v40 = vunpack.i.l.bf16 %v8360_v10  ;;  %v8452_v52 = vunpack.i.h.bf16 %v8448_v62  ;;  %v5864_v19 = vmax.f32 %v5862_v54, %v5863_v7 }
 0x4cd   : > { %v5725_v3 = vsel %vm3879_vm0, %v8364_v9, -inf  ;;  %v5726_v30 = vsel %vm3879_vm0, %v8369_v38, -inf  ;;  %v5649_v37 = vrot.slane %v5648_v32, 2  ;;  %v5721_v5 = vrot.slane %v5720_v13, 2  ;;  %v8375_v55 = vpop.trf.xlu0 }
 0x4ce   : > { %v8449_v49 = vunpack.i.l.bf16 %v8448_v62  ;;  %v8366_v47 = vunpack.i.l.bf16 %v8365_v0  ;;  %v5792_v48 = vmax.f32 %v5790_v57, %v5791_v36  ;;  %v5727_v1 = vmax.f32 %v5725_v3, %v5726_v30 }
 0x4cf   : > { %v8457_v51 = vunpack.i.h.bf16 %v8453_v24  ;;  %v5653_v31 = vsel %vm3879_vm0, %v8361_v40, -inf  ;;  %v5869_v6 = vsel %vm3879_vm0, %v8452_v52, -inf  ;;  %v5785_v22 = vmax.f32 %v5783_v27, %v5784_v17  ;;  %v8463_v0 = vpop.trf.xlu1 }
 0x4d0   : > { %v5654_v53 = vsel %vm3879_vm0, %v8366_v47, -inf  ;;  %v5865_v46 = vrot.slane %v5864_v19, 2  ;;  %v5722_v2 = vmax.f32 %v5720_v13, %v5721_v5  ;;  %v5797_v28 = vsel %vm3879_vm0, %v8449_v49, -inf }
 0x4d1   : > { %v5655_v35 = vmax.f32 %v5653_v31, %v5654_v53  ;;  %v5870_v39 = vsel %vm3879_vm0, %v8457_v51, -inf  ;;  %v5728_v44 = vrot.slane %v5727_v1, 4  ;;  %v8454_v34 = vunpack.i.l.bf16 %v8453_v24 }
 0x4d2   : > { %v5650_v25 = vmax.f32 %v5648_v32, %v5649_v37  ;;  %v5871_v41 = vmax.f32 %v5869_v6, %v5870_v39  ;;  %v12049_v20 = vmax.f32 %v5641_v26, %v5642_v42  ;;  %v12051_v10 = vmax.f32 %v5857_v14, %v5858_v21  ;;  %v8380_v37 = vpop.trf.xlu0 }
 0x4d3   : > { %v5793_v59 = vrot.slane %v5792_v48, 2  ;;  %v5798_v8 = vsel %vm3879_vm0, %v8454_v34, -inf  ;;  %v5866_v60 = vmax.f32 %v5864_v19, %v5865_v46  ;;  %v5656_v29 = vrot.slane %v5655_v35, 4  ;;  %v8468_v31 = vpop.trf.xlu1 }
 0x4d4   : > { %v5799_v58 = vmax.f32 %v5797_v28, %v5798_v8  ;;  %v8374_v50 = vunpack.i.h.bf16 %v8370_v18  ;;  %v5786_v43 = vrot.slane %v5785_v22, 1  ;;  %v5729_v23 = vmax.f32 %v5727_v1, %v5728_v44 }
 0x4d5   : > { %v5651_v16 = vrot.slane %v5650_v25, 1  ;;  %v5723_v54 = vrot.slane %v5722_v2, 1  ;;  %v5872_v4 = vrot.slane %v5871_v41, 4  ;;  %v5794_v62 = vmax.f32 %v5792_v48, %v5793_v59 }
 0x4d6   : > { %v5800_v12 = vrot.slane %v5799_v58, 4  ;;  %v8371_v61 = vunpack.i.l.bf16 %v8370_v18  ;;  %v8379_v26 = vunpack.i.h.bf16 %v8375_v55  ;;  %v5867_v27 = vrot.slane %v5866_v60, 1 }
 0x4d7   : > { %v5657_v57 = vmax.f32 %v5655_v35, %v5656_v29  ;;  %v5734_v14 = vsel %vm3879_vm0, %v8374_v50, -inf  ;;  %v5730_v7 = vrot.slane %v5729_v23, 2  ;;  %v8462_v9 = vunpack.i.h.bf16 %v8458_v63 }
 0x4d8   : > { %v5735_v42 = vsel %vm3879_vm0, %v8379_v26, -inf  ;;  %v8376_v32 = vunpack.i.l.bf16 %v8375_v55  ;;  %v5801_v13 = vmax.f32 %v5799_v58, %v5800_v12  ;;  %v5873_v17 = vmax.f32 %v5871_v41, %v5872_v4  ;;  %v8385_v58 = vpop.trf.xlu0 }
 0x4d9   : > { %v8459_v36 = vunpack.i.l.bf16 %v8458_v63  ;;  %v5736_v38 = vmax.f32 %v5734_v14, %v5735_v42  ;;  %v5662_v21 = vsel %vm3879_vm0, %v8371_v61, -inf  ;;  %v8467_v52 = vunpack.i.h.bf16 %v8463_v0  ;;  %v8473_v61 = vpop.trf.xlu1 }
 0x4da   : > { %v5663_v40 = vsel %vm3879_vm0, %v8376_v32, -inf  ;;  %v5795_v24 = vrot.slane %v5794_v62, 1  ;;  %v5658_v19 = vrot.slane %v5657_v57, 2  ;;  %v5878_v5 = vsel %vm3879_vm0, %v8462_v9, -inf }
 0x4db   : > { %v5664_v3 = vmax.f32 %v5662_v21, %v5663_v40  ;;  %v5737_v30 = vrot.slane %v5736_v38, 4  ;;  %v5879_v49 = vsel %vm3879_vm0, %v8467_v52, -inf  ;;  %v8464_v47 = vunpack.i.l.bf16 %v8463_v0 }
 0x4dc   : > { %v5731_v48 = vmax.f32 %v5729_v23, %v5730_v7  ;;  %v5802_v1 = vrot.slane %v5801_v13, 2  ;;  %v5874_v51 = vrot.slane %v5873_v17, 2  ;;  %v5806_v18 = vsel %vm3879_vm0, %v8459_v36, -inf  ;;  %v8486_v42 = vpop.trf.xlu0 }
 0x4dd   : > { %v5665_v6 = vrot.slane %v5664_v3, 4  ;;  %v5807_v53 = vsel %vm3879_vm0, %v8464_v47, -inf  ;;  %v12062_v46 = vmax.f32 %v5785_v22, %v5786_v43  ;;  %v5659_v35 = vmax.f32 %v5657_v57, %v5658_v19 }
 0x4de   : > { %v5738_v39 = vmax.f32 %v5736_v38, %v5737_v30  ;;  %v5880_v28 = vmax.f32 %v5878_v5, %v5879_v49  ;;  %v12064_v44 = vmax.f32 %v5650_v25, %v5651_v16  ;;  %v12066_v34 = vmax.f32 %v5722_v2, %v5723_v54 }
 0x4df   : > { %v12068_v41 = vmax.f32 %v5866_v60, %v5867_v27  ;;  %v5808_v63 = vmax.f32 %v5806_v18, %v5807_v53  ;;  %v5803_v59 = vmax.f32 %v5801_v13, %v5802_v1  ;;  %v5875_v8 = vmax.f32 %v5873_v17, %v5874_v51 }
 0x4e0   : > { %v8384_v29 = vunpack.i.h.bf16 %v8380_v37  ;;  %v12070_v50 = vmax.f32 %v5794_v62, %v5795_v24  ;;  %v5732_v55 = vrot.slane %v5731_v48, 1  ;;  %v5666_v23 = vmax.f32 %v5664_v3, %v5665_v6  ;;  %v8574_v3 = vpop.trf.xlu1  ;;  %v8491_v53 = vpop.trf.xlu0 }
 0x4e1   : > { %v5660_v22 = vrot.slane %v5659_v35, 1  ;;  %v5739_v43 = vrot.slane %v5738_v39, 2  ;;  %v5881_v12 = vrot.slane %v5880_v28, 4  ;;  %v8381_v4 = vunpack.i.l.bf16 %v8380_v37 }
 0x4e2   : > { %v5809_v25 = vrot.slane %v5808_v63, 4  ;;  %v8389_v16 = vunpack.i.h.bf16 %v8385_v58  ;;  %v5804_v2 = vrot.slane %v5803_v59, 1  ;;  %v5876_v54 = vrot.slane %v5875_v8, 1 }
 0x4e3   : > { %v5743_v60 = vsel %vm3879_vm0, %v8384_v29, -inf  ;;  %v8472_v26 = vunpack.i.h.bf16 %v8468_v31  ;;  %v5667_v27 = vrot.slane %v5666_v23, 2  ;;  %v8386_v14 = vunpack.i.l.bf16 %v8385_v58 }
 0x4e4   : > { %v5744_v57 = vsel %vm3879_vm0, %v8389_v16, -inf  ;;  %v8477_v62 = vunpack.i.h.bf16 %v8473_v61  ;;  %v5740_v0 = vmax.f32 %v5738_v39, %v5739_v43  ;;  %v5882_v7 = vmax.f32 %v5880_v28, %v5881_v12 }
 0x4e5   : > { %v5745_v9 = vmax.f32 %v5743_v60, %v5744_v57  ;;  %v5810_v32 = vmax.f32 %v5808_v63, %v5809_v25  ;;  %v5671_v13 = vsel %vm3879_vm0, %v8381_v4, -inf  ;;  %v5672_v17 = vsel %vm3879_vm0, %v8386_v14, -inf }
 0x4e6   : > { %v12076_v36 = vmax.f32 %v5731_v48, %v5732_v55  ;;  %v5887_v38 = vsel %vm3879_vm0, %v8472_v26, -inf  ;;  %v8469_v21 = vunpack.i.l.bf16 %v8468_v31  ;;  %v5673_v40 = vmax.f32 %v5671_v13, %v5672_v17 }
 0x4e7   : > { %v5746_v52 = vrot.slane %v5745_v9, 4  ;;  %v5888_v24 = vsel %vm3879_vm0, %v8477_v62, -inf  ;;  %v8474_v19 = vunpack.i.l.bf16 %v8473_v61  ;;  %v12080_v30 = vmax.f32 %v5659_v35, %v5660_v22  ;;  %v8579_v22 = vpop.trf.xlu1 }
 0x4e8   : > { %v5668_v37 = vmax.f32 %v5666_v23, %v5667_v27  ;;  %v5741_v5 = vrot.slane %v5740_v0, 1  ;;  %v5883_v49 = vrot.slane %v5882_v7, 2  ;;  %v12082_v47 = vmax.f32 %v5803_v59, %v5804_v2  ;;  %v8496_v27 = vpop.trf.xlu0 }
 0x4e9   : > { %v12084_v1 = vmax.f32 %v5875_v8, %v5876_v54  ;;  %v5811_v48 = vrot.slane %v5810_v32, 2  ;;  %v5815_v51 = vsel %vm3879_vm0, %v8469_v21, -inf  ;;  %v5674_v18 = vrot.slane %v5673_v40, 4 }
 0x4ea   : > { %v5889_v31 = vmax.f32 %v5887_v38, %v5888_v24  ;;  %v8490_v6 = vunpack.i.h.bf16 %v8486_v42  ;;  %v5747_v39 = vmax.f32 %v5745_v9, %v5746_v52  ;;  %v5816_v28 = vsel %vm3879_vm0, %v8474_v19, -inf }
 0x4eb   : > { %v5669_v63 = vrot.slane %v5668_v37, 1  ;;  %v12088_v35 = vmax.f32 %v5740_v0, %v5741_v5  ;;  %v12090_v29 = vmax.f32 %v5882_v7, %v5883_v49  ;;  %v8578_v58 = vunpack.i.h.bf16 %v8574_v3  ;;  %v8584_v38 = vpop.trf.xlu1 }
 0x4ec   : > { %v12092_v59 = vmax.f32 %v5810_v32, %v5811_v48  ;;  %v8487_v8 = vunpack.i.l.bf16 %v8486_v42  ;;  %v8575_v55 = vunpack.i.l.bf16 %v8574_v3  ;;  %v8495_v23 = vunpack.i.h.bf16 %v8491_v53 }
 0x4ed   : > { %v5817_v43 = vmax.f32 %v5815_v51, %v5816_v28  ;;  %v5890_v12 = vrot.slane %v5889_v31, 4  ;;  %v5675_v4 = vmax.f32 %v5673_v40, %v5674_v18  ;;  %v5748_v61 = vrot.slane %v5747_v39, 2  ;;  %v8501_v51 = vpop.trf.xlu0 }
 0x4ee   : > { %v5968_v25 = vsel %vm3879_vm0, %v8490_v6, -inf  ;;  %v5969_v16 = vsel %vm3879_vm0, %v8495_v23, -inf  ;;  %v6112_v2 = vsel %vm3879_vm0, %v8578_v58, -inf  ;;  %v8492_v54 = vunpack.i.l.bf16 %v8491_v53 }
 0x4ef   : > { %v5970_v60 = vmax.f32 %v5968_v25, %v5969_v16  ;;  %v8583_v26 = vunpack.i.h.bf16 %v8579_v22  ;;  %v5896_v57 = vsel %vm3879_vm0, %v8487_v8, -inf  ;;  %v6040_v14 = vsel %vm3879_vm0, %v8575_v55, -inf }
 0x4f0   : > { %v5897_v62 = vsel %vm3879_vm0, %v8492_v54, -inf  ;;  %v8580_v9 = vunpack.i.l.bf16 %v8579_v22  ;;  %v5818_v42 = vrot.slane %v5817_v43, 4  ;;  %v5891_v32 = vmax.f32 %v5889_v31, %v5890_v12  ;;  %v8589_v22 = vpop.trf.xlu1 }
 0x4f1   : > { %v5971_v0 = vrot.slane %v5970_v60, 4  ;;  %v6113_v7 = vsel %vm3879_vm0, %v8583_v26, -inf  ;;  %v5898_v13 = vmax.f32 %v5896_v57, %v5897_v62  ;;  %v12102_v52 = vmax.f32 %v5668_v37, %v5669_v63 }
 0x4f2   : > { %v6114_v17 = vmax.f32 %v6112_v2, %v6113_v7  ;;  %v6041_v40 = vsel %vm3879_vm0, %v8580_v9, -inf  ;;  %v5676_v24 = vrot.slane %v5675_v4, 2  ;;  %v5885_v5 = vrot.slane %v12090_v29, 1  ;;  %v8506_v7 = vpop.trf.xlu0 }
 0x4f3   : > { %v5972_v21 = vmax.f32 %v5970_v60, %v5971_v0  ;;  %v5899_v19 = vrot.slane %v5898_v13, 4  ;;  %v6042_v3 = vmax.f32 %v6040_v14, %v6041_v40  ;;  %v8500_v48 = vunpack.i.h.bf16 %v8496_v27 }
 0x4f4   : > { %v6115_v49 = vrot.slane %v6114_v17, 4  ;;  %v5813_v18 = vrot.slane %v12092_v59, 1  ;;  %v12106_v53 = vmax.f32 %v5747_v39, %v5748_v61  ;;  %v5819_v28 = vmax.f32 %v5817_v43, %v5818_v42 }
 0x4f5   : > { %v5900_v6 = vmax.f32 %v5898_v13, %v5899_v19  ;;  %v5973_v31 = vrot.slane %v5972_v21, 2  ;;  %v5892_v58 = vrot.slane %v5891_v32, 2  ;;  %v6043_v8 = vrot.slane %v6042_v3, 4 }
 0x4f6   : > { %v5677_v55 = vmax.f32 %v5675_v4, %v5676_v24  ;;  %v8497_v37 = vunpack.i.l.bf16 %v8496_v27  ;;  %v8588_v63 = vunpack.i.h.bf16 %v8584_v38  ;;  %v8505_v23 = vunpack.i.h.bf16 %v8501_v51 }
 0x4f7   : > { %v6116_v12 = vmax.f32 %v6114_v17, %v6115_v49  ;;  %v5977_v25 = vsel %vm3879_vm0, %v8500_v48, -inf  ;;  %v5901_v16 = vrot.slane %v5900_v6, 2  ;;  %v5974_v2 = vmax.f32 %v5972_v21, %v5973_v31 }
 0x4f8   : > { %v8585_v54 = vunpack.i.l.bf16 %v8584_v38  ;;  %v5978_v60 = vsel %vm3879_vm0, %v8505_v23, -inf  ;;  %v6044_v26 = vmax.f32 %v6042_v3, %v6043_v8  ;;  %v8502_v57 = vunpack.i.l.bf16 %v8501_v51 }
 0x4f9   : > { %v5979_v39 = vmax.f32 %v5977_v25, %v5978_v60  ;;  %v8593_v61 = vunpack.i.h.bf16 %v8589_v22  ;;  %v5820_v43 = vrot.slane %v5819_v28, 2  ;;  %v5905_v14 = vsel %vm3879_vm0, %v8497_v37, -inf  ;;  %v13106_v60 = vld [vmem:[#allocation41_spill] sm:$0xff] }
 0x4fa   : > { %v6121_v4 = vsel %vm3879_vm0, %v8588_v63, -inf  ;;  %v5906_v27 = vsel %vm3879_vm0, %v8502_v57, -inf  ;;  %v5975_v9 = vrot.slane %v5974_v2, 1  ;;  %v6117_v42 = vrot.slane %v6116_v12, 2 }
 0x4fb   : > { %v5980_v62 = vrot.slane %v5979_v39, 4  ;;  %v6122_v0 = vsel %vm3879_vm0, %v8593_v61, -inf  ;;  %v6049_v13 = vsel %vm3879_vm0, %v8585_v54, -inf  ;;  %v5907_v17 = vmax.f32 %v5905_v14, %v5906_v27  ;;  %v13109_v61 = vld [vmem:[#allocation57_spill] sm:$0xff] }
 0x4fc   : > { %v12115_v38 = vmax.f32 %v5900_v6, %v5901_v16  ;;  %v6045_v21 = vrot.slane %v6044_v26, 2  ;;  %v8590_v40 = vunpack.i.l.bf16 %v8589_v22  ;;  %v6123_v24 = vmax.f32 %v6121_v4, %v6122_v0  ;;  %v13110_v14 = vld [vmem:[#allocation61_spill] sm:$0xff] }
 0x4fd   : > { %v5908_v19 = vrot.slane %v5907_v17, 4  ;;  %v5981_v3 = vmax.f32 %v5979_v39, %v5980_v62  ;;  %v12118_v49 = vmax.f32 %v12090_v29, %v5885_v5  ;;  %v5678_v48 = vrot.slane %v5677_v55, 1  ;;  %v8594_v62 = vpop.trf.xlu1 }
 0x4fe   : > { %v6050_v51 = vsel %vm3879_vm0, %v8590_v40, -inf  ;;  %v6124_v31 = vrot.slane %v6123_v24, 4  ;;  %v5750_v8 = vrot.slane %v12106_v53, 1  ;;  %v12122_v37 = vmax.f32 %v5891_v32, %v5892_v58 }
 0x4ff   : > { %v12124_v63 = vmax.f32 %v6116_v12, %v6117_v42  ;;  %v6051_v6 = vmax.f32 %v6049_v13, %v6050_v51  ;;  %v12126_v23 = vmax.f32 %v5819_v28, %v5820_v43  ;;  %v5903_v22 = vrot.slane %v12115_v38, 1  ;;  %v13108_v12 = vld [vmem:[#allocation54_spill] sm:$0xff] }
 0x500   : > { %v12129_v25 = vmax.f32 %v5974_v2, %v5975_v9  ;;  %v12131_v16 = vmax.f32 %v6044_v26, %v6045_v21  ;;  %v5909_v29 = vmax.f32 %v5907_v17, %v5908_v19  ;;  %v5982_v5 = vrot.slane %v5981_v3, 2  ;;  %v13111_v9 = vld [vmem:[#allocation86_spill] sm:$0xff] }
 0x501   : > { %v6052_v54 = vrot.slane %v6051_v6, 4  ;;  %v13107_v57 = vrot.slane %v13106_v60, 1  ;;  %v6125_v32 = vmax.f32 %v6123_v24, %v6124_v31  ;;  %v5679_v58 = vmax.f32 %v5677_v55, %v5678_v48  ;;  %v8511_v24 = vpop.trf.xlu0 }
 0x502   : > { %v6505_v28 = vsel %vm6444_vm9, %v13109_v61, %v13108_v12  ;;  %v6617_v2 = vsel %vm6444_vm9, %v12049_v20, %v12028_v11  ;;  %v6119_v26 = vrot.slane %v12124_v63, 1  ;;  %v8510_v0 = vunpack.i.h.bf16 %v8506_v7  ;;  %v13112_v20 = vld [vmem:[#allocation87_spill] sm:$0xff] }
 0x503   : > { %v4527_v39 = vmax.f32 %v13106_v60, %v13107_v57  ;;  %v6053_v43 = vmax.f32 %v6051_v6, %v6052_v54  ;;  %v6506_v4 = vsel %vm6446_vm10, %v13110_v14, %v6505_v28  ;;  %v6618_v27 = vsel %vm6446_vm10, %v12064_v44, %v6617_v2 }
 0x504   : > { %v8507_v55 = vunpack.i.l.bf16 %v8506_v7  ;;  %v6507_v42 = vsel %vm6448_vm12, %v13111_v9, %v6506_v4  ;;  %v6619_v13 = vsel %vm6448_vm12, %v12080_v30, %v6618_v27  ;;  %v5910_v17 = vrot.slane %v5909_v29, 2  ;;  %v13113_v27 = vld [vmem:[#allocation42_spill] sm:$0xff] }
 0x505   : > { %v5983_v11 = vmax.f32 %v5981_v3, %v5982_v5  ;;  %v6508_v21 = vsel %vm6450_vm13, %v13112_v20, %v6507_v42  ;;  %v6620_v40 = vsel %vm6450_vm13, %v12102_v52, %v6619_v13  ;;  %v6126_v19 = vrot.slane %v6125_v32, 2  ;;  %v8599_v52 = vpop.trf.xlu1  ;;  %v13115_v42 = vld [vmem:[#allocation101_spill] sm:$0xff]  ;;  %v13116_v13 = vld [vmem:[#allocation58_spill] sm:$0xff] }
 0x506   : > { %v6509_v44 = vsel %vm6452_vm14, %v4527_v39, %v6508_v21  ;;  %v6621_v7 = vsel %vm6452_vm14, %v5679_v58, %v6620_v40  ;;  %v6047_v48 = vrot.slane %v12131_v16, 1  ;;  %v6054_v51 = vrot.slane %v6053_v43, 2  ;;  %v13117_v20 = vld [vmem:[#allocation62_spill] sm:$0xff] }
 0x507   : > { %v8670_v31 = vpack.i.bf16 %v6509_v44, %v6621_v7  ;;  %v8598_v6 = vunpack.i.h.bf16 %v8594_v62  ;;  %v5986_v30 = vsel %vm3879_vm0, %v8510_v0, -inf  ;;  %v8595_v3 = vunpack.i.l.bf16 %v8594_v62 }
 0x508   : > { %v8515_v5 = vunpack.i.h.bf16 %v8511_v24  ;;  %v5984_v54 = vrot.slane %v5983_v11, 1  ;;  %v5914_v60 = vsel %vm3879_vm0, %v8507_v55, -inf  ;;  %v5911_v57 = vmax.f32 %v5909_v29, %v5910_v17 }
 0x509   : > { %8671 = vxpose.xlu0.b32.cont [9/16] (narrow) %v8670_v31, 32  ;;  %v6127_v12 = vmax.f32 %v6125_v32, %v6126_v19  ;;  %v8512_v61 = vunpack.i.l.bf16 %v8511_v24  ;;  %v6055_v58 = vmax.f32 %v6053_v43, %v6054_v51  ;;  %v6130_v28 = vsel %vm3879_vm0, %v8598_v6, -inf  ;;  %v13118_v19 = vld [vmem:[#allocation66_spill] sm:$0xff]  ;;  %v8516_v51 = vpop.trf.xlu0  ;;  %v13119_v31 = vld [vmem:[#allocation88_spill] sm:$0xff] }
 0x50a   : > { %v5987_v39 = vsel %vm3879_vm0, %v8515_v5, -inf  ;;  %v6058_v2 = vsel %vm3879_vm0, %v8595_v3, -inf  ;;  %v13114_v62 = vrot.slane %v13113_v27, 1  ;;  %v5751_v55 = vmax.f32 %v12106_v53, %v5750_v8 }
 0x50b   : > { %v5988_v14 = vmax.f32 %v5986_v30, %v5987_v39  ;;  %v5915_v4 = vsel %vm3879_vm0, %v8512_v61, -inf  ;;  %v8603_v9 = vunpack.i.h.bf16 %v8599_v52  ;;  %v6512_v43 = vsel %vm6444_vm9, %v13116_v13, %v13115_v42  ;;  %v13122_v13 = vld [vmem:[#allocation56_spill] sm:$0xff] }
 0x50c   : > { %v4599_v0 = vmax.f32 %v13113_v27, %v13114_v62  ;;  %v5916_v29 = vmax.f32 %v5914_v60, %v5915_v4  ;;  %v6624_v17 = vsel %vm6444_vm9, %v12040_v33, %v12032_v45  ;;  %v6513_v21 = vsel %vm6446_vm10, %v13117_v20, %v6512_v43 }
 0x50d   : > { %v5989_v32 = vrot.slane %v5988_v14, 4  ;;  %v6625_v40 = vsel %vm6446_vm10, %v12066_v34, %v6624_v17  ;;  %v6131_v24 = vsel %vm3879_vm0, %v8603_v9, -inf  ;;  %v6514_v44 = vsel %vm6448_vm12, %v13118_v19, %v6513_v21  ;;  %v8521_v17 = vpop.trf.xlu0  ;;  %v13124_v21 = vld [vmem:[#allocation65_spill] sm:$0xff]  ;;  %v13125_v19 = vld [vmem:[#allocation68_spill] sm:$0xff] }
 0x50e   : > { %v5917_v53 = vrot.slane %v5916_v29, 4  ;;  %v6626_v7 = vsel %vm6448_vm12, %v12076_v36, %v6625_v40  ;;  %v6515_v45 = vsel %vm6450_vm13, %v13119_v31, %v6514_v44  ;;  %v8600_v6 = vunpack.i.l.bf16 %v8599_v52  ;;  %v13126_v31 = vld [vmem:[#allocation89_spill] sm:$0xff] }
 0x50f   : > { %v5990_v8 = vmax.f32 %v5988_v14, %v5989_v32  ;;  %v6627_v33 = vsel %vm6450_vm13, %v12088_v35, %v6626_v7  ;;  %v5985_v30 = vmax.f32 %v5983_v11, %v5984_v54  ;;  %v6516_v34 = vsel %vm6452_vm14, %v4599_v0, %v6515_v45 }
 0x510   : > { %v6628_v3 = vsel %vm6452_vm14, %v5751_v55, %v6627_v33  ;;  %v6132_v5 = vmax.f32 %v6130_v28, %v6131_v24  ;;  %v5912_v60 = vrot.slane %v5911_v57, 1  ;;  %v6059_v61 = vsel %vm3879_vm0, %v8600_v6, -inf }
 0x511   : > { %v8672_v39 = vpack.i.bf16 %v6516_v34, %v6628_v3  ;;  %v6056_v14 = vrot.slane %v6055_v58, 1  ;;  %v6128_v36 = vrot.slane %v6127_v12, 1  ;;  %v5918_v4 = vmax.f32 %v5916_v29, %v5917_v53  ;;  %v12218_v29 = vpop.trf.xlu1 }
 0x512   : > { %v6060_v27 = vmax.f32 %v6058_v2, %v6059_v61  ;;  %v5991_v62 = vrot.slane %v5990_v8, 2  ;;  %v6133_v9 = vrot.slane %v6132_v5, 4  ;;  %v8520_v32 = vunpack.i.h.bf16 %v8516_v51 }
 0x513   : > { %8673 = vxpose.xlu0.b32.cont [10/16] (narrow) %v8672_v39, 32  ;;  %v5814_v35 = vmax.f32 %v12092_v59, %v5813_v18  ;;  %v5822_v11 = vrot.slane %v12126_v23, 1  ;;  %v5894_v54 = vrot.slane %v12122_v37, 1  ;;  %v12198_v52 = vmax.f32 %v12115_v38, %v5903_v22 }
 0x514   : > { %v12201_v28 = vmax.f32 %v12131_v16, %v6047_v48  ;;  %v12206_v2 = vmax.f32 %v12124_v63, %v6119_v26  ;;  %v12208_v0 = vmax.f32 %v5911_v57, %v5912_v60  ;;  %v12212_v59 = vsel %vm6440_vm1, %v5985_v30, %v12129_v25  ;;  %v13120_v26 = vld [vmem:[#allocation105_spill] sm:$0xff] }
 0x515   : > { %v12214_v18 = vmax.f32 %v6055_v58, %v6056_v14  ;;  %v12216_v55 = vmax.f32 %v6127_v12, %v6128_v36  ;;  %v5919_v38 = vrot.slane %v5918_v4, 2  ;;  %v6061_v22 = vrot.slane %v6060_v27, 4  ;;  %v13123_v58 = vld [vmem:[#allocation59_spill] sm:$0xff]  ;;  %v8609_v39 = vpop.trf.xlu1  ;;  %v13127_v14 = vld [vmem:[#allocation102_spill] sm:$0xff] }
 0x516   : > { %v12220_v16 = vmax.f32 %v5990_v8, %v5991_v62  ;;  %v6134_v48 = vmax.f32 %v6132_v5, %v6133_v9  ;;  %v5995_v63 = vsel %vm3879_vm0, %v8520_v32, -inf  ;;  %v13121_v57 = vrot.slane %v13120_v26, 1  ;;  %v13129_v62 = vld [vmem:[#allocation55_spill] sm:$0xff]  ;;  %v13130_v9 = vld [vmem:[#allocation60_spill] sm:$0xff] }
 0x517   : > { %v5823_v25 = vmax.f32 %v12126_v23, %v5822_v11  ;;  %v6519_v12 = vsel %vm6444_vm9, %v13123_v58, %v13122_v13  ;;  %v6631_v43 = vsel %vm6444_vm9, %v12062_v46, %v12038_v15  ;;  %v8517_v20 = vunpack.i.l.bf16 %v8516_v51 }
 0x518   : > { %v4671_v42 = vmax.f32 %v13120_v26, %v13121_v57  ;;  %v6520_v40 = vsel %vm6446_vm10, %v13124_v21, %v6519_v12  ;;  %v6632_v24 = vsel %vm6446_vm10, %v12070_v50, %v6631_v43  ;;  %v5920_v53 = vmax.f32 %v5918_v4, %v5919_v38  ;;  %v13131_v38 = vld [vmem:[#allocation63_spill] sm:$0xff]  ;;  %v13132_v26 = vld [vmem:[#allocation72_spill] sm:$0xff]  ;;  %v8526_v12 = vpop.trf.xlu0 }
 0x519   : > { %v6062_v8 = vmax.f32 %v6060_v27, %v6061_v22  ;;  %v6521_v23 = vsel %vm6448_vm12, %v13125_v19, %v6520_v40  ;;  %v6633_v44 = vsel %vm6448_vm12, %v12082_v47, %v6632_v24  ;;  %v6135_v7 = vrot.slane %v6134_v48, 2 }
 0x51a   : > { %v6522_v15 = vsel %vm6450_vm13, %v13126_v31, %v6521_v23  ;;  %v6634_v46 = vsel %vm6450_vm13, %v5814_v35, %v6633_v44  ;;  %v8525_v51 = vunpack.i.h.bf16 %v8521_v17  ;;  %v5993_v45 = vrot.slane %v12220_v16, 1 }
 0x51b   : > { %v6523_v33 = vsel %vm6452_vm14, %v4671_v42, %v6522_v15  ;;  %v6635_v50 = vsel %vm6452_vm14, %v5823_v25, %v6634_v46  ;;  %v5923_v6 = vsel %vm3879_vm0, %v8517_v20, -inf  ;;  %v6063_v3 = vrot.slane %v6062_v8, 2  ;;  %v13133_v25 = vld [vmem:[#allocation39_spill] sm:$0xff] }
 0x51c   : > { %v8674_v30 = vpack.i.bf16 %v6523_v33, %v6635_v50  ;;  %v5996_v34 = vsel %vm3879_vm0, %v8525_v51, -inf  ;;  %v8608_v47 = vunpack.i.h.bf16 %v12218_v29  ;;  %v8522_v5 = vunpack.i.l.bf16 %v8521_v17  ;;  %v8531_v33 = vpop.trf.xlu0 }
 0x51d   : > { %v5997_v60 = vmax.f32 %v5995_v63, %v5996_v34  ;;  %v6136_v61 = vmax.f32 %v6134_v48, %v6135_v7  ;;  %v13128_v36 = vrot.slane %v13127_v14, 1  ;;  %v5895_v27 = vmax.f32 %v12122_v37, %v5894_v54 }
 0x51e   : > { %8675 = vxpose.xlu0.b32.cont [11/16] (narrow) %v8674_v30, 32  ;;  %v6526_v32 = vsel %vm6444_vm9, %v13130_v9, %v13129_v62  ;;  %v5924_v35 = vsel %vm3879_vm0, %v8522_v5, -inf  ;;  %v6638_v48 = vsel %vm6444_vm9, %v12051_v10, %v12035_v56  ;;  %v8613_v54 = vunpack.i.h.bf16 %v8609_v39 }
 0x51f   : > { %v4743_v4 = vmax.f32 %v13127_v14, %v13128_v36  ;;  %v5998_v11 = vrot.slane %v5997_v60, 4  ;;  %v6527_v22 = vsel %vm6446_vm10, %v13131_v38, %v6526_v32  ;;  %v5925_v63 = vmax.f32 %v5923_v6, %v5924_v35 }
 0x520   : > { %v6528_v57 = vsel %vm6448_vm12, %v13132_v26, %v6527_v22  ;;  %v6639_v37 = vsel %vm6446_vm10, %v12068_v41, %v6638_v48  ;;  %v6139_v43 = vsel %vm3879_vm0, %v8608_v47, -inf  ;;  %v8605_v56 = vunpack.i.l.bf16 %v12218_v29  ;;  %v8536_v9 = vpop.trf.xlu0 }
 0x521   : > { %v5999_v42 = vmax.f32 %v5997_v60, %v5998_v11  ;;  %v6529_v13 = vsel %vm6450_vm13, %v13133_v25, %v6528_v57  ;;  %v6640_v58 = vsel %vm6448_vm12, %v12084_v1, %v6639_v37  ;;  %v6140_v20 = vsel %vm3879_vm0, %v8613_v54, -inf  ;;  %v8614_v1 = vpop.trf.xlu1 }
 0x522   : > { %v6530_v10 = vsel %vm6452_vm14, %v4743_v4, %v6529_v13  ;;  %v6641_v17 = vsel %vm6450_vm13, %v12118_v49, %v6640_v58  ;;  %v8610_v21 = vunpack.i.l.bf16 %v8609_v39  ;;  %v5921_v40 = vrot.slane %v5920_v53, 1 }
 0x523   : > { %v6642_v41 = vsel %vm6452_vm14, %v5895_v27, %v6641_v17  ;;  %v6064_v24 = vmax.f32 %v6062_v8, %v6063_v3  ;;  %v5926_v19 = vrot.slane %v5925_v63, 4  ;;  %v6137_v44 = vrot.slane %v6136_v61, 1 }
 0x524   : > { %v8676_v23 = vpack.i.bf16 %v6530_v10, %v6642_v41  ;;  %v6000_v7 = vrot.slane %v5999_v42, 2  ;;  %v6643_v29 = vsel %vm6440_vm1, %v12208_v0, %v12198_v52  ;;  %v6657_v49 = vsel %vm6440_vm1, %v12214_v18, %v12201_v28 }
 0x525   : > { %v6664_v31 = vsel %vm6440_vm1, %v12216_v55, %v12206_v2  ;;  %v6141_v15 = vmax.f32 %v6139_v43, %v6140_v20  ;;  %v5994_v8 = vmax.f32 %v12220_v16, %v5993_v45  ;;  %v6067_v46 = vsel %vm3879_vm0, %v8605_v56, -inf  ;;  %v8619_v55 = vpop.trf.xlu1  ;;  %v8541_v20 = vpop.trf.xlu0 }
 0x526   : > { %8677 = vxpose.xlu0.b32.cont [12/16] (narrow) %v8676_v23, 32  ;;  %v6068_v51 = vsel %vm3879_vm0, %v8610_v21, -inf  ;;  %v5927_v50 = vmax.f32 %v5925_v63, %v5926_v19  ;;  %v8530_v6 = vunpack.i.h.bf16 %v8526_v12  ;;  %v8527_v52 = vunpack.i.l.bf16 %v8526_v12 }
 0x527   : > { %v5922_v0 = vmax.f32 %v5920_v53, %v5921_v40  ;;  %v6065_v30 = vrot.slane %v6064_v24, 1  ;;  %v6138_v34 = vmax.f32 %v6136_v61, %v6137_v44  ;;  %v6001_v28 = vmax.f32 %v5999_v42, %v6000_v7 }
 0x528   : > { %v6069_v18 = vmax.f32 %v6067_v46, %v6068_v51  ;;  %v6142_v3 = vrot.slane %v6141_v15, 4  ;;  %v8618_v47 = vunpack.i.h.bf16 %v8614_v1  ;;  %v8535_v2 = vunpack.i.h.bf16 %v8531_v33 }
 0x529   : > { %v8615_v5 = vunpack.i.l.bf16 %v8614_v1  ;;  %v8532_v60 = vunpack.i.l.bf16 %v8531_v33  ;;  %v5928_v16 = vrot.slane %v5927_v50, 2  ;;  %v6004_v45 = vsel %vm3879_vm0, %v8530_v6, -inf  ;;  %v8624_v57 = vpop.trf.xlu1 }
 0x52a   : > { %v5932_v39 = vsel %vm3879_vm0, %v8527_v52, -inf  ;;  %v6005_v14 = vsel %vm3879_vm0, %v8535_v2, -inf  ;;  %v8623_v4 = vunpack.i.h.bf16 %v8619_v55  ;;  %v6070_v61 = vrot.slane %v6069_v18, 4 }
 0x52b   : > { %v5933_v36 = vsel %vm3879_vm0, %v8532_v60, -inf  ;;  %v6006_v53 = vmax.f32 %v6004_v45, %v6005_v14  ;;  %v6143_v27 = vmax.f32 %v6141_v15, %v6142_v3  ;;  %v6148_v32 = vsel %vm3879_vm0, %v8618_v47, -inf }
 0x52c   : > { %v5934_v62 = vmax.f32 %v5932_v39, %v5933_v36  ;;  %v6076_v35 = vsel %vm3879_vm0, %v8615_v5, -inf  ;;  %v6149_v11 = vsel %vm3879_vm0, %v8623_v4, -inf  ;;  %v8620_v38 = vunpack.i.l.bf16 %v8619_v55 }
 0x52d   : > { %v12299_v22 = vsel %vm6442_vm2, %v5994_v8, %v12212_v59  ;;  %v6066_v48 = vmax.f32 %v6064_v24, %v6065_v30  ;;  %v6007_v26 = vrot.slane %v6006_v53, 4  ;;  %v5929_v37 = vmax.f32 %v5927_v50, %v5928_v16  ;;  %v8629_v7 = vpop.trf.xlu1 }
 0x52e   : > { %v5935_v63 = vrot.slane %v5934_v62, 4  ;;  %v6002_v54 = vrot.slane %v6001_v28, 1  ;;  %v6077_v42 = vsel %vm3879_vm0, %v8620_v38, -inf  ;;  %v12303_v25 = vsel %vm6442_vm2, %v5922_v0, %v6643_v29 }
 0x52f   : > { %v6071_v13 = vmax.f32 %v6069_v18, %v6070_v61  ;;  %v6078_v58 = vmax.f32 %v6076_v35, %v6077_v42  ;;  %v6150_v12 = vmax.f32 %v6148_v32, %v6149_v11  ;;  %v12306_v43 = vsel %vm6442_vm2, %v6138_v34, %v6664_v31 }
 0x530   : > { %v6144_v56 = vrot.slane %v6143_v27, 2  ;;  %v8540_v59 = vunpack.i.h.bf16 %v8536_v9  ;;  %v5936_v10 = vmax.f32 %v5934_v62, %v5935_v63  ;;  %v6008_v17 = vmax.f32 %v6006_v53, %v6007_v26 }
 0x531   : > { %v6079_v41 = vrot.slane %v6078_v58, 4  ;;  %v12309_v21 = vsel %vm6442_vm2, %v6066_v48, %v6657_v49  ;;  %v5930_v40 = vrot.slane %v5929_v37, 1  ;;  %v12311_v24 = vmax.f32 %v6001_v28, %v6002_v54  ;;  %v8546_v28 = vpop.trf.xlu0  ;;  %v8634_v53 = vpop.trf.xlu1 }
 0x532   : > { %v6072_v19 = vrot.slane %v6071_v13, 2  ;;  %v6151_v23 = vrot.slane %v6150_v12, 4  ;;  %v8537_v1 = vunpack.i.l.bf16 %v8536_v9  ;;  %v8628_v44 = vunpack.i.h.bf16 %v8624_v57 }
 0x533   : > { %v6145_v29 = vmax.f32 %v6143_v27, %v6144_v56  ;;  %v8545_v31 = vunpack.i.h.bf16 %v8541_v20  ;;  %v5937_v15 = vrot.slane %v5936_v10, 2  ;;  %v6009_v8 = vrot.slane %v6008_v17, 2 }
 0x534   : > { %v6080_v46 = vmax.f32 %v6078_v58, %v6079_v41  ;;  %v6013_v51 = vsel %vm3879_vm0, %v8540_v59, -inf  ;;  %v8625_v33 = vunpack.i.l.bf16 %v8624_v57  ;;  %v8542_v49 = vunpack.i.l.bf16 %v8541_v20 }
 0x535   : > { %v6014_v50 = vsel %vm3879_vm0, %v8545_v31, -inf  ;;  %v8633_v6 = vunpack.i.h.bf16 %v8629_v7  ;;  %v6152_v52 = vmax.f32 %v6150_v12, %v6151_v23  ;;  %v5941_v0 = vsel %vm3879_vm0, %v8537_v1, -inf  ;;  %v8551_v38 = vpop.trf.xlu0 }
 0x536   : > { %v6157_v30 = vsel %vm3879_vm0, %v8628_v44, -inf  ;;  %v6015_v34 = vmax.f32 %v6013_v51, %v6014_v50  ;;  %v5942_v18 = vsel %vm3879_vm0, %v8542_v49, -inf  ;;  %v6073_v47 = vmax.f32 %v6071_v13, %v6072_v19 }
 0x537   : > { %v6158_v3 = vsel %vm3879_vm0, %v8633_v6, -inf  ;;  %v6146_v2 = vrot.slane %v6145_v29, 1  ;;  %v6081_v55 = vrot.slane %v6080_v46, 2  ;;  %v5943_v5 = vmax.f32 %v5941_v0, %v5942_v18 }
 0x538   : > { %v6085_v60 = vsel %vm3879_vm0, %v8625_v33, -inf  ;;  %v6016_v16 = vrot.slane %v6015_v34, 4  ;;  %v8630_v45 = vunpack.i.l.bf16 %v8629_v7  ;;  %v5938_v39 = vmax.f32 %v5936_v10, %v5937_v15  ;;  %v8639_v10 = vpop.trf.xlu1 }
 0x539   : > { %v6010_v14 = vmax.f32 %v6008_v17, %v6009_v8  ;;  %v6159_v36 = vmax.f32 %v6157_v30, %v6158_v3  ;;  %v12320_v4 = vmax.f32 %v5929_v37, %v5930_v40  ;;  %v6153_v61 = vrot.slane %v6152_v52, 2  ;;  %v8556_v33 = vpop.trf.xlu0 }
 0x53a   : > { %v5944_v27 = vrot.slane %v5943_v5, 4  ;;  %v6086_v62 = vsel %vm3879_vm0, %v8630_v45, -inf  ;;  %v6074_v9 = vrot.slane %v6073_v47, 1  ;;  %v12323_v32 = vmax.f32 %v6145_v29, %v6146_v2 }
 0x53b   : > { %v6082_v35 = vmax.f32 %v6080_v46, %v6081_v55  ;;  %v6087_v11 = vmax.f32 %v6085_v60, %v6086_v62  ;;  %v6017_v48 = vmax.f32 %v6015_v34, %v6016_v16  ;;  %v8550_v63 = vunpack.i.h.bf16 %v8546_v28 }
 0x53c   : > { %v5939_v26 = vrot.slane %v5938_v39, 1  ;;  %v6011_v57 = vrot.slane %v6010_v14, 1  ;;  %v6160_v54 = vrot.slane %v6159_v36, 4  ;;  %v8547_v42 = vunpack.i.l.bf16 %v8546_v28  ;;  %v8644_v28 = vpop.trf.xlu1 }
 0x53d   : > { %v12325_v13 = vmax.f32 %v6152_v52, %v6153_v61  ;;  %v5945_v37 = vmax.f32 %v5943_v5, %v5944_v27  ;;  %v8555_v58 = vunpack.i.h.bf16 %v8551_v38  ;;  %v6083_v12 = vrot.slane %v6082_v35, 1 }
 0x53e   : > { %v6088_v56 = vrot.slane %v6087_v11, 4  ;;  %v8638_v59 = vunpack.i.h.bf16 %v8634_v53  ;;  %v6018_v17 = vrot.slane %v6017_v48, 2  ;;  %v6022_v41 = vsel %vm3879_vm0, %v8550_v63, -inf }
 0x53f   : > { %v6023_v20 = vsel %vm3879_vm0, %v8555_v58, -inf  ;;  %v8552_v40 = vunpack.i.l.bf16 %v8551_v38  ;;  %v6161_v19 = vmax.f32 %v6159_v36, %v6160_v54  ;;  %v5950_v23 = vsel %vm3879_vm0, %v8547_v42, -inf }
 0x540   : > { %v8635_v1 = vunpack.i.l.bf16 %v8634_v53  ;;  %v6024_v44 = vmax.f32 %v6022_v41, %v6023_v20  ;;  %v5946_v7 = vrot.slane %v5945_v37, 2  ;;  %v8643_v31 = vunpack.i.h.bf16 %v8639_v10  ;;  %v8649_v54 = vpop.trf.xlu1 }
 0x541   : > { %v5951_v29 = vsel %vm3879_vm0, %v8552_v40, -inf  ;;  %v6089_v15 = vmax.f32 %v6087_v11, %v6088_v56  ;;  %v6166_v8 = vsel %vm3879_vm0, %v8638_v59, -inf  ;;  %v6019_v50 = vmax.f32 %v6017_v48, %v6018_v17  ;;  %v8561_v11 = vpop.trf.xlu0 }
 0x542   : > { %v5952_v46 = vmax.f32 %v5950_v23, %v5951_v29  ;;  %v6025_v51 = vrot.slane %v6024_v44, 4  ;;  %v6167_v49 = vsel %vm3879_vm0, %v8643_v31, -inf  ;;  %v8640_v6 = vunpack.i.l.bf16 %v8639_v10 }
 0x543   : > { %v6162_v52 = vrot.slane %v6161_v19, 2  ;;  %v6094_v0 = vsel %vm3879_vm0, %v8635_v1, -inf  ;;  %v6168_v3 = vmax.f32 %v6166_v8, %v6167_v49  ;;  %v12335_v2 = vmax.f32 %v6073_v47, %v6074_v9 }
 0x544   : > { %v5953_v30 = vrot.slane %v5952_v46, 4  ;;  %v6026_v34 = vmax.f32 %v6024_v44, %v6025_v51  ;;  %v6095_v18 = vsel %vm3879_vm0, %v8640_v6, -inf  ;;  %v12337_v55 = vmax.f32 %v6010_v14, %v6011_v57 }
 0x545   : > { %v5947_v5 = vmax.f32 %v5945_v37, %v5946_v7  ;;  %v6090_v60 = vrot.slane %v6089_v15, 2  ;;  %v12339_v16 = vmax.f32 %v5938_v39, %v5939_v26  ;;  %v12341_v45 = vmax.f32 %v6082_v35, %v6083_v12 }
 0x546   : > { %v6155_v36 = vrot.slane %v12325_v13, 1  ;;  %v6096_v53 = vmax.f32 %v6094_v0, %v6095_v18  ;;  %v5954_v61 = vmax.f32 %v5952_v46, %v5953_v30  ;;  %v6027_v27 = vrot.slane %v6026_v34, 2 }
 0x547   : > { %v8560_v62 = vunpack.i.h.bf16 %v8556_v33  ;;  %v6020_v38 = vrot.slane %v6019_v50, 1  ;;  %v12344_v48 = vmax.f32 %v6161_v19, %v6162_v52  ;;  %v6169_v47 = vrot.slane %v6168_v3, 4 }
 0x548   : > { %v5948_v9 = vrot.slane %v5947_v5, 1  ;;  %v6091_v14 = vmax.f32 %v6089_v15, %v6090_v60  ;;  %v8557_v63 = vunpack.i.l.bf16 %v8556_v33  ;;  %v8648_v57 = vunpack.i.h.bf16 %v8644_v28 }
 0x549   : > { %v6097_v39 = vrot.slane %v6096_v53, 4  ;;  %v8565_v26 = vunpack.i.h.bf16 %v8561_v11  ;;  %v5955_v35 = vrot.slane %v5954_v61, 2  ;;  %v6028_v42 = vmax.f32 %v6026_v34, %v6027_v27 }
 0x54a   : > { %v6031_v37 = vsel %vm3879_vm0, %v8560_v62, -inf  ;;  %v8645_v58 = vunpack.i.l.bf16 %v8644_v28  ;;  %v6170_v12 = vmax.f32 %v6168_v3, %v6169_v47  ;;  %v8562_v59 = vunpack.i.l.bf16 %v8561_v11 }
 0x54b   : > { %v6032_v56 = vsel %vm3879_vm0, %v8565_v26, -inf  ;;  %v8653_v10 = vunpack.i.h.bf16 %v8649_v54  ;;  %v5959_v17 = vsel %vm3879_vm0, %v8557_v63, -inf  ;;  %v6175_v41 = vsel %vm3879_vm0, %v8648_v57, -inf  ;;  %v13134_v26 = vld [vmem:[#allocation110_spill] sm:$0xff] }
 0x54c   : > { %v6033_v20 = vmax.f32 %v6031_v37, %v6032_v56  ;;  %v6098_v40 = vmax.f32 %v6096_v53, %v6097_v39  ;;  %v5960_v19 = vsel %vm3879_vm0, %v8562_v59, -inf  ;;  %v6103_v1 = vsel %vm3879_vm0, %v8645_v58, -inf  ;;  %v13138_v56 = vld [vmem:[#allocation78_spill] sm:$0xff] }
 0x54d   : > { %v6176_v23 = vsel %vm3879_vm0, %v8653_v10, -inf  ;;  %v5961_v44 = vmax.f32 %v5959_v17, %v5960_v19  ;;  %v8650_v29 = vunpack.i.l.bf16 %v8649_v54  ;;  %v6092_v31 = vrot.slane %v6091_v14, 1  ;;  %v13139_v10 = vld [vmem:[#allocation15_spill] sm:$0xff] }
 0x54e   : > { %v6034_v7 = vrot.slane %v6033_v20, 4  ;;  %v5956_v15 = vmax.f32 %v5954_v61, %v5955_v35  ;;  %v6029_v8 = vrot.slane %v6028_v42, 1  ;;  %v6177_v46 = vmax.f32 %v6175_v41, %v6176_v23  ;;  %v13136_v35 = vld [vmem:[#allocation100_spill] sm:$0xff]  ;;  %v13140_v19 = vld [vmem:[#allocation111_spill] sm:$0xff] }
 0x54f   : > { %v6171_v51 = vrot.slane %v6170_v12, 2  ;;  %v5962_v33 = vrot.slane %v5961_v44, 4  ;;  %v6104_v6 = vsel %vm3879_vm0, %v8650_v29, -inf  ;;  %v6021_v52 = vmax.f32 %v6019_v50, %v6020_v38 }
 0x550   : > { %v6035_v49 = vmax.f32 %v6033_v20, %v6034_v7  ;;  %v6099_v0 = vrot.slane %v6098_v40, 2  ;;  %v6105_v30 = vmax.f32 %v6103_v1, %v6104_v6  ;;  %v6178_v34 = vrot.slane %v6177_v46, 4 }
 0x551   : > { %v5949_v28 = vmax.f32 %v5947_v5, %v5948_v9  ;;  %v6164_v18 = vrot.slane %v12344_v48, 1  ;;  %v5963_v3 = vmax.f32 %v5961_v44, %v5962_v33  ;;  %v6093_v53 = vmax.f32 %v6091_v14, %v6092_v31  ;;  %v13137_v5 = vld [vmem:[#allocation74_spill] sm:$0xff]  ;;  %v13141_v33 = vld [vmem:[#allocation99_spill] sm:$0xff] }
 0x552   : > { %v6036_v60 = vrot.slane %v6035_v49, 2  ;;  %v5957_v27 = vrot.slane %v5956_v15, 1  ;;  %v6106_v62 = vrot.slane %v6105_v30, 4  ;;  %v6179_v61 = vmax.f32 %v6177_v46, %v6178_v34 }
 0x553   : > { %v6030_v11 = vmax.f32 %v6028_v42, %v6029_v8  ;;  %v6172_v47 = vmax.f32 %v6170_v12, %v6171_v51  ;;  %v5964_v63 = vrot.slane %v5963_v3, 2  ;;  %v6100_v54 = vmax.f32 %v6098_v40, %v6099_v0 }
 0x554   : > { %v6037_v57 = vmax.f32 %v6035_v49, %v6036_v60  ;;  %v6107_v39 = vmax.f32 %v6105_v30, %v6106_v62  ;;  %v13135_v50 = vrot.slane %v13134_v26, 1  ;;  %v6533_v9 = vsel %vm6444_vm9, %v13137_v5, %v13136_v35  ;;  %v13142_v49 = vld [vmem:[#allocation71_spill] sm:$0xff]  ;;  %v13143_v30 = vld [vmem:[#allocation113_spill] sm:$0xff]  ;;  %v13146_v62 = vld [vmem:[#allocation14_spill] sm:$0xff] }
 0x555   : > { %v5965_v37 = vmax.f32 %v5963_v3, %v5964_v63  ;;  %v6180_v14 = vrot.slane %v6179_v61, 2  ;;  %v6534_v59 = vsel %vm6446_vm10, %v13138_v56, %v6533_v9  ;;  %v5958_v42 = vmax.f32 %v5956_v15, %v5957_v27  ;;  %v13145_v3 = vld [vmem:[#allocation76_spill] sm:$0xff] }
 0x556   : > { %v4815_v38 = vmax.f32 %v13134_v26, %v13135_v50  ;;  %v6038_v58 = vrot.slane %v6037_v57, 1  ;;  %v6108_v12 = vrot.slane %v6107_v39, 2  ;;  %v6535_v17 = vsel %vm6448_vm12, %v13139_v10, %v6534_v59  ;;  %v13148_v5 = vld [vmem:[#allocation64_spill] sm:$0xff] }
 0x557   : > { %v6645_v41 = vsel %vm6444_vm9, %v12320_v4, %v12303_v25  ;;  %v6173_v20 = vrot.slane %v6172_v47, 1  ;;  %v5966_v40 = vrot.slane %v5965_v37, 1  ;;  %v6536_v23 = vsel %vm6450_vm13, %v13140_v19, %v6535_v17  ;;  %v13154_v17 = vld [vmem:[#allocation95_spill] sm:$0xff]  ;;  %v13158_v19 = vld [vmem:[#allocation112_spill] sm:$0xff] }
 0x558   : > { %v6646_v1 = vsel %vm6446_vm10, %v12339_v16, %v6645_v41  ;;  %v6101_v44 = vrot.slane %v6100_v54, 1  ;;  %v6109_v7 = vmax.f32 %v6107_v39, %v6108_v12  ;;  %v6537_v29 = vsel %vm6452_vm14, %v4815_v38, %v6536_v23  ;;  %v13155_v41 = vld [vmem:[#allocation69_spill] sm:$0xff] }
 0x559   : > { %v6647_v31 = vsel %vm6448_vm12, %v5949_v28, %v6646_v1  ;;  %v6181_v15 = vmax.f32 %v6179_v61, %v6180_v14  ;;  %v5967_v8 = vmax.f32 %v5965_v37, %v5966_v40  ;;  %v6039_v46 = vmax.f32 %v6037_v57, %v6038_v58 }
 0x55a   : > { %v6652_v25 = vsel %vm6444_vm9, %v12311_v24, %v12299_v22  ;;  %v6110_v4 = vrot.slane %v6109_v7, 1  ;;  %v6648_v51 = vsel %vm6450_vm13, %v5958_v42, %v6647_v31  ;;  %v6540_v16 = vsel %vm6444_vm9, %v13142_v49, %v13141_v33 }
 0x55b   : > { %v6653_v6 = vsel %vm6446_vm10, %v12337_v55, %v6652_v25  ;;  %v6649_v0 = vsel %vm6452_vm14, %v5967_v8, %v6648_v51  ;;  %v13144_v34 = vrot.slane %v13143_v30, 1  ;;  %v6541_v60 = vsel %vm6446_vm10, %v13145_v3, %v6540_v16  ;;  %v13163_v51 = vld [vmem:[#allocation13_spill] sm:$0xff] }
 0x55c   : > { %v6654_v22 = vsel %vm6448_vm12, %v6021_v52, %v6653_v6  ;;  %v6102_v24 = vmax.f32 %v6100_v54, %v6101_v44  ;;  %v8678_v27 = vpack.i.bf16 %v6537_v29, %v6649_v0  ;;  %v6542_v61 = vsel %vm6448_vm12, %v13146_v62, %v6541_v60  ;;  %v13147_v54 = vld [vmem:[#allocation17_spill] sm:$0xff] }
 0x55d   : > { %v4887_v28 = vmax.f32 %v13143_v30, %v13144_v34  ;;  %v6655_v63 = vsel %vm6450_vm13, %v6030_v11, %v6654_v22  ;;  %v6182_v57 = vrot.slane %v6181_v15, 1  ;;  %v6111_v39 = vmax.f32 %v6109_v7, %v6110_v4  ;;  %v13159_v7 = vld [vmem:[#allocation114_spill] sm:$0xff] }
 0x55e   : > { %v6656_v55 = vsel %vm6452_vm14, %v6039_v46, %v6655_v63  ;;  %v6659_v26 = vsel %vm6444_vm9, %v12335_v2, %v12309_v21  ;;  %v6156_v50 = vmax.f32 %v12325_v13, %v6155_v36  ;;  %v6165_v52 = vmax.f32 %v12344_v48, %v6164_v18  ;;  %8679 = vxpose.xlu0.b32.cont [13/16] (narrow) %v8678_v27, 32  ;;  %v13150_v21 = vld [vmem:[#allocation70_spill] sm:$0xff]  ;;  %v13151_v2 = vld [vmem:[#allocation75_spill] sm:$0xff]  ;;  %v13152_v18 = vld [vmem:[#allocation77_spill] sm:$0xff] }
 0x55f   : > { %v6543_v38 = vsel %vm6450_vm13, %v13147_v54, %v6542_v61  ;;  %v6660_v11 = vsel %vm6446_vm10, %v12341_v45, %v6659_v26  ;;  %v13149_v9 = vrot.slane %v13148_v5, 1  ;;  %v6547_v58 = vsel %vm6444_vm9, %v13151_v2, %v13150_v21  ;;  %v13153_v45 = vld [vmem:[#allocation12_spill] sm:$0xff]  ;;  %v6973_v30 = vld [vmem:[%s12508_s9] sm:$0xff] }
 0x560   : > { %v6544_v35 = vsel %vm6452_vm14, %v4887_v28, %v6543_v38  ;;  %v6661_v13 = vsel %vm6448_vm12, %v6093_v53, %v6660_v11  ;;  %v6174_v36 = vmax.f32 %v6172_v47, %v6173_v20  ;;  %v6548_v14 = vsel %vm6446_vm10, %v13152_v18, %v6547_v58  ;;  %v13156_v47 = vld [vmem:[#allocation16_spill] sm:$0xff]  ;;  %v8717_v54 = vld [vmem:[%s12504_s5] sm:$0xff]   ;;  %v8718_v11 = vld [vmem:[%s12504_s5 + $0x8] sm:$0xff]  }
 0x561   : > { %v4959_v37 = vmax.f32 %v13148_v5, %v13149_v9  ;;  %v8680_v48 = vpack.i.bf16 %v6544_v35, %v6656_v55  ;;  %v6662_v56 = vsel %vm6450_vm13, %v6102_v24, %v6661_v13  ;;  %v6549_v59 = vsel %vm6448_vm12, %v13153_v45, %v6548_v14  ;;  %v13162_v46 = vld [vmem:[#allocation8_spill] sm:$0xff]  ;;  %v6792_v35 = vpop.permute.xlu1 %6791 }
 0x562   : > { %v6663_v42 = vsel %vm6452_vm14, %v6111_v39, %v6662_v56  ;;  %v6183_v12 = vmax.f32 %v6181_v15, %v6182_v57  ;;  %v6666_v10 = vsel %vm6444_vm9, %v12323_v32, %v12306_v43  ;;  %v6553_v53 = vsel %vm6442_vm2, %v13155_v41, %v13154_v17  ;;  %v13161_v32 = vld [vmem:[#allocation29_spill] sm:$0xff] }
 0x563   : > { %v13157_v20 = vrot.slane %v13156_v47, 1  ;;  %8681 = vxpose.xlu0.b32.cont [14/16] (narrow) %v8680_v48, 32  ;;  %v6550_v23 = vsel %vm6450_vm13, %v13158_v19, %v6549_v59  ;;  %v6667_v1 = vsel %vm6446_vm10, %v6156_v50, %v6666_v10  ;;  %v13160_v29 = vrot.slane %v13159_v7, 1 }
 0x564   : > { %v6551_v44 = vsel %vm6452_vm14, %v4959_v37, %v6550_v23  ;;  %v6554_v31 = vsel %vm6444_vm9, %v13161_v32, %v6553_v53  ;;  %v6668_v15 = vsel %vm6448_vm12, %v6165_v52, %v6667_v1  ;;  %v13164_v38 = vmov 0  }
 0x565   : > { %v5022_v40 = vmax.f32 %v13156_v47, %v13157_v20  ;;  %v5031_v43 = vmax.f32 %v13159_v7, %v13160_v29  ;;  %v8682_v8 = vpack.i.bf16 %v6551_v44, %v6663_v42  ;;  %v6555_v25 = vsel %vm6446_vm10, %v13162_v46, %v6554_v31  ;;  %v6797_v5 = vpop.permute.xlu1 %6796 }
 0x566   : > { %v6669_v4 = vsel %vm6450_vm13, %v6174_v36, %v6668_v15  ;;  %v6556_v33 = vsel %vm6448_vm12, %v13163_v51, %v6555_v25 }
 0x567   : > { %v6670_v49 = vsel %vm6452_vm14, %v6183_v12, %v6669_v4  ;;  %8683 = vxpose.xlu0.b32.cont [15/16] (narrow) %v8682_v8, 32  ;;  %v6557_v16 = vsel %vm6450_vm13, %v5022_v40, %v6556_v33 }
 0x568   : > { %v6558_v6 = vsel %vm6452_vm14, %v5031_v43, %v6557_v16 }
 0x569   : > { %v8684_v0 = vpack.i.bf16 %v6558_v6, %v6670_v49  ;;  %v6782_v21 = vpop.permute.xlu1 %6781  ;;  %v8719_v49 = vld [vmem:[%s12506_s7] sm:$0xff]  }
 0x56b   : > { %8685 = vxpose.xlu0.b32.end [16/16] (narrow) %v8684_v0, 32 }
 0x56d   : > { %v6787_v36 = vpop.permute.xlu1 %6786 }
 0x571   : > { %v6903_v16 = vpop.permute.xlu1 %6902 }
 0x594   : > { %6978 = vperm.xlu0 %7244, %v6973_v30  }
 0x5ab   : > { %v8686_v34 = vpop.trf.xlu0 }
 0x5ac   : > { %v8687_v63 = vunpack.i.l.bf16 %v8686_v34  ;;  %v8690_v50 = vunpack.i.h.bf16 %v8686_v34  ;;  %v6908_v34 = vpop.permute.xlu1 %6907 }
 0x5af   : > { %v8691_v28 = vpop.trf.xlu0 }
 0x5b0   : > { %v8692_v60 = vunpack.i.l.bf16 %v8691_v28  ;;  %v8695_v39 = vunpack.i.h.bf16 %v8691_v28 }
 0x5b2   : > { %v6776_v26 = vpack.c.bf16 %v8692_v60, %v8687_v63  ;;  %v6775_v52 = vpack.c.bf16 %v8695_v39, %v8690_v50 }
 0x5b3   : > { %v8696_v3 = vpop.trf.xlu0 }
 0x5b4   : > { %v8700_v22 = vunpack.i.h.bf16 %v8696_v3  ;;  %v8697_v24 = vunpack.i.l.bf16 %v8696_v3 }
 0x5b7   : > { %v8701_v27 = vpop.trf.xlu0 }
 0x5b8   : > { %v8705_v62 = vunpack.i.h.bf16 %v8701_v27  ;;  %v8702_v61 = vunpack.i.l.bf16 %v8701_v27 }
 0x5ba   : > { %v6778_v57 = vpack.c.bf16 %v8702_v61, %v8697_v24  ;;  %v6777_v55 = vpack.c.bf16 %v8705_v62, %v8700_v22 }
 0x5bc   : > { %6827 = vmatprep.subr.bf16.mxu0 %v6778_v57  ;;  %v6984_v57 = vpop.permute.xlu1 %6983 }
 0x5bd   : > { %6828 = vmatpush1.bf16.msra.mxu0 %v6777_v55 }
 0x5be   : > { %6829 = vmatprep.subr.bf16.mxu0 %v6776_v26 }
 0x5c1   : > { %6830 = vmatpush1.bf16.msra.mxu0 %v6775_v52 }
 0x5c4   : > { %7190 = vmatmul.mubr.msk.bf16.vlgmr.msra.gmra.mxu0 %vm3879_vm0, %v8717_v54 }
 0x5c5   : > { %6857 = vmatprep.mubr.bf16.mxu0 %v13164_v38 }
 0x5cc   : > { %7191 = vmatmul.mubr.msk.bf16.gmra.mxu0 %vm3879_vm0, %v8718_v11 }
 0x60f   : > { %v6979_v55 = vpop.permute.xlu0 %6978 }
 0x684   : > { %v6849_v9 = vpop.f32.mrf.mxu0 }
 0x685   : > { %v6850_v20 = vadd.f32 %v6849_v9, %v6782_v21 }
 0x686   : > { %v6851_v37 = vpop.f32.mrf.mxu0 }
 0x687   : > { %v6852_v59 = vadd.f32 %v6851_v37, %v6782_v21  ;;  %v6876_v32 = vmul.f32 0.2, %v6850_v20  ;;  %vm6868_vm7 = vcmp.gt.f32.partialorder %v6850_v20, 0.0 }
 0x688   : > { %v6853_v2 = vpop.f32.mrf.mxu0 }
 0x689   : > { %v6854_v12 = vadd.f32 %v6853_v2, %v6787_v36  ;;  %v6877_v19 = vmul.f32 0.2, %v6852_v59  ;;  %vm6869_vm5 = vcmp.gt.f32.partialorder %v6852_v59, 0.0  ;;  %v6884_v51 = vsel %vm6868_vm7, %v6850_v20, %v6876_v32 }
 0x68a   : > { %v6855_v58 = vpop.f32.mrf.mxu0  ;;  %v8793_v32 = vmov 1966171168  }
 0x68b   : > { %v6856_v48 = vadd.f32 %v6855_v58, %v6787_v36  ;;  %v6878_v1 = vmul.f32 0.2, %v6854_v12  ;;  %vm6870_vm6 = vcmp.gt.f32.partialorder %v6854_v12, 0.0  ;;  %v6885_v46 = vsel %vm6869_vm5, %v6852_v59, %v6877_v19  ;;  %v13165_v36 = vld [vmem:[#allocation6_spill] sm:$0xff] }
 0x68c   : > { %v6859_v13 = vpop.f32.mrf.mxu0 }
 0x68d   : > { %v6860_v56 = vadd.f32 %v6859_v13, %v6792_v35  ;;  %v6879_v10 = vmul.f32 0.2, %v6856_v48  ;;  %vm6871_vm1 = vcmp.gt.f32.partialorder %v6856_v48, 0.0  ;;  %v6886_v25 = vsel %vm6870_vm6, %v6854_v12, %v6878_v1 }
 0x68e   : > { %v6861_v18 = vpop.f32.mrf.mxu0  ;;  %v6896_v33 = vpack.c.bf16 %v6886_v25, %v6884_v51 }
 0x68f   : > { %v6862_v14 = vadd.f32 %v6861_v18, %v6792_v35  ;;  %v6880_v40 = vmul.f32 0.2, %v6860_v56  ;;  %vm6872_vm3 = vcmp.gt.f32.partialorder %v6860_v56, 0.0  ;;  %v6887_v43 = vsel %vm6871_vm1, %v6856_v48, %v6879_v10 }
 0x690   : > { %v6863_v45 = vpop.f32.mrf.mxu0  ;;  %v6897_v4 = vpack.c.bf16 %v6887_v43, %v6885_v46  ;;  %v7011_v48 = vsub.s32 0, %v13165_v36 }
 0x691   : > { %v6864_v42 = vadd.f32 %v6863_v45, %v6797_v5  ;;  %v6881_v41 = vmul.f32 0.2, %v6862_v14  ;;  %vm6873_vm2 = vcmp.gt.f32.partialorder %v6862_v14, 0.0  ;;  %v6888_v31 = vsel %vm6872_vm3, %v6860_v56, %v6880_v40  ;;  %v7007_v56 = vpop.permute.xlu1 %7006 }
 0x692   : > { %v6865_v17 = vpop.f32.mrf.mxu0 }
 0x693   : > { %vm6874_vm15 = vcmp.gt.f32.partialorder %v6864_v42, 0.0  ;;  %v6882_v53 = vmul.f32 0.2, %v6864_v42  ;;  %v6866_v47 = vadd.f32 %v6865_v17, %v6797_v5  ;;  %v6889_v7 = vsel %vm6873_vm2, %v6862_v14, %v6881_v41 }
 0x695   : > { %vm6875_vm4 = vcmp.gt.f32.partialorder %v6866_v47, 0.0  ;;  %v6883_v23 = vmul.f32 0.2, %v6866_v47  ;;  %v6890_v44 = vsel %vm6874_vm15, %v6864_v42, %v6882_v53  ;;  %v7012_v42 = vrot.slane %v7007_v56, %v7011_v48 }
 0x696   : > { %v6898_v8 = vpack.c.bf16 %v6890_v44, %v6888_v31  ;;  %v7037_v31 = vunpack.c.l.s4 %v8793_v32 }
 0x697   : > { %v6891_v29 = vsel %vm6875_vm4, %v6866_v47, %v6883_v23 }
 0x698   : > { %v6899_v15 = vpack.c.bf16 %v6891_v29, %v6889_v7 }
 0x69a   : > { %6930 = vmatprep.subr.bf16.mxu1 %v6899_v15 }
 0x69b   : > { %6931 = vmatpush1.bf16.msra.mxu1 %v6898_v8  ;;  %v7038_v8 = vunpack.c.0.s8 %v7037_v31 }
 0x69c   : > { %6932 = vmatprep.subr.bf16.mxu1 %v6897_v4 }
 0x69d   : > { %v7041_v51 = vsub.s32 %v7038_v8, %v13165_v36 }
 0x69f   : > { %6933 = vmatpush1.bf16.msra.mxu1 %v6896_v33 }
 0x6a2   : > { %7193 = vmatmul.mubr.msk.bf16.vlgmr.msra.gmra.mxu1 %vm3879_vm0, %v8719_v49 }
 0x762   : > { %v6952_v6 = vpop.f32.mrf.mxu1 }
 0x763   : > { %v6953_v0 = vadd.f32 %v6952_v6, %v6903_v16 }
 0x764   : > { %v6954_v30 = vpop.f32.mrf.mxu1 }
 0x765   : > { %v6965_v28 = vmul.f32 0.2, %v6953_v0  ;;  %v6955_v3 = vadd.f32 %v6954_v30, %v6903_v16  ;;  %vm6961_vm8 = vcmp.gt.f32.partialorder %v6953_v0, 0.0 }
 0x766   : > { %v6956_v60 = vpop.f32.mrf.mxu1 }
 0x767   : > { %v6966_v22 = vmul.f32 0.2, %v6955_v3  ;;  %v6957_v24 = vadd.f32 %v6956_v60, %v6908_v34  ;;  %vm6962_vm11 = vcmp.gt.f32.partialorder %v6955_v3, 0.0  ;;  %v6969_v62 = vsel %vm6961_vm8, %v6953_v0, %v6965_v28 }
 0x768   : > { %v6958_v27 = vpop.f32.mrf.mxu1  ;;  %v6986_v52 = vmul.f32 %v6979_v55, %v6969_v62  ;;  %v13166_v0 = vlaneseq }
 0x769   : > { %vm6963_vm9 = vcmp.gt.f32.partialorder %v6957_v24, 0.0  ;;  %v6967_v61 = vmul.f32 0.2, %v6957_v24  ;;  %v6959_v63 = vadd.f32 %v6958_v27, %v6908_v34  ;;  %v6970_v39 = vsel %vm6962_vm11, %v6955_v3, %v6966_v22 }
 0x76a   : > { %v6987_v11 = vmul.f32 %v6979_v55, %v6970_v39  ;;  %vm7053_vm13 = vcmp.lt.s32.totalorder %v13166_v0, 256 }
 0x76b   : > { %v6971_v26 = vsel %vm6963_vm9, %v6957_v24, %v6967_v61  ;;  %vm6964_vm0 = vcmp.gt.f32.partialorder %v6959_v63, 0.0  ;;  %v6968_v50 = vmul.f32 0.2, %v6959_v63 }
 0x76c   : > { %v6988_v54 = vmul.f32 %v6984_v57, %v6971_v26 }
 0x76d   : > { %v6972_v38 = vsel %vm6964_vm0, %v6959_v63, %v6968_v50 }
 0x76e   : > { %v6990_v35 = vadd.f32 %v6988_v54, %v6986_v52  ;;  %v6989_v5 = vmul.f32 %v6984_v57, %v6972_v38 }
 0x770   : > { %v6991_v9 = vrot.slane %v6990_v35, 4  ;;  %v6997_v37 = vadd.f32 %v6989_v5, %v6987_v11 }
 0x772   : > { %v6992_v21 = vadd.f32 %v6991_v9, %v6990_v35  ;;  %v6998_v2 = vrot.slane %v6997_v37, 4 }
 0x774   : > { %v6993_v58 = vrot.slane %v6992_v21, 2  ;;  %v6999_v13 = vadd.f32 %v6998_v2, %v6997_v37 }
 0x776   : > { %v6994_v18 = vadd.f32 %v6993_v58, %v6992_v21  ;;  %v7000_v14 = vrot.slane %v6999_v13, 2 }
 0x778   : > { %v6995_v45 = vrot.slane %v6994_v18, 1  ;;  %v7001_v59 = vadd.f32 %v7000_v14, %v6999_v13 }
 0x77a   : > { %v6996_v12 = vadd.f32 %v6995_v45, %v6994_v18  ;;  %v7002_v10 = vrot.slane %v7001_v59, 1 }
 0x77c   : > { %v7013_v17 = vadd.f32 %v7012_v42, %v6996_v12  ;;  %v7003_v41 = vadd.f32 %v7002_v10, %v7001_v59 }
 0x77e   : > { %v7015_v53 = vand.u32 2147483647, %v7013_v17  ;;  %v7014_v47 = vadd.f32 %v7012_v42, %v7003_v41  ;;  %vm7027_vm10 = vcmp.ge.f32.partialorder %v7013_v17, 0.0 }
 0x780   : > { %v7017_v20 = vsub.f32 0.0, %v7015_v53  ;;  %v7016_v40 = vand.u32 2147483647, %v7014_v47  ;;  %vm7028_vm12 = vcmp.ge.f32.partialorder %v7014_v47, 0.0 }
 0x782   : > { %v7019_v19 = vmul.f32 1.442695, %v7017_v20  ;;  %v7018_v23 = vsub.f32 0.0, %v7016_v40 }
 0x784   : > { %8720 = vpow2.f32 %v7019_v19  ;;  %v7021_v1 = vmul.f32 1.442695, %v7018_v23 }
 0x786   : > { %8722 = vpow2.f32 %v7021_v1 }
 0x791   : > { %v8721_v44 = vpop.eup %8720 }
 0x792   : > { %v7023_v7 = vadd.f32 1.0, %v8721_v44 }
 0x793   : > { %v8723_v29 = vpop.eup %8722 }
 0x794   : > { %v7024_v43 = vadd.f32 1.0, %v8723_v29  ;;  %8724 = vrcp.f32 %v7023_v7 }
 0x796   : > { %8726 = vrcp.f32 %v7024_v43 }
 0x7a1   : > { %v8725_v15 = vpop.eup %8724 }
 0x7a2   : > { %v7029_v46 = vmul.f32 %v8725_v15, %v8721_v44 }
 0x7a3   : > { %v8727_v25 = vpop.eup %8726 }
 0x7a4   : > { %v7030_v4 = vmul.f32 %v8727_v25, %v8723_v29  ;;  %v7031_v33 = vsel %vm7027_vm10, %v8725_v15, %v7029_v46 }
 0x7a6   : > { %v7032_v49 = vsel %vm7028_vm12, %v8727_v25, %v7030_v4 }
 0x7a7   : > { %v7035_v16 = vcombine.low %v7031_v33, %v7032_v49 }
 0x7a9   : > { %v7042_v6 = vrot.slane %v7035_v16, %v7041_v51 }
 0x7ab   : > { %v7049_v30 = vrot.slane %v7042_v6, %v7041_v51 }
 0x7ad   : > { %7055 = vst.msk [vmem:[%s382_s15] sm:$0x3] %vm7053_vm13, %v7049_v30 }
 0x7ae   : > { %8741 = shalt.err (!%p8738_p3)
}
 0x7af   : > { %s8742_s0 = scalar_lea.hbm %s7069_s10, 32  ;;  %s8746_s15 = scalar_lea.hbm %s12510_s11, 64 }
 0x7b0   : > { %p8743_p4 = scmp.ne.s32.totalorder %s7069_s10, %s8742_s0  ;;  %p8747_p9 = scmp.lt.s32.totalorder %s7069_s10, %s12510_s11 }
 0x7b1   : > { %p8748_p10 = scmp.lt.s32.totalorder %s8746_s15, %s8742_s0 }
 0x7b2   : > { %p8744_p7 = pnand %p8743_p4, %p8893_p5 }
 0x7b3   : > { %p8749_p11 = por %p8748_p10, %p8747_p9 }
 0x7b4   : > { %p8745_p8 = pneg %p8744_p7 }
 0x7b6   : > { %p8750_p12 = pnand %p8749_p11, %p8745_p8 }
 0x7b8   : > { %8753 = shalt.err (!%p8750_p12)
}
 0x7b9   : > { %7200 = dma.vmem_to_hbm [thread:$0]  (%p8893_p5), %s7072_s16, 32, %s7069_s10, %s7057_s23  }
 0x7ba PF: > { %p7206_p13 = scmp.ge.s32.totalorder %s8788_s22, 2  ;;  %s7083_s25 = sand.u32 1, %s8776_s19  }
 0x7bb   : > { %s7084_s26 = scalar_lea.sflag [#allocation4], %s7083_s25 }
 0x7bc   : > { %p7203_p0 = pnand %p7206_p13, %p8897_p6 }
 0x7be   : > { %p7204_p1 = pneg %p7203_p0 }
 0x7c0   : > { %8771 = dma.done.wait (%p7204_p1), %s7084_s26, 32  }
 0x7c1   : > { %8773 = vsyncadd (%p7204_p1), %s7084_s26, 4294967264  ;;  %p23_p2 = scmp.ge.s32.totalorder %s8881_s24, 4   ;;  %s13167_s19 = smov %s8780_s20 }
 0x7c2   : > { %s13168_s20 = smov %s8784_s21  ;;  %s13169_s21 = smov %s8891_s27 }
 0x7c3   : > { %s13170_s22 = smov %s8881_s24  ;;  %25 = sbr.rel (!%p23_p2) target bundleno = 6 (0x6), region = 99 }
 0x7c8   :  { %7089 = vsyncpa [#allocation4], 1 }
 0x7c9   :  { %7091 = vsyncpa [#allocation4 + $0x1], 1 }

</bundles_post_ra>
